<compile_context>
chip_gen: v6e
topology: v6e:2x2x1
jax: 0.10.0
libtpu: 0.0.40
codegen_flags: <defaults>
</compile_context>

<pallas_src>
import jax
import jax.numpy as jnp
import numpy as np
from jax.experimental import pallas as pl
from jax.experimental.pallas import tpu as pltpu

# ---- hyperparameters (match the PyTorch module) ----
N_EMBD = 64
N_HEAD = 8
N_LAYER = 8
VOCAB_SIZE = 101
BLOCK_SIZE = 500
NUM_CLASSES = 4
HEAD_SIZE = N_EMBD // N_HEAD
LN_EPS = 1e-5          # torch nn.LayerNorm default
LOGIT_PAD = 128        # lane-dense padded logits width (sliced to 4 outside)
NEG_BIG = -1e30        # additive mask for padded key columns


def _layernorm(x, g, b):
    m = jnp.mean(x, axis=-1, keepdims=True)
    c = x - m
    v = jnp.mean(c * c, axis=-1, keepdims=True)
    return c * jax.lax.rsqrt(v + LN_EPS) * g + b


def _bf16_eup_supported():
    """bf16 transcendental path exists on v6e/v7x, not on v5e and older."""
    try:
        kind = jax.devices()[0].device_kind.lower()
    except Exception:
        return False
    return not any(v in kind for v in ("v2", "v3", "v4", "v5"))


def _make_kernel(t_actual, t_pad, use_bf16_exp):
    """Build the fused forward kernel for a (1, t_pad, C) hidden-state block."""
    nt = (((1,), (1,)), ((), ()))        # contract last dims: A @ B^T

    def kernel(x0_ref, aqk_ref, bvoT_ref, ln1g_ref, ln1b_ref, bo_ref,
               ln2g_ref, ln2b_ref, w1_ref, b1_ref, w2_ref, b2_ref,
               lnfg_ref, lnfb_ref, wh_ref, bh_ref, out_ref):
        C = N_EMBD

        # Additive key-column mask for padded time steps (static shapes, so
        # this is compile-time constant work; skipped entirely when no pad).
        if t_pad != t_actual:
            col = jax.lax.broadcasted_iota(jnp.int32, (1, t_pad), 1)
            key_mask = jnp.where(col < t_actual, 0.0, NEG_BIG).astype(jnp.float32)
        else:
            key_mask = None

        def layer(l, x):
            # ---------------- multi-head self-attention ----------------
            h1 = _layernorm(x, ln1g_ref[l], ln1b_ref[l])          # (T, C) f32
            h1b = h1.astype(jnp.bfloat16)

            # Batched across all 8 heads (two lane-dense MXU calls per layer):
            #   r_all[h*C + c, t]  = (A_h @ h1^T)[c, t]
            #   vo_all[h*C + e, t] = (h1 @ B_h)[t, e]   (i.e. vo_h^T)
            r_all = jax.lax.dot_general(
                aqk_ref[l], h1b, nt,
                preferred_element_type=jnp.float32).astype(jnp.bfloat16)
            vo_all = jax.lax.dot_general(
                bvoT_ref[l], h1b, nt,
                preferred_element_type=jnp.float32).astype(jnp.bfloat16)

            sa = jnp.zeros((t_pad, C), jnp.float32)
            for h in range(N_HEAD):                 # fully unrolled head loop
                r_h = r_all[h * C:(h + 1) * C]      # (C, T) sublane slice
                vo_h = vo_all[h * C:(h + 1) * C]    # (C, T) sublane slice
                # scores = h1 @ A_h @ h1^T  (plain NN matmul now)
                s = jnp.dot(h1b, r_h, preferred_element_type=jnp.float32)
                if key_mask is not None:
                    s = s + key_mask                # mask padded key columns
                m = jnp.max(s, axis=-1, keepdims=True)
                if use_bf16_exp:                    # v6e/v7x bf16 EUP path
                    e = jnp.exp((s - m).astype(jnp.bfloat16)).astype(jnp.float32)
                else:                               # v5e: keep f32
                    e = jnp.exp(s - m)
                denom = jnp.sum(e, axis=-1, keepdims=True)
                p = (e * pl.reciprocal(denom, approx=True)).astype(jnp.bfloat16)
                # p @ vo_h  via NT dot_general against vo_h^T
                sa = sa + jax.lax.dot_general(
                    p, vo_h, nt, preferred_element_type=jnp.float32)

            x = x + sa + bo_ref[l]      # proj bias; dropout = identity

            # ---------------- feed-forward ----------------
            h2 = _layernorm(x, ln2g_ref[l], ln2b_ref[l]).astype(jnp.bfloat16)
            f = jnp.maximum(
                jnp.dot(h2, w1_ref[l], preferred_element_type=jnp.float32)
                + b1_ref[l], 0.0)
            x = x + jnp.dot(f.astype(jnp.bfloat16), w2_ref[l],
                            preferred_element_type=jnp.float32) + b2_ref[l]
            return x

        x = jax.lax.fori_loop(0, N_LAYER, layer, x0_ref[0])

        # -------- final LayerNorm + lm_head --------
        hf = _layernorm(x, lnfg_ref[...], lnfb_ref[...]).astype(jnp.bfloat16)
        logits = (jnp.dot(hf, wh_ref[...], preferred_element_type=jnp.float32)
                  + bh_ref[...])
        out_ref[0] = logits.astype(jnp.bfloat16)

    return kernel


def pack_params(p):
    """Fold the torch-style params into the kernel-side packed layout."""
    L, C, H, hs = N_LAYER, N_EMBD, N_HEAD, HEAD_SIZE
    scale = 1.0 / (C ** 0.5)   # torch: wei = q @ k^T * C**-0.5, C = n_embd
    wq = p["wq"].reshape(L, C, H, hs)
    wk = p["wk"].reshape(L, C, H, hs)
    wv = p["wv"].reshape(L, C, H, hs)
    wo = p["wo"].reshape(L, H, hs, C)
    # A[l,h] = Wq_h @ Wk_h^T * scale ; B[l,h] = Wv_h @ Wproj_h   (both (C,C))
    a = jnp.einsum('lchd,lehd->lhce', wq, wk) * scale            # (L,H,C,C)
    b = jnp.einsum('lchd,lhde->lhce', wv, wo)                    # (L,H,C,C)
    aqk = a.reshape(L, H * C, C)                                 # rows = A_h
    bvoT = jnp.swapaxes(b, -1, -2).reshape(L, H * C, C)          # rows = B_h^T
    w_head = jnp.zeros((C, LOGIT_PAD), jnp.float32).at[:, :NUM_CLASSES].set(
        p["w_head"])
    b_head = jnp.zeros((1, LOGIT_PAD), jnp.float32).at[:, :NUM_CLASSES].set(
        p["b_head"])
    return {
        "tok_emb": p["tok_emb"], "pos_emb": p["pos_emb"],
        "aqk": aqk.astype(jnp.bfloat16),
        "bvoT": bvoT.astype(jnp.bfloat16),
        "ln1_g": p["ln1_g"], "ln1_b": p["ln1_b"], "bo": p["bo"],
        "ln2_g": p["ln2_g"], "ln2_b": p["ln2_b"],
        "w1": p["w1"].astype(jnp.bfloat16), "b1": p["b1"],
        "w2": p["w2"].astype(jnp.bfloat16), "b2": p["b2"],
        "lnf_g": p["lnf_g"], "lnf_b": p["lnf_b"],
        "w_head": w_head.astype(jnp.bfloat16), "b_head": b_head,
    }


def heartgpt_forward(idx, kp):
    """Forward: idx (B, T) int32 -> logits (B, T, num_classes). loss=None path."""
    B, T = idx.shape
    C = N_EMBD
    t_pad = ((T + 127) // 128) * 128          # lane-dense time dimension

    # Embedding gathers are plain-JAX glue (no efficient in-kernel gather).
    x0 = (kp["tok_emb"][idx] + kp["pos_emb"][:T][None, :, :]).astype(jnp.float32)
    if t_pad != T:
        x0 = jnp.pad(x0, ((0, 0), (0, t_pad - T), (0, 0)))

    weight_names = ["aqk", "bvoT", "ln1_g", "ln1_b", "bo", "ln2_g", "ln2_b",
                    "w1", "b1", "w2", "b2", "lnf_g", "lnf_b",
                    "w_head", "b_head"]
    weights = [kp[n] for n in weight_names]

    def full_spec(a):
        nd = a.ndim
        return pl.BlockSpec(a.shape, lambda b, _nd=nd: (0,) * _nd)

    kernel = _make_kernel(T, t_pad, _bf16_eup_supported())

    logits_pad = pl.pallas_call(
        kernel,
        out_shape=jax.ShapeDtypeStruct((B, t_pad, LOGIT_PAD), jnp.bfloat16),
        grid_spec=pltpu.PrefetchScalarGridSpec(
            num_scalar_prefetch=0,
            grid=(B,),
            in_specs=[pl.BlockSpec((1, t_pad, C), lambda b: (b, 0, 0))]
                     + [full_spec(a) for a in weights],
            out_specs=pl.BlockSpec((1, t_pad, LOGIT_PAD), lambda b: (b, 0, 0)),
        ),
        compiler_params=pltpu.CompilerParams(
            dimension_semantics=("parallel",),
            vmem_limit_bytes=48 * 1024 * 1024),
    )(x0, *weights)
    return logits_pad[:, :T, :NUM_CLASSES].astype(jnp.float32)


def heartgpt_reference(idx, params):
    """Pure-JAX f32 reference of the PyTorch forward math, for verification."""
    hp = jax.lax.Precision.HIGHEST
    B, T = idx.shape
    C = N_EMBD
    scale = 1.0 / (C ** 0.5)

    def ln(x, g, b):
        m = x.mean(-1, keepdims=True)
        v = ((x - m) ** 2).mean(-1, keepdims=True)
        return (x - m) / jnp.sqrt(v + LN_EPS) * g + b

    x = params["tok_emb"][idx] + params["pos_emb"][:T][None]
    for l in range(N_LAYER):
        h = ln(x, params["ln1_g"][l, 0], params["ln1_b"][l, 0])
        q = jnp.einsum('btc,cd->btd', h, params["wq"][l], precision=hp)
        k = jnp.einsum('btc,cd->btd', h, params["wk"][l], precision=hp)
        v = jnp.einsum('btc,cd->btd', h, params["wv"][l], precision=hp)
        qh = q.reshape(B, T, N_HEAD, HEAD_SIZE)
        kh = k.reshape(B, T, N_HEAD, HEAD_SIZE)
        vh = v.reshape(B, T, N_HEAD, HEAD_SIZE)
        s = jnp.einsum('bthd,bshd->bhts', qh, kh, precision=hp) * scale
        p = jax.nn.softmax(s, axis=-1)
        o = jnp.einsum('bhts,bshd->bthd', p, vh, precision=hp).reshape(B, T, C)
        x = x + jnp.einsum('btc,cd->btd', o, params["wo"][l],
                           precision=hp) + params["bo"][l, 0]
        h2 = ln(x, params["ln2_g"][l, 0], params["ln2_b"][l, 0])
        f = jax.nn.relu(jnp.einsum('btc,cf->btf', h2, params["w1"][l],
                                   precision=hp) + params["b1"][l, 0])
        x = x + jnp.einsum('btf,fc->btc', f, params["w2"][l],
                           precision=hp) + params["b2"][l, 0]
    x = ln(x, params["lnf_g"][0], params["lnf_b"][0])
    return jnp.einsum('btc,cn->btn', x, params["w_head"],
                      precision=hp) + params["b_head"][0]


def init_params(key):
    C, L = N_EMBD, N_LAYER
    ks = jax.random.split(key, 12)
    w = lambda k, shape, s=0.02: (s * jax.random.normal(k, shape)).astype(jnp.float32)
    return {
        "tok_emb": jax.random.normal(ks[0], (VOCAB_SIZE, C)).astype(jnp.float32),
        "pos_emb": jax.random.normal(ks[1], (BLOCK_SIZE, C)).astype(jnp.float32),
        "ln1_g": jnp.ones((L, 1, C), jnp.float32),
        "ln1_b": jnp.zeros((L, 1, C), jnp.float32),
        "wq": w(ks[2], (L, C, C)),
        "wk": w(ks[3], (L, C, C)),
        "wv": w(ks[4], (L, C, C)),
        "wo": w(ks[5], (L, C, C)),
        "bo": w(ks[6], (L, 1, C)),
        "ln2_g": jnp.ones((L, 1, C), jnp.float32),
        "ln2_b": jnp.zeros((L, 1, C), jnp.float32),
        "w1": w(ks[7], (L, C, 4 * C)),
        "b1": w(ks[8], (L, 1, 4 * C)),
        "w2": w(ks[9], (L, 4 * C, C)),
        "b2": w(ks[10], (L, 1, C)),
        "lnf_g": jnp.ones((1, C), jnp.float32),
        "lnf_b": jnp.zeros((1, C), jnp.float32),
        "w_head": w(ks[11], (C, NUM_CLASSES)),
        "b_head": jnp.zeros((1, NUM_CLASSES), jnp.float32),
    }


if __name__ == "__main__":
    key = jax.random.PRNGKey(0)
    pkey, ikey = jax.random.split(key)
    params = init_params(pkey)
    packed = pack_params(params)

    B, T = 2, 64   # small shapes (T <= block_size=500); T is padded to 128 inside
    idx = jax.random.randint(ikey, (B, T), 0, VOCAB_SIZE, dtype=jnp.int32)

    logits = jax.jit(heartgpt_forward)(idx, packed)
    logits = jax.block_until_ready(logits)
    assert logits.shape == (B, T, NUM_CLASSES)

    ref = heartgpt_reference(idx, params)
    # bf16 matmul inputs / bf16 logits with f32 accumulation vs pure-f32 reference.
    np.testing.assert_allclose(np.asarray(logits), np.asarray(ref),
                               rtol=2e-2, atol=2e-2)

    print("KERNEL_OK")
</pallas_src>

<mosaic_0001>
module attributes {stable_mosaic.version = 11 : i64} {
  func.func @kernel(%arg0: i32, %arg1: memref<1x128x64xf32, #tpu.memory_space<vmem>>, %arg2: memref<8x512x64xbf16, #tpu.memory_space<vmem>>, %arg3: memref<8x512x64xbf16, #tpu.memory_space<vmem>>, %arg4: memref<8x1x64xf32, #tpu.memory_space<vmem>>, %arg5: memref<8x1x64xf32, #tpu.memory_space<vmem>>, %arg6: memref<8x1x64xf32, #tpu.memory_space<vmem>>, %arg7: memref<8x1x64xf32, #tpu.memory_space<vmem>>, %arg8: memref<8x1x64xf32, #tpu.memory_space<vmem>>, %arg9: memref<8x64x256xbf16, #tpu.memory_space<vmem>>, %arg10: memref<8x1x256xf32, #tpu.memory_space<vmem>>, %arg11: memref<8x256x64xbf16, #tpu.memory_space<vmem>>, %arg12: memref<8x1x64xf32, #tpu.memory_space<vmem>>, %arg13: memref<1x64xf32, #tpu.memory_space<vmem>>, %arg14: memref<1x64xf32, #tpu.memory_space<vmem>>, %arg15: memref<64x128xbf16, #tpu.memory_space<vmem>>, %arg16: memref<1x128xf32, #tpu.memory_space<vmem>>, %arg17: memref<1x128x128xbf16, #tpu.memory_space<vmem>>) attributes {dimension_semantics = [#tpu.dimension_semantics<parallel>], iteration_bounds = array<i64: 2>, scalar_prefetch = 0 : i64, scratch_operands = 0 : i64, tpu.core_type = #tpu.core_type<tc>, window_params = [{transform_indices = @transform_0, window_bounds = array<i64: 1, 128, 64>}, {pipeline_mode = #tpu.pipeline_mode<synchronous>, transform_indices = @transform_1, window_bounds = array<i64: 8, 512, 64>}, {pipeline_mode = #tpu.pipeline_mode<synchronous>, transform_indices = @transform_2, window_bounds = array<i64: 8, 512, 64>}, {pipeline_mode = #tpu.pipeline_mode<synchronous>, transform_indices = @transform_3, window_bounds = array<i64: 8, 1, 64>}, {pipeline_mode = #tpu.pipeline_mode<synchronous>, transform_indices = @transform_4, window_bounds = array<i64: 8, 1, 64>}, {pipeline_mode = #tpu.pipeline_mode<synchronous>, transform_indices = @transform_5, window_bounds = array<i64: 8, 1, 64>}, {pipeline_mode = #tpu.pipeline_mode<synchronous>, transform_indices = @transform_6, window_bounds = array<i64: 8, 1, 64>}, {pipeline_mode = #tpu.pipeline_mode<synchronous>, transform_indices = @transform_7, window_bounds = array<i64: 8, 1, 64>}, {pipeline_mode = #tpu.pipeline_mode<synchronous>, transform_indices = @transform_8, window_bounds = array<i64: 8, 64, 256>}, {pipeline_mode = #tpu.pipeline_mode<synchronous>, transform_indices = @transform_9, window_bounds = array<i64: 8, 1, 256>}, {pipeline_mode = #tpu.pipeline_mode<synchronous>, transform_indices = @transform_10, window_bounds = array<i64: 8, 256, 64>}, {pipeline_mode = #tpu.pipeline_mode<synchronous>, transform_indices = @transform_11, window_bounds = array<i64: 8, 1, 64>}, {pipeline_mode = #tpu.pipeline_mode<synchronous>, transform_indices = @transform_12, window_bounds = array<i64: 1, 64>}, {pipeline_mode = #tpu.pipeline_mode<synchronous>, transform_indices = @transform_13, window_bounds = array<i64: 1, 64>}, {pipeline_mode = #tpu.pipeline_mode<synchronous>, transform_indices = @transform_14, window_bounds = array<i64: 64, 128>}, {pipeline_mode = #tpu.pipeline_mode<synchronous>, transform_indices = @transform_15, window_bounds = array<i64: 1, 128>}, {transform_indices = @transform_16, window_bounds = array<i64: 1, 128, 128>}]} {
    %0 = tpu.iota {dimensions = array<i32: 1>} : vector<1x128xi32>
    %c64_i32 = arith.constant 64 : i32
    %1 = vector.broadcast %c64_i32 : i32 to vector<1x128xi32>
    %2 = arith.cmpi slt, %0, %1 : vector<1x128xi32>
    %cst = arith.constant 0.000000e+00 : f32
    %cst_0 = arith.constant -1.000000e+30 : f32
    %3 = vector.broadcast %cst : f32 to vector<1x128xf32>
    %4 = vector.broadcast %cst_0 : f32 to vector<1x128xf32>
    %5 = arith.select %2, %3, %4 : vector<1x128xi1>, vector<1x128xf32>
    %c0 = arith.constant 0 : index
    %c0_1 = arith.constant 0 : index
    %c0_2 = arith.constant 0 : index
    %6 = vector.load %arg1[%c0, %c0_1, %c0_2] : memref<1x128x64xf32, #tpu.memory_space<vmem>>, vector<1x128x64xf32>
    %7 = vector.shape_cast %6 : vector<1x128x64xf32> to vector<128x64xf32>
    %c0_i32 = arith.constant 0 : i32
    %c8_i32 = arith.constant 8 : i32
    %8 = arith.addi %c0_i32, %c8_i32 : i32
    %c1_i32 = arith.constant 1 : i32
    %9 = scf.for %arg18 = %c0_i32 to %8 step %c1_i32 iter_args(%arg19 = %7) -> (vector<128x64xf32>)  : i32 {
      %42 = arith.index_cast %arg18 : i32 to index
      %c0_21 = arith.constant 0 : index
      %c0_22 = arith.constant 0 : index
      %43 = vector.load %arg4[%42, %c0_21, %c0_22] : memref<8x1x64xf32, #tpu.memory_space<vmem>>, vector<1x1x64xf32>
      %44 = vector.shape_cast %43 : vector<1x1x64xf32> to vector<1x64xf32>
      %45 = arith.index_cast %arg18 : i32 to index
      %c0_23 = arith.constant 0 : index
      %c0_24 = arith.constant 0 : index
      %46 = vector.load %arg5[%45, %c0_23, %c0_24] : memref<8x1x64xf32, #tpu.memory_space<vmem>>, vector<1x1x64xf32>
      %47 = vector.shape_cast %46 : vector<1x1x64xf32> to vector<1x64xf32>
      %cst_25 = arith.constant dense<0.000000e+00> : vector<128xf32>
      %48 = vector.multi_reduction <add>, %arg19, %cst_25 [1] : vector<128x64xf32> to vector<128xf32>
      %49 = vector.shape_cast %48 : vector<128xf32> to vector<128x1xf32>
      %cst_26 = arith.constant 6.400000e+01 : f32
      %50 = vector.broadcast %cst_26 : f32 to vector<128x1xf32>
      %51 = arith.divf %49, %50 : vector<128x1xf32>
      %52 = vector.broadcast %51 : vector<128x1xf32> to vector<128x64xf32>
      %53 = arith.subf %arg19, %52 : vector<128x64xf32>
      %54 = arith.mulf %53, %53 : vector<128x64xf32>
      %cst_27 = arith.constant dense<0.000000e+00> : vector<128xf32>
      %55 = vector.multi_reduction <add>, %54, %cst_27 [1] : vector<128x64xf32> to vector<128xf32>
      %56 = vector.shape_cast %55 : vector<128xf32> to vector<128x1xf32>
      %cst_28 = arith.constant 6.400000e+01 : f32
      %57 = vector.broadcast %cst_28 : f32 to vector<128x1xf32>
      %58 = arith.divf %56, %57 : vector<128x1xf32>
      %cst_29 = arith.constant 9.99999974E-6 : f32
      %59 = vector.broadcast %cst_29 : f32 to vector<128x1xf32>
      %60 = arith.addf %58, %59 : vector<128x1xf32>
      %61 = math.rsqrt %60 : vector<128x1xf32>
      %62 = vector.broadcast %61 : vector<128x1xf32> to vector<128x64xf32>
      %63 = arith.mulf %53, %62 : vector<128x64xf32>
      %64 = vector.broadcast %44 : vector<1x64xf32> to vector<128x64xf32>
      %65 = arith.mulf %63, %64 : vector<128x64xf32>
      %66 = vector.broadcast %47 : vector<1x64xf32> to vector<128x64xf32>
      %67 = arith.addf %65, %66 : vector<128x64xf32>
      %68 = arith.truncf %67 : vector<128x64xf32> to vector<128x64xbf16>
      %69 = arith.index_cast %arg18 : i32 to index
      %c0_30 = arith.constant 0 : index
      %c0_31 = arith.constant 0 : index
      %70 = vector.load %arg2[%69, %c0_30, %c0_31] : memref<8x512x64xbf16, #tpu.memory_space<vmem>>, vector<1x512x64xbf16>
      %71 = vector.shape_cast %70 : vector<1x512x64xbf16> to vector<512x64xbf16>
      %cst_32 = arith.constant dense<0.000000e+00> : vector<512x128xf32>
      %72 = tpu.matmul %71, %68, %cst_32 {dimension_numbers = #tpu.dot_dimension_numbers<[1], [1], [0], [0], [0, 0, 1, 0], [], []>} : vector<512x64xbf16>, vector<128x64xbf16>, vector<512x128xf32> -> vector<512x128xf32>
      %73 = arith.truncf %72 : vector<512x128xf32> to vector<512x128xbf16>
      %74 = arith.index_cast %arg18 : i32 to index
      %c0_33 = arith.constant 0 : index
      %c0_34 = arith.constant 0 : index
      %75 = vector.load %arg3[%74, %c0_33, %c0_34] : memref<8x512x64xbf16, #tpu.memory_space<vmem>>, vector<1x512x64xbf16>
      %76 = vector.shape_cast %75 : vector<1x512x64xbf16> to vector<512x64xbf16>
      %cst_35 = arith.constant dense<0.000000e+00> : vector<512x128xf32>
      %77 = tpu.matmul %76, %68, %cst_35 {dimension_numbers = #tpu.dot_dimension_numbers<[1], [1], [0], [0], [0, 0, 1, 0], [], []>} : vector<512x64xbf16>, vector<128x64xbf16>, vector<512x128xf32> -> vector<512x128xf32>
      %78 = arith.truncf %77 : vector<512x128xf32> to vector<512x128xbf16>
      %cst_36 = arith.constant 0.000000e+00 : f32
      %79 = vector.broadcast %cst_36 : f32 to vector<128x64xf32>
      %80 = vector.extract_strided_slice %73 {offsets = [0, 0], sizes = [64, 128], strides = [1, 1]} : vector<512x128xbf16> to vector<64x128xbf16>
      %81 = vector.extract_strided_slice %78 {offsets = [0, 0], sizes = [64, 128], strides = [1, 1]} : vector<512x128xbf16> to vector<64x128xbf16>
      %cst_37 = arith.constant dense<0.000000e+00> : vector<128x128xf32>
      %82 = tpu.matmul %68, %80, %cst_37 {dimension_numbers = #tpu.dot_dimension_numbers<[1], [0], [0], [1], [0, 0, 1, 1], [], []>} : vector<128x64xbf16>, vector<64x128xbf16>, vector<128x128xf32> -> vector<128x128xf32>
      %83 = vector.broadcast %5 : vector<1x128xf32> to vector<128x128xf32>
      %84 = arith.addf %82, %83 : vector<128x128xf32>
      %cst_38 = arith.constant dense<0xFF800000> : vector<128xf32>
      %85 = vector.multi_reduction <maximumf>, %84, %cst_38 [1] : vector<128x128xf32> to vector<128xf32>
      %86 = vector.shape_cast %85 : vector<128xf32> to vector<128x1xf32>
      %87 = vector.broadcast %86 : vector<128x1xf32> to vector<128x128xf32>
      %88 = arith.subf %84, %87 : vector<128x128xf32>
      %89 = arith.truncf %88 : vector<128x128xf32> to vector<128x128xbf16>
      %90 = math.exp %89 : vector<128x128xbf16>
      %91 = arith.extf %90 : vector<128x128xbf16> to vector<128x128xf32>
      %cst_39 = arith.constant dense<0.000000e+00> : vector<128xf32>
      %92 = vector.multi_reduction <add>, %91, %cst_39 [1] : vector<128x128xf32> to vector<128xf32>
      %93 = vector.shape_cast %92 : vector<128xf32> to vector<128x1xf32>
      %94 = tpu.reciprocal %93 {approx = true} : vector<128x1xf32> -> vector<128x1xf32>
      %95 = vector.broadcast %94 : vector<128x1xf32> to vector<128x128xf32>
      %96 = arith.mulf %91, %95 : vector<128x128xf32>
      %97 = arith.truncf %96 : vector<128x128xf32> to vector<128x128xbf16>
      %cst_40 = arith.constant dense<0.000000e+00> : vector<128x64xf32>
      %98 = tpu.matmul %97, %81, %cst_40 {dimension_numbers = #tpu.dot_dimension_numbers<[1], [1], [0], [0], [0, 0, 1, 0], [], []>} : vector<128x128xbf16>, vector<64x128xbf16>, vector<128x64xf32> -> vector<128x64xf32>
      %99 = arith.addf %79, %98 : vector<128x64xf32>
      %100 = vector.extract_strided_slice %73 {offsets = [64, 0], sizes = [64, 128], strides = [1, 1]} : vector<512x128xbf16> to vector<64x128xbf16>
      %101 = vector.extract_strided_slice %78 {offsets = [64, 0], sizes = [64, 128], strides = [1, 1]} : vector<512x128xbf16> to vector<64x128xbf16>
      %cst_41 = arith.constant dense<0.000000e+00> : vector<128x128xf32>
      %102 = tpu.matmul %68, %100, %cst_41 {dimension_numbers = #tpu.dot_dimension_numbers<[1], [0], [0], [1], [0, 0, 1, 1], [], []>} : vector<128x64xbf16>, vector<64x128xbf16>, vector<128x128xf32> -> vector<128x128xf32>
      %103 = vector.broadcast %5 : vector<1x128xf32> to vector<128x128xf32>
      %104 = arith.addf %102, %103 : vector<128x128xf32>
      %cst_42 = arith.constant dense<0xFF800000> : vector<128xf32>
      %105 = vector.multi_reduction <maximumf>, %104, %cst_42 [1] : vector<128x128xf32> to vector<128xf32>
      %106 = vector.shape_cast %105 : vector<128xf32> to vector<128x1xf32>
      %107 = vector.broadcast %106 : vector<128x1xf32> to vector<128x128xf32>
      %108 = arith.subf %104, %107 : vector<128x128xf32>
      %109 = arith.truncf %108 : vector<128x128xf32> to vector<128x128xbf16>
      %110 = math.exp %109 : vector<128x128xbf16>
      %111 = arith.extf %110 : vector<128x128xbf16> to vector<128x128xf32>
      %cst_43 = arith.constant dense<0.000000e+00> : vector<128xf32>
      %112 = vector.multi_reduction <add>, %111, %cst_43 [1] : vector<128x128xf32> to vector<128xf32>
      %113 = vector.shape_cast %112 : vector<128xf32> to vector<128x1xf32>
      %114 = tpu.reciprocal %113 {approx = true} : vector<128x1xf32> -> vector<128x1xf32>
      %115 = vector.broadcast %114 : vector<128x1xf32> to vector<128x128xf32>
      %116 = arith.mulf %111, %115 : vector<128x128xf32>
      %117 = arith.truncf %116 : vector<128x128xf32> to vector<128x128xbf16>
      %cst_44 = arith.constant dense<0.000000e+00> : vector<128x64xf32>
      %118 = tpu.matmul %117, %101, %cst_44 {dimension_numbers = #tpu.dot_dimension_numbers<[1], [1], [0], [0], [0, 0, 1, 0], [], []>} : vector<128x128xbf16>, vector<64x128xbf16>, vector<128x64xf32> -> vector<128x64xf32>
      %119 = arith.addf %99, %118 : vector<128x64xf32>
      %120 = vector.extract_strided_slice %73 {offsets = [128, 0], sizes = [64, 128], strides = [1, 1]} : vector<512x128xbf16> to vector<64x128xbf16>
      %121 = vector.extract_strided_slice %78 {offsets = [128, 0], sizes = [64, 128], strides = [1, 1]} : vector<512x128xbf16> to vector<64x128xbf16>
      %cst_45 = arith.constant dense<0.000000e+00> : vector<128x128xf32>
      %122 = tpu.matmul %68, %120, %cst_45 {dimension_numbers = #tpu.dot_dimension_numbers<[1], [0], [0], [1], [0, 0, 1, 1], [], []>} : vector<128x64xbf16>, vector<64x128xbf16>, vector<128x128xf32> -> vector<128x128xf32>
      %123 = vector.broadcast %5 : vector<1x128xf32> to vector<128x128xf32>
      %124 = arith.addf %122, %123 : vector<128x128xf32>
      %cst_46 = arith.constant dense<0xFF800000> : vector<128xf32>
      %125 = vector.multi_reduction <maximumf>, %124, %cst_46 [1] : vector<128x128xf32> to vector<128xf32>
      %126 = vector.shape_cast %125 : vector<128xf32> to vector<128x1xf32>
      %127 = vector.broadcast %126 : vector<128x1xf32> to vector<128x128xf32>
      %128 = arith.subf %124, %127 : vector<128x128xf32>
      %129 = arith.truncf %128 : vector<128x128xf32> to vector<128x128xbf16>
      %130 = math.exp %129 : vector<128x128xbf16>
      %131 = arith.extf %130 : vector<128x128xbf16> to vector<128x128xf32>
      %cst_47 = arith.constant dense<0.000000e+00> : vector<128xf32>
      %132 = vector.multi_reduction <add>, %131, %cst_47 [1] : vector<128x128xf32> to vector<128xf32>
      %133 = vector.shape_cast %132 : vector<128xf32> to vector<128x1xf32>
      %134 = tpu.reciprocal %133 {approx = true} : vector<128x1xf32> -> vector<128x1xf32>
      %135 = vector.broadcast %134 : vector<128x1xf32> to vector<128x128xf32>
      %136 = arith.mulf %131, %135 : vector<128x128xf32>
      %137 = arith.truncf %136 : vector<128x128xf32> to vector<128x128xbf16>
      %cst_48 = arith.constant dense<0.000000e+00> : vector<128x64xf32>
      %138 = tpu.matmul %137, %121, %cst_48 {dimension_numbers = #tpu.dot_dimension_numbers<[1], [1], [0], [0], [0, 0, 1, 0], [], []>} : vector<128x128xbf16>, vector<64x128xbf16>, vector<128x64xf32> -> vector<128x64xf32>
      %139 = arith.addf %119, %138 : vector<128x64xf32>
      %140 = vector.extract_strided_slice %73 {offsets = [192, 0], sizes = [64, 128], strides = [1, 1]} : vector<512x128xbf16> to vector<64x128xbf16>
      %141 = vector.extract_strided_slice %78 {offsets = [192, 0], sizes = [64, 128], strides = [1, 1]} : vector<512x128xbf16> to vector<64x128xbf16>
      %cst_49 = arith.constant dense<0.000000e+00> : vector<128x128xf32>
      %142 = tpu.matmul %68, %140, %cst_49 {dimension_numbers = #tpu.dot_dimension_numbers<[1], [0], [0], [1], [0, 0, 1, 1], [], []>} : vector<128x64xbf16>, vector<64x128xbf16>, vector<128x128xf32> -> vector<128x128xf32>
      %143 = vector.broadcast %5 : vector<1x128xf32> to vector<128x128xf32>
      %144 = arith.addf %142, %143 : vector<128x128xf32>
      %cst_50 = arith.constant dense<0xFF800000> : vector<128xf32>
      %145 = vector.multi_reduction <maximumf>, %144, %cst_50 [1] : vector<128x128xf32> to vector<128xf32>
      %146 = vector.shape_cast %145 : vector<128xf32> to vector<128x1xf32>
      %147 = vector.broadcast %146 : vector<128x1xf32> to vector<128x128xf32>
      %148 = arith.subf %144, %147 : vector<128x128xf32>
      %149 = arith.truncf %148 : vector<128x128xf32> to vector<128x128xbf16>
      %150 = math.exp %149 : vector<128x128xbf16>
      %151 = arith.extf %150 : vector<128x128xbf16> to vector<128x128xf32>
      %cst_51 = arith.constant dense<0.000000e+00> : vector<128xf32>
      %152 = vector.multi_reduction <add>, %151, %cst_51 [1] : vector<128x128xf32> to vector<128xf32>
      %153 = vector.shape_cast %152 : vector<128xf32> to vector<128x1xf32>
      %154 = tpu.reciprocal %153 {approx = true} : vector<128x1xf32> -> vector<128x1xf32>
      %155 = vector.broadcast %154 : vector<128x1xf32> to vector<128x128xf32>
      %156 = arith.mulf %151, %155 : vector<128x128xf32>
      %157 = arith.truncf %156 : vector<128x128xf32> to vector<128x128xbf16>
      %cst_52 = arith.constant dense<0.000000e+00> : vector<128x64xf32>
      %158 = tpu.matmul %157, %141, %cst_52 {dimension_numbers = #tpu.dot_dimension_numbers<[1], [1], [0], [0], [0, 0, 1, 0], [], []>} : vector<128x128xbf16>, vector<64x128xbf16>, vector<128x64xf32> -> vector<128x64xf32>
      %159 = arith.addf %139, %158 : vector<128x64xf32>
      %160 = vector.extract_strided_slice %73 {offsets = [256, 0], sizes = [64, 128], strides = [1, 1]} : vector<512x128xbf16> to vector<64x128xbf16>
      %161 = vector.extract_strided_slice %78 {offsets = [256, 0], sizes = [64, 128], strides = [1, 1]} : vector<512x128xbf16> to vector<64x128xbf16>
      %cst_53 = arith.constant dense<0.000000e+00> : vector<128x128xf32>
      %162 = tpu.matmul %68, %160, %cst_53 {dimension_numbers = #tpu.dot_dimension_numbers<[1], [0], [0], [1], [0, 0, 1, 1], [], []>} : vector<128x64xbf16>, vector<64x128xbf16>, vector<128x128xf32> -> vector<128x128xf32>
      %163 = vector.broadcast %5 : vector<1x128xf32> to vector<128x128xf32>
      %164 = arith.addf %162, %163 : vector<128x128xf32>
      %cst_54 = arith.constant dense<0xFF800000> : vector<128xf32>
      %165 = vector.multi_reduction <maximumf>, %164, %cst_54 [1] : vector<128x128xf32> to vector<128xf32>
      %166 = vector.shape_cast %165 : vector<128xf32> to vector<128x1xf32>
      %167 = vector.broadcast %166 : vector<128x1xf32> to vector<128x128xf32>
      %168 = arith.subf %164, %167 : vector<128x128xf32>
      %169 = arith.truncf %168 : vector<128x128xf32> to vector<128x128xbf16>
      %170 = math.exp %169 : vector<128x128xbf16>
      %171 = arith.extf %170 : vector<128x128xbf16> to vector<128x128xf32>
      %cst_55 = arith.constant dense<0.000000e+00> : vector<128xf32>
      %172 = vector.multi_reduction <add>, %171, %cst_55 [1] : vector<128x128xf32> to vector<128xf32>
      %173 = vector.shape_cast %172 : vector<128xf32> to vector<128x1xf32>
      %174 = tpu.reciprocal %173 {approx = true} : vector<128x1xf32> -> vector<128x1xf32>
      %175 = vector.broadcast %174 : vector<128x1xf32> to vector<128x128xf32>
      %176 = arith.mulf %171, %175 : vector<128x128xf32>
      %177 = arith.truncf %176 : vector<128x128xf32> to vector<128x128xbf16>
      %cst_56 = arith.constant dense<0.000000e+00> : vector<128x64xf32>
      %178 = tpu.matmul %177, %161, %cst_56 {dimension_numbers = #tpu.dot_dimension_numbers<[1], [1], [0], [0], [0, 0, 1, 0], [], []>} : vector<128x128xbf16>, vector<64x128xbf16>, vector<128x64xf32> -> vector<128x64xf32>
      %179 = arith.addf %159, %178 : vector<128x64xf32>
      %180 = vector.extract_strided_slice %73 {offsets = [320, 0], sizes = [64, 128], strides = [1, 1]} : vector<512x128xbf16> to vector<64x128xbf16>
      %181 = vector.extract_strided_slice %78 {offsets = [320, 0], sizes = [64, 128], strides = [1, 1]} : vector<512x128xbf16> to vector<64x128xbf16>
      %cst_57 = arith.constant dense<0.000000e+00> : vector<128x128xf32>
      %182 = tpu.matmul %68, %180, %cst_57 {dimension_numbers = #tpu.dot_dimension_numbers<[1], [0], [0], [1], [0, 0, 1, 1], [], []>} : vector<128x64xbf16>, vector<64x128xbf16>, vector<128x128xf32> -> vector<128x128xf32>
      %183 = vector.broadcast %5 : vector<1x128xf32> to vector<128x128xf32>
      %184 = arith.addf %182, %183 : vector<128x128xf32>
      %cst_58 = arith.constant dense<0xFF800000> : vector<128xf32>
      %185 = vector.multi_reduction <maximumf>, %184, %cst_58 [1] : vector<128x128xf32> to vector<128xf32>
      %186 = vector.shape_cast %185 : vector<128xf32> to vector<128x1xf32>
      %187 = vector.broadcast %186 : vector<128x1xf32> to vector<128x128xf32>
      %188 = arith.subf %184, %187 : vector<128x128xf32>
      %189 = arith.truncf %188 : vector<128x128xf32> to vector<128x128xbf16>
      %190 = math.exp %189 : vector<128x128xbf16>
      %191 = arith.extf %190 : vector<128x128xbf16> to vector<128x128xf32>
      %cst_59 = arith.constant dense<0.000000e+00> : vector<128xf32>
      %192 = vector.multi_reduction <add>, %191, %cst_59 [1] : vector<128x128xf32> to vector<128xf32>
      %193 = vector.shape_cast %192 : vector<128xf32> to vector<128x1xf32>
      %194 = tpu.reciprocal %193 {approx = true} : vector<128x1xf32> -> vector<128x1xf32>
      %195 = vector.broadcast %194 : vector<128x1xf32> to vector<128x128xf32>
      %196 = arith.mulf %191, %195 : vector<128x128xf32>
      %197 = arith.truncf %196 : vector<128x128xf32> to vector<128x128xbf16>
      %cst_60 = arith.constant dense<0.000000e+00> : vector<128x64xf32>
      %198 = tpu.matmul %197, %181, %cst_60 {dimension_numbers = #tpu.dot_dimension_numbers<[1], [1], [0], [0], [0, 0, 1, 0], [], []>} : vector<128x128xbf16>, vector<64x128xbf16>, vector<128x64xf32> -> vector<128x64xf32>
      %199 = arith.addf %179, %198 : vector<128x64xf32>
      %200 = vector.extract_strided_slice %73 {offsets = [384, 0], sizes = [64, 128], strides = [1, 1]} : vector<512x128xbf16> to vector<64x128xbf16>
      %201 = vector.extract_strided_slice %78 {offsets = [384, 0], sizes = [64, 128], strides = [1, 1]} : vector<512x128xbf16> to vector<64x128xbf16>
      %cst_61 = arith.constant dense<0.000000e+00> : vector<128x128xf32>
      %202 = tpu.matmul %68, %200, %cst_61 {dimension_numbers = #tpu.dot_dimension_numbers<[1], [0], [0], [1], [0, 0, 1, 1], [], []>} : vector<128x64xbf16>, vector<64x128xbf16>, vector<128x128xf32> -> vector<128x128xf32>
      %203 = vector.broadcast %5 : vector<1x128xf32> to vector<128x128xf32>
      %204 = arith.addf %202, %203 : vector<128x128xf32>
      %cst_62 = arith.constant dense<0xFF800000> : vector<128xf32>
      %205 = vector.multi_reduction <maximumf>, %204, %cst_62 [1] : vector<128x128xf32> to vector<128xf32>
      %206 = vector.shape_cast %205 : vector<128xf32> to vector<128x1xf32>
      %207 = vector.broadcast %206 : vector<128x1xf32> to vector<128x128xf32>
      %208 = arith.subf %204, %207 : vector<128x128xf32>
      %209 = arith.truncf %208 : vector<128x128xf32> to vector<128x128xbf16>
      %210 = math.exp %209 : vector<128x128xbf16>
      %211 = arith.extf %210 : vector<128x128xbf16> to vector<128x128xf32>
      %cst_63 = arith.constant dense<0.000000e+00> : vector<128xf32>
      %212 = vector.multi_reduction <add>, %211, %cst_63 [1] : vector<128x128xf32> to vector<128xf32>
      %213 = vector.shape_cast %212 : vector<128xf32> to vector<128x1xf32>
      %214 = tpu.reciprocal %213 {approx = true} : vector<128x1xf32> -> vector<128x1xf32>
      %215 = vector.broadcast %214 : vector<128x1xf32> to vector<128x128xf32>
      %216 = arith.mulf %211, %215 : vector<128x128xf32>
      %217 = arith.truncf %216 : vector<128x128xf32> to vector<128x128xbf16>
      %cst_64 = arith.constant dense<0.000000e+00> : vector<128x64xf32>
      %218 = tpu.matmul %217, %201, %cst_64 {dimension_numbers = #tpu.dot_dimension_numbers<[1], [1], [0], [0], [0, 0, 1, 0], [], []>} : vector<128x128xbf16>, vector<64x128xbf16>, vector<128x64xf32> -> vector<128x64xf32>
      %219 = arith.addf %199, %218 : vector<128x64xf32>
      %220 = vector.extract_strided_slice %73 {offsets = [448, 0], sizes = [64, 128], strides = [1, 1]} : vector<512x128xbf16> to vector<64x128xbf16>
      %221 = vector.extract_strided_slice %78 {offsets = [448, 0], sizes = [64, 128], strides = [1, 1]} : vector<512x128xbf16> to vector<64x128xbf16>
      %cst_65 = arith.constant dense<0.000000e+00> : vector<128x128xf32>
      %222 = tpu.matmul %68, %220, %cst_65 {dimension_numbers = #tpu.dot_dimension_numbers<[1], [0], [0], [1], [0, 0, 1, 1], [], []>} : vector<128x64xbf16>, vector<64x128xbf16>, vector<128x128xf32> -> vector<128x128xf32>
      %223 = vector.broadcast %5 : vector<1x128xf32> to vector<128x128xf32>
      %224 = arith.addf %222, %223 : vector<128x128xf32>
      %cst_66 = arith.constant dense<0xFF800000> : vector<128xf32>
      %225 = vector.multi_reduction <maximumf>, %224, %cst_66 [1] : vector<128x128xf32> to vector<128xf32>
      %226 = vector.shape_cast %225 : vector<128xf32> to vector<128x1xf32>
      %227 = vector.broadcast %226 : vector<128x1xf32> to vector<128x128xf32>
      %228 = arith.subf %224, %227 : vector<128x128xf32>
      %229 = arith.truncf %228 : vector<128x128xf32> to vector<128x128xbf16>
      %230 = math.exp %229 : vector<128x128xbf16>
      %231 = arith.extf %230 : vector<128x128xbf16> to vector<128x128xf32>
      %cst_67 = arith.constant dense<0.000000e+00> : vector<128xf32>
      %232 = vector.multi_reduction <add>, %231, %cst_67 [1] : vector<128x128xf32> to vector<128xf32>
      %233 = vector.shape_cast %232 : vector<128xf32> to vector<128x1xf32>
      %234 = tpu.reciprocal %233 {approx = true} : vector<128x1xf32> -> vector<128x1xf32>
      %235 = vector.broadcast %234 : vector<128x1xf32> to vector<128x128xf32>
      %236 = arith.mulf %231, %235 : vector<128x128xf32>
      %237 = arith.truncf %236 : vector<128x128xf32> to vector<128x128xbf16>
      %cst_68 = arith.constant dense<0.000000e+00> : vector<128x64xf32>
      %238 = tpu.matmul %237, %221, %cst_68 {dimension_numbers = #tpu.dot_dimension_numbers<[1], [1], [0], [0], [0, 0, 1, 0], [], []>} : vector<128x128xbf16>, vector<64x128xbf16>, vector<128x64xf32> -> vector<128x64xf32>
      %239 = arith.addf %219, %238 : vector<128x64xf32>
      %240 = arith.addf %arg19, %239 : vector<128x64xf32>
      %241 = arith.index_cast %arg18 : i32 to index
      %c0_69 = arith.constant 0 : index
      %c0_70 = arith.constant 0 : index
      %242 = vector.load %arg6[%241, %c0_69, %c0_70] : memref<8x1x64xf32, #tpu.memory_space<vmem>>, vector<1x1x64xf32>
      %243 = vector.shape_cast %242 : vector<1x1x64xf32> to vector<1x64xf32>
      %244 = vector.broadcast %243 : vector<1x64xf32> to vector<128x64xf32>
      %245 = arith.addf %240, %244 : vector<128x64xf32>
      %246 = arith.index_cast %arg18 : i32 to index
      %c0_71 = arith.constant 0 : index
      %c0_72 = arith.constant 0 : index
      %247 = vector.load %arg7[%246, %c0_71, %c0_72] : memref<8x1x64xf32, #tpu.memory_space<vmem>>, vector<1x1x64xf32>
      %248 = vector.shape_cast %247 : vector<1x1x64xf32> to vector<1x64xf32>
      %249 = arith.index_cast %arg18 : i32 to index
      %c0_73 = arith.constant 0 : index
      %c0_74 = arith.constant 0 : index
      %250 = vector.load %arg8[%249, %c0_73, %c0_74] : memref<8x1x64xf32, #tpu.memory_space<vmem>>, vector<1x1x64xf32>
      %251 = vector.shape_cast %250 : vector<1x1x64xf32> to vector<1x64xf32>
      %cst_75 = arith.constant dense<0.000000e+00> : vector<128xf32>
      %252 = vector.multi_reduction <add>, %245, %cst_75 [1] : vector<128x64xf32> to vector<128xf32>
      %253 = vector.shape_cast %252 : vector<128xf32> to vector<128x1xf32>
      %cst_76 = arith.constant 6.400000e+01 : f32
      %254 = vector.broadcast %cst_76 : f32 to vector<128x1xf32>
      %255 = arith.divf %253, %254 : vector<128x1xf32>
      %256 = vector.broadcast %255 : vector<128x1xf32> to vector<128x64xf32>
      %257 = arith.subf %245, %256 : vector<128x64xf32>
      %258 = arith.mulf %257, %257 : vector<128x64xf32>
      %cst_77 = arith.constant dense<0.000000e+00> : vector<128xf32>
      %259 = vector.multi_reduction <add>, %258, %cst_77 [1] : vector<128x64xf32> to vector<128xf32>
      %260 = vector.shape_cast %259 : vector<128xf32> to vector<128x1xf32>
      %cst_78 = arith.constant 6.400000e+01 : f32
      %261 = vector.broadcast %cst_78 : f32 to vector<128x1xf32>
      %262 = arith.divf %260, %261 : vector<128x1xf32>
      %cst_79 = arith.constant 9.99999974E-6 : f32
      %263 = vector.broadcast %cst_79 : f32 to vector<128x1xf32>
      %264 = arith.addf %262, %263 : vector<128x1xf32>
      %265 = math.rsqrt %264 : vector<128x1xf32>
      %266 = vector.broadcast %265 : vector<128x1xf32> to vector<128x64xf32>
      %267 = arith.mulf %257, %266 : vector<128x64xf32>
      %268 = vector.broadcast %248 : vector<1x64xf32> to vector<128x64xf32>
      %269 = arith.mulf %267, %268 : vector<128x64xf32>
      %270 = vector.broadcast %251 : vector<1x64xf32> to vector<128x64xf32>
      %271 = arith.addf %269, %270 : vector<128x64xf32>
      %272 = arith.truncf %271 : vector<128x64xf32> to vector<128x64xbf16>
      %273 = arith.index_cast %arg18 : i32 to index
      %c0_80 = arith.constant 0 : index
      %c0_81 = arith.constant 0 : index
      %274 = vector.load %arg9[%273, %c0_80, %c0_81] : memref<8x64x256xbf16, #tpu.memory_space<vmem>>, vector<1x64x256xbf16>
      %275 = vector.shape_cast %274 : vector<1x64x256xbf16> to vector<64x256xbf16>
      %cst_82 = arith.constant dense<0.000000e+00> : vector<128x256xf32>
      %276 = tpu.matmul %272, %275, %cst_82 {dimension_numbers = #tpu.dot_dimension_numbers<[1], [0], [0], [1], [0, 0, 1, 1], [], []>} : vector<128x64xbf16>, vector<64x256xbf16>, vector<128x256xf32> -> vector<128x256xf32>
      %277 = arith.index_cast %arg18 : i32 to index
      %c0_83 = arith.constant 0 : index
      %c0_84 = arith.constant 0 : index
      %278 = vector.load %arg10[%277, %c0_83, %c0_84] : memref<8x1x256xf32, #tpu.memory_space<vmem>>, vector<1x1x256xf32>
      %279 = vector.shape_cast %278 : vector<1x1x256xf32> to vector<1x256xf32>
      %280 = vector.broadcast %279 : vector<1x256xf32> to vector<128x256xf32>
      %281 = arith.addf %276, %280 : vector<128x256xf32>
      %cst_85 = arith.constant 0.000000e+00 : f32
      %282 = vector.broadcast %cst_85 : f32 to vector<128x256xf32>
      %283 = arith.maximumf %281, %282 : vector<128x256xf32>
      %284 = arith.truncf %283 : vector<128x256xf32> to vector<128x256xbf16>
      %285 = arith.index_cast %arg18 : i32 to index
      %c0_86 = arith.constant 0 : index
      %c0_87 = arith.constant 0 : index
      %286 = vector.load %arg11[%285, %c0_86, %c0_87] : memref<8x256x64xbf16, #tpu.memory_space<vmem>>, vector<1x256x64xbf16>
      %287 = vector.shape_cast %286 : vector<1x256x64xbf16> to vector<256x64xbf16>
      %cst_88 = arith.constant dense<0.000000e+00> : vector<128x64xf32>
      %288 = tpu.matmul %284, %287, %cst_88 {dimension_numbers = #tpu.dot_dimension_numbers<[1], [0], [0], [1], [0, 0, 1, 1], [], []>} : vector<128x256xbf16>, vector<256x64xbf16>, vector<128x64xf32> -> vector<128x64xf32>
      %289 = arith.addf %245, %288 : vector<128x64xf32>
      %290 = arith.index_cast %arg18 : i32 to index
      %c0_89 = arith.constant 0 : index
      %c0_90 = arith.constant 0 : index
      %291 = vector.load %arg12[%290, %c0_89, %c0_90] : memref<8x1x64xf32, #tpu.memory_space<vmem>>, vector<1x1x64xf32>
      %292 = vector.shape_cast %291 : vector<1x1x64xf32> to vector<1x64xf32>
      %293 = vector.broadcast %292 : vector<1x64xf32> to vector<128x64xf32>
      %294 = arith.addf %289, %293 : vector<128x64xf32>
      scf.yield %294 : vector<128x64xf32>
    }
    %c8_i32_3 = arith.constant 8 : i32
    %c0_4 = arith.constant 0 : index
    %c0_5 = arith.constant 0 : index
    %10 = vector.load %arg13[%c0_4, %c0_5] : memref<1x64xf32, #tpu.memory_space<vmem>>, vector<1x64xf32>
    %c0_6 = arith.constant 0 : index
    %c0_7 = arith.constant 0 : index
    %11 = vector.load %arg14[%c0_6, %c0_7] : memref<1x64xf32, #tpu.memory_space<vmem>>, vector<1x64xf32>
    %cst_8 = arith.constant dense<0.000000e+00> : vector<128xf32>
    %12 = vector.multi_reduction <add>, %9, %cst_8 [1] : vector<128x64xf32> to vector<128xf32>
    %13 = vector.shape_cast %12 : vector<128xf32> to vector<128x1xf32>
    %cst_9 = arith.constant 6.400000e+01 : f32
    %14 = vector.broadcast %cst_9 : f32 to vector<128x1xf32>
    %15 = arith.divf %13, %14 : vector<128x1xf32>
    %16 = vector.broadcast %15 : vector<128x1xf32> to vector<128x64xf32>
    %17 = arith.subf %9, %16 : vector<128x64xf32>
    %18 = arith.mulf %17, %17 : vector<128x64xf32>
    %cst_10 = arith.constant dense<0.000000e+00> : vector<128xf32>
    %19 = vector.multi_reduction <add>, %18, %cst_10 [1] : vector<128x64xf32> to vector<128xf32>
    %20 = vector.shape_cast %19 : vector<128xf32> to vector<128x1xf32>
    %cst_11 = arith.constant 6.400000e+01 : f32
    %21 = vector.broadcast %cst_11 : f32 to vector<128x1xf32>
    %22 = arith.divf %20, %21 : vector<128x1xf32>
    %cst_12 = arith.constant 9.99999974E-6 : f32
    %23 = vector.broadcast %cst_12 : f32 to vector<128x1xf32>
    %24 = arith.addf %22, %23 : vector<128x1xf32>
    %25 = math.rsqrt %24 : vector<128x1xf32>
    %26 = vector.broadcast %25 : vector<128x1xf32> to vector<128x64xf32>
    %27 = arith.mulf %17, %26 : vector<128x64xf32>
    %28 = vector.broadcast %10 : vector<1x64xf32> to vector<128x64xf32>
    %29 = arith.mulf %27, %28 : vector<128x64xf32>
    %30 = vector.broadcast %11 : vector<1x64xf32> to vector<128x64xf32>
    %31 = arith.addf %29, %30 : vector<128x64xf32>
    %32 = arith.truncf %31 : vector<128x64xf32> to vector<128x64xbf16>
    %c0_13 = arith.constant 0 : index
    %c0_14 = arith.constant 0 : index
    %33 = vector.load %arg15[%c0_13, %c0_14] : memref<64x128xbf16, #tpu.memory_space<vmem>>, vector<64x128xbf16>
    %cst_15 = arith.constant dense<0.000000e+00> : vector<128x128xf32>
    %34 = tpu.matmul %32, %33, %cst_15 {dimension_numbers = #tpu.dot_dimension_numbers<[1], [0], [0], [1], [0, 0, 1, 1], [], []>} : vector<128x64xbf16>, vector<64x128xbf16>, vector<128x128xf32> -> vector<128x128xf32>
    %c0_16 = arith.constant 0 : index
    %c0_17 = arith.constant 0 : index
    %35 = vector.load %arg16[%c0_16, %c0_17] : memref<1x128xf32, #tpu.memory_space<vmem>>, vector<1x128xf32>
    %36 = vector.broadcast %35 : vector<1x128xf32> to vector<128x128xf32>
    %37 = arith.addf %34, %36 : vector<128x128xf32>
    %38 = arith.truncf %37 : vector<128x128xf32> to vector<128x128xbf16>
    %c0_18 = arith.constant 0 : index
    %c0_19 = arith.constant 0 : index
    %c0_20 = arith.constant 0 : index
    %39 = vector.load %arg17[%c0_18, %c0_19, %c0_20] : memref<1x128x128xbf16, #tpu.memory_space<vmem>>, vector<1x128x128xbf16>
    %40 = vector.shape_cast %39 : vector<1x128x128xbf16> to vector<128x128xbf16>
    %41 = vector.shape_cast %38 : vector<128x128xbf16> to vector<1x128x128xbf16>
    tpu.vector_store %arg17[%c0_18, %c0_19, %c0_20], %41 {strides = array<i32>} : memref<1x128x128xbf16, #tpu.memory_space<vmem>>, vector<1x128x128xbf16>,
    return
  }
  func.func @transform_0(%arg0: i32) -> (i32, i32, i32) {
    %c0_i32 = arith.constant 0 : i32
    %c0_i32_0 = arith.constant 0 : i32
    %c0_i32_1 = arith.constant 0 : i32
    return %arg0, %c0_i32, %c0_i32_0 : i32, i32, i32
  }
  func.func @transform_1(%arg0: i32) -> (i32, i32, i32) {
    %c0_i32 = arith.constant 0 : i32
    %c0_i32_0 = arith.constant 0 : i32
    %c0_i32_1 = arith.constant 0 : i32
    %c0_i32_2 = arith.constant 0 : i32
    return %c0_i32, %c0_i32_0, %c0_i32_1 : i32, i32, i32
  }
  func.func @transform_2(%arg0: i32) -> (i32, i32, i32) {
    %c0_i32 = arith.constant 0 : i32
    %c0_i32_0 = arith.constant 0 : i32
    %c0_i32_1 = arith.constant 0 : i32
    %c0_i32_2 = arith.constant 0 : i32
    return %c0_i32, %c0_i32_0, %c0_i32_1 : i32, i32, i32
  }
  func.func @transform_3(%arg0: i32) -> (i32, i32, i32) {
    %c0_i32 = arith.constant 0 : i32
    %c0_i32_0 = arith.constant 0 : i32
    %c0_i32_1 = arith.constant 0 : i32
    %c0_i32_2 = arith.constant 0 : i32
    return %c0_i32, %c0_i32_0, %c0_i32_1 : i32, i32, i32
  }
  func.func @transform_4(%arg0: i32) -> (i32, i32, i32) {
    %c0_i32 = arith.constant 0 : i32
    %c0_i32_0 = arith.constant 0 : i32
    %c0_i32_1 = arith.constant 0 : i32
    %c0_i32_2 = arith.constant 0 : i32
    return %c0_i32, %c0_i32_0, %c0_i32_1 : i32, i32, i32
  }
  func.func @transform_5(%arg0: i32) -> (i32, i32, i32) {
    %c0_i32 = arith.constant 0 : i32
    %c0_i32_0 = arith.constant 0 : i32
    %c0_i32_1 = arith.constant 0 : i32
    %c0_i32_2 = arith.constant 0 : i32
    return %c0_i32, %c0_i32_0, %c0_i32_1 : i32, i32, i32
  }
  func.func @transform_6(%arg0: i32) -> (i32, i32, i32) {
    %c0_i32 = arith.constant 0 : i32
    %c0_i32_0 = arith.constant 0 : i32
    %c0_i32_1 = arith.constant 0 : i32
    %c0_i32_2 = arith.constant 0 : i32
    return %c0_i32, %c0_i32_0, %c0_i32_1 : i32, i32, i32
  }
  func.func @transform_7(%arg0: i32) -> (i32, i32, i32) {
    %c0_i32 = arith.constant 0 : i32
    %c0_i32_0 = arith.constant 0 : i32
    %c0_i32_1 = arith.constant 0 : i32
    %c0_i32_2 = arith.constant 0 : i32
    return %c0_i32, %c0_i32_0, %c0_i32_1 : i32, i32, i32
  }
  func.func @transform_8(%arg0: i32) -> (i32, i32, i32) {
    %c0_i32 = arith.constant 0 : i32
    %c0_i32_0 = arith.constant 0 : i32
    %c0_i32_1 = arith.constant 0 : i32
    %c0_i32_2 = arith.constant 0 : i32
    return %c0_i32, %c0_i32_0, %c0_i32_1 : i32, i32, i32
  }
  func.func @transform_9(%arg0: i32) -> (i32, i32, i32) {
    %c0_i32 = arith.constant 0 : i32
    %c0_i32_0 = arith.constant 0 : i32
    %c0_i32_1 = arith.constant 0 : i32
    %c0_i32_2 = arith.constant 0 : i32
    return %c0_i32, %c0_i32_0, %c0_i32_1 : i32, i32, i32
  }
  func.func @transform_10(%arg0: i32) -> (i32, i32, i32) {
    %c0_i32 = arith.constant 0 : i32
    %c0_i32_0 = arith.constant 0 : i32
    %c0_i32_1 = arith.constant 0 : i32
    %c0_i32_2 = arith.constant 0 : i32
    return %c0_i32, %c0_i32_0, %c0_i32_1 : i32, i32, i32
  }
  func.func @transform_11(%arg0: i32) -> (i32, i32, i32) {
    %c0_i32 = arith.constant 0 : i32
    %c0_i32_0 = arith.constant 0 : i32
    %c0_i32_1 = arith.constant 0 : i32
    %c0_i32_2 = arith.constant 0 : i32
    return %c0_i32, %c0_i32_0, %c0_i32_1 : i32, i32, i32
  }
  func.func @transform_12(%arg0: i32) -> (i32, i32) {
    %c0_i32 = arith.constant 0 : i32
    %c0_i32_0 = arith.constant 0 : i32
    %c0_i32_1 = arith.constant 0 : i32
    return %c0_i32, %c0_i32_0 : i32, i32
  }
  func.func @transform_13(%arg0: i32) -> (i32, i32) {
    %c0_i32 = arith.constant 0 : i32
    %c0_i32_0 = arith.constant 0 : i32
    %c0_i32_1 = arith.constant 0 : i32
    return %c0_i32, %c0_i32_0 : i32, i32
  }
  func.func @transform_14(%arg0: i32) -> (i32, i32) {
    %c0_i32 = arith.constant 0 : i32
    %c0_i32_0 = arith.constant 0 : i32
    %c0_i32_1 = arith.constant 0 : i32
    return %c0_i32, %c0_i32_0 : i32, i32
  }
  func.func @transform_15(%arg0: i32) -> (i32, i32) {
    %c0_i32 = arith.constant 0 : i32
    %c0_i32_0 = arith.constant 0 : i32
    %c0_i32_1 = arith.constant 0 : i32
    return %c0_i32, %c0_i32_0 : i32, i32
  }
  func.func @transform_16(%arg0: i32) -> (i32, i32, i32) {
    %c0_i32 = arith.constant 0 : i32
    %c0_i32_0 = arith.constant 0 : i32
    %c0_i32_1 = arith.constant 0 : i32
    return %arg0, %c0_i32, %c0_i32_0 : i32, i32, i32
  }
}

</mosaic_0001>

<bundles_post_ra>
// kernel: heartgpt_forward.1
= control target key start
LH: loop header
LB: loop body
LE: loop exit
PB: predicated region body
PF: predicated region fallthrough
CT: control target
= control target key end

     0   :  { %s8826_s21 = smov 0   ;;  %s12077_s0 = inlined_call_operand.vmem [shape: f32[2,128,64], index: 0, kind: input, shape index: {}]   ;;  %s12078_s1 = inlined_call_operand.vmem [shape: bf16[8,512,64], index: 1, kind: input, shape index: {}]   ;;  %s12079_s2 = inlined_call_operand.vmem [shape: bf16[8,512,64], index: 2, kind: input, shape index: {}]   ;;  %s12080_s3 = inlined_call_operand.vmem [shape: f32[8,1,64], index: 3, kind: input, shape index: {}]   ;;  %s12081_s4 = inlined_call_operand.vmem [shape: f32[8,1,64], index: 4, kind: input, shape index: {}]   ;;  %s12082_s5 = inlined_call_operand.vmem [shape: f32[8,1,64], index: 5, kind: input, shape index: {}]   ;;  %s12083_s6 = inlined_call_operand.vmem [shape: f32[8,1,64], index: 6, kind: input, shape index: {}]   ;;  %s12084_s7 = inlined_call_operand.vmem [shape: f32[8,1,64], index: 7, kind: input, shape index: {}]   ;;  %s12085_s8 = inlined_call_operand.vmem [shape: bf16[8,64,256], index: 8, kind: input, shape index: {}]   ;;  %s12086_s9 = inlined_call_operand.vmem [shape: f32[8,1,256], index: 9, kind: input, shape index: {}]   ;;  %s12087_s10 = inlined_call_operand.vmem [shape: bf16[8,256,64], index: 10, kind: input, shape index: {}]   ;;  %s12088_s11 = inlined_call_operand.vmem [shape: f32[8,1,64], index: 11, kind: input, shape index: {}]   ;;  %s12089_s12 = inlined_call_operand.vmem [shape: f32[1,64], index: 12, kind: input, shape index: {}]   ;;  %s12090_s13 = inlined_call_operand.vmem [shape: f32[1,64], index: 13, kind: input, shape index: {}]   ;;  %s12091_s14 = inlined_call_operand.vmem [shape: bf16[64,128], index: 14, kind: input, shape index: {}]   ;;  %s12092_s15 = inlined_call_operand.vmem [shape: f32[1,128], index: 15, kind: input, shape index: {}]   ;;  %s12093_s16 = inlined_call_operand.vmem [shape: bf16[2,128,128], index: 16, kind: output, shape index: {}]  }
   0x1   :  { %12287 = sst [smem:[#allocation103_spill]] %s12077_s0 }
   0x2 LB: > { %s6584_s22 = sadd.s32 4294967295, %s8669_s21   ;;  %p6588_p0 = scmp.ge.s32.totalorder %s8669_s21, 1  ;;  %s8669_s21 = sphi %s8826_s21, %s26_s21  }
   0x3   : > { %p462_p1 = scmp.lt.s32.totalorder %s8669_s21, 3 }
   0x5   : > { %p463_p2 = pnand %p6588_p0, %p462_p1 }
   0x7   : > { %466 = sbr.rel (%p463_p2) target bundleno = 3499 (0xdab), region = 84 }
   0xc   : > { %p512_p3 = scmp.lt.s32.totalorder %s6584_s22, 1  ;;  %v12094_v0 = vlaneseq  ;;  %s12288_s27 = sld [smem:[#allocation103_spill]]  ;;  %v8739_v2 = vmov -1e+30  }
   0xd   : > { %s8877_s17 = smov 0  }
   0xe   : > { %s12694_s22 = smov (!%p512_p3, %s6584_s22), 1  ;;  %v524_v1 = vand.u32 127, %v12094_v0 }
   0xf   : > { %s6864_s23 = sshll.u32 %s12694_s22, 7  ;;  %s6865_s24 = sshll.u32 %s12694_s22, 6 }
  0x10   : > { %vm525_vm0 = vcmp.lt.s32.totalorder %v524_v1, 64  ;;  %s8841_s0 = scalar_lea.vmem %s12093_s16, %s6865_s24 }
  0x11   : > { %v8843_v3 = vsel %vm525_vm0, 0.0, %v8739_v2 }
  0x12   : > { %s516_s28 = scalar_lea.vmem %s12288_s27, %s6864_s23  ;;  %12289 = vst [vmem:[#allocation2_spill] sm:$0xff] %v8843_v3 }
  0x13   : > { %v527_v4 = vld [vmem:[%s516_s28] sm:$0xff]   ;;  %v528_v5 = vld [vmem:[%s516_s28 + $0x8] sm:$0xff]   ;;  %v529_v6 = vld [vmem:[%s516_s28 + $0x10] sm:$0xff]  }
  0x14   : > { %v530_v7 = vld [vmem:[%s516_s28 + $0x18] sm:$0xff]   ;;  %v531_v8 = vld [vmem:[%s516_s28 + $0x20] sm:$0xff]   ;;  %v532_v9 = vld [vmem:[%s516_s28 + $0x28] sm:$0xff]  }
  0x15   : > { %v533_v10 = vld [vmem:[%s516_s28 + $0x30] sm:$0xff]   ;;  %v534_v11 = vld [vmem:[%s516_s28 + $0x38] sm:$0xff]   ;;  %v535_v12 = vld [vmem:[%s516_s28 + $0x40] sm:$0xff]  }
  0x16   : > { %v536_v13 = vld [vmem:[%s516_s28 + $0x48] sm:$0xff]   ;;  %v537_v14 = vld [vmem:[%s516_s28 + $0x50] sm:$0xff]   ;;  %v538_v15 = vld [vmem:[%s516_s28 + $0x58] sm:$0xff]  }
  0x17   : > { %v539_v16 = vld [vmem:[%s516_s28 + $0x60] sm:$0xff]   ;;  %v540_v17 = vld [vmem:[%s516_s28 + $0x68] sm:$0xff]   ;;  %v541_v18 = vld [vmem:[%s516_s28 + $0x70] sm:$0xff]  }
  0x18   : > { %v542_v19 = vld [vmem:[%s516_s28 + $0x78] sm:$0xff]  }
  0x19 LB: >> { %v12290_v3 = vld [vmem:[#allocation2_spill] sm:$0xff]  ;;  %12291 = vst [vmem:[#allocation3_spill] sm:$0xff] %v8673_v19  ;;  %12292 = vst [vmem:[#allocation4_spill] sm:$0xff] %v8677_v18  ;;  %vm569_vm1 = vcmask 523264   ;;  %s6866_s18 = sshll.u32 %s8737_s17, 8  ;;  %s565_s28 = scalar_lea.vmem %s12080_s3, %s8737_s17  ;;  %v8673_v19 = vphi %v542_v19, %v12677_v19   ;;  %s8737_s17 = sphi %s8877_s17, %s548_s17   ;;  %v8733_v4 = vphi %v527_v4, %v12692_v4   ;;  %v8729_v5 = vphi %v528_v5, %v12691_v5   ;;  %v8725_v6 = vphi %v529_v6, %v12690_v6   ;;  %v8721_v7 = vphi %v530_v7, %v12689_v7   ;;  %v8717_v8 = vphi %v531_v8, %v12688_v8   ;;  %v8713_v9 = vphi %v532_v9, %v12687_v9   ;;  %v8709_v10 = vphi %v533_v10, %v12686_v10   ;;  %v8705_v11 = vphi %v534_v11, %v12685_v11   ;;  %v8701_v12 = vphi %v535_v12, %v12684_v12   ;;  %v8697_v13 = vphi %v536_v13, %v12683_v13   ;;  %v8693_v14 = vphi %v537_v14, %v12682_v14   ;;  %v8689_v15 = vphi %v538_v15, %v12681_v15   ;;  %v8685_v16 = vphi %v539_v16, %v12680_v16   ;;  %v8681_v17 = vphi %v540_v17, %v12679_v17   ;;  %v8677_v18 = vphi %v541_v18, %v12678_v18  }
  0x1a   : >> { %12293 = vst [vmem:[#allocation5_spill] sm:$0xff] %v8681_v17  ;;  %12294 = vst [vmem:[#allocation6_spill] sm:$0xff] %v8685_v16  ;;  %v612_v20 = vsel %vm569_vm1, %v8677_v18, 0.0  ;;  %v606_v21 = vsel %vm569_vm1, %v8685_v16, 0.0  ;;  %v615_v22 = vsel %vm569_vm1, %v8673_v19, 0.0  ;;  %v609_v23 = vsel %vm569_vm1, %v8681_v17, 0.0  ;;  %s9062_s22 = scalar_lea.vmem %s12078_s1, %s6866_s18  ;;  %s9067_s25 = scalar_lea.vmem %s12079_s2, %s6866_s18 }
  0x1b   : >> { %12295 = vst [vmem:[#allocation7_spill] sm:$0xff] %v8689_v15  ;;  %12296 = vst [vmem:[#allocation8_spill] sm:$0xff] %v8693_v14  ;;  %613 = vadd.xlane.f32.xlu0 %v612_v20  ;;  %607 = vadd.xlane.f32.xlu1 %v606_v21  ;;  %v600_v24 = vsel %vm569_vm1, %v8693_v14, 0.0  ;;  %v603_v25 = vsel %vm569_vm1, %v8689_v15, 0.0  ;;  %v594_v26 = vsel %vm569_vm1, %v8701_v12, 0.0  ;;  %v597_v27 = vsel %vm569_vm1, %v8697_v13, 0.0  ;;  %s567_s18 = scalar_lea.vmem %s12081_s4, %s8737_s17  ;;  %s5174_s29 = scalar_lea.vmem %s12083_s6, %s8737_s17 }
  0x1c   : >> { %12297 = vst [vmem:[#allocation9_spill] sm:$0xff] %v8697_v13  ;;  %12298 = vst [vmem:[#allocation10_spill] sm:$0xff] %v8701_v12  ;;  %v588_v28 = vsel %vm569_vm1, %v8709_v10, 0.0  ;;  %v591_v29 = vsel %vm569_vm1, %v8705_v11, 0.0  ;;  %v582_v30 = vsel %vm569_vm1, %v8717_v8, 0.0  ;;  %v585_v31 = vsel %vm569_vm1, %v8713_v9, 0.0  ;;  %s5176_s19 = scalar_lea.vmem %s12084_s7, %s8737_s17 }
  0x1d   : >> { %12299 = vst [vmem:[#allocation11_spill] sm:$0xff] %v8705_v11  ;;  %12300 = vst [vmem:[#allocation12_spill] sm:$0xff] %v8709_v10  ;;  %v576_v32 = vsel %vm569_vm1, %v8725_v6, 0.0  ;;  %v579_v33 = vsel %vm569_vm1, %v8721_v7, 0.0  ;;  %v570_v34 = vsel %vm569_vm1, %v8733_v4, 0.0  ;;  %v573_v35 = vsel %vm569_vm1, %v8729_v5, 0.0 }
  0x1e   : >> { %12301 = vst [vmem:[#allocation13_spill] sm:$0xff] %v8713_v9  ;;  %12302 = vst [vmem:[#allocation14_spill] sm:$0xff] %v8717_v8  ;;  %s6868_s23 = sshll.u32 %s8737_s17, 6  ;;  %s6869_s20 = sshll.u32 %s8737_s17, 7 }
  0x1f   : >> { %12303 = vst [vmem:[#allocation15_spill] sm:$0xff] %v8721_v7  ;;  %12304 = vst [vmem:[#allocation16_spill] sm:$0xff] %v8725_v6  ;;  %616 = vadd.xlane.f32.xlu0 %v615_v22  ;;  %610 = vadd.xlane.f32.xlu1 %v609_v23  ;;  %s5440_s26 = scalar_lea.vmem %s12085_s8, %s6868_s23  ;;  %s11613_s24 = scalar_lea.vmem %s12087_s10, %s6869_s20 }
  0x20   : >> { %12305 = vst [vmem:[#allocation17_spill] sm:$0xff] %v8729_v5  ;;  %12306 = vst [vmem:[#allocation18_spill] sm:$0xff] %v8733_v4 }
  0x23   : >> { %601 = vadd.xlane.f32.xlu0 %v600_v24  ;;  %604 = vadd.xlane.f32.xlu1 %v603_v25 }
  0x27   : >> { %595 = vadd.xlane.f32.xlu0 %v594_v26  ;;  %598 = vadd.xlane.f32.xlu1 %v597_v27 }
  0x2b   : >> { %589 = vadd.xlane.f32.xlu0 %v588_v28  ;;  %592 = vadd.xlane.f32.xlu1 %v591_v29 }
  0x2f   : >> { %583 = vadd.xlane.f32.xlu0 %v582_v30  ;;  %586 = vadd.xlane.f32.xlu1 %v585_v31 }
  0x33   : >> { %577 = vadd.xlane.f32.xlu0 %v576_v32  ;;  %580 = vadd.xlane.f32.xlu1 %v579_v33 }
  0x37   : >> { %571 = vadd.xlane.f32.xlu0 %v570_v34  ;;  %574 = vadd.xlane.f32.xlu1 %v573_v35 }
  0xa4   : >> { %v614_v36 = vpop.xlane.xlu0 %613  ;;  %v608_v37 = vpop.xlane.xlu1 %607 }
  0xa5   : >> { %v633_v38 = vmul.f32 0.015625, %v614_v36  ;;  %v631_v39 = vmul.f32 0.015625, %v608_v37 }
  0xa7   : >> { %v8963_v40 = vsub.f32 %v8677_v18, %v633_v38  ;;  %v8966_v41 = vsub.f32 %v8685_v16, %v631_v39 }
  0xa8   : >> { %v617_v42 = vpop.xlane.xlu0 %616  ;;  %v611_v43 = vpop.xlane.xlu1 %610 }
  0xa9   : >> { %v634_v44 = vmul.f32 0.015625, %v617_v42  ;;  %v632_v45 = vmul.f32 0.015625, %v611_v43  ;;  %v665_v46 = vmul.f32 %v8963_v40, %v8963_v40  ;;  %v663_v47 = vmul.f32 %v8966_v41, %v8966_v41 }
  0xab   : >> { %v8973_v48 = vsub.f32 %v8673_v19, %v634_v44  ;;  %v8976_v49 = vsub.f32 %v8681_v17, %v632_v45  ;;  %v709_v50 = vsel %vm569_vm1, %v665_v46, 0.0  ;;  %v703_v53 = vsel %vm569_vm1, %v663_v47, 0.0 }
  0xac   : >> { %710 = vadd.xlane.f32.xlu0 %v709_v50  ;;  %v602_v51 = vpop.xlane.xlu0 %601  ;;  %v605_v52 = vpop.xlane.xlu1 %604 }
  0xad   : >> { %v629_v54 = vmul.f32 0.015625, %v602_v51  ;;  %v630_v55 = vmul.f32 0.015625, %v605_v52  ;;  %v666_v56 = vmul.f32 %v8973_v48, %v8973_v48  ;;  %v664_v57 = vmul.f32 %v8976_v49, %v8976_v49 }
  0xaf   : >> { %v8985_v58 = vsub.f32 %v8693_v14, %v629_v54  ;;  %v8988_v59 = vsub.f32 %v8689_v15, %v630_v55  ;;  %v712_v60 = vsel %vm569_vm1, %v666_v56, 0.0  ;;  %v706_v63 = vsel %vm569_vm1, %v664_v57, 0.0 }
  0xb0   : >> { %704 = vadd.xlane.f32.xlu0 %v703_v53  ;;  %713 = vadd.xlane.f32.xlu1 %v712_v60  ;;  %v596_v61 = vpop.xlane.xlu0 %595  ;;  %v599_v62 = vpop.xlane.xlu1 %598 }
  0xb1   : >> { %v627_v1 = vmul.f32 0.015625, %v596_v61  ;;  %v628_v2 = vmul.f32 0.015625, %v599_v62  ;;  %v661_v20 = vmul.f32 %v8985_v58, %v8985_v58  ;;  %v662_v21 = vmul.f32 %v8988_v59, %v8988_v59 }
  0xb3   : >> { %v8997_v22 = vsub.f32 %v8701_v12, %v627_v1  ;;  %v9000_v23 = vsub.f32 %v8697_v13, %v628_v2  ;;  %v697_v24 = vsel %vm569_vm1, %v661_v20, 0.0  ;;  %v700_v27 = vsel %vm569_vm1, %v662_v21, 0.0 }
  0xb4   : >> { %707 = vadd.xlane.f32.xlu1 %v706_v63  ;;  %698 = vadd.xlane.f32.xlu0 %v697_v24  ;;  %v590_v25 = vpop.xlane.xlu0 %589  ;;  %v593_v26 = vpop.xlane.xlu1 %592 }
  0xb5   : >> { %v625_v28 = vmul.f32 0.015625, %v590_v25  ;;  %v626_v29 = vmul.f32 0.015625, %v593_v26  ;;  %v659_v30 = vmul.f32 %v8997_v22, %v8997_v22  ;;  %v660_v31 = vmul.f32 %v9000_v23, %v9000_v23 }
  0xb7   : >> { %v9009_v32 = vsub.f32 %v8709_v10, %v625_v28  ;;  %v9012_v33 = vsub.f32 %v8705_v11, %v626_v29  ;;  %v691_v34 = vsel %vm569_vm1, %v659_v30, 0.0  ;;  %v694_v37 = vsel %vm569_vm1, %v660_v31, 0.0 }
  0xb8   : >> { %701 = vadd.xlane.f32.xlu1 %v700_v27  ;;  %692 = vadd.xlane.f32.xlu0 %v691_v34  ;;  %v584_v35 = vpop.xlane.xlu0 %583  ;;  %v587_v36 = vpop.xlane.xlu1 %586  ;;  %v8019_v34 = vld [vmem:[%s9062_s22] sm:$0xff]  }
  0xb9   : >> { %v623_v38 = vmul.f32 0.015625, %v584_v35  ;;  %v624_v39 = vmul.f32 0.015625, %v587_v36  ;;  %v657_v42 = vmul.f32 %v9009_v32, %v9009_v32  ;;  %v658_v43 = vmul.f32 %v9012_v33, %v9012_v33  ;;  %v8020_v35 = vld [vmem:[%s9067_s25] sm:$0xff]   ;;  %7297 = vmatprep.mubr.msk.bf16.mxu0 %vm569_vm1, %v8019_v34 }
  0xba   : >> { %7377 = vmatprep.mubr.msk.bf16.mxu1 %vm569_vm1, %v8020_v35 }
  0xbb   : >> { %v9021_v44 = vsub.f32 %v8717_v8, %v623_v38  ;;  %v9024_v45 = vsub.f32 %v8713_v9, %v624_v39  ;;  %v685_v46 = vsel %vm569_vm1, %v657_v42, 0.0  ;;  %v688_v51 = vsel %vm569_vm1, %v658_v43, 0.0 }
  0xbc   : >> { %695 = vadd.xlane.f32.xlu1 %v694_v37  ;;  %686 = vadd.xlane.f32.xlu0 %v685_v46  ;;  %v578_v47 = vpop.xlane.xlu0 %577  ;;  %v581_v50 = vpop.xlane.xlu1 %580 }
  0xbd   : >> { %v621_v52 = vmul.f32 0.015625, %v578_v47  ;;  %v622_v53 = vmul.f32 0.015625, %v581_v50  ;;  %v655_v54 = vmul.f32 %v9021_v44, %v9021_v44  ;;  %v656_v55 = vmul.f32 %v9024_v45, %v9024_v45 }
  0xbf   : >> { %v9033_v56 = vsub.f32 %v8725_v6, %v621_v52  ;;  %v9036_v57 = vsub.f32 %v8721_v7, %v622_v53  ;;  %v679_v60 = vsel %vm569_vm1, %v655_v54, 0.0  ;;  %v682_v63 = vsel %vm569_vm1, %v656_v55, 0.0 }
  0xc0   : >> { %689 = vadd.xlane.f32.xlu1 %v688_v51  ;;  %680 = vadd.xlane.f32.xlu0 %v679_v60  ;;  %v572_v61 = vpop.xlane.xlu0 %571  ;;  %v575_v62 = vpop.xlane.xlu1 %574 }
  0xc1   : >> { %v619_v1 = vmul.f32 0.015625, %v572_v61  ;;  %v620_v2 = vmul.f32 0.015625, %v575_v62  ;;  %v653_v20 = vmul.f32 %v9033_v56, %v9033_v56  ;;  %v654_v21 = vmul.f32 %v9036_v57, %v9036_v57 }
  0xc3   : >> { %v9045_v24 = vsub.f32 %v8733_v4, %v619_v1  ;;  %v9048_v25 = vsub.f32 %v8729_v5, %v620_v2  ;;  %v673_v26 = vsel %vm569_vm1, %v653_v20, 0.0  ;;  %v676_v27 = vsel %vm569_vm1, %v654_v21, 0.0 }
  0xc4   : >> { %683 = vadd.xlane.f32.xlu1 %v682_v63  ;;  %674 = vadd.xlane.f32.xlu0 %v673_v26 }
  0xc5   : >> { %v651_v28 = vmul.f32 %v9045_v24, %v9045_v24  ;;  %v652_v29 = vmul.f32 %v9048_v25, %v9048_v25 }
  0xc7   : >> { %v667_v30 = vsel %vm569_vm1, %v651_v28, 0.0  ;;  %v670_v31 = vsel %vm569_vm1, %v652_v29, 0.0  ;;  %v9077_v29 = vld [vmem:[%s565_s28] ss:$0 sm:$0xff] }
  0xc8   : >> { %677 = vadd.xlane.f32.xlu1 %v676_v27  ;;  %668 = vadd.xlane.f32.xlu0 %v667_v30 }
  0xcc   : >> { %671 = vadd.xlane.f32.xlu1 %v670_v31 }
 0x135   : >> { %v711_v36 = vpop.xlane.xlu0 %710 }
 0x136   : >> { %v729_v37 = vmul.f32 0.015625, %v711_v36 }
 0x138   : >> { %v745_v38 = vadd.f32 1e-05, %v729_v37 }
 0x139   : >> { %v714_v39 = vpop.xlane.xlu1 %713  ;;  %v705_v42 = vpop.xlane.xlu0 %704 }
 0x13a   : >> { %8111 = vrsqrt.f32 %v745_v38  ;;  %v730_v43 = vmul.f32 0.015625, %v714_v39  ;;  %v727_v46 = vmul.f32 0.015625, %v705_v42  ;;  %v9085_v42 = vld [vmem:[%s567_s18] ss:$0 sm:$0xff]  ;;  %s5932_s18 = scalar_lea.vmem %s12088_s11, %s8737_s17 }
 0x13c   : >> { %v746_v47 = vadd.f32 1e-05, %v730_v43  ;;  %v743_v50 = vadd.f32 1e-05, %v727_v46 }
 0x13d   : >> { %v708_v51 = vpop.xlane.xlu1 %707  ;;  %v699_v52 = vpop.xlane.xlu0 %698 }
 0x13e   : >> { %8113 = vrsqrt.f32 %v746_v47  ;;  %v728_v53 = vmul.f32 0.015625, %v708_v51  ;;  %v725_v54 = vmul.f32 0.015625, %v699_v52 }
 0x13f   : >> { %8115 = vrsqrt.f32 %v743_v50 }
 0x140   : >> { %v744_v55 = vadd.f32 1e-05, %v728_v53  ;;  %v741_v60 = vadd.f32 1e-05, %v725_v54 }
 0x141   : >> { %v702_v61 = vpop.xlane.xlu1 %701  ;;  %v693_v62 = vpop.xlane.xlu0 %692 }
 0x142   : >> { %8117 = vrsqrt.f32 %v744_v55  ;;  %v726_v63 = vmul.f32 0.015625, %v702_v61  ;;  %v723_v1 = vmul.f32 0.015625, %v693_v62 }
 0x143   : >> { %8119 = vrsqrt.f32 %v741_v60 }
 0x144   : >> { %v742_v2 = vadd.f32 1e-05, %v726_v63  ;;  %v739_v20 = vadd.f32 1e-05, %v723_v1 }
 0x145   : >> { %v696_v21 = vpop.xlane.xlu1 %695  ;;  %v687_v28 = vpop.xlane.xlu0 %686 }
 0x146   : >> { %8121 = vrsqrt.f32 %v742_v2  ;;  %v724_v26 = vmul.f32 0.015625, %v696_v21  ;;  %v721_v35 = vmul.f32 0.015625, %v687_v28 }
 0x147   : >> { %v8112_v27 = vpop.eup %8111  ;;  %8123 = vrsqrt.f32 %v739_v20 }
 0x148   : >> { %v777_v30 = vmul.f32 %v8112_v27, %v8963_v40  ;;  %v740_v31 = vadd.f32 1e-05, %v724_v26  ;;  %v737_v51 = vadd.f32 1e-05, %v721_v35 }
 0x149   : >> { %v690_v34 = vpop.xlane.xlu1 %689  ;;  %v681_v52 = vpop.xlane.xlu0 %680 }
 0x14a   : >> { %8125 = vrsqrt.f32 %v740_v31  ;;  %v722_v36 = vmul.f32 0.015625, %v690_v34  ;;  %v799_v38 = vmul.f32 %v9077_v29, %v777_v30 }
 0x14b   : >> { %v8114_v37 = vpop.eup %8113 }
 0x14c   : >> { %v8116_v39 = vpop.eup %8115  ;;  %v778_v43 = vmul.f32 %v8114_v37, %v8973_v48  ;;  %v738_v46 = vadd.f32 1e-05, %v722_v36  ;;  %v821_v54 = vadd.f32 %v9085_v42, %v799_v38  ;;  %v719_v48 = vmul.f32 0.015625, %v681_v52 }
 0x14d   : >> { %v775_v40 = vmul.f32 %v8116_v39, %v8966_v41  ;;  %v684_v47 = vpop.xlane.xlu1 %683  ;;  %v675_v37 = vpop.xlane.xlu0 %674 }
 0x14e   : >> { %v800_v50 = vmul.f32 %v9077_v29, %v778_v43  ;;  %v720_v55 = vmul.f32 0.015625, %v684_v47  ;;  %8127 = vrsqrt.f32 %v738_v46  ;;  %v717_v47 = vmul.f32 0.015625, %v675_v37 }
 0x14f   : >> { %v8118_v53 = vpop.eup %8117  ;;  %v797_v62 = vmul.f32 %v9077_v29, %v775_v40  ;;  %8129 = vrsqrt.f32 %v737_v51 }
 0x150   : >> { %v8120_v60 = vpop.eup %8119  ;;  %v822_v61 = vadd.f32 %v9085_v42, %v800_v50  ;;  %v776_v63 = vmul.f32 %v8118_v53, %v8976_v49  ;;  %v736_v21 = vadd.f32 1e-05, %v720_v55 }
 0x151   : >> { %v773_v2 = vmul.f32 %v8120_v60, %v8985_v58  ;;  %v819_v26 = vadd.f32 %v9085_v42, %v797_v62  ;;  %v678_v30 = vpop.xlane.xlu1 %677  ;;  %v733_v60 = vadd.f32 1e-05, %v717_v47 }
 0x152   : >> { %v9094_v1 = vpack.c.bf16 %v822_v61, %v821_v54  ;;  %v798_v41 = vmul.f32 %v9077_v29, %v776_v63  ;;  %8131 = vrsqrt.f32 %v736_v21  ;;  %v718_v43 = vmul.f32 0.015625, %v678_v30  ;;  %v669_v61 = vpop.xlane.xlu0 %668 }
 0x153   : >> { %v8122_v20 = vpop.eup %8121  ;;  %v795_v34 = vmul.f32 %v9077_v29, %v773_v2 }
 0x154   : >> { %v820_v27 = vadd.f32 %v9085_v42, %v798_v41  ;;  %v774_v28 = vmul.f32 %v8122_v20, %v8988_v59  ;;  %7857 = vmatprep.subr.msk.bf16.mxu0 %vm569_vm1, %v9094_v1  ;;  %7865 = vmatprep.subr.msk.bf16.mxu1 %vm569_vm1, %v9094_v1  ;;  %v1176_v49 = vsel %vm569_vm1, %v9094_v1, 0  ;;  %v8124_v58 = vpop.eup %8123  ;;  %v735_v59 = vadd.f32 1e-05, %v719_v48 }
 0x155   : >> { %7282 = vmatpush3.bf16.xpose.msra.mxu0 %v1176_v49  ;;  %7362 = vmatpush3.bf16.xpose.msra.mxu1 %v1176_v49  ;;  %v817_v46 = vadd.f32 %v9085_v42, %v795_v34  ;;  %v771_v40 = vmul.f32 %v8124_v58, %v8997_v22  ;;  %v734_v52 = vadd.f32 1e-05, %v718_v43  ;;  %v672_v54 = vpop.xlane.xlu1 %671  ;;  %v715_v20 = vmul.f32 0.015625, %v669_v61 }
 0x156   : >> { %v9107_v31 = vpack.c.bf16 %v820_v27, %v819_v26  ;;  %v796_v35 = vmul.f32 %v9077_v29, %v774_v28  ;;  %8133 = vrsqrt.f32 %v735_v59  ;;  %v716_v48 = vmul.f32 0.015625, %v672_v54 }
 0x157   : >> { %v8126_v36 = vpop.eup %8125  ;;  %v793_v55 = vmul.f32 %v9077_v29, %v771_v40  ;;  %8135 = vrsqrt.f32 %v734_v52  ;;  %v731_v30 = vadd.f32 1e-05, %v715_v20  ;;  %v8022_v20 = vld [vmem:[%s9067_s25 + $0x8] sm:$0xff]  }
 0x158   : >> { %v818_v38 = vadd.f32 %v9085_v42, %v796_v35  ;;  %v772_v39 = vmul.f32 %v8126_v36, %v9000_v23  ;;  %7858 = vmatprep.subr.msk.bf16.mxu0 %vm569_vm1, %v9107_v31  ;;  %7866 = vmatprep.subr.msk.bf16.mxu1 %vm569_vm1, %v9107_v31  ;;  %v1173_v23 = vsel %vm569_vm1, %v9107_v31, 0  ;;  %8137 = vrsqrt.f32 %v733_v60 }
 0x159   : >> { %v815_v41 = vadd.f32 %v9085_v42, %v793_v55  ;;  %v732_v27 = vadd.f32 1e-05, %v716_v48 }
 0x15a   : >> { %v9119_v50 = vpack.c.bf16 %v818_v38, %v817_v46  ;;  %v794_v51 = vmul.f32 %v9077_v29, %v772_v39 }
 0x15b   : >> { %v8128_v53 = vpop.eup %8127  ;;  %8139 = vrsqrt.f32 %v732_v27  ;;  %v8024_v27 = vld [vmem:[%s9067_s25 + $0x10] sm:$0xff]  }
 0x15c   : >> { %v8130_v22 = vpop.eup %8129  ;;  %v816_v62 = vadd.f32 %v9085_v42, %v794_v51  ;;  %v770_v63 = vmul.f32 %v8128_v53, %v9012_v33  ;;  %v1170_v28 = vsel %vm569_vm1, %v9119_v50, 0  ;;  %8141 = vrsqrt.f32 %v731_v30  ;;  %v8028_v30 = vld [vmem:[%s9067_s25 + $0x20] sm:$0xff]  }
 0x15d   : >> { %7284 = vmatpush3.bf16.xpose.msra.mxu0 %v1173_v23  ;;  %7364 = vmatpush3.bf16.xpose.msra.mxu1 %v1173_v23  ;;  %v769_v2 = vmul.f32 %v8130_v22, %v9009_v32 }
 0x15e   : >> { %7859 = vmatprep.subr.msk.bf16.mxu0 %vm569_vm1, %v9119_v50  ;;  %7867 = vmatprep.subr.msk.bf16.mxu1 %vm569_vm1, %v9119_v50  ;;  %v9133_v21 = vpack.c.bf16 %v816_v62, %v815_v41  ;;  %v792_v26 = vmul.f32 %v9077_v29, %v770_v63 }
 0x15f   : >> { %v8132_v49 = vpop.eup %8131  ;;  %v791_v33 = vmul.f32 %v9077_v29, %v769_v2 }
 0x160   : >> { %v814_v58 = vadd.f32 %v9085_v42, %v792_v26  ;;  %v768_v34 = vmul.f32 %v8132_v49, %v9024_v45  ;;  %v1167_v38 = vsel %vm569_vm1, %v9133_v21, 0  ;;  %v8023_v26 = vld [vmem:[%s9062_s22 + $0x10] sm:$0xff]   ;;  %v8026_v49 = vld [vmem:[%s9067_s25 + $0x18] sm:$0xff]  }
 0x161   : >> { %v813_v35 = vadd.f32 %v9085_v42, %v791_v33  ;;  %v8027_v33 = vld [vmem:[%s9062_s22 + $0x20] sm:$0xff]  }
 0x162   : >> { %v790_v37 = vmul.f32 %v9077_v29, %v768_v34  ;;  %v8031_v34 = vld [vmem:[%s9062_s22 + $0x30] sm:$0xff]  }
 0x163   : >> { %v8134_v32 = vpop.eup %8133  ;;  %v9147_v36 = vpack.c.bf16 %v814_v58, %v813_v35  ;;  %v8030_v58 = vld [vmem:[%s9067_s25 + $0x28] sm:$0xff]   ;;  %v8032_v35 = vld [vmem:[%s9067_s25 + $0x30] sm:$0xff]  }
 0x164   : >> { %v767_v59 = vmul.f32 %v8134_v32, %v9021_v44  ;;  %v8136_v39 = vpop.eup %8135  ;;  %v812_v45 = vadd.f32 %v9085_v42, %v790_v37  ;;  %v8029_v32 = vld [vmem:[%s9062_s22 + $0x28] sm:$0xff]   ;;  %v8034_v37 = vld [vmem:[%s9067_s25 + $0x38] sm:$0xff]  }
 0x165   : >> { %7286 = vmatpush3.bf16.xpose.msra.mxu0 %v1170_v28  ;;  %7366 = vmatpush3.bf16.xpose.msra.mxu1 %v1170_v28  ;;  %v8138_v44 = vpop.eup %8137  ;;  %v766_v46 = vmul.f32 %v8136_v39, %v9036_v57  ;;  %v1164_v23 = vsel %vm569_vm1, %v9147_v36, 0  ;;  %v8025_v28 = vld [vmem:[%s9062_s22 + $0x18] sm:$0xff]   ;;  %v8036_v39 = vld [vmem:[%s9067_s25 + $0x40] sm:$0xff]  }
 0x166   : >> { %7860 = vmatprep.subr.msk.bf16.mxu0 %vm569_vm1, %v9133_v21  ;;  %7868 = vmatprep.subr.msk.bf16.mxu1 %vm569_vm1, %v9133_v21  ;;  %v789_v43 = vmul.f32 %v9077_v29, %v767_v59  ;;  %v765_v47 = vmul.f32 %v8138_v44, %v9033_v56  ;;  %v8033_v59 = vld [vmem:[%s9062_s22 + $0x38] sm:$0xff]   ;;  %v8038_v44 = vld [vmem:[%s9067_s25 + $0x48] sm:$0xff]  }
 0x167   : >> { %v788_v52 = vmul.f32 %v9077_v29, %v766_v46  ;;  %v8040_v46 = vld [vmem:[%s9067_s25 + $0x50] sm:$0xff]  }
 0x168   : >> { %v811_v40 = vadd.f32 %v9085_v42, %v789_v43  ;;  %v8140_v53 = vpop.eup %8139  ;;  %v787_v54 = vmul.f32 %v9077_v29, %v765_v47  ;;  %v8037_v43 = vld [vmem:[%s9062_s22 + $0x48] sm:$0xff]   ;;  %v8042_v47 = vld [vmem:[%s9067_s25 + $0x58] sm:$0xff]  }
 0x169   : >> { %v8142_v57 = vpop.eup %8141  ;;  %v810_v56 = vadd.f32 %v9085_v42, %v788_v52  ;;  %v764_v55 = vmul.f32 %v8140_v53, %v9048_v25  ;;  %v8043_v52 = vld [vmem:[%s9062_s22 + $0x60] sm:$0xff]   ;;  %v8045_v53 = vld [vmem:[%s9062_s22 + $0x68] sm:$0xff]  }
 0x16a   : >> { %v9161_v51 = vpack.c.bf16 %v812_v45, %v811_v40  ;;  %v809_v60 = vadd.f32 %v9085_v42, %v787_v54  ;;  %v763_v22 = vmul.f32 %v8142_v57, %v9045_v24  ;;  %v8039_v45 = vld [vmem:[%s9062_s22 + $0x50] sm:$0xff]   ;;  %v8041_v40 = vld [vmem:[%s9062_s22 + $0x58] sm:$0xff]   ;;  %v8046_v54 = vld [vmem:[%s9067_s25 + $0x68] sm:$0xff]  }
 0x16b   : >> { %v786_v62 = vmul.f32 %v9077_v29, %v764_v55  ;;  %v8047_v57 = vld [vmem:[%s9062_s22 + $0x70] sm:$0xff]   ;;  %v8049_v55 = vld [vmem:[%s9062_s22 + $0x78] sm:$0xff]  }
 0x16c   : >> { %v9175_v61 = vpack.c.bf16 %v810_v56, %v809_v60  ;;  %v1161_v63 = vsel %vm569_vm1, %v9161_v51, 0  ;;  %v785_v48 = vmul.f32 %v9077_v29, %v763_v22  ;;  %v8048_v56 = vld [vmem:[%s9067_s25 + $0x70] sm:$0xff]   ;;  %v8050_v60 = vld [vmem:[%s9067_s25 + $0x78] sm:$0xff]   ;;  %v8051_v22 = vld [vmem:[%s9062_s22 + $0x80] sm:$0xff]  }
 0x16d   : >> { %7288 = vmatpush3.bf16.xpose.msra.mxu0 %v1167_v38  ;;  %7368 = vmatpush3.bf16.xpose.msra.mxu1 %v1167_v38  ;;  %v808_v24 = vadd.f32 %v9085_v42, %v786_v62  ;;  %v8035_v38 = vld [vmem:[%s9062_s22 + $0x40] sm:$0xff]  }
 0x16e   : >> { %7861 = vmatprep.subr.msk.bf16.mxu0 %vm569_vm1, %v9147_v36  ;;  %7869 = vmatprep.subr.msk.bf16.mxu1 %vm569_vm1, %v9147_v36  ;;  %v807_v25 = vadd.f32 %v9085_v42, %v785_v48  ;;  %v1158_v2 = vsel %vm569_vm1, %v9175_v61, 0  ;;  %v8021_v42 = vld [vmem:[%s9062_s22 + $0x8] sm:$0xff]   ;;  %v8052_v62 = vld [vmem:[%s9067_s25 + $0x80] sm:$0xff]  }
 0x16f   : >> { %v8054_v48 = vld [vmem:[%s9067_s25 + $0x88] sm:$0xff]  }
 0x170   : >> { %v9187_v41 = vpack.c.bf16 %v808_v24, %v807_v25  ;;  %v8055_v24 = vld [vmem:[%s9062_s22 + $0x90] sm:$0xff]  }
 0x171   : >> { %v8056_v25 = vld [vmem:[%s9067_s25 + $0x90] sm:$0xff]  }
 0x172   : >> { %v1155_v29 = vsel %vm569_vm1, %v9187_v41, 0 }
 0x175   : >> { %7290 = vmatpush3.bf16.xpose.msra.mxu0 %v1164_v23  ;;  %7370 = vmatpush3.bf16.xpose.msra.mxu1 %v1164_v23  ;;  %v8044_v23 = vld [vmem:[%s9067_s25 + $0x60] sm:$0xff]  }
 0x176   : >> { %7862 = vmatprep.subr.msk.bf16.mxu0 %vm569_vm1, %v9161_v51  ;;  %7870 = vmatprep.subr.msk.bf16.mxu1 %vm569_vm1, %v9161_v51 }
 0x17d   : >> { %7292 = vmatpush3.bf16.xpose.msra.mxu0 %v1161_v63  ;;  %7372 = vmatpush3.bf16.xpose.msra.mxu1 %v1161_v63  ;;  %v8053_v63 = vld [vmem:[%s9062_s22 + $0x88] sm:$0xff]  }
 0x17e   : >> { %7863 = vmatprep.subr.msk.bf16.mxu0 %vm569_vm1, %v9175_v61  ;;  %7871 = vmatprep.subr.msk.bf16.mxu1 %vm569_vm1, %v9175_v61 }
 0x185   : >> { %7294 = vmatpush3.bf16.xpose.msra.mxu0 %v1158_v2  ;;  %7374 = vmatpush3.bf16.xpose.msra.mxu1 %v1158_v2  ;;  %v8057_v2 = vld [vmem:[%s9062_s22 + $0x98] sm:$0xff]  }
 0x186   : >> { %7864 = vmatprep.subr.msk.bf16.mxu0 %vm569_vm1, %v9187_v41  ;;  %7872 = vmatprep.subr.msk.bf16.mxu1 %vm569_vm1, %v9187_v41 }
 0x18d   : >> { %7296 = vmatpush3.bf16.xpose.msra.mxu0 %v1155_v29  ;;  %7376 = vmatpush3.bf16.xpose.msra.mxu1 %v1155_v29  ;;  %v8058_v29 = vld [vmem:[%s9067_s25 + $0x98] sm:$0xff]  }
 0x194   : >> { %7298 = vmatmul.mubr.msk.bf16.vlgmr.msra.gmra.mxu0 %vm569_vm1, %v8021_v42  ;;  %7378 = vmatmul.mubr.msk.bf16.vlgmr.msra.gmra.mxu1 %vm569_vm1, %v8022_v20  ;;  %v8059_v42 = vld [vmem:[%s9062_s22 + $0xa0] sm:$0xff]  }
 0x195   : >> { %7301 = vmatprep.mubr.msk.bf16.mxu0 %vm569_vm1, %v8023_v26  ;;  %7381 = vmatprep.mubr.msk.bf16.mxu1 %vm569_vm1, %v8024_v27  ;;  %v8060_v20 = vld [vmem:[%s9067_s25 + $0xa0] sm:$0xff]   ;;  %v8061_v26 = vld [vmem:[%s9062_s22 + $0xa8] sm:$0xff]  }
 0x196   : >> { %v8062_v27 = vld [vmem:[%s9067_s25 + $0xa8] sm:$0xff]  }
 0x19c   : >> { %7302 = vmatmul.mubr.msk.bf16.gmra.mxu0 %vm569_vm1, %v8025_v28  ;;  %7382 = vmatmul.mubr.msk.bf16.gmra.mxu1 %vm569_vm1, %v8026_v49  ;;  %v8063_v28 = vld [vmem:[%s9062_s22 + $0xb0] sm:$0xff]  }
 0x19d   : >> { %7305 = vmatprep.mubr.msk.bf16.mxu0 %vm569_vm1, %v8027_v33  ;;  %7385 = vmatprep.mubr.msk.bf16.mxu1 %vm569_vm1, %v8028_v30  ;;  %v8064_v49 = vld [vmem:[%s9067_s25 + $0xb0] sm:$0xff]   ;;  %v8065_v33 = vld [vmem:[%s9062_s22 + $0xb8] sm:$0xff]  }
 0x19e   : >> { %v8066_v30 = vld [vmem:[%s9067_s25 + $0xb8] sm:$0xff]  }
 0x1a4   : >> { %7306 = vmatmul.mubr.msk.bf16.gmra.mxu0 %vm569_vm1, %v8029_v32  ;;  %7386 = vmatmul.mubr.msk.bf16.gmra.mxu1 %vm569_vm1, %v8030_v58  ;;  %v8067_v32 = vld [vmem:[%s9062_s22 + $0xc0] sm:$0xff]  }
 0x1a5   : >> { %7309 = vmatprep.mubr.msk.bf16.mxu0 %vm569_vm1, %v8031_v34  ;;  %7389 = vmatprep.mubr.msk.bf16.mxu1 %vm569_vm1, %v8032_v35  ;;  %v8068_v58 = vld [vmem:[%s9067_s25 + $0xc0] sm:$0xff]   ;;  %v8069_v34 = vld [vmem:[%s9062_s22 + $0xc8] sm:$0xff]  }
 0x1a6   : >> { %v8070_v35 = vld [vmem:[%s9067_s25 + $0xc8] sm:$0xff]  }
 0x1ac   : >> { %7310 = vmatmul.mubr.msk.bf16.gmra.mxu0 %vm569_vm1, %v8033_v59  ;;  %7390 = vmatmul.mubr.msk.bf16.gmra.mxu1 %vm569_vm1, %v8034_v37  ;;  %v8071_v59 = vld [vmem:[%s9062_s22 + $0xd0] sm:$0xff]  }
 0x1ad   : >> { %7313 = vmatprep.mubr.msk.bf16.mxu0 %vm569_vm1, %v8035_v38  ;;  %7393 = vmatprep.mubr.msk.bf16.mxu1 %vm569_vm1, %v8036_v39  ;;  %v8072_v37 = vld [vmem:[%s9067_s25 + $0xd0] sm:$0xff]   ;;  %v8073_v38 = vld [vmem:[%s9062_s22 + $0xd8] sm:$0xff]  }
 0x1ae   : >> { %v8074_v39 = vld [vmem:[%s9067_s25 + $0xd8] sm:$0xff]  }
 0x1b4   : >> { %7314 = vmatmul.mubr.msk.bf16.gmra.mxu0 %vm569_vm1, %v8037_v43  ;;  %7394 = vmatmul.mubr.msk.bf16.gmra.mxu1 %vm569_vm1, %v8038_v44  ;;  %v8075_v43 = vld [vmem:[%s9062_s22 + $0xe0] sm:$0xff]  }
 0x1b5   : >> { %7317 = vmatprep.mubr.msk.bf16.mxu0 %vm569_vm1, %v8039_v45  ;;  %7397 = vmatprep.mubr.msk.bf16.mxu1 %vm569_vm1, %v8040_v46  ;;  %v8076_v44 = vld [vmem:[%s9067_s25 + $0xe0] sm:$0xff]   ;;  %v8077_v45 = vld [vmem:[%s9062_s22 + $0xe8] sm:$0xff]  }
 0x1b6   : >> { %v8078_v46 = vld [vmem:[%s9067_s25 + $0xe8] sm:$0xff]  }
 0x1bc   : >> { %7318 = vmatmul.mubr.msk.bf16.gmra.mxu0 %vm569_vm1, %v8041_v40  ;;  %7398 = vmatmul.mubr.msk.bf16.gmra.mxu1 %vm569_vm1, %v8042_v47  ;;  %v8079_v40 = vld [vmem:[%s9062_s22 + $0xf0] sm:$0xff]  }
 0x1bd   : >> { %7321 = vmatprep.mubr.msk.bf16.mxu0 %vm569_vm1, %v8043_v52  ;;  %7401 = vmatprep.mubr.msk.bf16.mxu1 %vm569_vm1, %v8044_v23  ;;  %v8080_v47 = vld [vmem:[%s9067_s25 + $0xf0] sm:$0xff]   ;;  %v8081_v52 = vld [vmem:[%s9062_s22 + $0xf8] sm:$0xff]   ;;  %s5150_s22 = scalar_lea.vmem %s12082_s5, %s8737_s17 }
 0x1be   : >> { %v8082_v23 = vld [vmem:[%s9067_s25 + $0xf8] sm:$0xff]   ;;  %s6795_s25 = sshll.u32 %s8737_s17, 1  ;;  %s548_s17 = sadd.s32 1, %s8737_s17  }
 0x1bf   : >> { %s5450_s28 = scalar_lea.vmem %s12086_s9, %s6795_s25  ;;  %p11801_p4 = scmp.ge.s32.totalorder %s548_s17, 8  }
 0x1c4   : >> { %7322 = vmatmul.mubr.msk.bf16.gmra.mxu0 %vm569_vm1, %v8045_v53  ;;  %7402 = vmatmul.mubr.msk.bf16.gmra.mxu1 %vm569_vm1, %v8046_v54 }
 0x1c5   : >> { %7325 = vmatprep.mubr.msk.bf16.mxu0 %vm569_vm1, %v8047_v57  ;;  %7405 = vmatprep.mubr.msk.bf16.mxu1 %vm569_vm1, %v8048_v56 }
 0x1cc   : >> { %7326 = vmatmul.mubr.msk.bf16.gmra.mxu0 %vm569_vm1, %v8049_v55  ;;  %7406 = vmatmul.mubr.msk.bf16.gmra.mxu1 %vm569_vm1, %v8050_v60 }
 0x1cd   : >> { %7329 = vmatprep.mubr.msk.bf16.mxu0 %vm569_vm1, %v8051_v22  ;;  %7409 = vmatprep.mubr.msk.bf16.mxu1 %vm569_vm1, %v8052_v62 }
 0x1d4   : >> { %7330 = vmatmul.mubr.msk.bf16.gmra.mxu0 %vm569_vm1, %v8053_v63  ;;  %7410 = vmatmul.mubr.msk.bf16.gmra.mxu1 %vm569_vm1, %v8054_v48 }
 0x1d5   : >> { %7333 = vmatprep.mubr.msk.bf16.mxu0 %vm569_vm1, %v8055_v24  ;;  %7413 = vmatprep.mubr.msk.bf16.mxu1 %vm569_vm1, %v8056_v25 }
 0x1dc   : >> { %7334 = vmatmul.mubr.msk.bf16.gmra.mxu0 %vm569_vm1, %v8057_v2  ;;  %7414 = vmatmul.mubr.msk.bf16.gmra.mxu1 %vm569_vm1, %v8058_v29 }
 0x1dd   : >> { %7337 = vmatprep.mubr.msk.bf16.mxu0 %vm569_vm1, %v8059_v42  ;;  %7417 = vmatprep.mubr.msk.bf16.mxu1 %vm569_vm1, %v8060_v20 }
 0x1e4   : >> { %7338 = vmatmul.mubr.msk.bf16.gmra.mxu0 %vm569_vm1, %v8061_v26  ;;  %7418 = vmatmul.mubr.msk.bf16.gmra.mxu1 %vm569_vm1, %v8062_v27 }
 0x1e5   : >> { %7341 = vmatprep.mubr.msk.bf16.mxu0 %vm569_vm1, %v8063_v28  ;;  %7421 = vmatprep.mubr.msk.bf16.mxu1 %vm569_vm1, %v8064_v49 }
 0x1ec   : >> { %7342 = vmatmul.mubr.msk.bf16.gmra.mxu0 %vm569_vm1, %v8065_v33  ;;  %7422 = vmatmul.mubr.msk.bf16.gmra.mxu1 %vm569_vm1, %v8066_v30 }
 0x1ed   : >> { %7345 = vmatprep.mubr.msk.bf16.mxu0 %vm569_vm1, %v8067_v32  ;;  %7425 = vmatprep.mubr.msk.bf16.mxu1 %vm569_vm1, %v8068_v58 }
 0x1f4   : >> { %7346 = vmatmul.mubr.msk.bf16.gmra.mxu0 %vm569_vm1, %v8069_v34  ;;  %7426 = vmatmul.mubr.msk.bf16.gmra.mxu1 %vm569_vm1, %v8070_v35 }
 0x1f5   : >> { %7349 = vmatprep.mubr.msk.bf16.mxu0 %vm569_vm1, %v8071_v59  ;;  %7429 = vmatprep.mubr.msk.bf16.mxu1 %vm569_vm1, %v8072_v37 }
 0x1fc   : >> { %7350 = vmatmul.mubr.msk.bf16.gmra.mxu0 %vm569_vm1, %v8073_v38  ;;  %7430 = vmatmul.mubr.msk.bf16.gmra.mxu1 %vm569_vm1, %v8074_v39 }
 0x1fd   : >> { %7353 = vmatprep.mubr.msk.bf16.mxu0 %vm569_vm1, %v8075_v43  ;;  %7433 = vmatprep.mubr.msk.bf16.mxu1 %vm569_vm1, %v8076_v44 }
 0x204   : >> { %7354 = vmatmul.mubr.msk.bf16.gmra.mxu0 %vm569_vm1, %v8077_v45  ;;  %7434 = vmatmul.mubr.msk.bf16.gmra.mxu1 %vm569_vm1, %v8078_v46 }
 0x205   : >> { %7357 = vmatprep.mubr.msk.bf16.mxu0 %vm569_vm1, %v8079_v40  ;;  %7437 = vmatprep.mubr.msk.bf16.mxu1 %vm569_vm1, %v8080_v47 }
 0x20c   : >> { %7358 = vmatmul.mubr.msk.bf16.gmra.mxu0 %vm569_vm1, %v8081_v52  ;;  %7438 = vmatmul.mubr.msk.bf16.gmra.mxu1 %vm569_vm1, %v8082_v23 }
 0x20d   : >> { %7449 = vmatprep.mubr.msk.bf16.mxu0 %vm569_vm1, %v9187_v41  ;;  %7473 = vmatprep.mubr.msk.bf16.mxu1 %vm569_vm1, %v9187_v41 }
 0x254   : >> { %v7299_v53 = vpop.f32.mrf.mxu0  ;;  %v9325_v54 = vpop.f32.mrf.mxu1 }
 0x256   : >> { %v1212_v57 = vpop.f32.mrf.mxu0  ;;  %v9327_v56 = vpop.f32.mrf.mxu1 }
 0x258   : >> { %v7300_v55 = vpop.f32.mrf.mxu0  ;;  %v9329_v60 = vpop.f32.mrf.mxu1 }
 0x259   : >> { %v1468_v32 = vpack.c.bf16 %v7300_v55, %v7299_v53 }
 0x25a   : >> { %v1215_v22 = vpop.f32.mrf.mxu0  ;;  %v9331_v62 = vpop.f32.mrf.mxu1 }
 0x25b   : >> { %v1467_v37 = vpack.c.bf16 %v1215_v22, %v1212_v57 }
 0x25c   : >> { %v7303_v63 = vpop.f32.mrf.mxu0  ;;  %v9333_v48 = vpop.f32.mrf.mxu1 }
 0x25e   : >> { %v1228_v24 = vpop.f32.mrf.mxu0  ;;  %v9335_v25 = vpop.f32.mrf.mxu1 }
 0x260   : >> { %v7304_v2 = vpop.f32.mrf.mxu0  ;;  %v9337_v29 = vpop.f32.mrf.mxu1 }
 0x261   : >> { %v1470_v42 = vpack.c.bf16 %v7304_v2, %v7303_v63 }
 0x262   : >> { %v1231_v20 = vpop.f32.mrf.mxu0  ;;  %v9339_v26 = vpop.f32.mrf.mxu1 }
 0x263   : >> { %v1469_v27 = vpack.c.bf16 %v1231_v20, %v1228_v24  ;;  %7441 = vmatprep.subr.bf16.mxu0 %v1470_v42 }
 0x264   : >> { %v7307_v28 = vpop.f32.mrf.mxu0  ;;  %7442 = vmatpush3.bf16.msra.mxu0 %v1470_v42  ;;  %v7387_v49 = vpop.f32.mrf.mxu1 }
 0x265   : >> { %7443 = vmatprep.subr.bf16.mxu0 %v1469_v27 }
 0x266   : >> { %v1244_v33 = vpop.f32.mrf.mxu0  ;;  %v9341_v30 = vpop.f32.mrf.mxu1 }
 0x268   : >> { %v7308_v58 = vpop.f32.mrf.mxu0  ;;  %7444 = vmatpush3.bf16.msra.mxu0 %v1469_v27  ;;  %v7388_v34 = vpop.f32.mrf.mxu1 }
 0x269   : >> { %7445 = vmatprep.subr.bf16.mxu0 %v1468_v32  ;;  %v1472_v2 = vpack.c.bf16 %v7308_v58, %v7307_v28 }
 0x26a   : >> { %v1247_v35 = vpop.f32.mrf.mxu0  ;;  %v1890_v59 = vpop.f32.mrf.mxu1 }
 0x26c   : >> { %v7311_v38 = vpop.f32.mrf.mxu0  ;;  %7446 = vmatpush3.bf16.msra.mxu0 %v1468_v32  ;;  %v7391_v39 = vpop.f32.mrf.mxu1 }
 0x26d   : >> { %7447 = vmatprep.subr.bf16.mxu0 %v1467_v37 }
 0x26e   : >> { %v1260_v43 = vpop.f32.mrf.mxu0  ;;  %v1903_v44 = vpop.f32.mrf.mxu1 }
 0x270   : >> { %v7312_v45 = vpop.f32.mrf.mxu0  ;;  %7448 = vmatpush3.bf16.msra.mxu0 %v1467_v37  ;;  %v7392_v46 = vpop.f32.mrf.mxu1 }
 0x271   : >> { %v1474_v40 = vpack.c.bf16 %v7312_v45, %v7311_v38  ;;  %v2117_v47 = vpack.c.bf16 %v7392_v46, %v7391_v39  ;;  %v1471_v39 = vpack.c.bf16 %v1247_v35, %v1244_v33 }
 0x272   : >> { %v1263_v52 = vpop.f32.mrf.mxu0  ;;  %v1906_v23 = vpop.f32.mrf.mxu1 }
 0x273   : >> { %v1473_v53 = vpack.c.bf16 %v1263_v52, %v1260_v43  ;;  %7450 = vmatmul.mubr.msk.bf16.vlgmr.msra.gmra.mxu0 %vm569_vm1, %v9175_v61  ;;  %7465 = vmatprep.subr.bf16.mxu1 %v1474_v40  ;;  %v2116_v55 = vpack.c.bf16 %v1906_v23, %v1903_v44  ;;  %v2115_v43 = vpack.c.bf16 %v7388_v34, %v7387_v49 }
 0x274   : >> { %7453 = vmatprep.mubr.msk.bf16.mxu0 %vm569_vm1, %v9161_v51  ;;  %7466 = vmatpush3.bf16.msra.mxu1 %v1474_v40  ;;  %v7315_v57 = vpop.f32.mrf.mxu0  ;;  %v7395_v22 = vpop.f32.mrf.mxu1  ;;  %v2113_v44 = vpack.c.bf16 %v9337_v29, %v9333_v48  ;;  %v2112_v34 = vpack.c.bf16 %v9339_v26, %v9335_v25  ;;  %v2114_v48 = vpack.c.bf16 %v1890_v59, %v9341_v30 }
 0x275   : >> { %7467 = vmatprep.subr.bf16.mxu1 %v1473_v53  ;;  %7489 = vmatprep.subr.bf16.mxu0 %v2117_v47  ;;  %v2111_v59 = vpack.c.bf16 %v9329_v60, %v9325_v54 }
 0x276   : >> { %v9347_v63 = vpop.f32.mrf.mxu0  ;;  %v9349_v24 = vpop.f32.mrf.mxu1  ;;  %7490 = vmatpush3.bf16.xpose.msra.mxu0 %v2117_v47 }
 0x277   : >> { %12307 = vst [vmem:[#allocation19_spill] sm:$0xff] %v9349_v24  ;;  %7491 = vmatprep.subr.bf16.mxu0 %v2116_v55 }
 0x278   : >> { %7468 = vmatpush3.bf16.msra.mxu1 %v1473_v53  ;;  %v7316_v42 = vpop.f32.mrf.mxu0  ;;  %v7396_v20 = vpop.f32.mrf.mxu1 }
 0x279   : >> { %7469 = vmatprep.subr.bf16.mxu1 %v1472_v2  ;;  %v9351_v27 = vpack.c.bf16 %v7316_v42, %v7315_v57  ;;  %v9353_v32 = vpack.c.bf16 %v7396_v20, %v7395_v22 }
 0x27a   : >> { %v9355_v37 = vpop.f32.mrf.mxu0  ;;  %v9357_v38 = vpop.f32.mrf.mxu1 }
 0x27b   : >> { %12308 = vst [vmem:[#allocation20_spill] sm:$0xff] %v9353_v32  ;;  %12309 = vst [vmem:[#allocation21_spill] sm:$0xff] %v9357_v38  ;;  %7454 = vmatmul.mubr.msk.bf16.gmra.mxu0 %vm569_vm1, %v9147_v36 }
 0x27c   : >> { %7457 = vmatprep.mubr.msk.bf16.mxu0 %vm569_vm1, %v9133_v21  ;;  %7470 = vmatpush3.bf16.msra.mxu1 %v1472_v2  ;;  %v7319_v28 = vpop.f32.mrf.mxu0  ;;  %v9363_v58 = vpop.f32.mrf.mxu1 }
 0x27d   : >> { %7471 = vmatprep.subr.bf16.mxu1 %v1471_v39 }
 0x27e   : >> { %v9367_v45 = vpop.f32.mrf.mxu0  ;;  %v9369_v46 = vpop.f32.mrf.mxu1  ;;  %7492 = vmatpush3.bf16.xpose.msra.mxu0 %v2116_v55 }
 0x27f   : >> { %12310 = vst [vmem:[#allocation22_spill] sm:$0xff] %v9369_v46  ;;  %7493 = vmatprep.subr.bf16.mxu0 %v2115_v43 }
 0x280   : >> { %7472 = vmatpush3.bf16.msra.mxu1 %v1471_v39  ;;  %v7320_v33 = vpop.f32.mrf.mxu0  ;;  %v7400_v49 = vpop.f32.mrf.mxu1 }
 0x281   : >> { %7513 = vmatprep.subr.bf16.mxu1 %v2113_v44  ;;  %v9404_v22 = vpack.c.bf16 %v7320_v33, %v7319_v28 }
 0x282   : >> { %v9373_v35 = vpop.f32.mrf.mxu0  ;;  %v9375_v40 = vpop.f32.mrf.mxu1 }
 0x283   : >> { %12311 = vst [vmem:[#allocation23_spill] sm:$0xff] %v9375_v40  ;;  %7458 = vmatmul.mubr.msk.bf16.gmra.mxu0 %vm569_vm1, %v9119_v50  ;;  %7474 = vmatmul.mubr.msk.bf16.vlgmr.msra.gmra.mxu1 %vm569_vm1, %v9175_v61 }
 0x284   : >> { %7461 = vmatprep.mubr.msk.bf16.mxu0 %vm569_vm1, %v9107_v31  ;;  %7477 = vmatprep.mubr.msk.bf16.mxu1 %vm569_vm1, %v9161_v51  ;;  %v7323_v29 = vpop.f32.mrf.mxu0  ;;  %v7403_v25 = vpop.f32.mrf.mxu1 }
 0x285   : >> { %7514 = vmatpush3.bf16.xpose.msra.mxu1 %v2113_v44  ;;  %v2110_v44 = vpack.c.bf16 %v9331_v62, %v9327_v56 }
 0x286   : >> { %v9386_v26 = vpop.f32.mrf.mxu0  ;;  %v9388_v47 = vpop.f32.mrf.mxu1  ;;  %7515 = vmatprep.subr.bf16.mxu1 %v2112_v34  ;;  %7494 = vmatpush3.bf16.xpose.msra.mxu0 %v2115_v43 }
 0x287   : >> { %12312 = vst [vmem:[#allocation24_spill] sm:$0xff] %v9388_v47  ;;  %7495 = vmatprep.subr.bf16.mxu0 %v2114_v48 }
 0x288   : >> { %v7324_v52 = vpop.f32.mrf.mxu0  ;;  %v7404_v23 = vpop.f32.mrf.mxu1 }
 0x289   : >> { %v9390_v53 = vpack.c.bf16 %v7324_v52, %v7323_v29  ;;  %v9392_v30 = vpack.c.bf16 %v7404_v23, %v7403_v25 }
 0x28a   : >> { %v9396_v55 = vpop.f32.mrf.mxu0  ;;  %v9398_v57 = vpop.f32.mrf.mxu1 }
 0x28b   : >> { %12313 = vst [vmem:[#allocation25_spill] sm:$0xff] %v9392_v30  ;;  %12314 = vst [vmem:[#allocation26_spill] sm:$0xff] %v9398_v57  ;;  %7462 = vmatmul.mubr.msk.bf16.gmra.mxu0 %vm569_vm1, %v9094_v1  ;;  %7478 = vmatmul.mubr.msk.bf16.gmra.mxu1 %vm569_vm1, %v9147_v36 }
 0x28c   : >> { %7481 = vmatprep.mubr.msk.bf16.mxu1 %vm569_vm1, %v9133_v21  ;;  %v7327_v2 = vpop.f32.mrf.mxu0  ;;  %v7407_v42 = vpop.f32.mrf.mxu1 }
 0x28d   : >> { %7516 = vmatpush3.bf16.xpose.msra.mxu1 %v2112_v34 }
 0x28e   : >> { %v9408_v20 = vpop.f32.mrf.mxu0  ;;  %v9410_v54 = vpop.f32.mrf.mxu1  ;;  %7517 = vmatprep.subr.bf16.mxu1 %v2111_v59  ;;  %7496 = vmatpush3.bf16.xpose.msra.mxu0 %v2114_v48 }
 0x28f   : >> { %12315 = vst [vmem:[#allocation27_spill] sm:$0xff] %v9410_v54  ;;  %7537 = vmatprep.subr.bf16.mxu0 %v9404_v22 }
 0x290   : >> { %v7328_v60 = vpop.f32.mrf.mxu0  ;;  %v7408_v39 = vpop.f32.mrf.mxu1 }
 0x291   : >> { %v9413_v43 = vpack.c.bf16 %v7328_v60, %v7327_v2  ;;  %v9415_v28 = vpack.c.bf16 %v7408_v39, %v7407_v42  ;;  %v9436_v42 = vpack.c.bf16 %v7400_v49, %v9363_v58 }
 0x292   : >> { %v9419_v33 = vpop.f32.mrf.mxu0  ;;  %v9421_v34 = vpop.f32.mrf.mxu1 }
 0x293   : >> { %12316 = vst [vmem:[#allocation28_spill] sm:$0xff] %v9415_v28  ;;  %12317 = vst [vmem:[#allocation29_spill] sm:$0xff] %v9421_v34  ;;  %7482 = vmatmul.mubr.msk.bf16.gmra.mxu1 %vm569_vm1, %v9119_v50 }
 0x294   : >> { %7485 = vmatprep.mubr.msk.bf16.mxu1 %vm569_vm1, %v9107_v31  ;;  %v7331_v48 = vpop.f32.mrf.mxu0  ;;  %v7411_v29 = vpop.f32.mrf.mxu1  ;;  %12322 = vst [vmem:[#allocation34_spill] sm:$0xff] %v9436_v42 }
 0x295   : >> { %7518 = vmatpush3.bf16.xpose.msra.mxu1 %v2111_v59 }
 0x296   : >> { %v9427_v25 = vpop.f32.mrf.mxu0  ;;  %v9429_v52 = vpop.f32.mrf.mxu1  ;;  %7519 = vmatprep.subr.bf16.mxu1 %v2110_v44 }
 0x297   : >> { %12318 = vst [vmem:[#allocation30_spill] sm:$0xff] %v9427_v25  ;;  %12319 = vst [vmem:[#allocation31_spill] sm:$0xff] %v9429_v52 }
 0x298   : >> { %v7332_v23 = vpop.f32.mrf.mxu0  ;;  %v7412_v56 = vpop.f32.mrf.mxu1 }
 0x299   : >> { %v9431_v62 = vpack.c.bf16 %v7332_v23, %v7331_v48  ;;  %v9433_v2 = vpack.c.bf16 %v7412_v56, %v7411_v29 }
 0x29a   : >> { %v9438_v60 = vpop.f32.mrf.mxu0  ;;  %v9440_v39 = vpop.f32.mrf.mxu1 }
 0x29b   : >> { %12320 = vst [vmem:[#allocation32_spill] sm:$0xff] %v9431_v62  ;;  %12321 = vst [vmem:[#allocation33_spill] sm:$0xff] %v9433_v2  ;;  %7486 = vmatmul.mubr.msk.bf16.gmra.mxu1 %vm569_vm1, %v9094_v1 }
 0x29c   : >> { %12323 = vst [vmem:[#allocation35_spill] sm:$0xff] %v9438_v60  ;;  %12324 = vst [vmem:[#allocation36_spill] sm:$0xff] %v9440_v39  ;;  %v7335_v59 = vpop.f32.mrf.mxu0  ;;  %v7415_v0 = vpop.f32.mrf.mxu1 }
 0x29d   : >> { %7520 = vmatpush3.bf16.xpose.msra.mxu1 %v2110_v44 }
 0x29e   : >> { %v9444_v17 = vpop.f32.mrf.mxu0  ;;  %v9446_v19 = vpop.f32.mrf.mxu1  ;;  %7561 = vmatprep.subr.bf16.mxu1 %v9436_v42 }
 0x29f   : >> { %12325 = vst [vmem:[#allocation37_spill] sm:$0xff] %v9446_v19 }
 0x2a0   : >> { %v7336_v48 = vpop.f32.mrf.mxu0  ;;  %v7416_v29 = vpop.f32.mrf.mxu1 }
 0x2a1   : >> { %v9449_v58 = vpack.c.bf16 %v7336_v48, %v7335_v59  ;;  %v9451_v49 = vpack.c.bf16 %v7416_v29, %v7415_v0 }
 0x2a2   : >> { %v9453_v23 = vpop.f32.mrf.mxu0  ;;  %v9455_v56 = vpop.f32.mrf.mxu1 }
 0x2a3   : >> { %12326 = vst [vmem:[#allocation38_spill] sm:$0xff] %v9451_v49  ;;  %12327 = vst [vmem:[#allocation39_spill] sm:$0xff] %v9455_v56 }
 0x2a4   : >> { %v7339_v16 = vpop.f32.mrf.mxu0  ;;  %v7419_v18 = vpop.f32.mrf.mxu1 }
 0x2a6   : >> { %v9457_v13 = vpop.f32.mrf.mxu0  ;;  %v9459_v44 = vpop.f32.mrf.mxu1 }
 0x2a7   : >> { %12328 = vst [vmem:[#allocation40_spill] sm:$0xff] %v9457_v13  ;;  %12329 = vst [vmem:[#allocation41_spill] sm:$0xff] %v9459_v44 }
 0x2a8   : >> { %v7340_v15 = vpop.f32.mrf.mxu0  ;;  %v7420_v12 = vpop.f32.mrf.mxu1 }
 0x2a9   : >> { %v9461_v14 = vpack.c.bf16 %v7340_v15, %v7339_v16  ;;  %v9463_v9 = vpack.c.bf16 %v7420_v12, %v7419_v18 }
 0x2aa   : >> { %v9465_v59 = vpop.f32.mrf.mxu0  ;;  %v9467_v0 = vpop.f32.mrf.mxu1 }
 0x2ab   : >> { %12330 = vst [vmem:[#allocation42_spill] sm:$0xff] %v9461_v14  ;;  %12331 = vst [vmem:[#allocation43_spill] sm:$0xff] %v9463_v9 }
 0x2ac   : >> { %12332 = vst [vmem:[#allocation44_spill] sm:$0xff] %v9465_v59  ;;  %12333 = vst [vmem:[#allocation45_spill] sm:$0xff] %v9467_v0  ;;  %v7343_v48 = vpop.f32.mrf.mxu0  ;;  %v7423_v29 = vpop.f32.mrf.mxu1 }
 0x2ae   : >> { %v9469_v11 = vpop.f32.mrf.mxu0  ;;  %v9471_v8 = vpop.f32.mrf.mxu1 }
 0x2af   : >> { %12334 = vst [vmem:[#allocation46_spill] sm:$0xff] %v9469_v11  ;;  %12335 = vst [vmem:[#allocation47_spill] sm:$0xff] %v9471_v8 }
 0x2b0   : >> { %v7344_v10 = vpop.f32.mrf.mxu0  ;;  %v7424_v5 = vpop.f32.mrf.mxu1 }
 0x2b1   : >> { %v9473_v7 = vpack.c.bf16 %v7344_v10, %v7343_v48  ;;  %v9475_v4 = vpack.c.bf16 %v7424_v5, %v7423_v29 }
 0x2b2   : >> { %v9477_v15 = vpop.f32.mrf.mxu0  ;;  %v9479_v12 = vpop.f32.mrf.mxu1 }
 0x2b3   : >> { %12336 = vst [vmem:[#allocation48_spill] sm:$0xff] %v9473_v7  ;;  %12337 = vst [vmem:[#allocation49_spill] sm:$0xff] %v9475_v4 }
 0x2b4   : >> { %12338 = vst [vmem:[#allocation50_spill] sm:$0xff] %v9477_v15  ;;  %12339 = vst [vmem:[#allocation51_spill] sm:$0xff] %v9479_v12  ;;  %v7347_v16 = vpop.f32.mrf.mxu0  ;;  %v7427_v18 = vpop.f32.mrf.mxu1 }
 0x2b6   : >> { %v9481_v6 = vpop.f32.mrf.mxu0  ;;  %v9483_v0 = vpop.f32.mrf.mxu1 }
 0x2b7   : >> { %12340 = vst [vmem:[#allocation52_spill] sm:$0xff] %v9481_v6  ;;  %12341 = vst [vmem:[#allocation53_spill] sm:$0xff] %v9483_v0 }
 0x2b8   : >> { %v7348_v44 = vpop.f32.mrf.mxu0  ;;  %v7428_v9 = vpop.f32.mrf.mxu1 }
 0x2b9   : >> { %v9485_v39 = vpack.c.bf16 %v7348_v44, %v7347_v16  ;;  %v9487_v8 = vpack.c.bf16 %v7428_v9, %v7427_v18 }
 0x2ba   : >> { %v9489_v10 = vpop.f32.mrf.mxu0  ;;  %v9491_v5 = vpop.f32.mrf.mxu1 }
 0x2bb   : >> { %12342 = vst [vmem:[#allocation54_spill] sm:$0xff] %v9485_v39  ;;  %12343 = vst [vmem:[#allocation55_spill] sm:$0xff] %v9487_v8 }
 0x2bc   : >> { %12344 = vst [vmem:[#allocation56_spill] sm:$0xff] %v9489_v10  ;;  %12345 = vst [vmem:[#allocation57_spill] sm:$0xff] %v9491_v5  ;;  %v7351_v48 = vpop.f32.mrf.mxu0  ;;  %v7431_v29 = vpop.f32.mrf.mxu1 }
 0x2be   : >> { %v9493_v4 = vpop.f32.mrf.mxu0  ;;  %v9495_v12 = vpop.f32.mrf.mxu1 }
 0x2bf   : >> { %12346 = vst [vmem:[#allocation58_spill] sm:$0xff] %v9493_v4  ;;  %12347 = vst [vmem:[#allocation59_spill] sm:$0xff] %v9495_v12 }
 0x2c0   : >> { %v7352_v52 = vpop.f32.mrf.mxu0  ;;  %v7432_v2 = vpop.f32.mrf.mxu1 }
 0x2c1   : >> { %v9497_v56 = vpack.c.bf16 %v7352_v52, %v7351_v48  ;;  %v9499_v0 = vpack.c.bf16 %v7432_v2, %v7431_v29 }
 0x2c2   : >> { %v9501_v44 = vpop.f32.mrf.mxu0  ;;  %v9503_v9 = vpop.f32.mrf.mxu1 }
 0x2c3   : >> { %12348 = vst [vmem:[#allocation60_spill] sm:$0xff] %v9497_v56  ;;  %12349 = vst [vmem:[#allocation61_spill] sm:$0xff] %v9499_v0 }
 0x2c4   : >> { %12350 = vst [vmem:[#allocation62_spill] sm:$0xff] %v9501_v44  ;;  %12351 = vst [vmem:[#allocation63_spill] sm:$0xff] %v9503_v9  ;;  %v7355_v16 = vpop.f32.mrf.mxu0  ;;  %v7435_v18 = vpop.f32.mrf.mxu1 }
 0x2c6   : >> { %v9505_v8 = vpop.f32.mrf.mxu0  ;;  %v9507_v5 = vpop.f32.mrf.mxu1 }
 0x2c7   : >> { %12352 = vst [vmem:[#allocation64_spill] sm:$0xff] %v9505_v8  ;;  %12353 = vst [vmem:[#allocation65_spill] sm:$0xff] %v9507_v5 }
 0x2c8   : >> { %v7356_v19 = vpop.f32.mrf.mxu0  ;;  %v7436_v49 = vpop.f32.mrf.mxu1 }
 0x2c9   : >> { %v9509_v57 = vpack.c.bf16 %v7356_v19, %v7355_v16  ;;  %v9511_v12 = vpack.c.bf16 %v7436_v49, %v7435_v18 }
 0x2ca   : >> { %v9513_v52 = vpop.f32.mrf.mxu0  ;;  %v9515_v2 = vpop.f32.mrf.mxu1 }
 0x2cb   : >> { %12354 = vst [vmem:[#allocation66_spill] sm:$0xff] %v9509_v57  ;;  %12355 = vst [vmem:[#allocation67_spill] sm:$0xff] %v9511_v12 }
 0x2cc   : >> { %12356 = vst [vmem:[#allocation68_spill] sm:$0xff] %v9513_v52  ;;  %12357 = vst [vmem:[#allocation69_spill] sm:$0xff] %v9515_v2  ;;  %v7359_v48 = vpop.f32.mrf.mxu0  ;;  %v7439_v29 = vpop.f32.mrf.mxu1 }
 0x2ce   : >> { %v9517_v0 = vpop.f32.mrf.mxu0  ;;  %v9519_v9 = vpop.f32.mrf.mxu1 }
 0x2cf   : >> { %12358 = vst [vmem:[#allocation70_spill] sm:$0xff] %v9517_v0  ;;  %12359 = vst [vmem:[#allocation71_spill] sm:$0xff] %v9519_v9 }
 0x2d0   : >> { %v7360_v47 = vpop.f32.mrf.mxu0  ;;  %v7440_v30 = vpop.f32.mrf.mxu1 }
 0x2d1   : >> { %v9521_v34 = vpack.c.bf16 %v7360_v47, %v7359_v48  ;;  %v9523_v5 = vpack.c.bf16 %v7440_v30, %v7439_v29 }
 0x2d2   : >> { %v9525_v19 = vpop.f32.mrf.mxu1  ;;  %v9558_v14 = vpop.f32.mrf.mxu0 }
 0x2d3   : >> { %12360 = vst [vmem:[#allocation72_spill] sm:$0xff] %v9521_v34  ;;  %12361 = vst [vmem:[#allocation73_spill] sm:$0xff] %v9523_v5 }
 0x2d4   : >> { %12362 = vst [vmem:[#allocation74_spill] sm:$0xff] %v9525_v19  ;;  %12363 = vst [vmem:[#allocation75_spill] sm:$0xff] %v9558_v14 }
 0x343   : >> { %v7475_v49 = vpop.f32.mrf.mxu1 }
 0x344   : >> { %v2450_v54 = vadd.f32 %v7475_v49, %v12290_v3 }
 0x345   : >> { %v2441_v16 = vpop.f32.mrf.mxu1 }
 0x346   : >> { %v2442_v18 = vadd.f32 %v2441_v16, %v12290_v3 }
 0x347   : >> { %v7476_v12 = vpop.f32.mrf.mxu1 }
 0x348   : >> { %2504 = vmax.xlane.f32.xlu0 %v2442_v18  ;;  %v2453_v30 = vadd.f32 %v7476_v12, %v12290_v3 }
 0x349   : >> { %v2444_v2 = vpop.f32.mrf.mxu1 }
 0x34a   : >> { %v2445_v28 = vadd.f32 %v2444_v2, %v12290_v3 }
 0x34b   : >> { %v7479_v9 = vpop.f32.mrf.mxu1 }
 0x34c   : >> { %2506 = vmax.xlane.f32.xlu1 %v2445_v28  ;;  %2508 = vmax.xlane.f32.xlu0 %v2450_v54  ;;  %v2466_v16 = vadd.f32 %v7479_v9, %v12290_v3 }
 0x34d   : >> { %v2457_v47 = vpop.f32.mrf.mxu1 }
 0x34e   : >> { %v2458_v48 = vadd.f32 %v2457_v47, %v12290_v3 }
 0x34f   : >> { %v7480_v29 = vpop.f32.mrf.mxu1 }
 0x350   : >> { %2510 = vmax.xlane.f32.xlu1 %v2453_v30  ;;  %2512 = vmax.xlane.f32.xlu0 %v2458_v48  ;;  %v2469_v49 = vadd.f32 %v7480_v29, %v12290_v3 }
 0x351   : >> { %v2460_v19 = vpop.f32.mrf.mxu1 }
 0x352   : >> { %v2461_v5 = vadd.f32 %v2460_v19, %v12290_v3 }
 0x353   : >> { %v7483_v38 = vpop.f32.mrf.mxu1 }
 0x354   : >> { %2514 = vmax.xlane.f32.xlu1 %v2461_v5  ;;  %2516 = vmax.xlane.f32.xlu0 %v2466_v16  ;;  %v9537_v47 = vadd.f32 %v7483_v38, %v12290_v3 }
 0x355   : >> { %v2473_v2 = vpop.f32.mrf.mxu1 }
 0x356   : >> { %v2474_v24 = vadd.f32 %v2473_v2, %v12290_v3 }
 0x357   : >> { %v7484_v32 = vpop.f32.mrf.mxu1 }
 0x358   : >> { %2518 = vmax.xlane.f32.xlu1 %v2469_v49  ;;  %2520 = vmax.xlane.f32.xlu0 %v2474_v24  ;;  %v2485_v40 = vadd.f32 %v7484_v32, %v12290_v3 }
 0x359   : >> { %v2476_v12 = vpop.f32.mrf.mxu1 }
 0x35a   : >> { %v2477_v42 = vadd.f32 %v2476_v12, %v12290_v3 }
 0x35b   : >> { %v7487_v9 = vpop.f32.mrf.mxu1 }
 0x35c   : >> { %2522 = vmax.xlane.f32.xlu1 %v2477_v42  ;;  %2524 = vmax.xlane.f32.xlu0 %v9537_v47  ;;  %v9547_v38 = vadd.f32 %v7487_v9, %v12290_v3 }
 0x35d   : >> { %v2489_v19 = vpop.f32.mrf.mxu1 }
 0x35e   : >> { %v9543_v29 = vadd.f32 %v2489_v19, %v12290_v3 }
 0x35f   : >> { %v7488_v2 = vpop.f32.mrf.mxu1 }
 0x360   : >> { %2526 = vmax.xlane.f32.xlu1 %v2485_v40  ;;  %2528 = vmax.xlane.f32.xlu0 %v9543_v29  ;;  %v9555_v32 = vadd.f32 %v7488_v2, %v12290_v3 }
 0x361   : >> { %v2492_v46 = vpop.f32.mrf.mxu1 }
 0x362   : >> { %v9550_v12 = vadd.f32 %v2492_v46, %v12290_v3 }
 0x364   : >> { %2530 = vmax.xlane.f32.xlu1 %v9550_v12  ;;  %2532 = vmax.xlane.f32.xlu0 %v9547_v38 }
 0x368   : >> { %2534 = vmax.xlane.f32.xlu1 %v9555_v32 }
 0x3d1   : >> { %v2505_v19 = vpop.xlane.xlu0 %2504 }
 0x3d2   : >> { %v2536_v57 = vsub.f32 %v2442_v18, %v2505_v19 }
 0x3d5   : >> { %v2507_v52 = vpop.xlane.xlu1 %2506  ;;  %v2509_v8 = vpop.xlane.xlu0 %2508 }
 0x3d6   : >> { %v2537_v0 = vsub.f32 %v2445_v28, %v2507_v52  ;;  %v2538_v46 = vsub.f32 %v2450_v54, %v2509_v8  ;;  %v9560_v52 = vpop.f32.mrf.mxu0 }
 0x3d8   : >> { %v2552_v34 = vpack.c.bf16 %v2537_v0, %v2536_v57 }
 0x3d9   : >> { %v2511_v9 = vpop.xlane.xlu1 %2510  ;;  %v2513_v10 = vpop.xlane.xlu0 %2512 }
 0x3da   : >> { %v2561_v6 = vmul.bf16 1069105081, %v2552_v34  ;;  %v2539_v39 = vsub.f32 %v2453_v30, %v2511_v9  ;;  %v2540_v2 = vsub.f32 %v2458_v48, %v2513_v10  ;;  %v9562_v10 = vpop.f32.mrf.mxu0 }
 0x3dc   : >> { %8143 = vpow.bf16 %v2561_v6  ;;  %v2553_v44 = vpack.c.bf16 %v2539_v39, %v2538_v46 }
 0x3dd   : >> { %v2515_v4 = vpop.xlane.xlu1 %2514  ;;  %v2517_v56 = vpop.xlane.xlu0 %2516 }
 0x3de   : >> { %v2564_v59 = vmul.bf16 1069105081, %v2553_v44  ;;  %v2541_v13 = vsub.f32 %v2461_v5, %v2515_v4  ;;  %v2542_v57 = vsub.f32 %v2466_v16, %v2517_v56  ;;  %v9569_v16 = vpop.f32.mrf.mxu0 }
 0x3e0   : >> { %8145 = vpow.bf16 %v2564_v59  ;;  %v2554_v15 = vpack.c.bf16 %v2541_v13, %v2540_v2 }
 0x3e1   : >> { %v2519_v11 = vpop.xlane.xlu1 %2518  ;;  %v2521_v18 = vpop.xlane.xlu0 %2520 }
 0x3e2   : >> { %v2567_v28 = vmul.bf16 1069105081, %v2554_v15  ;;  %v2543_v0 = vsub.f32 %v2469_v49, %v2519_v11  ;;  %v2544_v39 = vsub.f32 %v2474_v24, %v2521_v18  ;;  %v2179_v18 = vpop.f32.mrf.mxu0 }
 0x3e4   : >> { %8147 = vpow.bf16 %v2567_v28  ;;  %v2555_v8 = vpack.c.bf16 %v2543_v0, %v2542_v57 }
 0x3e5   : >> { %v2523_v6 = vpop.xlane.xlu1 %2522  ;;  %v2525_v54 = vpop.xlane.xlu0 %2524 }
 0x3e6   : >> { %v2570_v34 = vmul.bf16 1069105081, %v2555_v8  ;;  %v2545_v44 = vsub.f32 %v2477_v42, %v2523_v6  ;;  %v2546_v11 = vsub.f32 %v9537_v47, %v2525_v54 }
 0x3e8   : >> { %8149 = vpow.bf16 %v2570_v34  ;;  %v2556_v4 = vpack.c.bf16 %v2545_v44, %v2544_v39  ;;  %v7455_v34 = vpop.f32.mrf.mxu0 }
 0x3e9   : >> { %v2527_v59 = vpop.xlane.xlu1 %2526  ;;  %v2529_v13 = vpop.xlane.xlu0 %2528 }
 0x3ea   : >> { %v9564_v5 = vpop.eup %8143  ;;  %v2573_v15 = vmul.bf16 1069105081, %v2556_v4  ;;  %v2547_v56 = vsub.f32 %v2485_v40, %v2527_v59  ;;  %v2548_v40 = vsub.f32 %v9543_v29, %v2529_v13  ;;  %v2192_v59 = vpop.f32.mrf.mxu0 }
 0x3eb   : >> { %v2585_v30 = vunpack.c.h.bf16 %v9564_v5  ;;  %v12142_v48 = vunpack.c.l.bf16 %v9564_v5 }
 0x3ec   : >> { %8151 = vpow.bf16 %v2573_v15  ;;  %v2557_v24 = vpack.c.bf16 %v2547_v56, %v2546_v11  ;;  %v7456_v56 = vpop.f32.mrf.mxu0 }
 0x3ed   : >> { %v2531_v42 = vpop.xlane.xlu1 %2530  ;;  %2602 = vadd.xlane.f32.xlu1 %v2585_v30  ;;  %2600 = vadd.xlane.f32.xlu0 %v12142_v48  ;;  %v2533_v9 = vpop.xlane.xlu0 %2532 }
 0x3ee   : >> { %v9575_v49 = vpop.eup %8145  ;;  %v2576_v19 = vmul.bf16 1069105081, %v2557_v24  ;;  %v2549_v47 = vsub.f32 %v9550_v12, %v2531_v42  ;;  %v2550_v12 = vsub.f32 %v9547_v38, %v2533_v9 }
 0x3ef   : >> { %v12141_v46 = vunpack.c.h.bf16 %v9575_v49  ;;  %v12140_v2 = vunpack.c.l.bf16 %v9575_v49  ;;  %v12366_v25 = vunpack.c.l.bf16 %v9575_v49 }
 0x3f0   : >> { %8153 = vpow.bf16 %v2576_v19  ;;  %v2558_v28 = vpack.c.bf16 %v2549_v47, %v2548_v40  ;;  %v2195_v40 = vpop.f32.mrf.mxu0 }
 0x3f1   : >> { %v2535_v57 = vpop.xlane.xlu1 %2534  ;;  %2606 = vadd.xlane.f32.xlu1 %v12141_v46  ;;  %2604 = vadd.xlane.f32.xlu0 %v12140_v2 }
 0x3f2   : >> { %v9585_v0 = vpop.eup %8147  ;;  %v2579_v29 = vmul.bf16 1069105081, %v2558_v28  ;;  %v2551_v8 = vsub.f32 %v9555_v32, %v2535_v57  ;;  %v7459_v57 = vpop.f32.mrf.mxu0 }
 0x3f3   : >> { %v12139_v6 = vunpack.c.h.bf16 %v9585_v0  ;;  %v12138_v54 = vunpack.c.l.bf16 %v9585_v0 }
 0x3f4   : >> { %8155 = vpow.bf16 %v2579_v29  ;;  %v2559_v39 = vpack.c.bf16 %v2551_v8, %v2550_v12 }
 0x3f5   : >> { %2610 = vadd.xlane.f32.xlu1 %v12139_v6  ;;  %2608 = vadd.xlane.f32.xlu0 %v12138_v54 }
 0x3f6   : >> { %v9595_v44 = vpop.eup %8149  ;;  %v2582_v4 = vmul.bf16 1069105081, %v2559_v39  ;;  %v2208_v39 = vpop.f32.mrf.mxu0 }
 0x3f7   : >> { %v12137_v38 = vunpack.c.h.bf16 %v9595_v44  ;;  %v12136_v32 = vunpack.c.l.bf16 %v9595_v44 }
 0x3f8   : >> { %8157 = vpow.bf16 %v2582_v4  ;;  %v9637_v4 = vadd.f32 %v9562_v10, %v12290_v3  ;;  %v9655_v10 = vadd.f32 %v2192_v59, %v12290_v3  ;;  %v9671_v59 = vadd.f32 %v2208_v39, %v12290_v3 }
 0x3f9   : >> { %2614 = vadd.xlane.f32.xlu1 %v12137_v38  ;;  %2612 = vadd.xlane.f32.xlu0 %v12136_v32 }
 0x3fa   : >> { %v9603_v13 = vpop.eup %8151 }
 0x3fb   : >> { %v12135_v15 = vunpack.c.h.bf16 %v9603_v13  ;;  %v12134_v11 = vunpack.c.l.bf16 %v9603_v13 }
 0x3fd   : >> { %2618 = vadd.xlane.f32.xlu1 %v12135_v15  ;;  %2616 = vadd.xlane.f32.xlu0 %v12134_v11 }
 0x3fe   : >> { %v9611_v24 = vpop.eup %8153 }
 0x3ff   : >> { %v12133_v42 = vunpack.c.h.bf16 %v9611_v24  ;;  %v12130_v19 = vunpack.c.l.bf16 %v9611_v24 }
 0x401   : >> { %2622 = vadd.xlane.f32.xlu1 %v12133_v42  ;;  %2620 = vadd.xlane.f32.xlu0 %v12130_v19  ;;  %v9646_v19 = vadd.f32 %v9560_v52, %v12290_v3  ;;  %v9663_v52 = vadd.f32 %v7455_v34, %v12290_v3  ;;  %v9679_v34 = vadd.f32 %v7459_v57, %v12290_v3 }
 0x402   : >> { %v9619_v47 = vpop.eup %8155 }
 0x403   : >> { %v12128_v9 = vunpack.c.h.bf16 %v9619_v47  ;;  %v12129_v28 = vunpack.c.l.bf16 %v9619_v47 }
 0x405   : >> { %2626 = vadd.xlane.f32.xlu1 %v12128_v9  ;;  %2624 = vadd.xlane.f32.xlu0 %v12129_v28  ;;  %v9640_v9 = vadd.f32 %v2179_v18, %v12290_v3  ;;  %v7460_v28 = vpop.f32.mrf.mxu0  ;;  %v9658_v18 = vadd.f32 %v2195_v40, %v12290_v3 }
 0x406   : >> { %v9627_v29 = vpop.eup %8157 }
 0x407   : >> { %v12131_v12 = vunpack.c.h.bf16 %v9627_v29  ;;  %v12132_v8 = vunpack.c.l.bf16 %v9627_v29 }
 0x409   : >> { %2630 = vadd.xlane.f32.xlu1 %v12131_v12  ;;  %2628 = vadd.xlane.f32.xlu0 %v12132_v8  ;;  %v9650_v12 = vadd.f32 %v9569_v16, %v12290_v3  ;;  %v2211_v8 = vpop.f32.mrf.mxu0  ;;  %v9666_v16 = vadd.f32 %v7456_v56, %v12290_v3  ;;  %v9682_v56 = vadd.f32 %v7460_v28, %v12290_v3 }
 0x40a   : >> { %v9674_v40 = vadd.f32 %v2211_v8, %v12290_v3 }
 0x40b   : >> { %v7463_v42 = vpop.f32.mrf.mxu0 }
 0x40c   : >> { %v9695_v57 = vadd.f32 %v7463_v42, %v12290_v3 }
 0x40d   : >> { %2241 = vmax.xlane.f32.xlu1 %v9640_v9  ;;  %2239 = vmax.xlane.f32.xlu0 %v9637_v4  ;;  %v2224_v11 = vpop.f32.mrf.mxu0 }
 0x40e   : >> { %v9687_v39 = vadd.f32 %v2224_v11, %v12290_v3 }
 0x40f   : >> { %v7464_v15 = vpop.f32.mrf.mxu0 }
 0x410   : >> { %v9698_v28 = vadd.f32 %v7464_v15, %v12290_v3 }
 0x411   : >> { %2245 = vmax.xlane.f32.xlu1 %v9650_v12  ;;  %2243 = vmax.xlane.f32.xlu0 %v9646_v19  ;;  %v2227_v32 = vpop.f32.mrf.mxu0 }
 0x412   : >> { %v9690_v8 = vadd.f32 %v2227_v32, %v12290_v3 }
 0x415   : >> { %2249 = vmax.xlane.f32.xlu1 %v9658_v18  ;;  %2247 = vmax.xlane.f32.xlu0 %v9655_v10 }
 0x419   : >> { %2253 = vmax.xlane.f32.xlu1 %v9666_v16  ;;  %2251 = vmax.xlane.f32.xlu0 %v9663_v52 }
 0x41d   : >> { %2257 = vmax.xlane.f32.xlu1 %v9674_v40  ;;  %2255 = vmax.xlane.f32.xlu0 %v9671_v59 }
 0x421   : >> { %2261 = vmax.xlane.f32.xlu1 %v9682_v56  ;;  %2259 = vmax.xlane.f32.xlu0 %v9679_v34 }
 0x425   : >> { %2265 = vmax.xlane.f32.xlu1 %v9690_v8  ;;  %2263 = vmax.xlane.f32.xlu0 %v9687_v39 }
 0x429   : >> { %2269 = vmax.xlane.f32.xlu1 %v9698_v28  ;;  %2267 = vmax.xlane.f32.xlu0 %v9695_v57 }
 0x476   : >> { %v2603_v38 = vpop.xlane.xlu1 %2602  ;;  %v2601_v11 = vpop.xlane.xlu0 %2600 }
 0x477   : >> { %8159 = vrcp.f32 %v2603_v38 }
 0x478   : >> { %8161 = vrcp.f32 %v2601_v11  ;;  %v12364_v11 = vunpack.c.l.bf16 %v9564_v5 }
 0x47a   : >> { %v2607_v32 = vpop.xlane.xlu1 %2606  ;;  %v2605_v54 = vpop.xlane.xlu0 %2604 }
 0x47b   : >> { %8163 = vrcp.f32 %v2607_v32 }
 0x47c   : >> { %8165 = vrcp.f32 %v2605_v54 }
 0x47e   : >> { %v2611_v6 = vpop.xlane.xlu1 %2610  ;;  %v2609_v2 = vpop.xlane.xlu0 %2608 }
 0x47f   : >> { %8167 = vrcp.f32 %v2611_v6 }
 0x480   : >> { %8169 = vrcp.f32 %v2609_v2  ;;  %v12365_v2 = vunpack.c.h.bf16 %v9575_v49 }
 0x482   : >> { %v2615_v42 = vpop.xlane.xlu1 %2614  ;;  %v2613_v46 = vpop.xlane.xlu0 %2612 }
 0x483   : >> { %8171 = vrcp.f32 %v2615_v42 }
 0x484   : >> { %v8160_v15 = vpop.eup %8159  ;;  %8173 = vrcp.f32 %v2613_v46 }
 0x485   : >> { %v8162_v48 = vpop.eup %8161  ;;  %v2649_v3 = vmul.f32 %v8160_v15, %v2585_v30 }
 0x486   : >> { %v2619_v14 = vpop.xlane.xlu1 %2618  ;;  %v2617_v38 = vpop.xlane.xlu0 %2616  ;;  %v2648_v7 = vmul.f32 %v8162_v48, %v12364_v11  ;;  %v12368_v11 = vunpack.c.l.bf16 %v9585_v0 }
 0x487   : >> { %8175 = vrcp.f32 %v2619_v14  ;;  %v12367_v14 = vunpack.c.h.bf16 %v9585_v0 }
 0x488   : >> { %v8164_v54 = vpop.eup %8163  ;;  %8177 = vrcp.f32 %v2617_v38  ;;  %v2664_v32 = vpack.c.bf16 %v2649_v3, %v2648_v7  ;;  %v1477_v3 = vpack.c.bf16 %v9373_v35, %v9367_v45  ;;  %v12370_v35 = vunpack.c.l.bf16 %v9595_v44 }
 0x489   : >> { %v8166_v6 = vpop.eup %8165  ;;  %v2651_v60 = vmul.f32 %v8164_v54, %v12365_v2 }
 0x48a   : >> { %7497 = vmatprep.mubr.bf16.mxu0 %v2664_v32  ;;  %v2623_v42 = vpop.xlane.xlu1 %2622  ;;  %v2621_v46 = vpop.xlane.xlu0 %2620  ;;  %v2650_v62 = vmul.f32 %v8166_v6, %v12366_v25 }
 0x48b   : >> { %8179 = vrcp.f32 %v2623_v42 }
 0x48c   : >> { %v8168_v30 = vpop.eup %8167  ;;  %8181 = vrcp.f32 %v2621_v46  ;;  %v2665_v15 = vpack.c.bf16 %v2651_v60, %v2650_v62  ;;  %v12369_v60 = vunpack.c.h.bf16 %v9595_v44  ;;  %v12371_v46 = vunpack.c.h.bf16 %v9603_v13 }
 0x48d   : >> { %v8170_v5 = vpop.eup %8169  ;;  %v2653_v48 = vmul.f32 %v8168_v30, %v12367_v14  ;;  %v12372_v44 = vunpack.c.l.bf16 %v9603_v13  ;;  %v12374_v13 = vunpack.c.l.bf16 %v9611_v24 }
 0x48e   : >> { %7498 = vmatmul.mubr.bf16.vlgmr.msra.gmra.mxu0 %v2665_v15  ;;  %v2627_v7 = vpop.xlane.xlu1 %2626  ;;  %v2625_v38 = vpop.xlane.xlu0 %2624  ;;  %v2652_v54 = vmul.f32 %v8170_v5, %v12368_v11  ;;  %v1475_v15 = vpack.c.bf16 %v9355_v37, %v9347_v63 }
 0x48f   : >> { %8183 = vrcp.f32 %v2627_v7  ;;  %7538 = vmatpush3.bf16.msra.mxu0 %v9404_v22 }
 0x490   : >> { %v8172_v25 = vpop.eup %8171  ;;  %8185 = vrcp.f32 %v2625_v38  ;;  %v2666_v49 = vpack.c.bf16 %v2653_v48, %v2652_v54  ;;  %7539 = vmatprep.subr.bf16.mxu0 %v1477_v3 }
 0x491   : >> { %v8174_v62 = vpop.eup %8173  ;;  %v2655_v32 = vmul.f32 %v8172_v25, %v12369_v60 }
 0x492   : >> { %7501 = vmatprep.mubr.bf16.mxu0 %v2666_v49  ;;  %v2631_v6 = vpop.xlane.xlu1 %2630  ;;  %v2629_v45 = vpop.xlane.xlu0 %2628  ;;  %v2654_v2 = vmul.f32 %v8174_v62, %v12370_v35  ;;  %v12373_v49 = vunpack.c.h.bf16 %v9611_v24 }
 0x493   : >> { %8187 = vrcp.f32 %v2631_v6  ;;  %7540 = vmatpush3.bf16.msra.mxu0 %v1477_v3 }
 0x494   : >> { %v8176_v0 = vpop.eup %8175  ;;  %8189 = vrcp.f32 %v2629_v45  ;;  %v2667_v42 = vpack.c.bf16 %v2655_v32, %v2654_v2  ;;  %7541 = vmatprep.subr.bf16.mxu0 %v9351_v27  ;;  %v12375_v2 = vunpack.c.h.bf16 %v9619_v47 }
 0x495   : >> { %v8178_v22 = vpop.eup %8177  ;;  %v2657_v30 = vmul.f32 %v8176_v0, %v12371_v46 }
 0x496   : >> { %7502 = vmatmul.mubr.bf16.gmra.mxu0 %v2667_v42  ;;  %v2242_v5 = vpop.xlane.xlu1 %2241  ;;  %v2240_v14 = vpop.xlane.xlu0 %2239  ;;  %v2656_v48 = vmul.f32 %v8178_v22, %v12372_v44  ;;  %v12376_v22 = vunpack.c.l.bf16 %v9619_v47 }
 0x497   : >> { %v2272_v3 = vsub.f32 %v9640_v9, %v2242_v5  ;;  %v2271_v7 = vsub.f32 %v9637_v4, %v2240_v14  ;;  %7542 = vmatpush3.bf16.msra.mxu0 %v9351_v27 }
 0x498   : >> { %v8180_v38 = vpop.eup %8179  ;;  %v2668_v11 = vpack.c.bf16 %v2657_v30, %v2656_v48  ;;  %7543 = vmatprep.subr.bf16.mxu0 %v1475_v15  ;;  %v12377_v48 = vunpack.c.h.bf16 %v9627_v29 }
 0x499   : >> { %v8182_v54 = vpop.eup %8181  ;;  %v2287_v25 = vpack.c.bf16 %v2272_v3, %v2271_v7  ;;  %v2659_v63 = vmul.f32 %v8180_v38, %v12373_v49 }
 0x49a   : >> { %7505 = vmatprep.mubr.bf16.mxu0 %v2668_v11  ;;  %v2246_v37 = vpop.xlane.xlu1 %2245  ;;  %v2244_v62 = vpop.xlane.xlu0 %2243  ;;  %v2658_v60 = vmul.f32 %v8182_v54, %v12374_v13  ;;  %v12378_v11 = vunpack.c.l.bf16 %v9627_v29 }
 0x49b   : >> { %v2296_v32 = vmul.bf16 1069105081, %v2287_v25  ;;  %v2274_v9 = vsub.f32 %v9650_v12, %v2246_v37  ;;  %v2273_v4 = vsub.f32 %v9646_v19, %v2244_v62  ;;  %7544 = vmatpush3.bf16.msra.mxu0 %v1475_v15 }
 0x49c   : >> { %v8184_v27 = vpop.eup %8183  ;;  %v2669_v6 = vpack.c.bf16 %v2659_v63, %v2658_v60  ;;  %7585 = vmatprep.subr.bf16.mxu0 %v9413_v43 }
 0x49d   : >> { %v8186_v45 = vpop.eup %8185  ;;  %8191 = vpow.bf16 %v2296_v32  ;;  %v2288_v35 = vpack.c.bf16 %v2274_v9, %v2273_v4  ;;  %v2661_v0 = vmul.f32 %v8184_v27, %v12375_v2 }
 0x49e   : >> { %7506 = vmatmul.mubr.bf16.gmra.mxu0 %v2669_v6  ;;  %v2250_v42 = vpop.xlane.xlu1 %2249  ;;  %v2248_v24 = vpop.xlane.xlu0 %2247  ;;  %v2660_v46 = vmul.f32 %v8186_v45, %v12376_v22 }
 0x49f   : >> { %v2299_v12 = vmul.bf16 1069105081, %v2288_v35  ;;  %v2276_v19 = vsub.f32 %v9658_v18, %v2250_v42  ;;  %v2275_v30 = vsub.f32 %v9655_v10, %v2248_v24 }
 0x4a0   : >> { %v8188_v15 = vpop.eup %8187  ;;  %v2670_v5 = vpack.c.bf16 %v2661_v0, %v2660_v46 }
 0x4a1   : >> { %v8190_v14 = vpop.eup %8189  ;;  %8193 = vpow.bf16 %v2299_v12  ;;  %v2289_v44 = vpack.c.bf16 %v2276_v19, %v2275_v30  ;;  %v2663_v3 = vmul.f32 %v8188_v15, %v12377_v48 }
 0x4a2   : >> { %7509 = vmatprep.mubr.bf16.mxu0 %v2670_v5  ;;  %v2254_v7 = vpop.xlane.xlu1 %2253  ;;  %v2252_v38 = vpop.xlane.xlu0 %2251  ;;  %v2662_v47 = vmul.f32 %v8190_v14, %v12378_v11 }
 0x4a3   : >> { %v2302_v54 = vmul.bf16 1069105081, %v2289_v44  ;;  %v2278_v25 = vsub.f32 %v9666_v16, %v2254_v7  ;;  %v2277_v18 = vsub.f32 %v9663_v52, %v2252_v38 }
 0x4a4   : >> { %v2671_v10 = vpack.c.bf16 %v2663_v3, %v2662_v47 }
 0x4a5   : >> { %8195 = vpow.bf16 %v2302_v54  ;;  %v2290_v49 = vpack.c.bf16 %v2278_v25, %v2277_v18 }
 0x4a6   : >> { %7510 = vmatmul.mubr.bf16.gmra.mxu0 %v2671_v10  ;;  %v2258_v63 = vpop.xlane.xlu1 %2257  ;;  %v2256_v37 = vpop.xlane.xlu0 %2255  ;;  %v1485_v10 = vpack.c.bf16 %v9453_v23, %v9444_v17  ;;  %v12382_v17 = vld [vmem:[#allocation48_spill] sm:$0xff]  ;;  %v12384_v23 = vld [vmem:[#allocation50_spill] sm:$0xff] }
 0x4a7   : >> { %v2305_v62 = vmul.bf16 1069105081, %v2290_v49  ;;  %7545 = vmatprep.mubr.msk.bf16.mxu0 %vm569_vm1, %v9187_v41  ;;  %v2280_v13 = vsub.f32 %v9674_v40, %v2258_v63  ;;  %v2279_v29 = vsub.f32 %v9671_v59, %v2256_v37  ;;  %v12379_v49 = vld [vmem:[#allocation32_spill] sm:$0xff]  ;;  %v12380_v63 = vld [vmem:[#allocation30_spill] sm:$0xff]  ;;  %v12381_v37 = vld [vmem:[#allocation35_spill] sm:$0xff] }
 0x4a9   : >> { %8197 = vpow.bf16 %v2305_v62  ;;  %v2291_v60 = vpack.c.bf16 %v2280_v13, %v2279_v29  ;;  %v1483_v62 = vpack.c.bf16 %v12381_v37, %v12380_v63  ;;  %v12385_v29 = vld [vmem:[#allocation42_spill] sm:$0xff] }
 0x4aa   : >> { %v2262_v32 = vpop.xlane.xlu1 %2261  ;;  %v2260_v16 = vpop.xlane.xlu0 %2259 }
 0x4ab   : >> { %v9754_v9 = vpop.eup %8191  ;;  %v2308_v52 = vmul.bf16 1069105081, %v2291_v60  ;;  %v2282_v4 = vsub.f32 %v9682_v56, %v2262_v32  ;;  %v2281_v27 = vsub.f32 %v9679_v34, %v2260_v16  ;;  %v1481_v56 = vpack.c.bf16 %v9419_v33, %v9408_v20  ;;  %v12386_v60 = vld [vmem:[#allocation40_spill] sm:$0xff] }
 0x4ac   : >> { %v2320_v6 = vunpack.c.h.bf16 %v9754_v9  ;;  %v2319_v45 = vunpack.c.l.bf16 %v9754_v9  ;;  %v12387_v32 = vld [vmem:[#allocation44_spill] sm:$0xff] }
 0x4ad   : >> { %8199 = vpow.bf16 %v2308_v52  ;;  %v2292_v35 = vpack.c.bf16 %v2282_v4, %v2281_v27  ;;  %v1487_v16 = vpack.c.bf16 %v12387_v32, %v12386_v60  ;;  %v12388_v52 = vld [vmem:[#allocation60_spill] sm:$0xff]  ;;  %v12389_v4 = vld [vmem:[#allocation58_spill] sm:$0xff] }
 0x4ae   : >> { %7546 = vmatmul.mubr.msk.bf16.vlgmr.msra.gmra.mxu0 %vm569_vm1, %v9175_v61  ;;  %v2266_v59 = vpop.xlane.xlu1 %2265  ;;  %2337 = vadd.xlane.f32.xlu1 %v2320_v6  ;;  %v2264_v40 = vpop.xlane.xlu0 %2263  ;;  %v12390_v27 = vld [vmem:[#allocation62_spill] sm:$0xff] }
 0x4af   : >> { %v9764_v2 = vpop.eup %8193  ;;  %v2311_v34 = vmul.bf16 1069105081, %v2292_v35  ;;  %7549 = vmatprep.mubr.msk.bf16.mxu0 %vm569_vm1, %v9161_v51  ;;  %v2284_v0 = vsub.f32 %v9690_v8, %v2266_v59  ;;  %2335 = vadd.xlane.f32.xlu0 %v2319_v45  ;;  %v2283_v42 = vsub.f32 %v9687_v39, %v2264_v40  ;;  %v1493_v35 = vpack.c.bf16 %v12390_v27, %v12389_v4  ;;  %v12391_v59 = vld [vmem:[#allocation54_spill] sm:$0xff]  ;;  %v12392_v40 = vld [vmem:[#allocation52_spill] sm:$0xff] }
 0x4b0   : >> { %v2322_v24 = vunpack.c.h.bf16 %v9764_v2  ;;  %v2321_v22 = vunpack.c.l.bf16 %v9764_v2  ;;  %7586 = vmatpush3.bf16.msra.mxu0 %v9413_v43 }
 0x4b1   : >> { %8201 = vpow.bf16 %v2311_v34  ;;  %v2293_v46 = vpack.c.bf16 %v2284_v0, %v2283_v42  ;;  %7587 = vmatprep.subr.bf16.mxu0 %v1481_v56  ;;  %v12394_v0 = vld [vmem:[#allocation72_spill] sm:$0xff]  ;;  %v12395_v42 = vld [vmem:[#allocation70_spill] sm:$0xff] }
 0x4b2   : >> { %v2270_v20 = vpop.xlane.xlu1 %2269  ;;  %2341 = vadd.xlane.f32.xlu1 %v2322_v24  ;;  %v2268_v33 = vpop.xlane.xlu0 %2267 }
 0x4b3   : >> { %v9779_v8 = vpop.eup %8195  ;;  %v2314_v12 = vmul.bf16 1069105081, %v2293_v46  ;;  %v2286_v19 = vsub.f32 %v9698_v28, %v2270_v20  ;;  %2339 = vadd.xlane.f32.xlu0 %v2321_v22  ;;  %v2285_v39 = vsub.f32 %v9695_v57, %v2268_v33  ;;  %v1479_v57 = vpack.c.bf16 %v9396_v55, %v9386_v26  ;;  %v12396_v46 = vld [vmem:[#allocation75_spill] sm:$0xff]  ;;  %v12397_v33 = vld [vmem:[#allocation66_spill] sm:$0xff] }
 0x4b4   : >> { %v2324_v43 = vunpack.c.h.bf16 %v9779_v8  ;;  %v2323_v30 = vunpack.c.l.bf16 %v9779_v8  ;;  %7588 = vmatpush3.bf16.msra.mxu0 %v1481_v56  ;;  %v12393_v56 = vld [vmem:[#allocation56_spill] sm:$0xff]  ;;  %v1497_v20 = vpack.c.bf16 %v12396_v46, %v12395_v42 }
 0x4b5   : >> { %8203 = vpow.bf16 %v2314_v12  ;;  %v2294_v15 = vpack.c.bf16 %v2286_v19, %v2285_v39  ;;  %7589 = vmatprep.subr.bf16.mxu0 %v9390_v53  ;;  %v1491_v34 = vpack.c.bf16 %v12393_v56, %v12392_v40  ;;  %v12398_v12 = vld [vmem:[#allocation64_spill] sm:$0xff]  ;;  %v12402_v56 = vld [vmem:[#allocation23_spill] sm:$0xff] }
 0x4b6   : >> { %7550 = vmatmul.mubr.msk.bf16.gmra.mxu0 %vm569_vm1, %v9147_v36  ;;  %2345 = vadd.xlane.f32.xlu1 %v2324_v43  ;;  %v12399_v19 = vld [vmem:[#allocation68_spill] sm:$0xff] }
 0x4b7   : >> { %v9792_v28 = vpop.eup %8197  ;;  %v2317_v5 = vmul.bf16 1069105081, %v2294_v15  ;;  %7553 = vmatprep.mubr.msk.bf16.mxu0 %vm569_vm1, %v9133_v21  ;;  %2343 = vadd.xlane.f32.xlu0 %v2323_v30  ;;  %v1495_v39 = vpack.c.bf16 %v12399_v19, %v12398_v12 }
 0x4b8   : >> { %v2326_v14 = vunpack.c.h.bf16 %v9792_v28  ;;  %v2325_v44 = vunpack.c.l.bf16 %v9792_v28  ;;  %7590 = vmatpush3.bf16.msra.mxu0 %v9390_v53 }
 0x4b9   : >> { %8205 = vpow.bf16 %v2317_v5  ;;  %7591 = vmatprep.subr.bf16.mxu0 %v1479_v57 }
 0x4ba   : >> { %2349 = vadd.xlane.f32.xlu1 %v2326_v14 }
 0x4bb   : >> { %v9805_v48 = vpop.eup %8199  ;;  %2347 = vadd.xlane.f32.xlu0 %v2325_v44 }
 0x4bc   : >> { %v2328_v26 = vunpack.c.h.bf16 %v9805_v48  ;;  %v2327_v55 = vunpack.c.l.bf16 %v9805_v48  ;;  %7592 = vmatpush3.bf16.msra.mxu0 %v1479_v57 }
 0x4bd   : >> { %7633 = vmatprep.subr.bf16.mxu0 %v9449_v58 }
 0x4be   : >> { %7554 = vmatmul.mubr.msk.bf16.gmra.mxu0 %vm569_vm1, %v9119_v50  ;;  %2353 = vadd.xlane.f32.xlu1 %v2328_v26 }
 0x4bf   : >> { %v9816_v53 = vpop.eup %8201  ;;  %7557 = vmatprep.mubr.msk.bf16.mxu0 %vm569_vm1, %v9107_v31  ;;  %2351 = vadd.xlane.f32.xlu0 %v2327_v55 }
 0x4c0   : >> { %v2330_v3 = vunpack.c.h.bf16 %v9816_v53  ;;  %v2329_v7 = vunpack.c.l.bf16 %v9816_v53 }
 0x4c2   : >> { %2357 = vadd.xlane.f32.xlu1 %v2330_v3 }
 0x4c3   : >> { %v9826_v38 = vpop.eup %8203  ;;  %2355 = vadd.xlane.f32.xlu0 %v2329_v7 }
 0x4c4   : >> { %v2332_v11 = vunpack.c.h.bf16 %v9826_v38  ;;  %v2331_v47 = vunpack.c.l.bf16 %v9826_v38 }
 0x4c6   : >> { %7558 = vmatmul.mubr.msk.bf16.gmra.mxu0 %vm569_vm1, %v9094_v1  ;;  %2361 = vadd.xlane.f32.xlu1 %v2332_v11 }
 0x4c7   : >> { %v9836_v54 = vpop.eup %8205  ;;  %7593 = vmatprep.mubr.msk.bf16.mxu0 %vm569_vm1, %v9187_v41  ;;  %2359 = vadd.xlane.f32.xlu0 %v2331_v47 }
 0x4c8   : >> { %v2334_v25 = vunpack.c.h.bf16 %v9836_v54  ;;  %v2333_v18 = vunpack.c.l.bf16 %v9836_v54 }
 0x4ca   : >> { %2365 = vadd.xlane.f32.xlu1 %v2334_v25 }
 0x4cb   : >> { %2363 = vadd.xlane.f32.xlu0 %v2333_v18 }
 0x4ce   : >> { %7594 = vmatmul.mubr.msk.bf16.vlgmr.msra.gmra.mxu0 %vm569_vm1, %v9175_v61 }
 0x4cf   : >> { %7597 = vmatprep.mubr.msk.bf16.mxu0 %vm569_vm1, %v9161_v51  ;;  %7634 = vmatpush3.bf16.msra.mxu0 %v9449_v58  ;;  %v12383_v58 = vld [vmem:[#allocation46_spill] sm:$0xff] }
 0x4d0   : >> { %7635 = vmatprep.subr.bf16.mxu0 %v1485_v10  ;;  %v1489_v13 = vpack.c.bf16 %v12384_v23, %v12383_v58 }
 0x4d3   : >> { %7636 = vmatpush3.bf16.msra.mxu0 %v1485_v10 }
 0x4d4   : >> { %7637 = vmatprep.subr.bf16.mxu0 %v12379_v49 }
 0x4d6   : >> { %7598 = vmatmul.mubr.msk.bf16.gmra.mxu0 %vm569_vm1, %v9147_v36 }
 0x4d7   : >> { %7601 = vmatprep.mubr.msk.bf16.mxu0 %vm569_vm1, %v9133_v21  ;;  %7638 = vmatpush3.bf16.msra.mxu0 %v12379_v49 }
 0x4d8   : >> { %7639 = vmatprep.subr.bf16.mxu0 %v1483_v62 }
 0x4db   : >> { %7640 = vmatpush3.bf16.msra.mxu0 %v1483_v62 }
 0x4dc   : >> { %7681 = vmatprep.subr.bf16.mxu0 %v12382_v17 }
 0x4de   : >> { %7602 = vmatmul.mubr.msk.bf16.gmra.mxu0 %vm569_vm1, %v9119_v50 }
 0x4df   : >> { %7605 = vmatprep.mubr.msk.bf16.mxu0 %vm569_vm1, %v9107_v31 }
 0x4e6   : >> { %7606 = vmatmul.mubr.msk.bf16.gmra.mxu0 %vm569_vm1, %v9094_v1 }
 0x4e7   : >> { %7641 = vmatprep.mubr.msk.bf16.mxu0 %vm569_vm1, %v9187_v41 }
 0x4ee   : >> { %7642 = vmatmul.mubr.msk.bf16.vlgmr.msra.gmra.mxu0 %vm569_vm1, %v9175_v61 }
 0x4ef   : >> { %7682 = vmatpush3.bf16.msra.mxu0 %v12382_v17  ;;  %7645 = vmatprep.mubr.msk.bf16.mxu0 %vm569_vm1, %v9161_v51 }
 0x4f0   : >> { %7683 = vmatprep.subr.bf16.mxu0 %v1489_v13 }
 0x4f3   : >> { %7684 = vmatpush3.bf16.msra.mxu0 %v1489_v13 }
 0x4f4   : >> { %7685 = vmatprep.subr.bf16.mxu0 %v12385_v29 }
 0x4f6   : >> { %7646 = vmatmul.mubr.msk.bf16.gmra.mxu0 %vm569_vm1, %v9147_v36 }
 0x4f7   : >> { %7686 = vmatpush3.bf16.msra.mxu0 %v12385_v29  ;;  %7649 = vmatprep.mubr.msk.bf16.mxu0 %vm569_vm1, %v9133_v21 }
 0x4f8   : >> { %7687 = vmatprep.subr.bf16.mxu0 %v1487_v16 }
 0x4fb   : >> { %7688 = vmatpush3.bf16.msra.mxu0 %v1487_v16 }
 0x4fc   : >> { %7729 = vmatprep.subr.bf16.mxu0 %v12388_v52 }
 0x4fe   : >> { %7650 = vmatmul.mubr.msk.bf16.gmra.mxu0 %vm569_vm1, %v9119_v50 }
 0x4ff   : >> { %7653 = vmatprep.mubr.msk.bf16.mxu0 %vm569_vm1, %v9107_v31 }
 0x506   : >> { %7654 = vmatmul.mubr.msk.bf16.gmra.mxu0 %vm569_vm1, %v9094_v1 }
 0x507   : >> { %7689 = vmatprep.mubr.msk.bf16.mxu0 %vm569_vm1, %v9187_v41 }
 0x50e   : >> { %7690 = vmatmul.mubr.msk.bf16.vlgmr.msra.gmra.mxu0 %vm569_vm1, %v9175_v61 }
 0x50f   : >> { %7730 = vmatpush3.bf16.msra.mxu0 %v12388_v52  ;;  %7693 = vmatprep.mubr.msk.bf16.mxu0 %vm569_vm1, %v9161_v51 }
 0x510   : >> { %7731 = vmatprep.subr.bf16.mxu0 %v1493_v35 }
 0x513   : >> { %7732 = vmatpush3.bf16.msra.mxu0 %v1493_v35 }
 0x514   : >> { %7733 = vmatprep.subr.bf16.mxu0 %v12391_v59 }
 0x516   : >> { %7694 = vmatmul.mubr.msk.bf16.gmra.mxu0 %vm569_vm1, %v9147_v36 }
 0x517   : >> { %7734 = vmatpush3.bf16.msra.mxu0 %v12391_v59  ;;  %7697 = vmatprep.mubr.msk.bf16.mxu0 %vm569_vm1, %v9133_v21 }
 0x518   : >> { %7735 = vmatprep.subr.bf16.mxu0 %v1491_v34 }
 0x51b   : >> { %7736 = vmatpush3.bf16.msra.mxu0 %v1491_v34 }
 0x51c   : >> { %7777 = vmatprep.subr.bf16.mxu0 %v12394_v0 }
 0x51e   : >> { %7698 = vmatmul.mubr.msk.bf16.gmra.mxu0 %vm569_vm1, %v9119_v50 }
 0x51f   : >> { %7701 = vmatprep.mubr.msk.bf16.mxu0 %vm569_vm1, %v9107_v31 }
 0x526   : >> { %7702 = vmatmul.mubr.msk.bf16.gmra.mxu0 %vm569_vm1, %v9094_v1 }
 0x527   : >> { %7737 = vmatprep.mubr.msk.bf16.mxu0 %vm569_vm1, %v9187_v41 }
 0x52e   : >> { %7738 = vmatmul.mubr.msk.bf16.vlgmr.msra.gmra.mxu0 %vm569_vm1, %v9175_v61 }
 0x52f   : >> { %7778 = vmatpush3.bf16.msra.mxu0 %v12394_v0  ;;  %7741 = vmatprep.mubr.msk.bf16.mxu0 %vm569_vm1, %v9161_v51  ;;  %v12403_v0 = vld [vmem:[#allocation34_spill] sm:$0xff] }
 0x530   : >> { %7779 = vmatprep.subr.bf16.mxu0 %v1497_v20 }
 0x533   : >> { %7780 = vmatpush3.bf16.msra.mxu0 %v1497_v20 }
 0x534   : >> { %7781 = vmatprep.subr.bf16.mxu0 %v12397_v33 }
 0x536   : >> { %7742 = vmatmul.mubr.msk.bf16.gmra.mxu0 %vm569_vm1, %v9147_v36 }
 0x537   : >> { %7782 = vmatpush3.bf16.msra.mxu0 %v12397_v33  ;;  %7745 = vmatprep.mubr.msk.bf16.mxu0 %vm569_vm1, %v9133_v21  ;;  %v2338_v15 = vpop.xlane.xlu1 %2337 }
 0x538   : >> { %7783 = vmatprep.subr.bf16.mxu0 %v1495_v39  ;;  %8207 = vrcp.f32 %v2338_v15  ;;  %v2336_v57 = vpop.xlane.xlu0 %2335 }
 0x539   : >> { %8209 = vrcp.f32 %v2336_v57 }
 0x53b   : >> { %7784 = vmatpush3.bf16.msra.mxu0 %v1495_v39  ;;  %v2342_v5 = vpop.xlane.xlu1 %2341 }
 0x53c   : >> { %8211 = vrcp.f32 %v2342_v5  ;;  %v2340_v10 = vpop.xlane.xlu0 %2339 }
 0x53d   : >> { %8213 = vrcp.f32 %v2340_v10 }
 0x53e   : >> { %7746 = vmatmul.mubr.msk.bf16.gmra.mxu0 %vm569_vm1, %v9119_v50 }
 0x53f   : >> { %7749 = vmatprep.mubr.msk.bf16.mxu0 %vm569_vm1, %v9107_v31  ;;  %v2346_v49 = vpop.xlane.xlu1 %2345 }
 0x540   : >> { %8215 = vrcp.f32 %v2346_v49  ;;  %v2344_v63 = vpop.xlane.xlu0 %2343  ;;  %v12409_v49 = vld [vmem:[#allocation20_spill] sm:$0xff] }
 0x541   : >> { %8217 = vrcp.f32 %v2344_v63 }
 0x543   : >> { %v2350_v37 = vpop.xlane.xlu1 %2349 }
 0x544   : >> { %8219 = vrcp.f32 %v2350_v37  ;;  %v2348_v62 = vpop.xlane.xlu0 %2347 }
 0x545   : >> { %v8208_v17 = vpop.eup %8207  ;;  %8221 = vrcp.f32 %v2348_v62 }
 0x546   : >> { %v8210_v58 = vpop.eup %8209  ;;  %7750 = vmatmul.mubr.msk.bf16.gmra.mxu0 %vm569_vm1, %v9094_v1  ;;  %v2384_v23 = vmul.f32 %v8208_v17, %v2320_v6 }
 0x547   : >> { %7785 = vmatprep.mubr.msk.bf16.mxu0 %vm569_vm1, %v9187_v41  ;;  %v2354_v13 = vpop.xlane.xlu1 %2353  ;;  %v2383_v29 = vmul.f32 %v8210_v58, %v2319_v45 }
 0x548   : >> { %8223 = vrcp.f32 %v2354_v13  ;;  %v2352_v60 = vpop.xlane.xlu0 %2351  ;;  %v12413_v13 = vld [vmem:[#allocation19_spill] sm:$0xff] }
 0x549   : >> { %v8212_v32 = vpop.eup %8211  ;;  %8225 = vrcp.f32 %v2352_v60  ;;  %v2399_v16 = vpack.c.bf16 %v2384_v23, %v2383_v29  ;;  %v12414_v29 = vld [vmem:[#allocation21_spill] sm:$0xff] }
 0x54a   : >> { %v8214_v52 = vpop.eup %8213  ;;  %v2386_v4 = vmul.f32 %v8212_v32, %v2322_v24  ;;  %v12401_v24 = vld [vmem:[#allocation22_spill] sm:$0xff] }
 0x54b   : >> { %7521 = vmatprep.mubr.bf16.mxu1 %v2399_v16  ;;  %v2358_v27 = vpop.xlane.xlu1 %2357  ;;  %v2385_v6 = vmul.f32 %v8214_v52, %v2321_v22  ;;  %v2120_v34 = vpack.c.bf16 %v12402_v56, %v12401_v24 }
 0x54c   : >> { %8227 = vrcp.f32 %v2358_v27  ;;  %v2356_v41 = vpop.xlane.xlu0 %2355  ;;  %v12420_v27 = vld [vmem:[#allocation28_spill] sm:$0xff] }
 0x54d   : >> { %v8216_v35 = vpop.eup %8215  ;;  %8229 = vrcp.f32 %v2356_v41  ;;  %v2400_v9 = vpack.c.bf16 %v2386_v4, %v2385_v6 }
 0x54e   : >> { %v8218_v45 = vpop.eup %8217  ;;  %v9951_v59 = vpop.f32.mrf.mxu0  ;;  %7786 = vmatmul.mubr.msk.bf16.vlgmr.msra.gmra.mxu0 %vm569_vm1, %v9175_v61  ;;  %v2388_v40 = vmul.f32 %v8216_v35, %v2324_v43 }
 0x54f   : >> { %12400 = vst [vmem:[#allocation32_spill] sm:$0xff] %v9951_v59  ;;  %7522 = vmatmul.mubr.bf16.vlgmr.msra.gmra.mxu1 %v2400_v9  ;;  %7789 = vmatprep.mubr.msk.bf16.mxu0 %vm569_vm1, %v9161_v51  ;;  %v2362_v2 = vpop.xlane.xlu1 %2361  ;;  %v2387_v22 = vmul.f32 %v8218_v45, %v2323_v30 }
 0x550   : >> { %7562 = vmatpush3.bf16.xpose.msra.mxu1 %v12403_v0  ;;  %v9964_v42 = vpop.f32.mrf.mxu0  ;;  %8231 = vrcp.f32 %v2362_v2  ;;  %v2360_v61 = vpop.xlane.xlu0 %2359 }
 0x551   : >> { %12404 = vst [vmem:[#allocation30_spill] sm:$0xff] %v9964_v42  ;;  %v8220_v46 = vpop.eup %8219  ;;  %7563 = vmatprep.subr.bf16.mxu1 %v2120_v34  ;;  %8233 = vrcp.f32 %v2360_v61  ;;  %v2401_v43 = vpack.c.bf16 %v2388_v40, %v2387_v22 }
 0x552   : >> { %v8222_v20 = vpop.eup %8221  ;;  %v9966_v33 = vpop.f32.mrf.mxu0  ;;  %v2390_v51 = vmul.f32 %v8220_v46, %v2326_v14 }
 0x553   : >> { %12405 = vst [vmem:[#allocation35_spill] sm:$0xff] %v9966_v33  ;;  %7525 = vmatprep.mubr.bf16.mxu1 %v2401_v43  ;;  %v2366_v12 = vpop.xlane.xlu1 %2365  ;;  %v2389_v8 = vmul.f32 %v8222_v20, %v2325_v44 }
 0x554   : >> { %v9972_v30 = vpop.f32.mrf.mxu0  ;;  %8235 = vrcp.f32 %v2366_v12  ;;  %v2364_v19 = vpop.xlane.xlu0 %2363 }
 0x555   : >> { %12406 = vst [vmem:[#allocation48_spill] sm:$0xff] %v9972_v30  ;;  %v8224_v39 = vpop.eup %8223  ;;  %8237 = vrcp.f32 %v2364_v19  ;;  %v2402_v15 = vpack.c.bf16 %v2390_v51, %v2389_v8 }
 0x556   : >> { %v8226_v57 = vpop.eup %8225  ;;  %v9974_v5 = vpop.f32.mrf.mxu0  ;;  %7790 = vmatmul.mubr.msk.bf16.gmra.mxu0 %vm569_vm1, %v9147_v36  ;;  %v2392_v14 = vmul.f32 %v8224_v39, %v2328_v26 }
 0x557   : >> { %12407 = vst [vmem:[#allocation46_spill] sm:$0xff] %v9974_v5  ;;  %7526 = vmatmul.mubr.bf16.gmra.mxu1 %v2402_v15  ;;  %7793 = vmatprep.mubr.msk.bf16.mxu0 %vm569_vm1, %v9133_v21  ;;  %v2391_v28 = vmul.f32 %v8226_v57, %v2327_v55 }
 0x558   : >> { %7564 = vmatpush3.bf16.xpose.msra.mxu1 %v2120_v34  ;;  %v9984_v44 = vpop.f32.mrf.mxu0 }
 0x559   : >> { %12408 = vst [vmem:[#allocation50_spill] sm:$0xff] %v9984_v44  ;;  %v8228_v10 = vpop.eup %8227  ;;  %7565 = vmatprep.subr.bf16.mxu1 %v12409_v49  ;;  %v2403_v63 = vpack.c.bf16 %v2392_v14, %v2391_v28 }
 0x55a   : >> { %v8230_v37 = vpop.eup %8229  ;;  %v9987_v62 = vpop.f32.mrf.mxu0  ;;  %v2394_v36 = vmul.f32 %v8228_v10, %v2330_v3  ;;  %v2118_v3 = vpack.c.bf16 %v12414_v29, %v12413_v13 }
 0x55b   : >> { %12410 = vst [vmem:[#allocation42_spill] sm:$0xff] %v9987_v62  ;;  %7529 = vmatprep.mubr.bf16.mxu1 %v2403_v63  ;;  %v2393_v21 = vmul.f32 %v8230_v37, %v2329_v7 }
 0x55c   : >> { %v9993_v26 = vpop.f32.mrf.mxu0 }
 0x55d   : >> { %12411 = vst [vmem:[#allocation40_spill] sm:$0xff] %v9993_v26  ;;  %v8232_v48 = vpop.eup %8231  ;;  %v2404_v55 = vpack.c.bf16 %v2394_v36, %v2393_v21 }
 0x55e   : >> { %v8234_v17 = vpop.eup %8233  ;;  %v9995_v58 = vpop.f32.mrf.mxu0  ;;  %7794 = vmatmul.mubr.msk.bf16.gmra.mxu0 %vm569_vm1, %v9119_v50  ;;  %v2396_v23 = vmul.f32 %v8232_v48, %v2332_v11 }
 0x55f   : >> { %12412 = vst [vmem:[#allocation44_spill] sm:$0xff] %v9995_v58  ;;  %7530 = vmatmul.mubr.bf16.gmra.mxu1 %v2404_v55  ;;  %7797 = vmatprep.mubr.msk.bf16.mxu0 %vm569_vm1, %v9107_v31  ;;  %v2395_v53 = vmul.f32 %v8234_v17, %v2331_v47 }
 0x560   : >> { %7566 = vmatpush3.bf16.xpose.msra.mxu1 %v12409_v49  ;;  %v10008_v7 = vpop.f32.mrf.mxu0 }
 0x561   : >> { %12415 = vst [vmem:[#allocation60_spill] sm:$0xff] %v10008_v7  ;;  %v8236_v60 = vpop.eup %8235  ;;  %7567 = vmatprep.subr.bf16.mxu1 %v2118_v3  ;;  %v2405_v50 = vpack.c.bf16 %v2396_v23, %v2395_v53 }
 0x562   : >> { %v8238_v32 = vpop.eup %8237  ;;  %v10010_v16 = vpop.f32.mrf.mxu0  ;;  %v2398_v11 = vmul.f32 %v8236_v60, %v2334_v25 }
 0x563   : >> { %12416 = vst [vmem:[#allocation58_spill] sm:$0xff] %v10010_v16  ;;  %7533 = vmatprep.mubr.bf16.mxu1 %v2405_v50  ;;  %v2397_v31 = vmul.f32 %v8238_v32, %v2333_v18  ;;  %v12423_v18 = vld [vmem:[#allocation2_spill] sm:$0xff] }
 0x564   : >> { %v10016_v52 = vpop.f32.mrf.mxu0 }
 0x565   : >> { %12417 = vst [vmem:[#allocation62_spill] sm:$0xff] %v10016_v52  ;;  %v2406_v38 = vpack.c.bf16 %v2398_v11, %v2397_v31 }
 0x566   : >> { %v10018_v47 = vpop.f32.mrf.mxu0  ;;  %7798 = vmatmul.mubr.msk.bf16.gmra.mxu0 %vm569_vm1, %v9094_v1 }
 0x567   : >> { %12418 = vst [vmem:[#allocation54_spill] sm:$0xff] %v10018_v47  ;;  %7534 = vmatmul.mubr.bf16.gmra.mxu1 %v2406_v38 }
 0x568   : >> { %7568 = vmatpush3.bf16.xpose.msra.mxu1 %v2118_v3  ;;  %v10022_v4 = vpop.f32.mrf.mxu0 }
 0x569   : >> { %12419 = vst [vmem:[#allocation52_spill] sm:$0xff] %v10022_v4  ;;  %7609 = vmatprep.subr.bf16.mxu1 %v12420_v27 }
 0x56a   : >> { %v10025_v6 = vpop.f32.mrf.mxu0 }
 0x56b   : >> { %12421 = vst [vmem:[#allocation56_spill] sm:$0xff] %v10025_v6 }
 0x56c   : >> { %v10027_v25 = vpop.f32.mrf.mxu0 }
 0x56d   : >> { %12422 = vst [vmem:[#allocation72_spill] sm:$0xff] %v10027_v25 }
 0x56e   : >> { %v7547_v54 = vpop.f32.mrf.mxu0 }
 0x56f   : >> { %v10030_v41 = vadd.f32 %v7547_v54, %v12423_v18 }
 0x570   : >> { %v2900_v35 = vpop.f32.mrf.mxu0 }
 0x571   : >> { %2967 = vmax.xlane.f32.xlu0 %v10030_v41  ;;  %v10034_v1 = vadd.f32 %v2900_v35, %v12423_v18 }
 0x572   : >> { %v7548_v9 = vpop.f32.mrf.mxu0 }
 0x573   : >> { %v10037_v45 = vadd.f32 %v7548_v9, %v12423_v18 }
 0x574   : >> { %v2903_v40 = vpop.f32.mrf.mxu0 }
 0x575   : >> { %2969 = vmax.xlane.f32.xlu1 %v10037_v45  ;;  %2963 = vmax.xlane.f32.xlu0 %v10034_v1  ;;  %v10042_v56 = vadd.f32 %v2903_v40, %v12423_v18 }
 0x576   : >> { %v7551_v24 = vpop.f32.mrf.mxu0 }
 0x577   : >> { %v10045_v34 = vadd.f32 %v7551_v24, %v12423_v18 }
 0x578   : >> { %v2916_v2 = vpop.f32.mrf.mxu0 }
 0x579   : >> { %2965 = vmax.xlane.f32.xlu1 %v10042_v56  ;;  %2975 = vmax.xlane.f32.xlu0 %v10045_v34  ;;  %v10050_v0 = vadd.f32 %v2916_v2, %v12423_v18 }
 0x57a   : >> { %v7552_v22 = vpop.f32.mrf.mxu0 }
 0x57b   : >> { %v10053_v61 = vadd.f32 %v7552_v22, %v12423_v18 }
 0x57c   : >> { %v2919_v46 = vpop.f32.mrf.mxu0 }
 0x57d   : >> { %2977 = vmax.xlane.f32.xlu1 %v10053_v61  ;;  %2971 = vmax.xlane.f32.xlu0 %v10050_v0  ;;  %v10058_v20 = vadd.f32 %v2919_v46, %v12423_v18 }
 0x57e   : >> { %v7555_v43 = vpop.f32.mrf.mxu0 }
 0x57f   : >> { %v10061_v51 = vadd.f32 %v7555_v43, %v12423_v18 }
 0x580   : >> { %v2932_v12 = vpop.f32.mrf.mxu0 }
 0x581   : >> { %2973 = vmax.xlane.f32.xlu1 %v10058_v20  ;;  %2983 = vmax.xlane.f32.xlu0 %v10061_v51  ;;  %v10066_v19 = vadd.f32 %v2932_v12, %v12423_v18 }
 0x582   : >> { %v7556_v8 = vpop.f32.mrf.mxu0 }
 0x583   : >> { %v10069_v39 = vadd.f32 %v7556_v8, %v12423_v18 }
 0x584   : >> { %v2935_v15 = vpop.f32.mrf.mxu0 }
 0x585   : >> { %2985 = vmax.xlane.f32.xlu1 %v10069_v39  ;;  %2979 = vmax.xlane.f32.xlu0 %v10066_v19  ;;  %v10074_v14 = vadd.f32 %v2935_v15, %v12423_v18 }
 0x586   : >> { %v7559_v57 = vpop.f32.mrf.mxu0 }
 0x587   : >> { %v10077_v28 = vadd.f32 %v7559_v57, %v12423_v18 }
 0x588   : >> { %v2948_v10 = vpop.f32.mrf.mxu0 }
 0x589   : >> { %2981 = vmax.xlane.f32.xlu1 %v10074_v14  ;;  %2991 = vmax.xlane.f32.xlu0 %v10077_v28  ;;  %v10082_v63 = vadd.f32 %v2948_v10, %v12423_v18 }
 0x58a   : >> { %v7560_v49 = vpop.f32.mrf.mxu0 }
 0x58b   : >> { %v10085_v37 = vadd.f32 %v7560_v49, %v12423_v18 }
 0x58c   : >> { %v2951_v36 = vpop.f32.mrf.mxu0 }
 0x58d   : >> { %2993 = vmax.xlane.f32.xlu1 %v10085_v37  ;;  %2987 = vmax.xlane.f32.xlu0 %v10082_v63  ;;  %v10090_v48 = vadd.f32 %v2951_v36, %v12423_v18 }
 0x58e   : >> { %v7595_v21 = vpop.f32.mrf.mxu0 }
 0x58f   : >> { %v10093_v55 = vadd.f32 %v7595_v21, %v12423_v18 }
 0x590   : >> { %v3278_v17 = vpop.f32.mrf.mxu0 }
 0x591   : >> { %2989 = vmax.xlane.f32.xlu1 %v10090_v48  ;;  %3345 = vmax.xlane.f32.xlu0 %v10093_v55  ;;  %v10098_v13 = vadd.f32 %v3278_v17, %v12423_v18 }
 0x592   : >> { %v7596_v23 = vpop.f32.mrf.mxu0 }
 0x593   : >> { %v10101_v29 = vadd.f32 %v7596_v23, %v12423_v18 }
 0x594   : >> { %v3281_v3 = vpop.f32.mrf.mxu0 }
 0x595   : >> { %3347 = vmax.xlane.f32.xlu1 %v10101_v29  ;;  %3341 = vmax.xlane.f32.xlu0 %v10098_v13  ;;  %v10106_v60 = vadd.f32 %v3281_v3, %v12423_v18 }
 0x596   : >> { %v7599_v53 = vpop.f32.mrf.mxu0 }
 0x597   : >> { %v10109_v50 = vadd.f32 %v7599_v53, %v12423_v18 }
 0x598   : >> { %v3294_v32 = vpop.f32.mrf.mxu0 }
 0x599   : >> { %3343 = vmax.xlane.f32.xlu1 %v10106_v60  ;;  %3353 = vmax.xlane.f32.xlu0 %v10109_v50  ;;  %v10114_v31 = vadd.f32 %v3294_v32, %v12423_v18 }
 0x59a   : >> { %v7600_v11 = vpop.f32.mrf.mxu0 }
 0x59b   : >> { %v10117_v38 = vadd.f32 %v7600_v11, %v12423_v18 }
 0x59c   : >> { %v3297_v54 = vpop.f32.mrf.mxu0 }
 0x59d   : >> { %3355 = vmax.xlane.f32.xlu1 %v10117_v38  ;;  %3349 = vmax.xlane.f32.xlu0 %v10114_v31  ;;  %v10122_v9 = vadd.f32 %v3297_v54, %v12423_v18 }
 0x59e   : >> { %v7603_v35 = vpop.f32.mrf.mxu0 }
 0x59f   : >> { %v10125_v40 = vadd.f32 %v7603_v35, %v12423_v18 }
 0x5a0   : >> { %v3310_v24 = vpop.f32.mrf.mxu0 }
 0x5a1   : >> { %3351 = vmax.xlane.f32.xlu1 %v10122_v9  ;;  %3361 = vmax.xlane.f32.xlu0 %v10125_v40  ;;  %v10130_v22 = vadd.f32 %v3310_v24, %v12423_v18 }
 0x5a2   : >> { %v7604_v2 = vpop.f32.mrf.mxu0 }
 0x5a3   : >> { %v10133_v46 = vadd.f32 %v7604_v2, %v12423_v18 }
 0x5a4   : >> { %v3313_v43 = vpop.f32.mrf.mxu0 }
 0x5a5   : >> { %3363 = vmax.xlane.f32.xlu1 %v10133_v46  ;;  %3357 = vmax.xlane.f32.xlu0 %v10130_v22  ;;  %v10138_v8 = vadd.f32 %v3313_v43, %v12423_v18 }
 0x5a6   : >> { %v7607_v12 = vpop.f32.mrf.mxu0 }
 0x5a7   : >> { %v10141_v15 = vadd.f32 %v7607_v12, %v12423_v18 }
 0x5a8   : >> { %v3326_v57 = vpop.f32.mrf.mxu0 }
 0x5a9   : >> { %3359 = vmax.xlane.f32.xlu1 %v10138_v8  ;;  %3369 = vmax.xlane.f32.xlu0 %v10141_v15  ;;  %v10146_v49 = vadd.f32 %v3326_v57, %v12423_v18 }
 0x5aa   : >> { %v7608_v10 = vpop.f32.mrf.mxu0 }
 0x5ab   : >> { %v10149_v36 = vadd.f32 %v7608_v10, %v12423_v18 }
 0x5ac   : >> { %v3329_v21 = vpop.f32.mrf.mxu0 }
 0x5ad   : >> { %3371 = vmax.xlane.f32.xlu1 %v10149_v36  ;;  %3365 = vmax.xlane.f32.xlu0 %v10146_v49  ;;  %v10154_v23 = vadd.f32 %v3329_v21, %v12423_v18 }
 0x5ae   : >> { %v7643_v17 = vpop.f32.mrf.mxu0 }
 0x5af   : >> { %v10157_v3 = vadd.f32 %v7643_v17, %v12423_v18 }
 0x5b0   : >> { %v3656_v53 = vpop.f32.mrf.mxu0 }
 0x5b1   : >> { %3367 = vmax.xlane.f32.xlu1 %v10154_v23  ;;  %3723 = vmax.xlane.f32.xlu0 %v10157_v3  ;;  %v10162_v11 = vadd.f32 %v3656_v53, %v12423_v18 }
 0x5b2   : >> { %v7644_v32 = vpop.f32.mrf.mxu0 }
 0x5b3   : >> { %v10165_v54 = vadd.f32 %v7644_v32, %v12423_v18 }
 0x5b4   : >> { %v3659_v35 = vpop.f32.mrf.mxu0 }
 0x5b5   : >> { %3725 = vmax.xlane.f32.xlu1 %v10165_v54  ;;  %3719 = vmax.xlane.f32.xlu0 %v10162_v11  ;;  %v10170_v2 = vadd.f32 %v3659_v35, %v12423_v18 }
 0x5b6   : >> { %v7647_v24 = vpop.f32.mrf.mxu0 }
 0x5b7   : >> { %v10173_v43 = vadd.f32 %v7647_v24, %v12423_v18 }
 0x5b8   : >> { %v3672_v12 = vpop.f32.mrf.mxu0 }
 0x5b9   : >> { %3721 = vmax.xlane.f32.xlu1 %v10170_v2  ;;  %3731 = vmax.xlane.f32.xlu0 %v10173_v43  ;;  %v10178_v10 = vadd.f32 %v3672_v12, %v12423_v18 }
 0x5ba   : >> { %v7648_v57 = vpop.f32.mrf.mxu0 }
 0x5bb   : >> { %v10181_v21 = vadd.f32 %v7648_v57, %v12423_v18 }
 0x5bc   : >> { %v3675_v17 = vpop.f32.mrf.mxu0 }
 0x5bd   : >> { %3733 = vmax.xlane.f32.xlu1 %v10181_v21  ;;  %3727 = vmax.xlane.f32.xlu0 %v10178_v10  ;;  %v10186_v32 = vadd.f32 %v3675_v17, %v12423_v18 }
 0x5be   : >> { %v7651_v53 = vpop.f32.mrf.mxu0 }
 0x5bf   : >> { %v10189_v35 = vadd.f32 %v7651_v53, %v12423_v18 }
 0x5c0   : >> { %v3688_v24 = vpop.f32.mrf.mxu0 }
 0x5c1   : >> { %3729 = vmax.xlane.f32.xlu1 %v10186_v32  ;;  %3739 = vmax.xlane.f32.xlu0 %v10189_v35  ;;  %v10194_v57 = vadd.f32 %v3688_v24, %v12423_v18 }
 0x5c2   : >> { %v7652_v12 = vpop.f32.mrf.mxu0 }
 0x5c3   : >> { %v10197_v25 = vadd.f32 %v7652_v12, %v12423_v18 }
 0x5c4   : >> { %v3691_v52 = vpop.f32.mrf.mxu0 }
 0x5c5   : >> { %3741 = vmax.xlane.f32.xlu1 %v10197_v25  ;;  %3735 = vmax.xlane.f32.xlu0 %v10194_v57  ;;  %v10202_v53 = vadd.f32 %v3691_v52, %v12423_v18 }
 0x5c6   : >> { %v7655_v17 = vpop.f32.mrf.mxu0 }
 0x5c7   : >> { %v10205_v26 = vadd.f32 %v7655_v17, %v12423_v18 }
 0x5c8   : >> { %v3704_v30 = vpop.f32.mrf.mxu0 }
 0x5c9   : >> { %3737 = vmax.xlane.f32.xlu1 %v10202_v53  ;;  %3747 = vmax.xlane.f32.xlu0 %v10205_v26  ;;  %v10210_v12 = vadd.f32 %v3704_v30, %v12423_v18 }
 0x5ca   : >> { %v7656_v24 = vpop.f32.mrf.mxu0 }
 0x5cb   : >> { %v10213_v6 = vadd.f32 %v7656_v24, %v12423_v18 }
 0x5cc   : >> { %v3707_v4 = vpop.f32.mrf.mxu0 }
 0x5cd   : >> { %3749 = vmax.xlane.f32.xlu1 %v10213_v6  ;;  %3743 = vmax.xlane.f32.xlu0 %v10210_v12  ;;  %v10218_v17 = vadd.f32 %v3707_v4, %v12423_v18 }
 0x5ce   : >> { %v7691_v52 = vpop.f32.mrf.mxu0 }
 0x5cf   : >> { %v10221_v47 = vadd.f32 %v7691_v52, %v12423_v18 }
 0x5d0   : >> { %v4034_v16 = vpop.f32.mrf.mxu0 }
 0x5d1   : >> { %12424 = vst [vmem:[#allocation70_spill] sm:$0xff] %v10221_v47  ;;  %3745 = vmax.xlane.f32.xlu1 %v10218_v17  ;;  %4101 = vmax.xlane.f32.xlu0 %v10221_v47  ;;  %v10226_v24 = vadd.f32 %v4034_v16, %v12423_v18 }
 0x5d2   : >> { %v7692_v30 = vpop.f32.mrf.mxu0 }
 0x5d3   : >> { %12425 = vst [vmem:[#allocation75_spill] sm:$0xff] %v10226_v24  ;;  %v10229_v7 = vadd.f32 %v7692_v30, %v12423_v18 }
 0x5d4   : >> { %v4037_v58 = vpop.f32.mrf.mxu0 }
 0x5d5   : >> { %4103 = vmax.xlane.f32.xlu1 %v10229_v7  ;;  %4097 = vmax.xlane.f32.xlu0 %v10226_v24  ;;  %v10234_v52 = vadd.f32 %v4037_v58, %v12423_v18 }
 0x5d6   : >> { %v7695_v4 = vpop.f32.mrf.mxu0 }
 0x5d7   : >> { %12426 = vst [vmem:[#allocation66_spill] sm:$0xff] %v10234_v52  ;;  %v10237_v62 = vadd.f32 %v7695_v4, %v12423_v18 }
 0x5d8   : >> { %v4050_v44 = vpop.f32.mrf.mxu0 }
 0x5d9   : >> { %12427 = vst [vmem:[#allocation64_spill] sm:$0xff] %v10237_v62  ;;  %4099 = vmax.xlane.f32.xlu1 %v10234_v52  ;;  %4109 = vmax.xlane.f32.xlu0 %v10237_v62  ;;  %v10242_v30 = vadd.f32 %v4050_v44, %v12423_v18 }
 0x5da   : >> { %v7696_v16 = vpop.f32.mrf.mxu0 }
 0x5db   : >> { %12428 = vst [vmem:[#allocation68_spill] sm:$0xff] %v10242_v30  ;;  %v10245_v5 = vadd.f32 %v7696_v16, %v12423_v18 }
 0x5dc   : >> { %v4053_v33 = vpop.f32.mrf.mxu0 }
 0x5dd   : >> { %12429 = vst [vmem:[#allocation22_spill] sm:$0xff] %v10245_v5  ;;  %4111 = vmax.xlane.f32.xlu1 %v10245_v5  ;;  %4105 = vmax.xlane.f32.xlu0 %v10242_v30  ;;  %v10250_v4 = vadd.f32 %v4053_v33, %v12423_v18 }
 0x5de   : >> { %v7699_v58 = vpop.f32.mrf.mxu0 }
 0x5df   : >> { %12430 = vst [vmem:[#allocation23_spill] sm:$0xff] %v10250_v4  ;;  %v10253_v42 = vadd.f32 %v7699_v58, %v12423_v18 }
 0x5e0   : >> { %v4066_v59 = vpop.f32.mrf.mxu0 }
 0x5e1   : >> { %12431 = vst [vmem:[#allocation34_spill] sm:$0xff] %v10253_v42  ;;  %4107 = vmax.xlane.f32.xlu1 %v10250_v4  ;;  %4117 = vmax.xlane.f32.xlu0 %v10253_v42  ;;  %v10258_v16 = vadd.f32 %v4066_v59, %v12423_v18 }
 0x5e2   : >> { %v7700_v44 = vpop.f32.mrf.mxu0 }
 0x5e3   : >> { %12432 = vst [vmem:[#allocation20_spill] sm:$0xff] %v10258_v16  ;;  %v10261_v27 = vadd.f32 %v7700_v44, %v12423_v18 }
 0x5e4   : >> { %v4069_v30 = vpop.f32.mrf.mxu0 }
 0x5e5   : >> { %12433 = vst [vmem:[#allocation19_spill] sm:$0xff] %v10261_v27  ;;  %4119 = vmax.xlane.f32.xlu1 %v10261_v27  ;;  %4113 = vmax.xlane.f32.xlu0 %v10258_v16  ;;  %v10266_v58 = vadd.f32 %v4069_v30, %v12423_v18 }
 0x5e6   : >> { %v7703_v33 = vpop.f32.mrf.mxu0 }
 0x5e7   : >> { %12434 = vst [vmem:[#allocation21_spill] sm:$0xff] %v10266_v58  ;;  %v10269_v4 = vadd.f32 %v7703_v33, %v12423_v18 }
 0x5e8   : >> { %v4082_v42 = vpop.f32.mrf.mxu0 }
 0x5e9   : >> { %12435 = vst [vmem:[#allocation76_spill] sm:$0xff] %v10269_v4  ;;  %4115 = vmax.xlane.f32.xlu1 %v10266_v58  ;;  %4125 = vmax.xlane.f32.xlu0 %v10269_v4  ;;  %v10274_v44 = vadd.f32 %v4082_v42, %v12423_v18 }
 0x5ea   : >> { %v7704_v59 = vpop.f32.mrf.mxu0 }
 0x5eb   : >> { %12436 = vst [vmem:[#allocation77_spill] sm:$0xff] %v10274_v44  ;;  %v10277_v27 = vadd.f32 %v7704_v59, %v12423_v18 }
 0x5ec   : >> { %v4085_v16 = vpop.f32.mrf.mxu0 }
 0x5ed   : >> { %12437 = vst [vmem:[#allocation78_spill] sm:$0xff] %v10277_v27  ;;  %4127 = vmax.xlane.f32.xlu1 %v10277_v27  ;;  %4121 = vmax.xlane.f32.xlu0 %v10274_v44  ;;  %v10282_v33 = vadd.f32 %v4085_v16, %v12423_v18 }
 0x5ee   : >> { %v7739_v30 = vpop.f32.mrf.mxu0 }
 0x5ef   : >> { %12438 = vst [vmem:[#allocation79_spill] sm:$0xff] %v10282_v33  ;;  %v10285_v58 = vadd.f32 %v7739_v30, %v12423_v18 }
 0x5f0   : >> { %v4412_v4 = vpop.f32.mrf.mxu0 }
 0x5f1   : >> { %12439 = vst [vmem:[#allocation80_spill] sm:$0xff] %v10285_v58  ;;  %4123 = vmax.xlane.f32.xlu1 %v10282_v33  ;;  %4479 = vmax.xlane.f32.xlu0 %v10285_v58  ;;  %v10290_v59 = vadd.f32 %v4412_v4, %v12423_v18 }
 0x5f2   : >> { %v7740_v42 = vpop.f32.mrf.mxu0 }
 0x5f3   : >> { %12440 = vst [vmem:[#allocation81_spill] sm:$0xff] %v10290_v59  ;;  %v10293_v27 = vadd.f32 %v7740_v42, %v12423_v18 }
 0x5f4   : >> { %v4415_v44 = vpop.f32.mrf.mxu0 }
 0x5f5   : >> { %12441 = vst [vmem:[#allocation82_spill] sm:$0xff] %v10293_v27  ;;  %4481 = vmax.xlane.f32.xlu1 %v10293_v27  ;;  %4475 = vmax.xlane.f32.xlu0 %v10290_v59  ;;  %v10298_v30 = vadd.f32 %v4415_v44, %v12423_v18 }
 0x5f6   : >> { %v7743_v16 = vpop.f32.mrf.mxu0 }
 0x5f7   : >> { %12442 = vst [vmem:[#allocation83_spill] sm:$0xff] %v10298_v30  ;;  %v10301_v33 = vadd.f32 %v7743_v16, %v12423_v18 }
 0x5f8   : >> { %v4428_v58 = vpop.f32.mrf.mxu0 }
 0x5f9   : >> { %12443 = vst [vmem:[#allocation84_spill] sm:$0xff] %v10301_v33  ;;  %4477 = vmax.xlane.f32.xlu1 %v10298_v30  ;;  %4487 = vmax.xlane.f32.xlu0 %v10301_v33  ;;  %v10306_v62 = vadd.f32 %v4428_v58, %v12423_v18 }
 0x5fa   : >> { %v7744_v4 = vpop.f32.mrf.mxu0  ;;  %v2968_v42 = vpop.xlane.xlu0 %2967 }
 0x5fb   : >> { %12444 = vst [vmem:[#allocation85_spill] sm:$0xff] %v10306_v62  ;;  %v10309_v27 = vadd.f32 %v7744_v4, %v12423_v18  ;;  %v2997_v5 = vsub.f32 %v10030_v41, %v2968_v42 }
 0x5fc   : >> { %v4431_v59 = vpop.f32.mrf.mxu0 }
 0x5fd   : >> { %12445 = vst [vmem:[#allocation86_spill] sm:$0xff] %v10309_v27  ;;  %4489 = vmax.xlane.f32.xlu1 %v10309_v27  ;;  %4483 = vmax.xlane.f32.xlu0 %v10306_v62  ;;  %v10315_v30 = vadd.f32 %v4431_v59, %v12423_v18 }
 0x5fe   : >> { %v7747_v44 = vpop.f32.mrf.mxu0  ;;  %v2970_v16 = vpop.xlane.xlu1 %2969 }
 0x5ff   : >> { %v10318_v33 = vadd.f32 %v7747_v44, %v12423_v18  ;;  %v2998_v58 = vsub.f32 %v10037_v45, %v2970_v16  ;;  %v2964_v24 = vpop.xlane.xlu0 %2963 }
 0x600   : >> { %v4444_v4 = vpop.f32.mrf.mxu0  ;;  %v2995_v62 = vsub.f32 %v10034_v1, %v2964_v24 }
 0x601   : >> { %12446 = vst [vmem:[#allocation87_spill] sm:$0xff] %v10318_v33  ;;  %v3012_v52 = vpack.c.bf16 %v2998_v58, %v2997_v5  ;;  %4485 = vmax.xlane.f32.xlu1 %v10315_v30  ;;  %4495 = vmax.xlane.f32.xlu0 %v10318_v33  ;;  %v10325_v59 = vadd.f32 %v4444_v4, %v12423_v18 }
 0x602   : >> { %v7748_v27 = vpop.f32.mrf.mxu0  ;;  %v2966_v47 = vpop.xlane.xlu1 %2965 }
 0x603   : >> { %v3023_v41 = vmul.bf16 1069105081, %v3012_v52  ;;  %12447 = vst [vmem:[#allocation88_spill] sm:$0xff] %v10325_v59  ;;  %v10328_v42 = vadd.f32 %v7748_v27, %v12423_v18  ;;  %v2996_v45 = vsub.f32 %v10042_v56, %v2966_v47  ;;  %v2976_v44 = vpop.xlane.xlu0 %2975 }
 0x604   : >> { %v4447_v16 = vpop.f32.mrf.mxu0 }
 0x605   : >> { %12448 = vst [vmem:[#allocation89_spill] sm:$0xff] %v10328_v42  ;;  %v3011_v5 = vpack.c.bf16 %v2996_v45, %v2995_v62  ;;  %4497 = vmax.xlane.f32.xlu1 %v10328_v42  ;;  %4491 = vmax.xlane.f32.xlu0 %v10325_v59  ;;  %8239 = vpow.bf16 %v3023_v41  ;;  %v10334_v52 = vadd.f32 %v4447_v16, %v12423_v18 }
 0x606   : >> { %v7751_v1 = vpop.f32.mrf.mxu0  ;;  %v2978_v24 = vpop.xlane.xlu1 %2977 }
 0x607   : >> { %v3020_v58 = vmul.bf16 1069105081, %v3011_v5  ;;  %12449 = vst [vmem:[#allocation90_spill] sm:$0xff] %v10334_v52  ;;  %v10337_v4 = vadd.f32 %v7751_v1, %v12423_v18  ;;  %v2972_v27 = vpop.xlane.xlu0 %2971  ;;  %v3002_v62 = vsub.f32 %v10053_v61, %v2978_v24  ;;  %v3001_v5 = vsub.f32 %v10045_v34, %v2976_v44 }
 0x608   : >> { %v4460_v33 = vpop.f32.mrf.mxu0  ;;  %v2999_v59 = vsub.f32 %v10050_v0, %v2972_v27 }
 0x609   : >> { %12450 = vst [vmem:[#allocation91_spill] sm:$0xff] %v10337_v4  ;;  %4493 = vmax.xlane.f32.xlu1 %v10334_v52  ;;  %4503 = vmax.xlane.f32.xlu0 %v10337_v4  ;;  %8241 = vpow.bf16 %v3020_v58  ;;  %v10343_v41 = vadd.f32 %v4460_v33, %v12423_v18  ;;  %v3014_v4 = vpack.c.bf16 %v3002_v62, %v3001_v5 }
 0x60a   : >> { %v7752_v47 = vpop.f32.mrf.mxu0  ;;  %v2974_v56 = vpop.xlane.xlu1 %2973 }
 0x60b   : >> { %12451 = vst [vmem:[#allocation92_spill] sm:$0xff] %v10343_v41  ;;  %v10346_v45 = vadd.f32 %v7752_v47, %v12423_v18  ;;  %v2984_v16 = vpop.xlane.xlu0 %2983  ;;  %v3000_v58 = vsub.f32 %v10058_v20, %v2974_v56  ;;  %v3029_v44 = vmul.bf16 1069105081, %v3014_v4 }
 0x60c   : >> { %v4463_v1 = vpop.f32.mrf.mxu0 }
 0x60d   : >> { %12452 = vst [vmem:[#allocation93_spill] sm:$0xff] %v10346_v45  ;;  %4505 = vmax.xlane.f32.xlu1 %v10346_v45  ;;  %4499 = vmax.xlane.f32.xlu0 %v10343_v41  ;;  %v10353_v42 = vadd.f32 %v4463_v1, %v12423_v18  ;;  %v3013_v62 = vpack.c.bf16 %v3000_v58, %v2999_v59  ;;  %8243 = vpow.bf16 %v3029_v44 }
 0x60e   : >> { %v2986_v61 = vpop.xlane.xlu1 %2985  ;;  %v7787_v24 = vpop.f32.mrf.mxu0 }
 0x60f   : >> { %12453 = vst [vmem:[#allocation94_spill] sm:$0xff] %v10353_v42  ;;  %v2980_v33 = vpop.xlane.xlu0 %2979  ;;  %v10356_v47 = vadd.f32 %v7787_v24, %v12423_v18  ;;  %v3026_v0 = vmul.bf16 1069105081, %v3013_v62 }
 0x610   : >> { %v4790_v34 = vpop.f32.mrf.mxu0 }
 0x611   : >> { %12454 = vst [vmem:[#allocation95_spill] sm:$0xff] %v10356_v47  ;;  %4501 = vmax.xlane.f32.xlu1 %v10353_v42  ;;  %4857 = vmax.xlane.f32.xlu0 %v10356_v47  ;;  %v10362_v56 = vadd.f32 %v4790_v34, %v12423_v18  ;;  %8245 = vpow.bf16 %v3026_v0  ;;  %v3005_v42 = vsub.f32 %v10061_v51, %v2984_v16 }
 0x612   : >> { %v2982_v5 = vpop.xlane.xlu1 %2981  ;;  %v7788_v20 = vpop.f32.mrf.mxu0 }
 0x613   : >> { %12455 = vst [vmem:[#allocation96_spill] sm:$0xff] %v10362_v56  ;;  %v2992_v1 = vpop.xlane.xlu0 %2991  ;;  %v10365_v45 = vadd.f32 %v7788_v20, %v12423_v18  ;;  %v10367_v24 = vpop.eup %8239  ;;  %v3006_v20 = vsub.f32 %v10069_v39, %v2986_v61  ;;  %v3004_v0 = vsub.f32 %v10074_v14, %v2982_v5 }
 0x614   : >> { %12457 = vst [vmem:[#allocation98_spill] sm:$0xff] %v10367_v24  ;;  %v4793_v41 = vpop.f32.mrf.mxu0  ;;  %v12181_v27 = vunpack.c.h.bf16 %v10367_v24  ;;  %v12180_v58 = vunpack.c.l.bf16 %v10367_v24  ;;  %v3003_v24 = vsub.f32 %v10066_v19, %v2980_v33 }
 0x615   : >> { %12456 = vst [vmem:[#allocation97_spill] sm:$0xff] %v10365_v45  ;;  %4859 = vmax.xlane.f32.xlu1 %v10365_v45  ;;  %4853 = vmax.xlane.f32.xlu0 %v10362_v56  ;;  %v10381_v62 = vadd.f32 %v4793_v41, %v12423_v18 }
 0x616   : >> { %v2994_v4 = vpop.xlane.xlu1 %2993  ;;  %v7791_v47 = vpop.f32.mrf.mxu0 }
 0x617   : >> { %v2988_v59 = vpop.xlane.xlu0 %2987  ;;  %v10373_v34 = vpop.eup %8241  ;;  %v10392_v61 = vadd.f32 %v7791_v47, %v12423_v18 }
 0x618   : >> { %12458 = vst [vmem:[#allocation99_spill] sm:$0xff] %v10373_v34  ;;  %v12184_v56 = vunpack.c.l.bf16 %v10373_v34  ;;  %v4806_v52 = vpop.f32.mrf.mxu0 }
 0x619   : >> { %3065 = vadd.xlane.f32.xlu1 %v12181_v27  ;;  %3063 = vadd.xlane.f32.xlu0 %v12180_v58  ;;  %v3016_v58 = vpack.c.bf16 %v3006_v20, %v3005_v42  ;;  %12459 = vst [vmem:[#allocation100_spill] sm:$0xff] %v10392_v61  ;;  %v12185_v27 = vunpack.c.h.bf16 %v10373_v34  ;;  %v3015_v42 = vpack.c.bf16 %v3004_v0, %v3003_v24 }
 0x61a   : >> { %v2990_v44 = vpop.xlane.xlu1 %2989  ;;  %v7792_v51 = vpop.f32.mrf.mxu0  ;;  %v10402_v14 = vadd.f32 %v4806_v52, %v12423_v18  ;;  %v3010_v24 = vsub.f32 %v10085_v37, %v2994_v4 }
 0x61b   : >> { %v10383_v45 = vpop.xlane.xlu0 %3345  ;;  %v3035_v16 = vmul.bf16 1069105081, %v3016_v58  ;;  %v10405_v47 = vadd.f32 %v7792_v51, %v12423_v18  ;;  %v3032_v33 = vmul.bf16 1069105081, %v3015_v42  ;;  %v3008_v4 = vsub.f32 %v10090_v48, %v2990_v44 }
 0x61c   : >> { %12460 = vst [vmem:[#allocation101_spill] sm:$0xff] %v10402_v14  ;;  %v4809_v19 = vpop.f32.mrf.mxu0 }
 0x61d   : >> { %4855 = vmax.xlane.f32.xlu1 %v10381_v62  ;;  %3059 = vadd.xlane.f32.xlu0 %v12184_v56  ;;  %12461 = vst [vmem:[#allocation102_spill] sm:$0xff] %v10405_v47  ;;  %v10409_v56 = vpop.eup %8243  ;;  %8247 = vpow.bf16 %v3035_v16  ;;  %v10427_v42 = vadd.f32 %v4809_v19, %v12423_v18 }
 0x61e   : >> { %v3348_v39 = vpop.xlane.xlu1 %3347  ;;  %v12191_v52 = vunpack.c.h.bf16 %v10409_v56  ;;  %v12237_v51 = vunpack.c.l.bf16 %v10409_v56  ;;  %v7795_v34 = vpop.f32.mrf.mxu0  ;;  %8249 = vpow.bf16 %v3032_v33 }
 0x61f   : >> { %v10394_v41 = vpop.xlane.xlu0 %3341  ;;  %v3376_v48 = vsub.f32 %v10101_v29, %v3348_v39  ;;  %v10438_v19 = vadd.f32 %v7795_v34, %v12423_v18 }
 0x621   : >> { %3061 = vadd.xlane.f32.xlu1 %v12185_v27  ;;  %4865 = vmax.xlane.f32.xlu0 %v10392_v61  ;;  %v10418_v27 = vpop.eup %8245  ;;  %v3009_v61 = vsub.f32 %v10077_v28, %v2992_v1  ;;  %v3007_v28 = vsub.f32 %v10082_v63, %v2988_v59  ;;  %v4822_v1 = vpop.f32.mrf.mxu0  ;;  %v3375_v63 = vsub.f32 %v10093_v55, %v10383_v45 }
 0x622   : >> { %v3344_v20 = vpop.xlane.xlu1 %3343 }
 0x623   : >> { %v10407_v5 = vpop.xlane.xlu0 %3353  ;;  %v3018_v37 = vpack.c.bf16 %v3010_v24, %v3009_v61  ;;  %v3017_v61 = vpack.c.bf16 %v3008_v4, %v3007_v28  ;;  %v7796_v59 = vpop.f32.mrf.mxu0  ;;  %v3390_v29 = vpack.c.bf16 %v3376_v48, %v3375_v63  ;;  %v3374_v39 = vsub.f32 %v10106_v60, %v3344_v20 }
 0x624   : >> { %v10452_v4 = vadd.f32 %v4822_v1, %v12423_v18  ;;  %v10455_v28 = vadd.f32 %v7796_v59, %v12423_v18 }
 0x625   : >> { %4867 = vmax.xlane.f32.xlu1 %v10405_v47  ;;  %4861 = vmax.xlane.f32.xlu0 %v10402_v14  ;;  %v12193_v14 = vunpack.c.l.bf16 %v10418_v27  ;;  %v3041_v33 = vmul.bf16 1069105081, %v3018_v37  ;;  %v3038_v37 = vmul.bf16 1069105081, %v3017_v61  ;;  %v3401_v60 = vmul.bf16 1069105081, %v3390_v29 }
 0x626   : >> { %v3356_v58 = vpop.xlane.xlu1 %3355 }
 0x627   : >> { %v10414_v0 = vpop.xlane.xlu0 %3349  ;;  %8251 = vpow.bf16 %v3041_v33  ;;  %v4825_v33 = vpop.f32.mrf.mxu0  ;;  %v3380_v1 = vsub.f32 %v10117_v38, %v3356_v58 }
 0x628   : >> { %8253 = vpow.bf16 %v3038_v37  ;;  %v10482_v29 = vadd.f32 %v4825_v33, %v12423_v18 }
 0x629   : >> { %3073 = vadd.xlane.f32.xlu1 %v12191_v52  ;;  %3071 = vadd.xlane.f32.xlu0 %v12237_v51  ;;  %v12192_v52 = vunpack.c.h.bf16 %v10418_v27  ;;  %8255 = vpow.bf16 %v3401_v60 }
 0x62a   : >> { %v3352_v16 = vpop.xlane.xlu1 %3351 }
 0x62b   : >> { %v10429_v47 = vpop.xlane.xlu0 %3361  ;;  %v10459_v45 = vpop.eup %8247 }
 0x62c   : >> { %v12194_v63 = vunpack.c.h.bf16 %v10459_v45  ;;  %v12195_v59 = vunpack.c.l.bf16 %v10459_v45 }
 0x62d   : >> { %4863 = vmax.xlane.f32.xlu1 %v10427_v42  ;;  %3067 = vadd.xlane.f32.xlu0 %v12193_v14  ;;  %v10470_v14 = vpop.eup %8249 }
 0x62e   : >> { %v3364_v44 = vpop.xlane.xlu1 %3363 }
 0x62f   : >> { %v10440_v24 = vpop.xlane.xlu0 %3357 }
 0x631   : >> { %3069 = vadd.xlane.f32.xlu1 %v12192_v52  ;;  %4873 = vmax.xlane.f32.xlu0 %v10438_v19  ;;  %v3373_v52 = vsub.f32 %v10098_v13, %v10394_v41  ;;  %v3379_v13 = vsub.f32 %v10109_v50, %v10407_v5  ;;  %v10474_v41 = vpop.f32.mrf.mxu0  ;;  %v12197_v50 = vunpack.c.l.bf16 %v10470_v14  ;;  %v3377_v5 = vsub.f32 %v10114_v31, %v10414_v0 }
 0x632   : >> { %v10449_v34 = vpop.xlane.xlu1 %3359  ;;  %v3383_v0 = vsub.f32 %v10125_v40, %v10429_v47 }
 0x633   : >> { %v10457_v55 = vpop.xlane.xlu0 %3369  ;;  %v3389_v20 = vpack.c.bf16 %v3374_v39, %v3373_v52  ;;  %v3392_v58 = vpack.c.bf16 %v3380_v1, %v3379_v13  ;;  %v3378_v52 = vsub.f32 %v10122_v9, %v3352_v16  ;;  %v3384_v16 = vsub.f32 %v10133_v46, %v3364_v44 }
 0x634   : >> { %v12196_v13 = vunpack.c.h.bf16 %v10470_v14 }
 0x635   : >> { %4875 = vmax.xlane.f32.xlu1 %v10455_v28  ;;  %4869 = vmax.xlane.f32.xlu0 %v10452_v4  ;;  %v3398_v38 = vmul.bf16 1069105081, %v3389_v20  ;;  %v3407_v60 = vmul.bf16 1069105081, %v3392_v58  ;;  %v3391_v9 = vpack.c.bf16 %v3378_v52, %v3377_v5  ;;  %v10499_v31 = vpop.eup %8251  ;;  %v3394_v44 = vpack.c.bf16 %v3384_v16, %v3383_v0 }
 0x636   : >> { %v3372_v61 = vpop.xlane.xlu1 %3371  ;;  %v12198_v52 = vunpack.c.h.bf16 %v10499_v31  ;;  %v12236_v40 = vunpack.c.l.bf16 %v10499_v31  ;;  %v10514_v47 = vpop.eup %8253 }
 0x637   : >> { %v10466_v48 = vpop.xlane.xlu0 %3365  ;;  %8257 = vpow.bf16 %v3398_v38  ;;  %v3404_v46 = vmul.bf16 1069105081, %v3391_v9 }
 0x638   : >> { %8259 = vpow.bf16 %v3407_v60  ;;  %v3388_v60 = vsub.f32 %v10149_v36, %v3372_v61 }
 0x639   : >> { %3081 = vadd.xlane.f32.xlu1 %v12194_v63  ;;  %3079 = vadd.xlane.f32.xlu0 %v12195_v59  ;;  %v4838_v63 = vpop.f32.mrf.mxu0  ;;  %8261 = vpow.bf16 %v3404_v46 }
 0x63a   : >> { %v3368_v37 = vpop.xlane.xlu1 %3367  ;;  %v10494_v20 = vadd.f32 %v4838_v63, %v12423_v18  ;;  %v3382_v63 = vsub.f32 %v10138_v8, %v10449_v34  ;;  %v3413_v8 = vmul.bf16 1069105081, %v3394_v44 }
 0x63b   : >> { %v10484_v39 = vpop.xlane.xlu0 %3723  ;;  %v10503_v59 = vpop.f32.mrf.mxu0 }
 0x63c   : >> { %8263 = vpow.bf16 %v3413_v8 }
 0x63d   : >> { %4871 = vmax.xlane.f32.xlu1 %v10482_v29  ;;  %3075 = vadd.xlane.f32.xlu0 %v12197_v50  ;;  %v4841_v5 = vpop.f32.mrf.mxu0  ;;  %v12199_v50 = vunpack.c.l.bf16 %v10514_v47 }
 0x63e   : >> { %v3726_v33 = vpop.xlane.xlu1 %3725  ;;  %v10524_v16 = vadd.f32 %v4841_v5, %v12423_v18 }
 0x63f   : >> { %v10496_v1 = vpop.xlane.xlu0 %3719 }
 0x641   : >> { %3077 = vadd.xlane.f32.xlu1 %v12196_v13  ;;  %4877 = vmax.xlane.f32.xlu0 %v10494_v20  ;;  %v3381_v13 = vsub.f32 %v10130_v22, %v10440_v24  ;;  %v10529_v22 = vpop.eup %8255  ;;  %v3387_v24 = vsub.f32 %v10141_v15, %v10457_v55  ;;  %v3385_v15 = vsub.f32 %v10146_v49, %v10466_v48 }
 0x642   : >> { %v3722_v38 = vpop.xlane.xlu1 %3721  ;;  %v12200_v5 = vunpack.c.l.bf16 %v10529_v22  ;;  %v3753_v49 = vsub.f32 %v10157_v3, %v10484_v39  ;;  %v3751_v3 = vsub.f32 %v10162_v11, %v10496_v1 }
 0x643   : >> { %v10510_v58 = vpop.xlane.xlu0 %3731  ;;  %v3393_v34 = vpack.c.bf16 %v3382_v63, %v3381_v13  ;;  %v3396_v61 = vpack.c.bf16 %v3388_v60, %v3387_v24  ;;  %v3386_v13 = vsub.f32 %v10154_v23, %v3368_v37  ;;  %v12233_v63 = vunpack.c.h.bf16 %v10514_v47 }
 0x644   : >> { %v3754_v37 = vsub.f32 %v10165_v54, %v3726_v33  ;;  %v12229_v60 = vunpack.c.h.bf16 %v10529_v22  ;;  %v3752_v33 = vsub.f32 %v10170_v2, %v3722_v38  ;;  %v3757_v11 = vsub.f32 %v10173_v43, %v10510_v58 }
 0x645   : >> { %3089 = vadd.xlane.f32.xlu1 %v12198_v52  ;;  %3087 = vadd.xlane.f32.xlu0 %v12236_v40  ;;  %v3410_v36 = vmul.bf16 1069105081, %v3393_v34  ;;  %v10541_v52 = vpop.eup %8257  ;;  %v3419_v23 = vmul.bf16 1069105081, %v3396_v61  ;;  %v3395_v55 = vpack.c.bf16 %v3386_v13, %v3385_v15 }
 0x646   : >> { %v3734_v9 = vpop.xlane.xlu1 %3733  ;;  %v12201_v24 = vunpack.c.l.bf16 %v10541_v52  ;;  %v3768_v48 = vpack.c.bf16 %v3754_v37, %v3753_v49  ;;  %v12227_v13 = vunpack.c.h.bf16 %v10541_v52  ;;  %v3767_v39 = vpack.c.bf16 %v3752_v33, %v3751_v3 }
 0x647   : >> { %v10526_v0 = vpop.xlane.xlu0 %3727  ;;  %8265 = vpow.bf16 %v3410_v36  ;;  %v3416_v54 = vmul.bf16 1069105081, %v3395_v55  ;;  %v3758_v38 = vsub.f32 %v10181_v21, %v3734_v9 }
 0x648   : >> { %8267 = vpow.bf16 %v3419_v23  ;;  %v3779_v2 = vmul.bf16 1069105081, %v3768_v48  ;;  %v3776_v21 = vmul.bf16 1069105081, %v3767_v39  ;;  %v3755_v43 = vsub.f32 %v10178_v10, %v10526_v0 }
 0x649   : >> { %4879 = vmax.xlane.f32.xlu1 %v10524_v16  ;;  %3083 = vadd.xlane.f32.xlu0 %v12199_v50  ;;  %v10554_v50 = vpop.eup %8259  ;;  %8269 = vpow.bf16 %v3416_v54  ;;  %v3770_v1 = vpack.c.bf16 %v3758_v38, %v3757_v11 }
 0x64a   : >> { %v3730_v46 = vpop.xlane.xlu1 %3729  ;;  %v12202_v15 = vunpack.c.l.bf16 %v10554_v50  ;;  %v12222_v37 = vunpack.c.h.bf16 %v10554_v50  ;;  %8271 = vpow.bf16 %v3779_v2 }
 0x64b   : >> { %v10537_v44 = vpop.xlane.xlu0 %3739  ;;  %v3756_v9 = vsub.f32 %v10186_v32, %v3730_v46  ;;  %8273 = vpow.bf16 %v3776_v21  ;;  %v3785_v32 = vmul.bf16 1069105081, %v3770_v1 }
 0x64c   : >> { %v3761_v10 = vsub.f32 %v10189_v35, %v10537_v44 }
 0x64d   : >> { %3085 = vadd.xlane.f32.xlu1 %v12233_v63  ;;  %3441 = vadd.xlane.f32.xlu0 %v12200_v5  ;;  %v10567_v5 = vpop.eup %8261  ;;  %v3769_v58 = vpack.c.bf16 %v3756_v9, %v3755_v43  ;;  %8275 = vpow.bf16 %v3785_v32 }
 0x64e   : >> { %v3742_v8 = vpop.xlane.xlu1 %3741  ;;  %v12203_v49 = vunpack.c.l.bf16 %v10567_v5  ;;  %v12221_v33 = vunpack.c.h.bf16 %v10567_v5 }
 0x64f   : >> { %v10550_v34 = vpop.xlane.xlu0 %3735  ;;  %v3762_v46 = vsub.f32 %v10197_v25, %v3742_v8  ;;  %v3782_v25 = vmul.bf16 1069105081, %v3769_v58 }
 0x650   : >> { %v3759_v35 = vsub.f32 %v10194_v57, %v10550_v34 }
 0x651   : >> { %3443 = vadd.xlane.f32.xlu1 %v12229_v60  ;;  %3437 = vadd.xlane.f32.xlu0 %v12201_v24  ;;  %v10580_v24 = vpop.eup %8263  ;;  %v3772_v0 = vpack.c.bf16 %v3762_v46, %v3761_v10  ;;  %8277 = vpow.bf16 %v3782_v25 }
 0x652   : >> { %v3738_v36 = vpop.xlane.xlu1 %3737  ;;  %v12204_v3 = vunpack.c.l.bf16 %v10580_v24  ;;  %v12216_v38 = vunpack.c.h.bf16 %v10580_v24 }
 0x653   : >> { %v10563_v61 = vpop.xlane.xlu0 %3747  ;;  %v3760_v8 = vsub.f32 %v10202_v53, %v3738_v36  ;;  %v3791_v53 = vmul.bf16 1069105081, %v3772_v0 }
 0x654   : >> { %v3765_v57 = vsub.f32 %v10205_v26, %v10563_v61 }
 0x655   : >> { %3439 = vadd.xlane.f32.xlu1 %v12227_v13  ;;  %3449 = vadd.xlane.f32.xlu0 %v12202_v15  ;;  %v10593_v15 = vpop.eup %8265  ;;  %v3771_v44 = vpack.c.bf16 %v3760_v8, %v3759_v35  ;;  %8279 = vpow.bf16 %v3791_v53 }
 0x656   : >> { %v3750_v23 = vpop.xlane.xlu1 %3749  ;;  %v12205_v11 = vunpack.c.l.bf16 %v10593_v15  ;;  %v12215_v9 = vunpack.c.h.bf16 %v10593_v15 }
 0x657   : >> { %v10576_v55 = vpop.xlane.xlu0 %3743  ;;  %v3766_v36 = vsub.f32 %v10213_v6, %v3750_v23  ;;  %v3788_v6 = vmul.bf16 1069105081, %v3771_v44 }
 0x658   : >> { %v3763_v26 = vsub.f32 %v10210_v12, %v10576_v55  ;;  %v12462_v12 = vld [vmem:[#allocation70_spill] sm:$0xff] }
 0x659   : >> { %3451 = vadd.xlane.f32.xlu1 %v12222_v37  ;;  %3445 = vadd.xlane.f32.xlu0 %v12203_v49  ;;  %v10606_v49 = vpop.eup %8267  ;;  %v3774_v34 = vpack.c.bf16 %v3766_v36, %v3765_v57  ;;  %8281 = vpow.bf16 %v3788_v6  ;;  %v12463_v6 = vld [vmem:[#allocation66_spill] sm:$0xff] }
 0x65a   : >> { %v3746_v54 = vpop.xlane.xlu1 %3745  ;;  %v12206_v43 = vunpack.c.l.bf16 %v10606_v49  ;;  %v12210_v46 = vunpack.c.h.bf16 %v10606_v49 }
 0x65b   : >> { %v10589_v48 = vpop.xlane.xlu0 %4101  ;;  %v3764_v23 = vsub.f32 %v10218_v17, %v3746_v54  ;;  %v3797_v17 = vmul.bf16 1069105081, %v3774_v34 }
 0x65c   : >> { %v4131_v55 = vsub.f32 %v12462_v12, %v10589_v48  ;;  %v12464_v48 = vld [vmem:[#allocation75_spill] sm:$0xff] }
 0x65d   : >> { %3447 = vadd.xlane.f32.xlu1 %v12221_v33  ;;  %3457 = vadd.xlane.f32.xlu0 %v12204_v3  ;;  %v10619_v3 = vpop.eup %8269  ;;  %v3773_v61 = vpack.c.bf16 %v3764_v23, %v3763_v26  ;;  %8283 = vpow.bf16 %v3797_v17 }
 0x65e   : >> { %v4104_v2 = vpop.xlane.xlu1 %4103  ;;  %v12207_v10 = vunpack.c.l.bf16 %v10619_v3  ;;  %v12209_v8 = vunpack.c.h.bf16 %v10619_v3 }
 0x65f   : >> { %v10602_v39 = vpop.xlane.xlu0 %4097  ;;  %v4132_v54 = vsub.f32 %v10229_v7, %v4104_v2  ;;  %v3794_v7 = vmul.bf16 1069105081, %v3773_v61  ;;  %v12465_v61 = vld [vmem:[#allocation22_spill] sm:$0xff] }
 0x660   : >> { %v4129_v12 = vsub.f32 %v12464_v48, %v10602_v39  ;;  %v12466_v48 = vld [vmem:[#allocation64_spill] sm:$0xff] }
 0x661   : >> { %3459 = vadd.xlane.f32.xlu1 %v12216_v38  ;;  %3453 = vadd.xlane.f32.xlu0 %v12205_v11  ;;  %v10632_v11 = vpop.eup %8271  ;;  %v4146_v2 = vpack.c.bf16 %v4132_v54, %v4131_v55  ;;  %8285 = vpow.bf16 %v3794_v7 }
 0x662   : >> { %v4100_v21 = vpop.xlane.xlu1 %4099  ;;  %v12208_v35 = vunpack.c.l.bf16 %v10632_v11  ;;  %v12212_v36 = vunpack.c.h.bf16 %v10632_v11 }
 0x663   : >> { %v10615_v1 = vpop.xlane.xlu0 %4109  ;;  %v4130_v34 = vsub.f32 %v12463_v6, %v4100_v21  ;;  %v4157_v21 = vmul.bf16 1069105081, %v4146_v2  ;;  %v12467_v2 = vld [vmem:[#allocation23_spill] sm:$0xff] }
 0x665   : >> { %3455 = vadd.xlane.f32.xlu1 %v12215_v9  ;;  %3465 = vadd.xlane.f32.xlu0 %v12206_v43  ;;  %v10645_v43 = vpop.eup %8273  ;;  %v4145_v17 = vpack.c.bf16 %v4130_v34, %v4129_v12  ;;  %8287 = vpow.bf16 %v4157_v21  ;;  %v12469_v21 = vld [vmem:[#allocation19_spill] sm:$0xff] }
 0x666   : >> { %v4112_v32 = vpop.xlane.xlu1 %4111  ;;  %v12211_v57 = vunpack.c.l.bf16 %v10645_v43 }
 0x667   : >> { %v10628_v58 = vpop.xlane.xlu0 %4105  ;;  %v4136_v54 = vsub.f32 %v12465_v61, %v4112_v32  ;;  %v4154_v32 = vmul.bf16 1069105081, %v4145_v17 }
 0x669   : >> { %3467 = vadd.xlane.f32.xlu1 %v12210_v46  ;;  %3461 = vadd.xlane.f32.xlu0 %v12207_v10  ;;  %v10658_v10 = vpop.eup %8275  ;;  %8289 = vpow.bf16 %v4154_v32 }
 0x66a   : >> { %v4108_v25 = vpop.xlane.xlu1 %4107  ;;  %v10671_v46 = vpop.eup %8277 }
 0x66b   : >> { %v10641_v0 = vpop.xlane.xlu0 %4117  ;;  %v10686_v39 = vpop.eup %8279  ;;  %v4134_v34 = vsub.f32 %v12467_v2, %v4108_v25 }
 0x66c   : >> { %v12220_v9 = vunpack.c.l.bf16 %v10686_v39  ;;  %v10699_v38 = vpop.eup %8281 }
 0x66d   : >> { %3463 = vadd.xlane.f32.xlu1 %v12209_v8  ;;  %3819 = vadd.xlane.f32.xlu0 %v12208_v35  ;;  %v12213_v35 = vunpack.c.h.bf16 %v10645_v43  ;;  %v12214_v8 = vunpack.c.l.bf16 %v10658_v10 }
 0x66e   : >> { %v4120_v53 = vpop.xlane.xlu1 %4119 }
 0x66f   : >> { %v10654_v44 = vpop.xlane.xlu0 %4113  ;;  %v4140_v17 = vsub.f32 %v12469_v21, %v4120_v53 }
 0x671   : >> { %3821 = vadd.xlane.f32.xlu1 %v12212_v36  ;;  %3815 = vadd.xlane.f32.xlu0 %v12211_v57  ;;  %v12218_v57 = vunpack.c.h.bf16 %v10658_v10  ;;  %v12217_v36 = vunpack.c.l.bf16 %v10671_v46 }
 0x672   : >> { %v4116_v23 = vpop.xlane.xlu1 %4115 }
 0x673   : >> { %v10667_v26 = vpop.xlane.xlu0 %4125 }
 0x675   : >> { %3817 = vadd.xlane.f32.xlu1 %v12213_v35  ;;  %3827 = vadd.xlane.f32.xlu0 %v12214_v8  ;;  %v4135_v35 = vsub.f32 %v12466_v48, %v10615_v1  ;;  %v12219_v8 = vunpack.c.h.bf16 %v10671_v46  ;;  %v12468_v1 = vld [vmem:[#allocation68_spill] sm:$0xff] }
 0x676   : >> { %v10680_v55 = vpop.xlane.xlu1 %4127  ;;  %v4133_v48 = vsub.f32 %v12468_v1, %v10628_v58  ;;  %v10714_v58 = vpop.eup %8283  ;;  %v12470_v1 = vld [vmem:[#allocation34_spill] sm:$0xff] }
 0x677   : >> { %v10682_v6 = vpop.xlane.xlu0 %4121  ;;  %v4148_v7 = vpack.c.bf16 %v4136_v54, %v4135_v35  ;;  %v12224_v33 = vunpack.c.l.bf16 %v10714_v58  ;;  %v10727_v37 = vpop.eup %8285 }
 0x678   : >> { %v4147_v35 = vpack.c.bf16 %v4134_v34, %v4133_v48  ;;  %12472 = vst [vmem:[#allocation70_spill] sm:$0xff] %v10727_v37 }
 0x679   : >> { %3829 = vadd.xlane.f32.xlu1 %v12218_v57  ;;  %3823 = vadd.xlane.f32.xlu0 %v12217_v36  ;;  %v4163_v25 = vmul.bf16 1069105081, %v4148_v7  ;;  %v12226_v36 = vunpack.c.h.bf16 %v10686_v39  ;;  %v12223_v57 = vunpack.c.l.bf16 %v10699_v38  ;;  %v12471_v7 = vld [vmem:[#allocation21_spill] sm:$0xff] }
 0x67a   : >> { %v4124_v12 = vpop.xlane.xlu1 %4123  ;;  %v4160_v53 = vmul.bf16 1069105081, %v4147_v35  ;;  %v4138_v34 = vsub.f32 %v12471_v7, %v4116_v23  ;;  %v12230_v7 = vunpack.c.l.bf16 %v10727_v37 }
 0x67b   : >> { %v10695_v61 = vpop.xlane.xlu0 %4479  ;;  %8291 = vpow.bf16 %v4163_v25 }
 0x67c   : >> { %8293 = vpow.bf16 %v4160_v53  ;;  %v12475_v53 = vld [vmem:[#allocation79_spill] sm:$0xff] }
 0x67d   : >> { %3825 = vadd.xlane.f32.xlu1 %v12219_v8  ;;  %3835 = vadd.xlane.f32.xlu0 %v12220_v9  ;;  %v4139_v8 = vsub.f32 %v12470_v1, %v10641_v0  ;;  %v12225_v9 = vunpack.c.h.bf16 %v10699_v38  ;;  %v12473_v0 = vld [vmem:[#allocation20_spill] sm:$0xff] }
 0x67e   : >> { %v10708_v54 = vpop.xlane.xlu1 %4481  ;;  %v4137_v1 = vsub.f32 %v12473_v0, %v10654_v44 }
 0x67f   : >> { %v10710_v2 = vpop.xlane.xlu0 %4475  ;;  %v4150_v32 = vpack.c.bf16 %v4140_v17, %v4139_v8  ;;  %v12228_v17 = vunpack.c.h.bf16 %v10714_v58 }
 0x680   : >> { %v4149_v23 = vpack.c.bf16 %v4138_v34, %v4137_v1  ;;  %v12232_v1 = vunpack.c.h.bf16 %v10727_v37 }
 0x681   : >> { %3837 = vadd.xlane.f32.xlu1 %v12226_v36  ;;  %3831 = vadd.xlane.f32.xlu0 %v12223_v57  ;;  %v4169_v8 = vmul.bf16 1069105081, %v4150_v32  ;;  %v10741_v57 = vpop.eup %8287  ;;  %v4142_v32 = vsub.f32 %v12475_v53, %v4124_v12  ;;  %v12477_v36 = vld [vmem:[#allocation77_spill] sm:$0xff] }
 0x682   : >> { %v4478_v48 = vpop.xlane.xlu1 %4477  ;;  %12474 = vst [vmem:[#allocation66_spill] sm:$0xff] %v10741_v57  ;;  %v4166_v44 = vmul.bf16 1069105081, %v4149_v23  ;;  %v4141_v13 = vsub.f32 %v12477_v36, %v10682_v6  ;;  %v12479_v23 = vld [vmem:[#allocation76_spill] sm:$0xff]  ;;  %v12234_v36 = vunpack.c.h.bf16 %v10741_v57 }
 0x683   : >> { %v10723_v21 = vpop.xlane.xlu0 %4487  ;;  %8295 = vpow.bf16 %v4169_v8  ;;  %v4143_v53 = vsub.f32 %v12479_v23, %v10667_v26 }
 0x684   : >> { %8297 = vpow.bf16 %v4166_v44  ;;  %v4151_v12 = vpack.c.bf16 %v4142_v32, %v4141_v13  ;;  %v12480_v44 = vld [vmem:[#allocation83_spill] sm:$0xff] }
 0x685   : >> { %3833 = vadd.xlane.f32.xlu1 %v12225_v9  ;;  %3843 = vadd.xlane.f32.xlu0 %v12224_v33  ;;  %v12231_v33 = vunpack.c.l.bf16 %v10741_v57  ;;  %v10752_v9 = vpop.eup %8289  ;;  %v4508_v32 = vsub.f32 %v12480_v44, %v4478_v48  ;;  %v12482_v48 = vld [vmem:[#allocation82_spill] sm:$0xff] }
 0x686   : >> { %v10735_v25 = vpop.xlane.xlu1 %4489  ;;  %12476 = vst [vmem:[#allocation75_spill] sm:$0xff] %v10752_v9  ;;  %v12235_v6 = vunpack.c.l.bf16 %v10752_v9  ;;  %v4172_v13 = vmul.bf16 1069105081, %v4151_v12  ;;  %v12238_v23 = vunpack.c.h.bf16 %v10752_v9  ;;  %v4510_v12 = vsub.f32 %v12482_v48, %v10708_v54  ;;  %v12485_v9 = vld [vmem:[#allocation84_spill] sm:$0xff] }
 0x687   : >> { %v10737_v35 = vpop.xlane.xlu0 %4483  ;;  %v4513_v57 = vsub.f32 %v12485_v9, %v10723_v21 }
 0x688   : >> { %8299 = vpow.bf16 %v4172_v13  ;;  %v12484_v13 = vld [vmem:[#allocation86_spill] sm:$0xff] }
 0x689   : >> { %3845 = vadd.xlane.f32.xlu1 %v12228_v17  ;;  %3839 = vadd.xlane.f32.xlu0 %v12230_v7  ;;  %v12478_v17 = vld [vmem:[#allocation78_spill] sm:$0xff] }
 0x68a   : >> { %v4486_v34 = vpop.xlane.xlu1 %4485  ;;  %v4144_v60 = vsub.f32 %v12478_v17, %v10680_v55  ;;  %v10770_v55 = vpop.eup %8291 }
 0x68b   : >> { %v10748_v0 = vpop.xlane.xlu0 %4495  ;;  %v10783_v63 = vpop.eup %8293  ;;  %v12257_v51 = vunpack.c.h.bf16 %v10770_v55 }
 0x68c   : >> { %v4152_v17 = vpack.c.bf16 %v4144_v60, %v4143_v53  ;;  %v12481_v60 = vld [vmem:[#allocation81_spill] sm:$0xff] }
 0x68d   : >> { %3841 = vadd.xlane.f32.xlu1 %v12232_v1  ;;  %4197 = vadd.xlane.f32.xlu0 %v12231_v33  ;;  %v12239_v1 = vunpack.c.l.bf16 %v10770_v55  ;;  %v4507_v53 = vsub.f32 %v12481_v60, %v10710_v2  ;;  %v12246_v2 = vunpack.c.l.bf16 %v10783_v63  ;;  %v12483_v60 = vld [vmem:[#allocation80_spill] sm:$0xff] }
 0x68e   : >> { %v10762_v8 = vpop.xlane.xlu1 %4497 }
 0x68f   : >> { %v10766_v7 = vpop.xlane.xlu0 %4491  ;;  %v4523_v44 = vpack.c.bf16 %v4508_v32, %v4507_v53  ;;  %v4512_v53 = vsub.f32 %v10315_v30, %v4486_v34 }
 0x691   : >> { %4199 = vadd.xlane.f32.xlu1 %v12234_v36  ;;  %4193 = vadd.xlane.f32.xlu0 %v12235_v6  ;;  %v4175_v36 = vmul.bf16 1069105081, %v4152_v17  ;;  %v10799_v17 = vpop.eup %8295  ;;  %v4532_v32 = vmul.bf16 1069105081, %v4523_v44 }
 0x692   : >> { %v10777_v33 = vpop.xlane.xlu1 %4493 }
 0x693   : >> { %v10779_v26 = vpop.xlane.xlu0 %4503  ;;  %8301 = vpow.bf16 %v4175_v36  ;;  %v10816_v36 = vpop.eup %8297 }
 0x694   : >> { %8303 = vpow.bf16 %v4532_v32 }
 0x695   : >> { %4195 = vadd.xlane.f32.xlu1 %v12238_v23  ;;  %4205 = vadd.xlane.f32.xlu0 %v12239_v1  ;;  %v4509_v23 = vsub.f32 %v12483_v60, %v10695_v61  ;;  %v4514_v1 = vsub.f32 %v12484_v13, %v10735_v25  ;;  %v12255_v61 = vunpack.c.h.bf16 %v10783_v63  ;;  %v12247_v25 = vunpack.c.l.bf16 %v10799_v17  ;;  %v12486_v60 = vld [vmem:[#allocation85_spill] sm:$0xff] }
 0x696   : >> { %v10793_v6 = vpop.xlane.xlu1 %4505  ;;  %v4511_v13 = vsub.f32 %v12486_v60, %v10737_v35  ;;  %v12249_v60 = vunpack.c.h.bf16 %v10816_v36 }
 0x697   : >> { %v10795_v40 = vpop.xlane.xlu0 %4499  ;;  %v4524_v54 = vpack.c.bf16 %v4510_v12, %v4509_v23  ;;  %v12253_v23 = vunpack.c.h.bf16 %v10799_v17  ;;  %v12248_v12 = vunpack.c.l.bf16 %v10816_v36 }
 0x698   : >> { %v4525_v9 = vpack.c.bf16 %v4512_v53, %v4511_v13  ;;  %v12489_v13 = vld [vmem:[#allocation88_spill] sm:$0xff] }
 0x699   : >> { %4207 = vadd.xlane.f32.xlu1 %v12257_v51  ;;  %4201 = vadd.xlane.f32.xlu0 %v12246_v2  ;;  %v4526_v2 = vpack.c.bf16 %v4514_v1, %v4513_v57  ;;  %v4535_v30 = vmul.bf16 1069105081, %v4524_v54  ;;  %v10836_v1 = vadd.f32 %v10474_v41, %v12423_v18  ;;  %v12487_v54 = vld [vmem:[#allocation90_spill] sm:$0xff]  ;;  %v10850_v41 = vadd.f32 %v10503_v59, %v12423_v18 }
 0x69a   : >> { %v4502_v48 = vpop.xlane.xlu1 %4501  ;;  %v4538_v57 = vmul.bf16 1069105081, %v4525_v9  ;;  %v4516_v32 = vsub.f32 %v12487_v54, %v10777_v33  ;;  %v12491_v9 = vld [vmem:[#allocation89_spill] sm:$0xff]  ;;  %v12493_v18 = vld [vmem:[#allocation94_spill] sm:$0xff] }
 0x69b   : >> { %v10812_v37 = vpop.xlane.xlu0 %4857  ;;  %v4541_v44 = vmul.bf16 1069105081, %v4526_v2  ;;  %8305 = vpow.bf16 %v4535_v30  ;;  %v10841_v2 = vpop.eup %8299  ;;  %v4518_v54 = vsub.f32 %v12491_v9, %v10762_v8  ;;  %v4520_v59 = vsub.f32 %v12493_v18, %v4502_v48  ;;  %v12496_v48 = vld [vmem:[#allocation93_spill] sm:$0xff] }
 0x69c   : >> { %12488 = vst [vmem:[#allocation22_spill] sm:$0xff] %v10841_v2 }
 0x69d   : >> { %4203 = vadd.xlane.f32.xlu1 %v12255_v61  ;;  %4213 = vadd.xlane.f32.xlu0 %v12247_v25  ;;  %8307 = vpow.bf16 %v4541_v44  ;;  %v4515_v25 = vsub.f32 %v12489_v13, %v10766_v7  ;;  %v12250_v7 = vunpack.c.l.bf16 %v10841_v2  ;;  %v12492_v13 = vld [vmem:[#allocation87_spill] sm:$0xff]  ;;  %v12499_v61 = vld [vmem:[#allocation96_spill] sm:$0xff] }
 0x69e   : >> { %v10824_v21 = vpop.xlane.xlu1 %4859  ;;  %8309 = vpow.bf16 %v4538_v57 }
 0x69f   : >> { %v10826_v34 = vpop.xlane.xlu0 %4853  ;;  %v4527_v44 = vpack.c.bf16 %v4516_v32, %v4515_v25 }
 0x6a1   : >> { %4215 = vadd.xlane.f32.xlu1 %v12253_v23  ;;  %4209 = vadd.xlane.f32.xlu0 %v12248_v12  ;;  %v10852_v30 = vpop.eup %8301 }
 0x6a2   : >> { %v3066_v35 = vpop.xlane.xlu1 %3065  ;;  %12490 = vst [vmem:[#allocation64_spill] sm:$0xff] %v10852_v30  ;;  %v12252_v8 = vunpack.c.l.bf16 %v10852_v30  ;;  %v10867_v9 = vpop.eup %8303 }
 0x6a3   : >> { %v3064_v53 = vpop.xlane.xlu0 %3063  ;;  %8311 = vrcp.f32 %v3066_v35  ;;  %v4544_v35 = vmul.bf16 1069105081, %v4527_v44  ;;  %12494 = vst [vmem:[#allocation23_spill] sm:$0xff] %v10867_v9 }
 0x6a4   : >> { %8313 = vrcp.f32 %v3064_v53  ;;  %v12251_v53 = vunpack.c.h.bf16 %v10841_v2 }
 0x6a5   : >> { %4211 = vadd.xlane.f32.xlu1 %v12249_v60  ;;  %4881 = vmax.xlane.f32.xlu0 %v10836_v1  ;;  %v4517_v60 = vsub.f32 %v12492_v13, %v10748_v0  ;;  %v12495_v0 = vld [vmem:[#allocation92_spill] sm:$0xff] }
 0x6a6   : >> { %v4856_v33 = vpop.xlane.xlu1 %4855 }
 0x6a7   : >> { %v3060_v12 = vpop.xlane.xlu0 %3059  ;;  %v4528_v25 = vpack.c.bf16 %v4518_v54, %v4517_v60  ;;  %v4522_v60 = vsub.f32 %v12496_v48, %v10793_v6 }
 0x6a8   : >> { %8315 = vrcp.f32 %v3060_v12  ;;  %v4519_v12 = vsub.f32 %v12495_v0, %v10795_v40  ;;  %v12498_v0 = vld [vmem:[#allocation91_spill] sm:$0xff] }
 0x6a9   : >> { %4883 = vmax.xlane.f32.xlu1 %v10850_v41  ;;  %4217 = vadd.xlane.f32.xlu0 %v12250_v7  ;;  %v4547_v13 = vmul.bf16 1069105081, %v4528_v25  ;;  %v12256_v7 = vunpack.c.l.bf16 %v10867_v9  ;;  %v10881_v40 = vpop.eup %8305 }
 0x6aa   : >> { %v3062_v57 = vpop.xlane.xlu1 %3061  ;;  %v4529_v54 = vpack.c.bf16 %v4520_v59, %v4519_v12  ;;  %12497 = vst [vmem:[#allocation68_spill] sm:$0xff] %v10881_v40  ;;  %v4886_v12 = vsub.f32 %v10381_v62, %v4856_v33  ;;  %v12263_v23 = vunpack.c.l.bf16 %v10881_v40 }
 0x6ab   : >> { %8317 = vrcp.f32 %v3062_v57  ;;  %v10864_v32 = vpop.xlane.xlu0 %4865  ;;  %v12254_v57 = vunpack.c.h.bf16 %v10852_v30 }
 0x6ac   : >> { %8319 = vpow.bf16 %v4544_v35  ;;  %v4550_v59 = vmul.bf16 1069105081, %v4529_v54  ;;  %v10889_v35 = vpop.eup %8307  ;;  %v12500_v54 = vld [vmem:[#allocation97_spill] sm:$0xff] }
 0x6ad   : >> { %4219 = vadd.xlane.f32.xlu1 %v12251_v53  ;;  %4221 = vadd.xlane.f32.xlu0 %v12252_v8  ;;  %v4521_v53 = vsub.f32 %v12498_v0, %v10779_v26  ;;  %8321 = vpow.bf16 %v4547_v13  ;;  %v12260_v8 = vunpack.c.h.bf16 %v10867_v9  ;;  %v10894_v26 = vpop.eup %8309  ;;  %v4888_v13 = vsub.f32 %v12500_v54, %v10824_v21  ;;  %v12504_v21 = vld [vmem:[#allocation99_spill] sm:$0xff] }
 0x6ae   : >> { %v10877_v44 = vpop.xlane.xlu1 %4867  ;;  %8323 = vpow.bf16 %v4550_v59 }
 0x6af   : >> { %v4862_v18 = vpop.xlane.xlu0 %4861  ;;  %v4530_v6 = vpack.c.bf16 %v4522_v60, %v4521_v53  ;;  %v12266_v60 = vunpack.c.h.bf16 %v10881_v40 }
 0x6b0   : >> { %v8312_v0 = vpop.eup %8311 }
 0x6b1   : >> { %4223 = vadd.xlane.f32.xlu1 %v12254_v57  ;;  %4571 = vadd.xlane.f32.xlu0 %v12256_v7  ;;  %v8314_v57 = vpop.eup %8313  ;;  %v4885_v7 = vsub.f32 %v12499_v61, %v10826_v34  ;;  %v4553_v62 = vmul.bf16 1069105081, %v4530_v6  ;;  %v12267_v61 = vunpack.c.l.bf16 %v10894_v26 }
 0x6b2   : >> { %v3074_v25 = vpop.xlane.xlu1 %3073 }
 0x6b3   : >> { %v3072_v48 = vpop.xlane.xlu0 %3071  ;;  %v4901_v51 = vpack.c.bf16 %v4886_v12, %v4885_v7  ;;  %8325 = vrcp.f32 %v3074_v25  ;;  %v12505_v7 = vunpack.c.l.bf16 %v12504_v21  ;;  %v12506_v25 = vunpack.c.h.bf16 %v12504_v21 }
 0x6b4   : >> { %8327 = vrcp.f32 %v3072_v48  ;;  %v4561_v48 = vunpack.c.l.bf16 %v10889_v35 }
 0x6b5   : >> { %4573 = vadd.xlane.f32.xlu1 %v12260_v8  ;;  %4575 = vadd.xlane.f32.xlu0 %v12263_v23  ;;  %v8316_v53 = vpop.eup %8315  ;;  %v12501_v8 = vld [vmem:[#allocation95_spill] sm:$0xff]  ;;  %v12502_v23 = vld [vmem:[#allocation98_spill] sm:$0xff] }
 0x6b6   : >> { %v4864_v33 = vpop.xlane.xlu1 %4863  ;;  %v4887_v9 = vsub.f32 %v12501_v8, %v10812_v37  ;;  %v12503_v2 = vunpack.c.h.bf16 %v12502_v23  ;;  %v3107_v59 = vmul.f32 %v8316_v53, %v12505_v7  ;;  %v12507_v54 = vunpack.c.l.bf16 %v12502_v23  ;;  %v12508_v53 = vld [vmem:[#allocation101_spill] sm:$0xff]  ;;  %v12509_v23 = vld [vmem:[#allocation102_spill] sm:$0xff] }
 0x6b7   : >> { %v3068_v30 = vpop.xlane.xlu0 %3067  ;;  %v4890_v8 = vsub.f32 %v10427_v42, %v4864_v33  ;;  %v4889_v7 = vsub.f32 %v12508_v53, %v4862_v18  ;;  %v12511_v33 = vld [vmem:[#allocation29_spill] sm:$0xff] }
 0x6b8   : >> { %v8318_v34 = vpop.eup %8317  ;;  %v3110_v6 = vmul.f32 %v8312_v0, %v12503_v2  ;;  %8329 = vrcp.f32 %v3068_v30  ;;  %v3109_v37 = vmul.f32 %v8314_v57, %v12507_v54  ;;  %v4560_v30 = vunpack.c.h.bf16 %v10894_v26  ;;  %v12513_v54 = vld [vmem:[#allocation28_spill] sm:$0xff] }
 0x6b9   : >> { %4577 = vadd.xlane.f32.xlu1 %v12266_v60  ;;  %4579 = vadd.xlane.f32.xlu0 %v12267_v61  ;;  %v3108_v12 = vmul.f32 %v8318_v34, %v12506_v25  ;;  %8331 = vpow.bf16 %v4553_v62  ;;  %v4902_v0 = vpack.c.bf16 %v4888_v13, %v4887_v9  ;;  %v4910_v60 = vmul.bf16 1069105081, %v4901_v51  ;;  %v12510_v9 = vld [vmem:[#allocation27_spill] sm:$0xff]  ;;  %v12512_v25 = vld [vmem:[#allocation100_spill] sm:$0xff] }
 0x6ba   : >> { %v3070_v2 = vpop.xlane.xlu1 %3069  ;;  %v10924_v21 = vpop.eup %8319  ;;  %v3124_v42 = vpack.c.bf16 %v3110_v6, %v3109_v37  ;;  %v4892_v57 = vsub.f32 %v12509_v23, %v10877_v44  ;;  %v4903_v62 = vpack.c.bf16 %v4890_v8, %v4889_v7  ;;  %v2124_v13 = vpack.c.bf16 %v12511_v33, %v12510_v9 }
 0x6bb   : >> { %8333 = vrcp.f32 %v3070_v2  ;;  %v4874_v61 = vpop.xlane.xlu0 %4873  ;;  %v3123_v40 = vpack.c.bf16 %v3108_v12, %v3107_v59  ;;  %v4913_v34 = vmul.bf16 1069105081, %v4902_v0  ;;  %v4562_v59 = vunpack.c.h.bf16 %v10889_v35  ;;  %v10939_v44 = vpop.eup %8321 }
 0x6bc   : >> { %8335 = vpow.bf16 %v4910_v60  ;;  %v4891_v12 = vsub.f32 %v12512_v25, %v10864_v32  ;;  %v4563_v6 = vunpack.c.l.bf16 %v10924_v21  ;;  %v4916_v37 = vmul.bf16 1069105081, %v4903_v62  ;;  %v10946_v2 = vpop.eup %8323 }
 0x6bd   : >> { %4581 = vadd.xlane.f32.xlu1 %v4560_v30  ;;  %4583 = vadd.xlane.f32.xlu0 %v4561_v48  ;;  %8337 = vpow.bf16 %v4913_v34  ;;  %v12271_v32 = vunpack.c.h.bf16 %v10924_v21  ;;  %v12270_v53 = vunpack.c.l.bf16 %v10939_v44  ;;  %v4566_v9 = vunpack.c.h.bf16 %v10939_v44 }
 0x6be   : >> { %7569 = vmatprep.mubr.bf16.mxu1 %v3123_v40  ;;  %v4876_v51 = vpop.xlane.xlu1 %4875  ;;  %v4904_v40 = vpack.c.bf16 %v4892_v57, %v4891_v12  ;;  %8339 = vpow.bf16 %v4916_v37  ;;  %v4567_v12 = vunpack.c.l.bf16 %v10946_v2  ;;  %v4895_v37 = vsub.f32 %v10438_v19, %v4874_v61 }
 0x6bf   : >> { %7570 = vmatmul.mubr.bf16.vlgmr.msra.gmra.mxu1 %v3124_v42  ;;  %v4870_v18 = vpop.xlane.xlu0 %4869  ;;  %v4896_v57 = vsub.f32 %v10455_v28, %v4876_v51  ;;  %v12514_v28 = vunpack.c.l.bf16 %v10409_v56  ;;  %v12518_v19 = vunpack.c.h.bf16 %v10418_v27 }
 0x6c0   : >> { %7610 = vmatpush3.bf16.xpose.msra.mxu1 %v12513_v54  ;;  %v8326_v0 = vpop.eup %8325  ;;  %v4919_v23 = vmul.bf16 1069105081, %v4904_v40  ;;  %v4893_v33 = vsub.f32 %v10452_v4, %v4870_v18  ;;  %v12516_v18 = vld [vmem:[#allocation25_spill] sm:$0xff] }
 0x6c1   : >> { %7611 = vmatprep.subr.bf16.mxu1 %v2124_v13  ;;  %4585 = vadd.xlane.f32.xlu1 %v4562_v59  ;;  %v8328_v7 = vpop.eup %8327 }
 0x6c2   : >> { %4587 = vadd.xlane.f32.xlu0 %v4563_v6  ;;  %v3082_v60 = vpop.xlane.xlu1 %3081  ;;  %v3113_v51 = vmul.f32 %v8328_v7, %v12514_v28 }
 0x6c3   : >> { %v3080_v8 = vpop.xlane.xlu0 %3079  ;;  %8341 = vrcp.f32 %v3082_v60 }
 0x6c4   : >> { %8343 = vrcp.f32 %v3080_v8 }
 0x6c5   : >> { %4589 = vadd.xlane.f32.xlu1 %v12271_v32  ;;  %v8330_v42 = vpop.eup %8329 }
 0x6c6   : >> { %4591 = vadd.xlane.f32.xlu0 %v12270_v53  ;;  %v4872_v62 = vpop.xlane.xlu1 %4871  ;;  %v12515_v53 = vunpack.c.h.bf16 %v10409_v56 }
 0x6c7   : >> { %v4894_v34 = vsub.f32 %v10482_v29, %v4872_v62  ;;  %v3076_v25 = vpop.xlane.xlu0 %3075  ;;  %v10958_v54 = vpop.eup %8331  ;;  %v12517_v29 = vunpack.c.l.bf16 %v10418_v27 }
 0x6c8   : >> { %v8334_v40 = vpop.eup %8333  ;;  %7612 = vmatpush3.bf16.xpose.msra.mxu1 %v2124_v13  ;;  %v3114_v32 = vmul.f32 %v8326_v0, %v12515_v53  ;;  %8345 = vrcp.f32 %v3076_v25  ;;  %v4906_v13 = vpack.c.bf16 %v4896_v57, %v4895_v37  ;;  %v4568_v53 = vunpack.c.h.bf16 %v10946_v2  ;;  %v12520_v57 = vld [vmem:[#allocation26_spill] sm:$0xff] }
 0x6c9   : >> { %v4905_v4 = vpack.c.bf16 %v4894_v34, %v4893_v33  ;;  %7613 = vmatprep.subr.bf16.mxu1 %v12516_v18  ;;  %4593 = vadd.xlane.f32.xlu1 %v4566_v9  ;;  %v3111_v60 = vmul.f32 %v8330_v42, %v12517_v29  ;;  %v3112_v61 = vmul.f32 %v8334_v40, %v12518_v19  ;;  %8347 = vpow.bf16 %v4919_v23  ;;  %v12519_v23 = vld [vmem:[#allocation24_spill] sm:$0xff] }
 0x6ca   : >> { %4595 = vadd.xlane.f32.xlu0 %v4567_v12  ;;  %v3078_v56 = vpop.xlane.xlu1 %3077  ;;  %v4569_v62 = vunpack.c.l.bf16 %v10958_v54  ;;  %v3126_v33 = vpack.c.bf16 %v3114_v32, %v3113_v51  ;;  %v10976_v34 = vpop.eup %8335  ;;  %v4925_v27 = vmul.bf16 1069105081, %v4906_v13  ;;  %v2122_v25 = vpack.c.bf16 %v12520_v57, %v12519_v23 }
 0x6cb   : >> { %v4922_v8 = vmul.bf16 1069105081, %v4905_v4  ;;  %8349 = vrcp.f32 %v3078_v56  ;;  %v4878_v0 = vpop.xlane.xlu0 %4877  ;;  %v3125_v7 = vpack.c.bf16 %v3112_v61, %v3111_v60  ;;  %v12286_v37 = vunpack.c.h.bf16 %v10958_v54  ;;  %v10987_v28 = vpop.eup %8337 }
 0x6cc   : >> { %v12285_v32 = vunpack.c.l.bf16 %v10976_v34  ;;  %v4897_v4 = vsub.f32 %v10494_v20, %v4878_v0  ;;  %v10996_v19 = vpop.eup %8339  ;;  %v12272_v13 = vunpack.c.l.bf16 %v10987_v28  ;;  %v12521_v57 = vunpack.c.l.bf16 %v10459_v45 }
 0x6cd   : >> { %4597 = vadd.xlane.f32.xlu1 %v4568_v53  ;;  %7573 = vmatprep.mubr.bf16.mxu1 %v3125_v7  ;;  %8351 = vpow.bf16 %v4922_v8  ;;  %v12277_v23 = vunpack.c.l.bf16 %v10996_v19 }
 0x6ce   : >> { %4599 = vadd.xlane.f32.xlu0 %v4569_v62  ;;  %v3090_v42 = vpop.xlane.xlu1 %3089  ;;  %7574 = vmatmul.mubr.bf16.gmra.mxu1 %v3126_v33  ;;  %8353 = vpow.bf16 %v4925_v27  ;;  %v12278_v33 = vunpack.c.h.bf16 %v10987_v28 }
 0x6cf   : >> { %v3088_v40 = vpop.xlane.xlu0 %3087  ;;  %8355 = vrcp.f32 %v3090_v42 }
 0x6d0   : >> { %7614 = vmatpush3.bf16.xpose.msra.mxu1 %v12516_v18  ;;  %v12279_v18 = vunpack.c.h.bf16 %v10976_v34  ;;  %v8342_v61 = vpop.eup %8341  ;;  %8357 = vrcp.f32 %v3088_v40 }
 0x6d1   : >> { %7615 = vmatprep.subr.bf16.mxu1 %v2122_v25  ;;  %4601 = vadd.xlane.f32.xlu1 %v12286_v37  ;;  %v8344_v56 = vpop.eup %8343 }
 0x6d2   : >> { %4949 = vadd.xlane.f32.xlu0 %v12285_v32  ;;  %v4880_v51 = vpop.xlane.xlu1 %4879  ;;  %v3117_v40 = vmul.f32 %v8344_v56, %v12521_v57 }
 0x6d3   : >> { %v4898_v29 = vsub.f32 %v10524_v16, %v4880_v51  ;;  %v3084_v60 = vpop.xlane.xlu0 %3083  ;;  %v12522_v51 = vunpack.c.h.bf16 %v10459_v45  ;;  %v12274_v45 = vunpack.c.h.bf16 %v10996_v19 }
 0x6d4   : >> { %8359 = vrcp.f32 %v3084_v60  ;;  %v12524_v60 = vunpack.c.l.bf16 %v10470_v14 }
 0x6d5   : >> { %v4907_v8 = vpack.c.bf16 %v4898_v29, %v4897_v4  ;;  %4951 = vadd.xlane.f32.xlu1 %v12279_v18  ;;  %v8346_v7 = vpop.eup %8345  ;;  %v3118_v4 = vmul.f32 %v8342_v61, %v12522_v51  ;;  %v12523_v29 = vld [vmem:[#allocation38_spill] sm:$0xff] }
 0x6d6   : >> { %4953 = vadd.xlane.f32.xlu0 %v12272_v13  ;;  %v3086_v20 = vpop.xlane.xlu1 %3085 }
 0x6d7   : >> { %v4928_v16 = vmul.bf16 1069105081, %v4907_v8  ;;  %8361 = vrcp.f32 %v3086_v20  ;;  %v3442_v0 = vpop.xlane.xlu0 %3441  ;;  %v11004_v27 = vpop.eup %8347  ;;  %v3115_v8 = vmul.f32 %v8346_v7, %v12524_v60  ;;  %v12525_v20 = vunpack.c.h.bf16 %v10470_v14 }
 0x6d8   : >> { %v8350_v42 = vpop.eup %8349  ;;  %7616 = vmatpush3.bf16.xpose.msra.mxu1 %v2122_v25  ;;  %v3128_v57 = vpack.c.bf16 %v3118_v4, %v3117_v40 }
 0x6d9   : >> { %8363 = vpow.bf16 %v4928_v16  ;;  %7657 = vmatprep.subr.bf16.mxu1 %v12523_v29  ;;  %4955 = vadd.xlane.f32.xlu1 %v12278_v33  ;;  %v3116_v25 = vmul.f32 %v8350_v42, %v12525_v20  ;;  %v12273_v16 = vunpack.c.l.bf16 %v11004_v27 }
 0x6da   : >> { %4957 = vadd.xlane.f32.xlu0 %v12277_v23  ;;  %v3444_v13 = vpop.xlane.xlu1 %3443  ;;  %v12529_v23 = vunpack.c.h.bf16 %v10514_v47 }
 0x6db   : >> { %v3438_v56 = vpop.xlane.xlu0 %3437  ;;  %v3127_v61 = vpack.c.bf16 %v3116_v25, %v3115_v8  ;;  %8365 = vrcp.f32 %v3444_v13  ;;  %v11022_v51 = vpop.eup %8351  ;;  %v12276_v13 = vunpack.c.h.bf16 %v11004_v27 }
 0x6dc   : >> { %8367 = vrcp.f32 %v3438_v56  ;;  %v11029_v42 = vpop.eup %8353  ;;  %v12275_v4 = vunpack.c.l.bf16 %v11022_v51  ;;  %v12283_v25 = vunpack.c.h.bf16 %v11022_v51 }
 0x6dd   : >> { %4959 = vadd.xlane.f32.xlu1 %v12274_v45  ;;  %7577 = vmatprep.mubr.bf16.mxu1 %v3127_v61  ;;  %8369 = vrcp.f32 %v3442_v0  ;;  %v8356_v40 = vpop.eup %8355  ;;  %v12282_v61 = vunpack.c.l.bf16 %v11029_v42 }
 0x6de   : >> { %4961 = vadd.xlane.f32.xlu0 %v12273_v16  ;;  %v3440_v14 = vpop.xlane.xlu1 %3439  ;;  %7578 = vmatmul.mubr.bf16.gmra.mxu1 %v3128_v57  ;;  %v8358_v60 = vpop.eup %8357  ;;  %v12526_v57 = vunpack.c.l.bf16 %v10499_v31  ;;  %v12527_v16 = vunpack.c.h.bf16 %v10499_v31 }
 0x6df   : >> { %8371 = vrcp.f32 %v3440_v14  ;;  %v3450_v7 = vpop.xlane.xlu0 %3449 }
 0x6e0   : >> { %v3121_v14 = vmul.f32 %v8358_v60, %v12526_v57  ;;  %v3122_v45 = vmul.f32 %v8356_v40, %v12527_v16  ;;  %v12281_v16 = vunpack.c.h.bf16 %v11029_v42 }
 0x6e1   : >> { %4963 = vadd.xlane.f32.xlu1 %v12276_v13  ;;  %v8360_v8 = vpop.eup %8359 }
 0x6e2   : >> { %4965 = vadd.xlane.f32.xlu0 %v12275_v4  ;;  %v3452_v0 = vpop.xlane.xlu1 %3451  ;;  %v12528_v4 = vunpack.c.l.bf16 %v10514_v47 }
 0x6e3   : >> { %v3446_v20 = vpop.xlane.xlu0 %3445  ;;  %8373 = vrcp.f32 %v3452_v0 }
 0x6e4   : >> { %v8362_v56 = vpop.eup %8361  ;;  %8375 = vrcp.f32 %v3446_v20  ;;  %v3119_v13 = vmul.f32 %v8360_v8, %v12528_v4  ;;  %v3130_v20 = vpack.c.bf16 %v3122_v45, %v3121_v14  ;;  %v12531_v45 = vunpack.c.l.bf16 %v10541_v52 }
 0x6e5   : >> { %4967 = vadd.xlane.f32.xlu1 %v12283_v25  ;;  %v3120_v33 = vmul.f32 %v8362_v56, %v12529_v23  ;;  %8377 = vrcp.f32 %v3450_v7 }
 0x6e6   : >> { %4969 = vadd.xlane.f32.xlu0 %v12282_v61  ;;  %v3448_v0 = vpop.xlane.xlu1 %3447 }
 0x6e7   : >> { %v11050_v18 = vpop.eup %8363  ;;  %8379 = vrcp.f32 %v3448_v0  ;;  %v3458_v31 = vpop.xlane.xlu0 %3457  ;;  %v3129_v40 = vpack.c.bf16 %v3120_v33, %v3119_v13  ;;  %v12530_v33 = vunpack.c.h.bf16 %v10529_v22  ;;  %v12532_v0 = vunpack.c.h.bf16 %v10541_v52 }
 0x6e8   : >> { %v12280_v60 = vunpack.c.l.bf16 %v11050_v18  ;;  %v8366_v57 = vpop.eup %8365  ;;  %v12284_v8 = vunpack.c.h.bf16 %v11050_v18 }
 0x6e9   : >> { %4971 = vadd.xlane.f32.xlu1 %v12281_v16  ;;  %7581 = vmatprep.mubr.bf16.mxu1 %v3129_v40  ;;  %v8368_v47 = vpop.eup %8367  ;;  %v3488_v13 = vmul.f32 %v8366_v57, %v12530_v33  ;;  %v12534_v33 = vld [vmem:[#allocation37_spill] sm:$0xff] }
 0x6ea   : >> { %v3460_v23 = vpop.xlane.xlu1 %3459  ;;  %4973 = vadd.xlane.f32.xlu0 %v12280_v60  ;;  %7582 = vmatmul.mubr.bf16.gmra.mxu1 %v3130_v20  ;;  %v8370_v7 = vpop.eup %8369  ;;  %v3485_v14 = vmul.f32 %v8368_v47, %v12531_v45  ;;  %v12533_v20 = vunpack.c.l.bf16 %v10529_v22 }
 0x6eb   : >> { %v3454_v4 = vpop.xlane.xlu0 %3453  ;;  %8381 = vrcp.f32 %v3460_v23 }
 0x6ec   : >> { %v8372_v56 = vpop.eup %8371  ;;  %8383 = vrcp.f32 %v3454_v4  ;;  %v3487_v60 = vmul.f32 %v8370_v7, %v12533_v20  ;;  %v12538_v7 = vunpack.c.h.bf16 %v10567_v5 }
 0x6ed   : >> { %4975 = vadd.xlane.f32.xlu1 %v12284_v8  ;;  %v3486_v40 = vmul.f32 %v8372_v56, %v12532_v0  ;;  %8385 = vrcp.f32 %v3458_v31  ;;  %v12535_v8 = vld [vmem:[#allocation39_spill] sm:$0xff]  ;;  %v12536_v31 = vunpack.c.h.bf16 %v10554_v50 }
 0x6ee   : >> { %v3456_v16 = vpop.xlane.xlu1 %3455  ;;  %v3502_v57 = vpack.c.bf16 %v3488_v13, %v3487_v60  ;;  %v2128_v32 = vpack.c.bf16 %v12535_v8, %v12534_v33  ;;  %v12537_v60 = vunpack.c.l.bf16 %v10567_v5  ;;  %v12539_v13 = vunpack.c.l.bf16 %v10554_v50  ;;  %v12540_v5 = vld [vmem:[#allocation33_spill] sm:$0xff] }
 0x6ef   : >> { %8387 = vrcp.f32 %v3456_v16  ;;  %v3466_v61 = vpop.xlane.xlu0 %3465  ;;  %v3501_v25 = vpack.c.bf16 %v3486_v40, %v3485_v14  ;;  %v12542_v33 = vunpack.c.l.bf16 %v10593_v15 }
 0x6f0   : >> { %v8374_v23 = vpop.eup %8373 }
 0x6f1   : >> { %7617 = vmatprep.mubr.bf16.mxu1 %v3501_v25  ;;  %v8376_v4 = vpop.eup %8375  ;;  %v3492_v16 = vmul.f32 %v8374_v23, %v12536_v31 }
 0x6f2   : >> { %v3468_v37 = vpop.xlane.xlu1 %3467  ;;  %7618 = vmatmul.mubr.bf16.vlgmr.msra.gmra.mxu1 %v3502_v57  ;;  %v8378_v47 = vpop.eup %8377  ;;  %v3489_v25 = vmul.f32 %v8376_v4, %v12537_v60 }
 0x6f3   : >> { %7658 = vmatpush3.bf16.xpose.msra.mxu1 %v12523_v29  ;;  %v3462_v52 = vpop.xlane.xlu0 %3461  ;;  %8389 = vrcp.f32 %v3468_v37  ;;  %v3491_v45 = vmul.f32 %v8378_v47, %v12539_v13  ;;  %v12545_v13 = vld [vmem:[#allocation31_spill] sm:$0xff] }
 0x6f4   : >> { %v8380_v22 = vpop.eup %8379  ;;  %7659 = vmatprep.subr.bf16.mxu1 %v2128_v32  ;;  %8391 = vrcp.f32 %v3462_v52  ;;  %v12543_v52 = vunpack.c.h.bf16 %v10593_v15 }
 0x6f5   : >> { %v3490_v56 = vmul.f32 %v8380_v22, %v12538_v7  ;;  %8393 = vrcp.f32 %v3466_v61  ;;  %v3504_v37 = vpack.c.bf16 %v3492_v16, %v3491_v45  ;;  %v12541_v61 = vunpack.c.h.bf16 %v10580_v24  ;;  %v12546_v45 = vld [vmem:[#allocation36_spill] sm:$0xff] }
 0x6f6   : >> { %v3464_v8 = vpop.xlane.xlu1 %3463  ;;  %v12544_v16 = vunpack.c.l.bf16 %v10580_v24  ;;  %v12547_v24 = vunpack.c.h.bf16 %v10606_v49 }
 0x6f7   : >> { %8395 = vrcp.f32 %v3464_v8  ;;  %v3820_v29 = vpop.xlane.xlu0 %3819  ;;  %v3503_v14 = vpack.c.bf16 %v3490_v56, %v3489_v25 }
 0x6f8   : >> { %v8382_v0 = vpop.eup %8381 }
 0x6f9   : >> { %7621 = vmatprep.mubr.bf16.mxu1 %v3503_v14  ;;  %v8384_v40 = vpop.eup %8383  ;;  %v3496_v50 = vmul.f32 %v8382_v0, %v12541_v61  ;;  %v2126_v14 = vpack.c.bf16 %v12546_v45, %v12545_v13  ;;  %v12554_v13 = vunpack.c.h.bf16 %v10645_v43 }
 0x6fa   : >> { %v3822_v20 = vpop.xlane.xlu1 %3821  ;;  %7622 = vmatmul.mubr.bf16.gmra.mxu1 %v3504_v37  ;;  %v8386_v57 = vpop.eup %8385  ;;  %v3493_v47 = vmul.f32 %v8384_v40, %v12542_v33 }
 0x6fb   : >> { %7660 = vmatpush3.bf16.xpose.msra.mxu1 %v2128_v32  ;;  %v3816_v23 = vpop.xlane.xlu0 %3815  ;;  %8397 = vrcp.f32 %v3822_v20  ;;  %v3495_v32 = vmul.f32 %v8386_v57, %v12544_v16  ;;  %v12548_v20 = vunpack.c.l.bf16 %v10619_v3 }
 0x6fc   : >> { %v8388_v4 = vpop.eup %8387  ;;  %7661 = vmatprep.subr.bf16.mxu1 %v12540_v5  ;;  %8399 = vrcp.f32 %v3816_v23  ;;  %v12549_v23 = vunpack.c.h.bf16 %v10619_v3  ;;  %v12551_v3 = vunpack.c.h.bf16 %v10632_v11 }
 0x6fd   : >> { %v3494_v22 = vmul.f32 %v8388_v4, %v12543_v52  ;;  %8401 = vrcp.f32 %v3820_v29  ;;  %v3506_v7 = vpack.c.bf16 %v3496_v50, %v3495_v32  ;;  %v12550_v50 = vunpack.c.l.bf16 %v10606_v49 }
 0x6fe   : >> { %v3818_v31 = vpop.xlane.xlu1 %3817  ;;  %v12553_v49 = vunpack.c.l.bf16 %v10645_v43 }
 0x6ff   : >> { %8403 = vrcp.f32 %v3818_v31  ;;  %v3828_v60 = vpop.xlane.xlu0 %3827  ;;  %v3505_v25 = vpack.c.bf16 %v3494_v22, %v3493_v47 }
 0x700   : >> { %v8390_v56 = vpop.eup %8389 }
 0x701   : >> { %7625 = vmatprep.mubr.bf16.mxu1 %v3505_v25  ;;  %v8392_v8 = vpop.eup %8391  ;;  %v3500_v40 = vmul.f32 %v8390_v56, %v12547_v24  ;;  %v12552_v56 = vld [vmem:[#allocation49_spill] sm:$0xff] }
 0x702   : >> { %v3830_v37 = vpop.xlane.xlu1 %3829  ;;  %7626 = vmatmul.mubr.bf16.gmra.mxu1 %v3506_v7  ;;  %v8394_v0 = vpop.eup %8393  ;;  %v3497_v57 = vmul.f32 %v8392_v8, %v12548_v20 }
 0x703   : >> { %7662 = vmatpush3.bf16.xpose.msra.mxu1 %v12540_v5  ;;  %v3824_v15 = vpop.xlane.xlu0 %3823  ;;  %8405 = vrcp.f32 %v3830_v37  ;;  %v3499_v33 = vmul.f32 %v8394_v0, %v12550_v50  ;;  %v12555_v37 = vunpack.c.l.bf16 %v10632_v11 }
 0x704   : >> { %v8396_v29 = vpop.eup %8395  ;;  %7663 = vmatprep.subr.bf16.mxu1 %v2126_v14  ;;  %8407 = vrcp.f32 %v3824_v15 }
 0x705   : >> { %v3498_v4 = vmul.f32 %v8396_v29, %v12549_v23  ;;  %8409 = vrcp.f32 %v3828_v60  ;;  %v3508_v52 = vpack.c.bf16 %v3500_v40, %v3499_v33  ;;  %v12557_v23 = vld [vmem:[#allocation51_spill] sm:$0xff]  ;;  %v12558_v33 = vunpack.c.h.bf16 %v10658_v10 }
 0x706   : >> { %v3826_v61 = vpop.xlane.xlu1 %3825 }
 0x707   : >> { %8411 = vrcp.f32 %v3826_v61  ;;  %v3836_v5 = vpop.xlane.xlu0 %3835  ;;  %v3507_v47 = vpack.c.bf16 %v3498_v4, %v3497_v57  ;;  %v12556_v57 = vld [vmem:[#allocation47_spill] sm:$0xff] }
 0x708   : >> { %v8398_v22 = vpop.eup %8397  ;;  %v2132_v4 = vpack.c.bf16 %v12557_v23, %v12556_v57 }
 0x709   : >> { %7629 = vmatprep.mubr.bf16.mxu1 %v3507_v47  ;;  %v8400_v31 = vpop.eup %8399  ;;  %v3866_v60 = vmul.f32 %v8398_v22, %v12551_v3  ;;  %v12559_v47 = vunpack.c.l.bf16 %v10671_v46  ;;  %v12560_v22 = vunpack.c.h.bf16 %v10671_v46  ;;  %v12562_v46 = vld [vmem:[#allocation43_spill] sm:$0xff] }
 0x70a   : >> { %v3838_v16 = vpop.xlane.xlu1 %3837  ;;  %7630 = vmatmul.mubr.bf16.gmra.mxu1 %v3508_v52  ;;  %v8402_v32 = vpop.eup %8401  ;;  %v3863_v8 = vmul.f32 %v8400_v31, %v12553_v49 }
 0x70b   : >> { %7664 = vmatpush3.bf16.xpose.msra.mxu1 %v2126_v14  ;;  %v3832_v25 = vpop.xlane.xlu0 %3831  ;;  %8413 = vrcp.f32 %v3838_v16  ;;  %v3865_v0 = vmul.f32 %v8402_v32, %v12555_v37  ;;  %v12561_v32 = vunpack.c.l.bf16 %v10658_v10 }
 0x70c   : >> { %v8404_v7 = vpop.eup %8403  ;;  %7705 = vmatprep.subr.bf16.mxu1 %v12552_v56  ;;  %8415 = vrcp.f32 %v3832_v25 }
 0x70d   : >> { %v3864_v45 = vmul.f32 %v8404_v7, %v12554_v13  ;;  %8417 = vrcp.f32 %v3836_v5  ;;  %v3880_v24 = vpack.c.bf16 %v3866_v60, %v3865_v0  ;;  %v12563_v0 = vunpack.c.h.bf16 %v10686_v39 }
 0x70e   : >> { %v3834_v14 = vpop.xlane.xlu1 %3833 }
 0x70f   : >> { %8419 = vrcp.f32 %v3834_v14  ;;  %v3844_v15 = vpop.xlane.xlu0 %3843  ;;  %v3879_v29 = vpack.c.bf16 %v3864_v45, %v3863_v8  ;;  %v12564_v14 = vunpack.c.l.bf16 %v10699_v38 }
 0x710   : >> { %v8406_v40 = vpop.eup %8405 }
 0x711   : >> { %7665 = vmatprep.mubr.bf16.mxu1 %v3879_v29  ;;  %v8408_v20 = vpop.eup %8407  ;;  %v3870_v5 = vmul.f32 %v8406_v40, %v12558_v33  ;;  %v12565_v29 = vunpack.c.h.bf16 %v10699_v38  ;;  %v12568_v33 = vld [vmem:[#allocation45_spill] sm:$0xff] }
 0x712   : >> { %v3846_v61 = vpop.xlane.xlu1 %3845  ;;  %7666 = vmatmul.mubr.bf16.vlgmr.msra.gmra.mxu1 %v3880_v24  ;;  %v8410_v50 = vpop.eup %8409  ;;  %v3867_v52 = vmul.f32 %v8408_v20, %v12559_v47  ;;  %v12566_v20 = vunpack.c.l.bf16 %v10686_v39  ;;  %v12569_v39 = vunpack.c.h.bf16 %v10714_v58 }
 0x713   : >> { %7706 = vmatpush3.bf16.xpose.msra.mxu1 %v12552_v56  ;;  %v3840_v43 = vpop.xlane.xlu0 %3839  ;;  %8421 = vrcp.f32 %v3846_v61  ;;  %v3869_v25 = vmul.f32 %v8410_v50, %v12561_v32 }
 0x714   : >> { %v8412_v11 = vpop.eup %8411  ;;  %7707 = vmatprep.subr.bf16.mxu1 %v2132_v4  ;;  %8423 = vrcp.f32 %v3840_v43 }
 0x715   : >> { %v3868_v31 = vmul.f32 %v8412_v11, %v12560_v22  ;;  %8425 = vrcp.f32 %v3844_v15  ;;  %v3882_v60 = vpack.c.bf16 %v3870_v5, %v3869_v25  ;;  %v12567_v11 = vld [vmem:[#allocation41_spill] sm:$0xff] }
 0x716   : >> { %v3842_v16 = vpop.xlane.xlu1 %3841  ;;  %v2130_v5 = vpack.c.bf16 %v12568_v33, %v12567_v11 }
 0x717   : >> { %8427 = vrcp.f32 %v3842_v16  ;;  %v4198_v7 = vpop.xlane.xlu0 %4197  ;;  %v3881_v3 = vpack.c.bf16 %v3868_v31, %v3867_v52  ;;  %v12570_v16 = vld [vmem:[#allocation70_spill] sm:$0xff] }
 0x718   : >> { %v8414_v56 = vpop.eup %8413  ;;  %v12571_v32 = vunpack.c.l.bf16 %v12570_v16 }
 0x719   : >> { %7669 = vmatprep.mubr.bf16.mxu1 %v3881_v3  ;;  %v8416_v49 = vpop.eup %8415  ;;  %v3874_v10 = vmul.f32 %v8414_v56, %v12563_v0  ;;  %v12573_v56 = vunpack.c.l.bf16 %v10714_v58  ;;  %v12577_v58 = vld [vmem:[#allocation75_spill] sm:$0xff] }
 0x71a   : >> { %v4200_v8 = vpop.xlane.xlu1 %4199  ;;  %7670 = vmatmul.mubr.bf16.gmra.mxu1 %v3882_v60  ;;  %v8418_v13 = vpop.eup %8417  ;;  %v3871_v15 = vmul.f32 %v8416_v49, %v12564_v14 }
 0x71b   : >> { %7708 = vmatpush3.bf16.xpose.msra.mxu1 %v2132_v4  ;;  %v4194_v45 = vpop.xlane.xlu0 %4193  ;;  %8429 = vrcp.f32 %v4200_v8  ;;  %v3873_v57 = vmul.f32 %v8418_v13, %v12566_v20  ;;  %v12576_v20 = vld [vmem:[#allocation61_spill] sm:$0xff] }
 0x71c   : >> { %v8420_v37 = vpop.eup %8419  ;;  %7709 = vmatprep.subr.bf16.mxu1 %v12562_v46  ;;  %8431 = vrcp.f32 %v4194_v45 }
 0x71d   : >> { %v3872_v24 = vmul.f32 %v8420_v37, %v12565_v29  ;;  %8433 = vrcp.f32 %v4198_v7  ;;  %v3884_v61 = vpack.c.bf16 %v3874_v10, %v3873_v57  ;;  %v12572_v7 = vunpack.c.h.bf16 %v12570_v16  ;;  %v12574_v29 = vld [vmem:[#allocation66_spill] sm:$0xff] }
 0x71e   : >> { %v4196_v40 = vpop.xlane.xlu1 %4195  ;;  %v12578_v57 = vunpack.c.l.bf16 %v12577_v58 }
 0x71f   : >> { %8435 = vrcp.f32 %v4196_v40  ;;  %v4206_v23 = vpop.xlane.xlu0 %4205  ;;  %v3883_v4 = vpack.c.bf16 %v3872_v24, %v3871_v15  ;;  %v12575_v24 = vunpack.c.h.bf16 %v12574_v29 }
 0x720   : >> { %v8422_v50 = vpop.eup %8421 }
 0x721   : >> { %7673 = vmatprep.mubr.bf16.mxu1 %v3883_v4  ;;  %v8424_v43 = vpop.eup %8423  ;;  %v3878_v31 = vmul.f32 %v8422_v50, %v12569_v39  ;;  %v12579_v4 = vunpack.c.h.bf16 %v12577_v58  ;;  %v12580_v50 = vunpack.c.l.bf16 %v12574_v29  ;;  %v12582_v39 = vld [vmem:[#allocation63_spill] sm:$0xff] }
 0x722   : >> { %v4208_v47 = vpop.xlane.xlu1 %4207  ;;  %7674 = vmatmul.mubr.bf16.gmra.mxu1 %v3884_v61  ;;  %v8426_v52 = vpop.eup %8425  ;;  %v3875_v25 = vmul.f32 %v8424_v43, %v12571_v32 }
 0x723   : >> { %7710 = vmatpush3.bf16.xpose.msra.mxu1 %v12562_v46  ;;  %v4202_v38 = vpop.xlane.xlu0 %4201  ;;  %8437 = vrcp.f32 %v4208_v47  ;;  %v3877_v49 = vmul.f32 %v8426_v52, %v12573_v56  ;;  %v12583_v56 = vunpack.c.h.bf16 %v10770_v55 }
 0x724   : >> { %v8428_v22 = vpop.eup %8427  ;;  %7711 = vmatprep.subr.bf16.mxu1 %v2130_v5  ;;  %8439 = vrcp.f32 %v4202_v38 }
 0x725   : >> { %v3876_v3 = vmul.f32 %v8428_v22, %v12572_v7  ;;  %8441 = vrcp.f32 %v4206_v23  ;;  %v3886_v45 = vpack.c.bf16 %v3878_v31, %v3877_v49  ;;  %v12581_v22 = vld [vmem:[#allocation59_spill] sm:$0xff] }
 0x726   : >> { %v4204_v60 = vpop.xlane.xlu1 %4203  ;;  %v2136_v31 = vpack.c.bf16 %v12582_v39, %v12581_v22  ;;  %v11171_v39 = vpop.f32.mrf.mxu1 }
 0x727   : >> { %8443 = vrcp.f32 %v4204_v60  ;;  %v4214_v8 = vpop.xlane.xlu0 %4213  ;;  %v3885_v13 = vpack.c.bf16 %v3876_v3, %v3875_v25 }
 0x728   : >> { %v8430_v37 = vpop.eup %8429 }
 0x729   : >> { %7677 = vmatprep.mubr.bf16.mxu1 %v3885_v13  ;;  %v8432_v46 = vpop.eup %8431  ;;  %v4244_v40 = vmul.f32 %v8430_v37, %v12575_v24  ;;  %v12584_v13 = vunpack.c.l.bf16 %v10783_v63  ;;  %v12585_v37 = vunpack.c.h.bf16 %v10783_v63 }
 0x72a   : >> { %v4216_v0 = vpop.xlane.xlu1 %4215  ;;  %7678 = vmatmul.mubr.bf16.gmra.mxu1 %v3886_v45  ;;  %v8434_v10 = vpop.eup %8433  ;;  %v4241_v23 = vmul.f32 %v8432_v46, %v12578_v57 }
 0x72b   : >> { %7712 = vmatpush3.bf16.xpose.msra.mxu1 %v2130_v5  ;;  %v4210_v14 = vpop.xlane.xlu0 %4209  ;;  %8445 = vrcp.f32 %v4216_v0  ;;  %v4243_v43 = vmul.f32 %v8434_v10, %v12580_v50 }
 0x72c   : >> { %v8436_v15 = vpop.eup %8435  ;;  %7753 = vmatprep.subr.bf16.mxu1 %v12576_v20  ;;  %8447 = vrcp.f32 %v4210_v14 }
 0x72d   : >> { %v4242_v61 = vmul.f32 %v8436_v15, %v12579_v4  ;;  %8449 = vrcp.f32 %v4214_v8  ;;  %v4258_v47 = vpack.c.bf16 %v4244_v40, %v4243_v43  ;;  %v12590_v43 = vunpack.c.h.bf16 %v10816_v36 }
 0x72e   : >> { %v4212_v11 = vpop.xlane.xlu1 %4211 }
 0x72f   : >> { %8451 = vrcp.f32 %v4212_v11  ;;  %v4882_v33 = vpop.xlane.xlu0 %4881  ;;  %v4257_v5 = vpack.c.bf16 %v4242_v61, %v4241_v23  ;;  %v12587_v23 = vld [vmem:[#allocation55_spill] sm:$0xff]  ;;  %v12589_v61 = vunpack.c.l.bf16 %v10816_v36 }
 0x730   : >> { %v8438_v52 = vpop.eup %8437  ;;  %v4899_v25 = vsub.f32 %v10836_v1, %v4882_v33  ;;  %v12586_v1 = vunpack.c.l.bf16 %v10770_v55  ;;  %v12588_v55 = vunpack.c.h.bf16 %v10799_v17 }
 0x731   : >> { %7713 = vmatprep.mubr.bf16.mxu1 %v4257_v5  ;;  %v8440_v38 = vpop.eup %8439  ;;  %v4248_v49 = vmul.f32 %v8438_v52, %v12583_v56  ;;  %v12591_v5 = vunpack.c.l.bf16 %v10799_v17  ;;  %v12594_v56 = vld [vmem:[#allocation22_spill] sm:$0xff] }
 0x732   : >> { %v4884_v16 = vpop.xlane.xlu1 %4883  ;;  %7714 = vmatmul.mubr.bf16.vlgmr.msra.gmra.mxu1 %v4258_v47  ;;  %v8442_v32 = vpop.eup %8441  ;;  %v4245_v45 = vmul.f32 %v8440_v38, %v12584_v13  ;;  %v12596_v13 = vunpack.c.h.bf16 %v12594_v56 }
 0x733   : >> { %v4900_v7 = vsub.f32 %v10850_v41, %v4884_v16  ;;  %7754 = vmatpush3.bf16.xpose.msra.mxu1 %v12576_v20  ;;  %v4218_v3 = vpop.xlane.xlu0 %4217  ;;  %v4247_v41 = vmul.f32 %v8442_v32, %v12586_v1  ;;  %v12592_v16 = vld [vmem:[#allocation53_spill] sm:$0xff] }
 0x734   : >> { %v8444_v60 = vpop.eup %8443  ;;  %7755 = vmatprep.subr.bf16.mxu1 %v2136_v31  ;;  %8453 = vrcp.f32 %v4218_v3  ;;  %v12593_v32 = vld [vmem:[#allocation57_spill] sm:$0xff] }
 0x735   : >> { %v4908_v8 = vpack.c.bf16 %v4900_v7, %v4899_v25  ;;  %v4246_v46 = vmul.f32 %v8444_v60, %v12585_v37  ;;  %v4260_v29 = vpack.c.bf16 %v4248_v49, %v4247_v41  ;;  %v2134_v25 = vpack.c.bf16 %v12593_v32, %v12592_v16  ;;  %v11176_v60 = vpop.f32.mrf.mxu1 }
 0x736   : >> { %v4220_v0 = vpop.xlane.xlu1 %4219  ;;  %v12595_v49 = vunpack.c.l.bf16 %v12594_v56 }
 0x737   : >> { %v4931_v10 = vmul.bf16 1069105081, %v4908_v8  ;;  %8455 = vrcp.f32 %v4220_v0  ;;  %v4222_v14 = vpop.xlane.xlu0 %4221  ;;  %v4259_v15 = vpack.c.bf16 %v4246_v46, %v4245_v45 }
 0x738   : >> { %8457 = vrcp.f32 %v4222_v14  ;;  %v8446_v24 = vpop.eup %8445 }
 0x739   : >> { %8459 = vpow.bf16 %v4931_v10  ;;  %7717 = vmatprep.mubr.bf16.mxu1 %v4259_v15  ;;  %v8448_v40 = vpop.eup %8447  ;;  %v4252_v4 = vmul.f32 %v8446_v24, %v12588_v55  ;;  %v11186_v15 = vpop.f32.mrf.mxu1 }
 0x73a   : >> { %v4224_v20 = vpop.xlane.xlu1 %4223  ;;  %7718 = vmatmul.mubr.bf16.gmra.mxu1 %v4260_v29  ;;  %v8450_v58 = vpop.eup %8449  ;;  %v4249_v50 = vmul.f32 %v8448_v40, %v12589_v61  ;;  %v12597_v29 = vld [vmem:[#allocation64_spill] sm:$0xff]  ;;  %v12600_v61 = vld [vmem:[#allocation73_spill] sm:$0xff] }
 0x73b   : >> { %8461 = vrcp.f32 %v4224_v20  ;;  %7756 = vmatpush3.bf16.xpose.msra.mxu1 %v2136_v31  ;;  %v4572_v63 = vpop.xlane.xlu0 %4571  ;;  %v4251_v47 = vmul.f32 %v8450_v58, %v12591_v5  ;;  %v12598_v24 = vunpack.c.l.bf16 %v12597_v29  ;;  %v12599_v20 = vunpack.c.h.bf16 %v12597_v29 }
 0x73c   : >> { %v8452_v57 = vpop.eup %8451  ;;  %7757 = vmatprep.subr.bf16.mxu1 %v12587_v23  ;;  %8463 = vrcp.f32 %v4572_v63  ;;  %v12609_v29 = vunpack.c.l.bf16 %v10894_v26 }
 0x73d   : >> { %v4250_v11 = vmul.f32 %v8452_v57, %v12590_v43  ;;  %v4262_v22 = vpack.c.bf16 %v4252_v4, %v4251_v47  ;;  %v12601_v43 = vld [vmem:[#allocation23_spill] sm:$0xff] }
 0x73e   : >> { %v4574_v33 = vpop.xlane.xlu1 %4573  ;;  %v12603_v5 = vunpack.c.h.bf16 %v12601_v43 }
 0x73f   : >> { %8465 = vrcp.f32 %v4574_v33  ;;  %v4576_v52 = vpop.xlane.xlu0 %4575  ;;  %v4261_v38 = vpack.c.bf16 %v4250_v11, %v4249_v50  ;;  %v11197_v50 = vpop.f32.mrf.mxu1  ;;  %v12602_v11 = vunpack.c.l.bf16 %v12601_v43 }
 0x740   : >> { %8467 = vrcp.f32 %v4576_v52 }
 0x741   : >> { %7721 = vmatprep.mubr.bf16.mxu1 %v4261_v38  ;;  %v8454_v31 = vpop.eup %8453  ;;  %v11203_v32 = vpop.f32.mrf.mxu1 }
 0x742   : >> { %v4578_v7 = vpop.xlane.xlu1 %4577  ;;  %7722 = vmatmul.mubr.bf16.gmra.mxu1 %v4262_v22  ;;  %v4253_v8 = vmul.f32 %v8454_v31, %v12595_v49 }
 0x743   : >> { %8469 = vrcp.f32 %v4578_v7  ;;  %7758 = vmatpush3.bf16.xpose.msra.mxu1 %v12587_v23  ;;  %v4580_v36 = vpop.xlane.xlu0 %4579 }
 0x744   : >> { %v8456_v17 = vpop.eup %8455  ;;  %7759 = vmatprep.subr.bf16.mxu1 %v2134_v25  ;;  %8471 = vrcp.f32 %v4580_v36 }
 0x745   : >> { %v8458_v3 = vpop.eup %8457  ;;  %v4254_v45 = vmul.f32 %v8456_v17, %v12596_v13 }
 0x746   : >> { %v4582_v37 = vpop.xlane.xlu1 %4581  ;;  %v4255_v40 = vmul.f32 %v8458_v3, %v12598_v24 }
 0x747   : >> { %v11182_v46 = vpop.eup %8459  ;;  %8473 = vrcp.f32 %v4582_v37  ;;  %v4584_v0 = vpop.xlane.xlu0 %4583  ;;  %v4263_v1 = vpack.c.bf16 %v4254_v45, %v4253_v8  ;;  %v12607_v37 = vld [vmem:[#allocation71_spill] sm:$0xff] }
 0x748   : >> { %v8462_v41 = vpop.eup %8461  ;;  %v4948_v10 = vunpack.c.h.bf16 %v11182_v46  ;;  %v4947_v14 = vunpack.c.l.bf16 %v11182_v46  ;;  %8475 = vrcp.f32 %v4584_v0  ;;  %v12608_v0 = vld [vmem:[#allocation74_spill] sm:$0xff] }
 0x749   : >> { %7725 = vmatprep.mubr.bf16.mxu1 %v4263_v1  ;;  %v4256_v58 = vmul.f32 %v8462_v41, %v12599_v20  ;;  %v8464_v63 = vpop.eup %8463  ;;  %v2140_v1 = vpack.c.bf16 %v12608_v0, %v12607_v37  ;;  %v11211_v41 = vpop.f32.mrf.mxu1 }
 0x74a   : >> { %v4586_v57 = vpop.xlane.xlu1 %4585  ;;  %4979 = vadd.xlane.f32.xlu1 %v4948_v10  ;;  %4977 = vadd.xlane.f32.xlu0 %v4947_v14  ;;  %v4619_v33 = vmul.f32 %v8464_v63, %v12602_v11 }
 0x74b   : >> { %8477 = vrcp.f32 %v4586_v57  ;;  %7760 = vmatpush3.bf16.xpose.msra.mxu1 %v2134_v25  ;;  %v4588_v23 = vpop.xlane.xlu0 %4587  ;;  %v4264_v55 = vpack.c.bf16 %v4256_v58, %v4255_v40  ;;  %v12604_v25 = vld [vmem:[#allocation68_spill] sm:$0xff] }
 0x74c   : >> { %v8466_v4 = vpop.eup %8465  ;;  %7801 = vmatprep.subr.bf16.mxu1 %v12600_v61  ;;  %8479 = vrcp.f32 %v4588_v23  ;;  %v12605_v7 = vunpack.c.l.bf16 %v12604_v25  ;;  %v12606_v17 = vunpack.c.h.bf16 %v12604_v25 }
 0x74d   : >> { %7726 = vmatmul.mubr.bf16.gmra.mxu1 %v4264_v55  ;;  %v4620_v47 = vmul.f32 %v8466_v4, %v12603_v5  ;;  %v8468_v52 = vpop.eup %8467  ;;  %v11218_v55 = vpop.f32.mrf.mxu1 }
 0x74e   : >> { %v4590_v38 = vpop.xlane.xlu1 %4589  ;;  %v4621_v36 = vmul.f32 %v8468_v52, %v12605_v7  ;;  %v12610_v52 = vunpack.c.h.bf16 %v10924_v21  ;;  %v12612_v7 = vunpack.c.l.bf16 %v10939_v44 }
 0x74f   : >> { %8481 = vrcp.f32 %v4590_v38  ;;  %v4592_v22 = vpop.xlane.xlu0 %4591  ;;  %v4635_v31 = vpack.c.bf16 %v4620_v47, %v4619_v33  ;;  %v11224_v5 = vpop.f32.mrf.mxu1 }
 0x750   : >> { %v8470_v16 = vpop.eup %8469  ;;  %8483 = vrcp.f32 %v4592_v22 }
 0x751   : >> { %v4622_v3 = vmul.f32 %v8470_v16, %v12606_v17  ;;  %7761 = vmatprep.mubr.bf16.mxu1 %v4635_v31  ;;  %v8472_v56 = vpop.eup %8471  ;;  %v11231_v25 = vpop.f32.mrf.mxu1 }
 0x752   : >> { %v4594_v49 = vpop.xlane.xlu1 %4593  ;;  %v4623_v24 = vmul.f32 %v8472_v56, %v12609_v29 }
 0x753   : >> { %v4636_v8 = vpack.c.bf16 %v4622_v3, %v4621_v36  ;;  %8485 = vrcp.f32 %v4594_v49  ;;  %v4596_v13 = vpop.xlane.xlu0 %4595  ;;  %v11239_v37 = vpop.f32.mrf.mxu1 }
 0x754   : >> { %v8474_v45 = vpop.eup %8473  ;;  %8487 = vrcp.f32 %v4596_v13  ;;  %v12614_v13 = vld [vmem:[#allocation69_spill] sm:$0xff] }
 0x755   : >> { %7762 = vmatmul.mubr.bf16.vlgmr.msra.gmra.mxu1 %v4636_v8  ;;  %v4624_v40 = vmul.f32 %v8474_v45, %v4560_v30  ;;  %v8476_v20 = vpop.eup %8475  ;;  %v12613_v8 = vld [vmem:[#allocation65_spill] sm:$0xff] }
 0x756   : >> { %7802 = vmatpush3.bf16.xpose.msra.mxu1 %v12600_v61  ;;  %v4598_v58 = vpop.xlane.xlu1 %4597  ;;  %v4625_v4 = vmul.f32 %v8476_v20, %v4561_v48  ;;  %v2138_v45 = vpack.c.bf16 %v12614_v13, %v12613_v8  ;;  %v11246_v20 = vpop.f32.mrf.mxu1 }
 0x757   : >> { %8489 = vrcp.f32 %v4598_v58  ;;  %7803 = vmatprep.subr.bf16.mxu1 %v2140_v1  ;;  %v4600_v63 = vpop.xlane.xlu0 %4599  ;;  %v4637_v57 = vpack.c.bf16 %v4624_v40, %v4623_v24 }
 0x758   : >> { %v8478_v23 = vpop.eup %8477  ;;  %8491 = vrcp.f32 %v4600_v63 }
 0x759   : >> { %7765 = vmatprep.mubr.bf16.mxu1 %v4637_v57  ;;  %v4626_v26 = vmul.f32 %v8478_v23, %v4562_v59  ;;  %v8480_v30 = vpop.eup %8479  ;;  %v12611_v59 = vld [vmem:[#allocation67_spill] sm:$0xff] }
 0x75a   : >> { %v4602_v43 = vpop.xlane.xlu1 %4601  ;;  %v4627_v47 = vmul.f32 %v8480_v30, %v4563_v6  ;;  %v12616_v30 = vunpack.c.l.bf16 %v10976_v34 }
 0x75b   : >> { %8493 = vrcp.f32 %v4602_v43  ;;  %v4950_v61 = vpop.xlane.xlu0 %4949  ;;  %v4638_v11 = vpack.c.bf16 %v4626_v26, %v4625_v4  ;;  %v11252_v26 = vpop.f32.mrf.mxu1 }
 0x75c   : >> { %v8482_v33 = vpop.eup %8481  ;;  %8495 = vrcp.f32 %v4950_v61  ;;  %v12617_v61 = vunpack.c.h.bf16 %v10976_v34 }
 0x75d   : >> { %7766 = vmatmul.mubr.bf16.gmra.mxu1 %v4638_v11  ;;  %v4628_v38 = vmul.f32 %v8482_v33, %v12610_v52  ;;  %v8484_v48 = vpop.eup %8483 }
 0x75e   : >> { %7804 = vmatpush3.bf16.xpose.msra.mxu1 %v2140_v1  ;;  %v4952_v35 = vpop.xlane.xlu1 %4951  ;;  %v4629_v36 = vmul.f32 %v8484_v48, %v12612_v7  ;;  %v12618_v48 = vunpack.c.l.bf16 %v10987_v28 }
 0x75f   : >> { %8497 = vrcp.f32 %v4952_v35  ;;  %7805 = vmatprep.subr.bf16.mxu1 %v12611_v59  ;;  %v4954_v22 = vpop.xlane.xlu0 %4953  ;;  %v4639_v31 = vpack.c.bf16 %v4628_v38, %v4627_v47  ;;  %v11258_v38 = vpop.f32.mrf.mxu1 }
 0x760   : >> { %v8486_v16 = vpop.eup %8485  ;;  %8499 = vrcp.f32 %v4954_v22 }
 0x761   : >> { %7769 = vmatprep.mubr.bf16.mxu1 %v4639_v31  ;;  %v4630_v21 = vmul.f32 %v8486_v16, %v4566_v9  ;;  %v8488_v6 = vpop.eup %8487 }
 0x762   : >> { %v4956_v17 = vpop.xlane.xlu1 %4955  ;;  %v4631_v0 = vmul.f32 %v8488_v6, %v4567_v12  ;;  %v12615_v12 = vunpack.c.h.bf16 %v10958_v54  ;;  %v12620_v6 = vunpack.c.l.bf16 %v10996_v19 }
 0x763   : >> { %8501 = vrcp.f32 %v4956_v17  ;;  %v4958_v3 = vpop.xlane.xlu0 %4957  ;;  %v4640_v56 = vpack.c.bf16 %v4630_v21, %v4629_v36  ;;  %v11264_v21 = vpop.f32.mrf.mxu1 }
 0x764   : >> { %v8490_v49 = vpop.eup %8489  ;;  %8503 = vrcp.f32 %v4958_v3  ;;  %v12621_v3 = vunpack.c.h.bf16 %v10996_v19  ;;  %v12624_v19 = vunpack.c.l.bf16 %v11022_v51 }
 0x765   : >> { %7770 = vmatmul.mubr.bf16.gmra.mxu1 %v4640_v56  ;;  %v4632_v44 = vmul.f32 %v8490_v49, %v4568_v53  ;;  %v8492_v9 = vpop.eup %8491 }
 0x766   : >> { %7806 = vmatpush3.bf16.xpose.msra.mxu1 %v12611_v59  ;;  %v4960_v1 = vpop.xlane.xlu1 %4959  ;;  %v4633_v58 = vmul.f32 %v8492_v9, %v4569_v62  ;;  %v12619_v59 = vunpack.c.h.bf16 %v10987_v28  ;;  %v12623_v9 = vunpack.c.h.bf16 %v11004_v27 }
 0x767   : >> { %8505 = vrcp.f32 %v4960_v1  ;;  %7807 = vmatprep.subr.bf16.mxu1 %v2138_v45  ;;  %v4962_v29 = vpop.xlane.xlu0 %4961  ;;  %v4641_v24 = vpack.c.bf16 %v4632_v44, %v4631_v0  ;;  %v12622_v0 = vunpack.c.l.bf16 %v11004_v27 }
 0x768   : >> { %v8494_v40 = vpop.eup %8493  ;;  %8507 = vrcp.f32 %v4962_v29 }
 0x769   : >> { %7773 = vmatprep.mubr.bf16.mxu1 %v4641_v24  ;;  %v4634_v2 = vmul.f32 %v8494_v40, %v12615_v12  ;;  %v8496_v53 = vpop.eup %8495 }
 0x76a   : >> { %v4964_v63 = vpop.xlane.xlu1 %4963  ;;  %v4997_v43 = vmul.f32 %v8496_v53, %v12616_v30 }
 0x76b   : >> { %8509 = vrcp.f32 %v4964_v63  ;;  %v4966_v57 = vpop.xlane.xlu0 %4965  ;;  %v4642_v23 = vpack.c.bf16 %v4634_v2, %v4633_v58  ;;  %v12625_v2 = vunpack.c.h.bf16 %v11022_v51 }
 0x76c   : >> { %v8498_v4 = vpop.eup %8497  ;;  %8511 = vrcp.f32 %v4966_v57  ;;  %v12626_v57 = vld [vmem:[#allocation32_spill] sm:$0xff] }
 0x76d   : >> { %7774 = vmatmul.mubr.bf16.gmra.mxu1 %v4642_v23  ;;  %v4998_v11 = vmul.f32 %v8498_v4, %v12617_v61  ;;  %v8500_v62 = vpop.eup %8499  ;;  %v2812_v23 = vadd.f32 %v11171_v39, %v12626_v57 }
 0x76e   : >> { %7808 = vmatpush3.bf16.xpose.msra.mxu1 %v2138_v45  ;;  %v4968_v54 = vpop.xlane.xlu1 %4967  ;;  %v4999_v35 = vmul.f32 %v8500_v62, %v12618_v48  ;;  %v7536_v45 = vpop.f32.mrf.mxu1  ;;  %v12630_v48 = vld [vmem:[#allocation35_spill] sm:$0xff] }
 0x76f   : >> { %8513 = vrcp.f32 %v4968_v54  ;;  %v4970_v33 = vpop.xlane.xlu0 %4969  ;;  %v5013_v47 = vpack.c.bf16 %v4998_v11, %v4997_v43  ;;  %v12627_v43 = vld [vmem:[#allocation30_spill] sm:$0xff]  ;;  %v12628_v54 = vunpack.c.l.bf16 %v11029_v42 }
 0x770   : >> { %v8502_v52 = vpop.eup %8501  ;;  %8515 = vrcp.f32 %v4970_v33  ;;  %v11274_v58 = vpop.f32.mrf.mxu1  ;;  %v2804_v61 = vadd.f32 %v11176_v60, %v12627_v43  ;;  %v12631_v60 = vunpack.c.l.bf16 %v11050_v18  ;;  %v12640_v43 = vld [vmem:[#allocation52_spill] sm:$0xff] }
 0x771   : >> { %v5000_v22 = vmul.f32 %v8502_v52, %v12619_v59  ;;  %7809 = vmatprep.mubr.bf16.mxu1 %v5013_v47  ;;  %v8504_v31 = vpop.eup %8503  ;;  %v12629_v47 = vunpack.c.h.bf16 %v11029_v42 }
 0x772   : >> { %v4972_v34 = vpop.xlane.xlu1 %4971  ;;  %v5001_v17 = vmul.f32 %v8504_v31, %v12620_v6 }
 0x773   : >> { %v5014_v16 = vpack.c.bf16 %v5000_v22, %v4999_v35  ;;  %8517 = vrcp.f32 %v4972_v34  ;;  %v4974_v7 = vpop.xlane.xlu0 %4973  ;;  %v2815_v35 = vadd.f32 %v11186_v15, %v12630_v48 }
 0x774   : >> { %v8506_v36 = vpop.eup %8505  ;;  %8519 = vrcp.f32 %v4974_v7  ;;  %v12632_v7 = vunpack.c.h.bf16 %v11050_v18 }
 0x775   : >> { %7810 = vmatmul.mubr.bf16.vlgmr.msra.gmra.mxu1 %v5014_v16  ;;  %v5002_v56 = vmul.f32 %v8506_v36, %v12621_v3  ;;  %v8508_v28 = vpop.eup %8507 }
 0x776   : >> { %v4976_v49 = vpop.xlane.xlu1 %4975  ;;  %v5003_v44 = vmul.f32 %v8508_v28, %v12622_v0 }
 0x777   : >> { %8521 = vrcp.f32 %v4976_v49  ;;  %v5015_v8 = vpack.c.bf16 %v5002_v56, %v5001_v17  ;;  %v12633_v17 = vld [vmem:[#allocation46_spill] sm:$0xff] }
 0x778   : >> { %v8510_v13 = vpop.eup %8509  ;;  %v2828_v3 = vadd.f32 %v11203_v32, %v12633_v17  ;;  %v12634_v56 = vld [vmem:[#allocation50_spill] sm:$0xff] }
 0x779   : >> { %7813 = vmatprep.mubr.bf16.mxu1 %v5015_v8  ;;  %v5004_v1 = vmul.f32 %v8510_v13, %v12623_v9  ;;  %v8512_v29 = vpop.eup %8511  ;;  %v2820_v28 = vadd.f32 %v11211_v41, %v12634_v56  ;;  %v12635_v13 = vld [vmem:[#allocation42_spill] sm:$0xff] }
 0x77a   : >> { %v5005_v12 = vmul.f32 %v8512_v29, %v12624_v19  ;;  %v2831_v0 = vadd.f32 %v11218_v55, %v12635_v13  ;;  %v12636_v29 = vld [vmem:[#allocation44_spill] sm:$0xff]  ;;  %v12638_v41 = vld [vmem:[#allocation58_spill] sm:$0xff] }
 0x77b   : >> { %v5016_v24 = vpack.c.bf16 %v5004_v1, %v5003_v44  ;;  %v12637_v19 = vld [vmem:[#allocation60_spill] sm:$0xff] }
 0x77c   : >> { %v8514_v40 = vpop.eup %8513  ;;  %v2836_v32 = vadd.f32 %v11239_v37, %v12637_v19  ;;  %v12641_v37 = vld [vmem:[#allocation56_spill] sm:$0xff] }
 0x77d   : >> { %7814 = vmatmul.mubr.bf16.gmra.mxu1 %v5016_v24  ;;  %v5006_v53 = vmul.f32 %v8514_v40, %v12625_v2  ;;  %v8516_v63 = vpop.eup %8515  ;;  %v2844_v24 = vadd.f32 %v11231_v25, %v12636_v29  ;;  %v2852_v25 = vadd.f32 %v11264_v21, %v12640_v43 }
 0x77e   : >> { %v5007_v33 = vmul.f32 %v8516_v63, %v12628_v54  ;;  %v2863_v54 = vadd.f32 %v7536_v45, %v12641_v37 }
 0x77f   : >> { %v7571_v4 = vpop.f32.mrf.mxu1  ;;  %v5017_v30 = vpack.c.bf16 %v5006_v53, %v5005_v12  ;;  %v2847_v53 = vadd.f32 %v11246_v20, %v12638_v41 }
 0x780   : >> { %v8518_v27 = vpop.eup %8517  ;;  %v3230_v11 = vadd.f32 %v7571_v4, %v2812_v23  ;;  %v12639_v4 = vld [vmem:[#allocation54_spill] sm:$0xff] }
 0x781   : >> { %v3165_v62 = vpop.f32.mrf.mxu1  ;;  %7817 = vmatprep.mubr.bf16.mxu1 %v5017_v30  ;;  %v5008_v51 = vmul.f32 %v8518_v27, %v12629_v47  ;;  %v8520_v52 = vpop.eup %8519  ;;  %v2860_v30 = vadd.f32 %v11258_v38, %v12639_v4 }
 0x782   : >> { %v3228_v39 = vadd.f32 %v3165_v62, %v2804_v61  ;;  %v5009_v16 = vmul.f32 %v8520_v52, %v12631_v60 }
 0x783   : >> { %v7572_v59 = vpop.f32.mrf.mxu1  ;;  %v5018_v22 = vpack.c.bf16 %v5008_v51, %v5007_v33 }
 0x784   : >> { %v8522_v31 = vpop.eup %8521  ;;  %v3231_v34 = vadd.f32 %v7572_v59, %v2815_v35 }
 0x785   : >> { %7818 = vmatmul.mubr.bf16.gmra.mxu1 %v5018_v22  ;;  %v5010_v36 = vmul.f32 %v8522_v31, %v12632_v7  ;;  %v11294_v42 = vpop.f32.mrf.mxu1 }
 0x787   : >> { %v5019_v6 = vpack.c.bf16 %v5010_v36, %v5009_v16 }
 0x789   : >> { %7821 = vmatprep.mubr.bf16.mxu1 %v5019_v6 }
 0x78e   : >> { %v7575_v15 = vpop.f32.mrf.mxu1 }
 0x78f   : >> { %v3234_v49 = vadd.f32 %v7575_v15, %v2828_v3 }
 0x790   : >> { %v3181_v8 = vpop.f32.mrf.mxu1 }
 0x791   : >> { %v3232_v44 = vadd.f32 %v3181_v8, %v2820_v28 }
 0x792   : >> { %v7576_v9 = vpop.f32.mrf.mxu1 }
 0x793   : >> { %v3235_v18 = vadd.f32 %v7576_v9, %v2831_v0 }
 0x794   : >> { %v11302_v1 = vpop.f32.mrf.mxu1 }
 0x79e   : >> { %v7579_v40 = vpop.f32.mrf.mxu1 }
 0x79f   : >> { %v3238_v12 = vadd.f32 %v7579_v40, %v2844_v24  ;;  %v12642_v40 = vld [vmem:[#allocation48_spill] sm:$0xff] }
 0x7a0   : >> { %v3197_v2 = vpop.f32.mrf.mxu1 }
 0x7a1   : >> { %v3236_v63 = vadd.f32 %v3197_v2, %v2836_v32 }
 0x7a2   : >> { %v7580_v57 = vpop.f32.mrf.mxu1 }
 0x7a3   : >> { %v3239_v55 = vadd.f32 %v7580_v57, %v2847_v53 }
 0x7a4   : >> { %v11310_v23 = vpop.f32.mrf.mxu1 }
 0x7aa   : >> { %v7583_v27 = vpop.f32.mrf.mxu1 }
 0x7ab   : >> { %v3242_v61 = vadd.f32 %v7583_v27, %v2860_v30  ;;  %v12643_v27 = vld [vmem:[#allocation40_spill] sm:$0xff] }
 0x7ac   : >> { %v3213_v62 = vpop.f32.mrf.mxu1 }
 0x7ad   : >> { %v3240_v33 = vadd.f32 %v3213_v62, %v2852_v25 }
 0x7ae   : >> { %v7584_v47 = vpop.f32.mrf.mxu1 }
 0x7af   : >> { %v3243_v51 = vadd.f32 %v7584_v47, %v2863_v54 }
 0x7b0   : >> { %v11317_v20 = vpop.f32.mrf.mxu1 }
 0x7b2   : >> { %v7619_v52 = vpop.f32.mrf.mxu1 }
 0x7b3   : >> { %v3608_v48 = vadd.f32 %v7619_v52, %v3230_v11 }
 0x7b4   : >> { %v3543_v35 = vpop.f32.mrf.mxu1 }
 0x7b5   : >> { %v3606_v59 = vadd.f32 %v3543_v35, %v3228_v39 }
 0x7b6   : >> { %v7620_v22 = vpop.f32.mrf.mxu1 }
 0x7b7   : >> { %v3609_v31 = vadd.f32 %v7620_v22, %v3231_v34 }
 0x7b8   : >> { %v3546_v38 = vpop.f32.mrf.mxu1 }
 0x7ba   : >> { %v7623_v60 = vpop.f32.mrf.mxu1 }
 0x7bb   : >> { %v3612_v16 = vadd.f32 %v7623_v60, %v3234_v49 }
 0x7bc   : >> { %v3559_v7 = vpop.f32.mrf.mxu1 }
 0x7bd   : >> { %v3610_v21 = vadd.f32 %v3559_v7, %v3232_v44  ;;  %v2807_v44 = vadd.f32 %v11197_v50, %v12642_v40  ;;  %v2823_v50 = vadd.f32 %v11224_v5, %v12643_v27 }
 0x7be   : >> { %v7624_v36 = vpop.f32.mrf.mxu1 }
 0x7bf   : >> { %v3613_v6 = vadd.f32 %v7624_v36, %v3235_v18  ;;  %v3229_v2 = vadd.f32 %v11294_v42, %v2807_v44 }
 0x7c0   : >> { %v3562_v17 = vpop.f32.mrf.mxu1 }
 0x7c2   : >> { %v7627_v45 = vpop.f32.mrf.mxu1 }
 0x7c3   : >> { %v3616_v3 = vadd.f32 %v7627_v45, %v3238_v12  ;;  %v12645_v45 = vld [vmem:[#allocation72_spill] sm:$0xff] }
 0x7c4   : >> { %v3575_v15 = vpop.f32.mrf.mxu1 }
 0x7c5   : >> { %v3614_v56 = vadd.f32 %v3575_v15, %v3236_v63  ;;  %v3607_v63 = vadd.f32 %v3546_v38, %v3229_v2 }
 0x7c6   : >> { %v7628_v28 = vpop.f32.mrf.mxu1 }
 0x7c7   : >> { %v3617_v8 = vadd.f32 %v7628_v28, %v3239_v55 }
 0x7c8   : >> { %v3578_v13 = vpop.f32.mrf.mxu1 }
 0x7ca   : >> { %v7631_v11 = vpop.f32.mrf.mxu1 }
 0x7cb   : >> { %v3620_v0 = vadd.f32 %v7631_v11, %v3242_v61  ;;  %v3233_v61 = vadd.f32 %v11302_v1, %v2823_v50 }
 0x7cc   : >> { %v3591_v39 = vpop.f32.mrf.mxu1 }
 0x7cd   : >> { %v3618_v9 = vadd.f32 %v3591_v39, %v3240_v33  ;;  %v3611_v37 = vadd.f32 %v3562_v17, %v3233_v61 }
 0x7ce   : >> { %v7632_v34 = vpop.f32.mrf.mxu1 }
 0x7cf   : >> { %v3621_v29 = vadd.f32 %v7632_v34, %v3243_v51 }
 0x7d0   : >> { %v3594_v24 = vpop.f32.mrf.mxu1 }
 0x7d2   : >> { %v7667_v49 = vpop.f32.mrf.mxu1 }
 0x7d3   : >> { %v3986_v18 = vadd.f32 %v7667_v49, %v3608_v48  ;;  %v4980_v19 = vpop.xlane.xlu1 %4979  ;;  %v4978_v32 = vpop.xlane.xlu0 %4977 }
 0x7d4   : >> { %8523 = vrcp.f32 %v4980_v19  ;;  %v3921_v12 = vpop.f32.mrf.mxu1 }
 0x7d5   : >> { %8525 = vrcp.f32 %v4978_v32  ;;  %v11322_v41 = vadd.f32 %v3921_v12, %v3606_v59  ;;  %v12644_v59 = vld [vmem:[#allocation62_spill] sm:$0xff] }
 0x7d6   : >> { %v7668_v53 = vpop.f32.mrf.mxu1  ;;  %v2839_v5 = vadd.f32 %v11252_v26, %v12644_v59  ;;  %v2855_v26 = vadd.f32 %v11274_v58, %v12645_v45 }
 0x7d7   : >> { %v3987_v57 = vadd.f32 %v7668_v53, %v3609_v31 }
 0x7d8   : >> { %v3924_v55 = vpop.f32.mrf.mxu1  ;;  %v3237_v38 = vadd.f32 %v11310_v23, %v2839_v5 }
 0x7d9   : >> { %v11324_v4 = vadd.f32 %v3924_v55, %v3607_v63 }
 0x7da   : >> { %v7671_v30 = vpop.f32.mrf.mxu1 }
 0x7db   : >> { %v3990_v43 = vadd.f32 %v7671_v30, %v3612_v16 }
 0x7dc   : >> { %v3937_v25 = vpop.f32.mrf.mxu1 }
 0x7dd   : >> { %v11329_v62 = vadd.f32 %v3937_v25, %v3610_v21  ;;  %v3615_v21 = vadd.f32 %v3578_v13, %v3237_v38 }
 0x7de   : >> { %v7672_v42 = vpop.f32.mrf.mxu1 }
 0x7df   : >> { %v3991_v54 = vadd.f32 %v7672_v42, %v3613_v6 }
 0x7e0   : >> { %v3940_v33 = vpop.f32.mrf.mxu1 }
 0x7e1   : >> { %v8524_v47 = vpop.eup %8523  ;;  %v11331_v51 = vadd.f32 %v3940_v33, %v3611_v37 }
 0x7e2   : >> { %v8526_v52 = vpop.eup %8525  ;;  %v7675_v48 = vpop.f32.mrf.mxu1  ;;  %v5012_v35 = vmul.f32 %v8524_v47, %v4948_v10 }
 0x7e3   : >> { %v3994_v22 = vadd.f32 %v7675_v48, %v3616_v3  ;;  %v5011_v1 = vmul.f32 %v8526_v52, %v4947_v14  ;;  %v3241_v14 = vadd.f32 %v11317_v20, %v2855_v26 }
 0x7e4   : >> { %v3953_v31 = vpop.f32.mrf.mxu1 }
 0x7e5   : >> { %v11340_v60 = vadd.f32 %v3953_v31, %v3614_v56  ;;  %v5020_v16 = vpack.c.bf16 %v5012_v35, %v5011_v1  ;;  %v3619_v56 = vadd.f32 %v3594_v24, %v3241_v14 }
 0x7e6   : >> { %v7676_v7 = vpop.f32.mrf.mxu1 }
 0x7e7   : >> { %v3995_v36 = vadd.f32 %v7676_v7, %v3617_v8  ;;  %7822 = vmatmul.mubr.bf16.gmra.mxu1 %v5020_v16 }
 0x7e8   : >> { %v3956_v6 = vpop.f32.mrf.mxu1 }
 0x7e9   : >> { %v11342_v17 = vadd.f32 %v3956_v6, %v3615_v21 }
 0x7ea   : >> { %v7679_v10 = vpop.f32.mrf.mxu1 }
 0x7eb   : >> { %v3998_v3 = vadd.f32 %v7679_v10, %v3620_v0 }
 0x7ec   : >> { %v3969_v46 = vpop.f32.mrf.mxu1 }
 0x7ed   : >> { %v3996_v15 = vadd.f32 %v3969_v46, %v3618_v9 }
 0x7ee   : >> { %v7680_v23 = vpop.f32.mrf.mxu1 }
 0x7ef   : >> { %v3999_v28 = vadd.f32 %v7680_v23, %v3621_v29 }
 0x7f0   : >> { %v3972_v11 = vpop.f32.mrf.mxu1 }
 0x7f1   : >> { %v3997_v39 = vadd.f32 %v3972_v11, %v3619_v56 }
 0x7f2   : >> { %v7715_v13 = vpop.f32.mrf.mxu1 }
 0x7f3   : >> { %v4364_v8 = vadd.f32 %v7715_v13, %v3986_v18 }
 0x7f4   : >> { %v4299_v34 = vpop.f32.mrf.mxu1 }
 0x7f5   : >> { %v4362_v6 = vadd.f32 %v4299_v34, %v11322_v41  ;;  %v11378_v41 = vld [vmem:[%s5150_s22] ss:$0 sm:$0xff] }
 0x7f6   : >> { %v7716_v49 = vpop.f32.mrf.mxu1 }
 0x7f7   : >> { %v4365_v40 = vadd.f32 %v7716_v49, %v3987_v57 }
 0x7f8   : >> { %v4302_v44 = vpop.f32.mrf.mxu1 }
 0x7fa   : >> { %v7719_v19 = vpop.f32.mrf.mxu1 }
 0x7fb   : >> { %v4368_v32 = vadd.f32 %v7719_v19, %v3990_v43 }
 0x7fc   : >> { %v4315_v12 = vpop.f32.mrf.mxu1 }
 0x7fd   : >> { %v4366_v19 = vadd.f32 %v4315_v12, %v11329_v62 }
 0x7fe   : >> { %v7720_v58 = vpop.f32.mrf.mxu1 }
 0x7ff   : >> { %v11347_v0 = vadd.f32 %v7720_v58, %v3991_v54 }
 0x800   : >> { %v11349_v2 = vpop.f32.mrf.mxu1 }
 0x801   : >> { %v4367_v62 = vadd.f32 %v11349_v2, %v11331_v51 }
 0x802   : >> { %v7723_v20 = vpop.f32.mrf.mxu1 }
 0x803   : >> { %v11351_v9 = vadd.f32 %v7723_v20, %v3994_v22 }
 0x804   : >> { %v11353_v29 = vpop.f32.mrf.mxu1 }
 0x806   : >> { %v7724_v24 = vpop.f32.mrf.mxu1 }
 0x807   : >> { %v11355_v53 = vadd.f32 %v7724_v24, %v3995_v36 }
 0x808   : >> { %v11357_v18 = vpop.f32.mrf.mxu1 }
 0x80d   : >> { %v7727_v63 = vpop.f32.mrf.mxu1 }
 0x80e   : >> { %v4376_v57 = vadd.f32 %v7727_v63, %v3998_v3 }
 0x80f   : >> { %v4347_v55 = vpop.f32.mrf.mxu1 }
 0x810   : >> { %v4374_v30 = vadd.f32 %v4347_v55, %v3996_v15  ;;  %v4363_v15 = vadd.f32 %v4302_v44, %v11324_v4 }
 0x811   : >> { %v7728_v27 = vpop.f32.mrf.mxu1 }
 0x812   : >> { %v4377_v50 = vadd.f32 %v7728_v27, %v3999_v28  ;;  %v12646_v28 = vld [vmem:[#allocation16_spill] sm:$0xff] }
 0x813   : >> { %v4350_v43 = vpop.f32.mrf.mxu1 }
 0x814   : >> { %v4375_v25 = vadd.f32 %v4350_v43, %v3997_v39 }
 0x815   : >> { %v7763_v61 = vpop.f32.mrf.mxu1 }
 0x816   : >> { %v4742_v10 = vadd.f32 %v7763_v61, %v4364_v8  ;;  %v12647_v8 = vld [vmem:[#allocation18_spill] sm:$0xff] }
 0x817   : >> { %v4677_v42 = vpop.f32.mrf.mxu1 }
 0x818   : >> { %v4740_v3 = vadd.f32 %v4677_v42, %v4362_v6 }
 0x819   : >> { %v7764_v37 = vpop.f32.mrf.mxu1 }
 0x81a   : >> { %v4743_v23 = vadd.f32 %v7764_v37, %v4365_v40  ;;  %v12650_v37 = vld [vmem:[#allocation12_spill] sm:$0xff] }
 0x81b   : >> { %v4680_v54 = vpop.f32.mrf.mxu1 }
 0x81c   : >> { %v4741_v13 = vadd.f32 %v4680_v54, %v4363_v15  ;;  %v12653_v15 = vld [vmem:[#allocation13_spill] sm:$0xff] }
 0x81d   : >> { %v7767_v33 = vpop.f32.mrf.mxu1 }
 0x81e   : >> { %v4746_v20 = vadd.f32 %v7767_v33, %v4368_v32 }
 0x81f   : >> { %v4693_v47 = vpop.f32.mrf.mxu1 }
 0x820   : >> { %v4744_v4 = vadd.f32 %v4693_v47, %v4366_v19 }
 0x821   : >> { %v7768_v52 = vpop.f32.mrf.mxu1 }
 0x822   : >> { %v4747_v12 = vadd.f32 %v7768_v52, %v11347_v0  ;;  %v4370_v52 = vadd.f32 %v11353_v29, %v11340_v60  ;;  %v4371_v29 = vadd.f32 %v11357_v18, %v11342_v17  ;;  %v12654_v17 = vld [vmem:[#allocation8_spill] sm:$0xff] }
 0x823   : >> { %v4696_v48 = vpop.f32.mrf.mxu1 }
 0x824   : >> { %v4745_v42 = vadd.f32 %v4696_v48, %v4367_v62 }
 0x825   : >> { %v7771_v35 = vpop.f32.mrf.mxu1 }
 0x827   : >> { %v4709_v59 = vpop.f32.mrf.mxu1 }
 0x829   : >> { %v11359_v5 = vpop.f32.mrf.mxu1 }
 0x82b   : >> { %v11361_v22 = vpop.f32.mrf.mxu1 }
 0x82d   : >> { %v7775_v1 = vpop.f32.mrf.mxu1 }
 0x82e   : >> { %v11363_v31 = vadd.f32 %v7775_v1, %v4376_v57  ;;  %v12648_v57 = vld [vmem:[#allocation15_spill] sm:$0xff] }
 0x82f   : >> { %v4725_v38 = vpop.f32.mrf.mxu1 }
 0x830   : >> { %v11365_v16 = vadd.f32 %v4725_v38, %v4374_v30  ;;  %v12649_v30 = vld [vmem:[#allocation17_spill] sm:$0xff]  ;;  %v12651_v38 = vld [vmem:[#allocation14_spill] sm:$0xff] }
 0x831   : >> { %v7776_v7 = vpop.f32.mrf.mxu1 }
 0x832   : >> { %v11367_v21 = vadd.f32 %v7776_v7, %v4377_v50  ;;  %v4750_v7 = vadd.f32 %v7771_v35, %v11351_v9 }
 0x833   : >> { %v4728_v36 = vpop.f32.mrf.mxu1 }
 0x834   : >> { %v11370_v45 = vadd.f32 %v4728_v36, %v4375_v25 }
 0x835   : >> { %v7811_v26 = vpop.f32.mrf.mxu1 }
 0x836   : >> { %v5120_v46 = vadd.f32 %v7811_v26, %v4742_v10  ;;  %v4748_v10 = vadd.f32 %v4709_v59, %v4370_v52  ;;  %v4751_v59 = vadd.f32 %v11359_v5, %v11355_v53 }
 0x837   : >> { %v5055_v14 = vpop.f32.mrf.mxu1 }
 0x838   : >> { %v5118_v56 = vadd.f32 %v5055_v14, %v4740_v3  ;;  %v5136_v11 = vadd.f32 %v12646_v28, %v5120_v46  ;;  %v12652_v3 = vld [vmem:[#allocation11_spill] sm:$0xff] }
 0x839   : >> { %v7812_v39 = vpop.f32.mrf.mxu1 }
 0x83a   : >> { %v5134_v34 = vadd.f32 %v12647_v8, %v5118_v56  ;;  %v5121_v49 = vadd.f32 %v7812_v39, %v4743_v23  ;;  %v11386_v40 = vadd.f32 %v11378_v41, %v5136_v11  ;;  %v4749_v39 = vadd.f32 %v11361_v22, %v4371_v29 }
 0x83b   : >> { %v5058_v58 = vpop.f32.mrf.mxu1 }
 0x83c   : >> { %v11383_v24 = vadd.f32 %v11378_v41, %v5134_v34  ;;  %v5119_v63 = vadd.f32 %v5058_v58, %v4741_v13  ;;  %v5137_v55 = vadd.f32 %v12648_v57, %v5121_v49  ;;  %v5184_v47 = vsel %vm569_vm1, %v11386_v40, 0.0  ;;  %v12655_v49 = vld [vmem:[#allocation10_spill] sm:$0xff] }
 0x83d   : >> { %v7815_v44 = vpop.f32.mrf.mxu1 }
 0x83e   : >> { %v5135_v27 = vadd.f32 %v12649_v30, %v5119_v63  ;;  %v5124_v50 = vadd.f32 %v7815_v44, %v4746_v20  ;;  %v5178_v43 = vsel %vm569_vm1, %v11383_v24, 0.0  ;;  %v11402_v1 = vadd.f32 %v11378_v41, %v5137_v55  ;;  %v12656_v44 = vld [vmem:[#allocation7_spill] sm:$0xff]  ;;  %v12657_v55 = vld [vmem:[#allocation9_spill] sm:$0xff] }
 0x83f   : >> { %5179 = vadd.xlane.f32.xlu0 %v5178_v43  ;;  %v5071_v32 = vpop.f32.mrf.mxu1 }
 0x840   : >> { %v11396_v25 = vadd.f32 %v11378_v41, %v5135_v27  ;;  %v5122_v61 = vadd.f32 %v5071_v32, %v4744_v4  ;;  %v5140_v54 = vadd.f32 %v12650_v37, %v5124_v50  ;;  %v5187_v60 = vsel %vm569_vm1, %v11402_v1, 0.0 }
 0x841   : >> { %v7816_v33 = vpop.f32.mrf.mxu1 }
 0x842   : >> { %v5138_v51 = vadd.f32 %v12651_v38, %v5122_v61  ;;  %v5125_v2 = vadd.f32 %v7816_v33, %v4747_v12  ;;  %v5181_v0 = vsel %vm569_vm1, %v11396_v25, 0.0  ;;  %v11414_v26 = vadd.f32 %v11378_v41, %v5140_v54 }
 0x843   : >> { %5185 = vadd.xlane.f32.xlu0 %v5184_v47  ;;  %5182 = vadd.xlane.f32.xlu1 %v5181_v0  ;;  %v5074_v48 = vpop.f32.mrf.mxu1  ;;  %v12658_v47 = vld [vmem:[#allocation4_spill] sm:$0xff] }
 0x844   : >> { %v11411_v36 = vadd.f32 %v11378_v41, %v5138_v51  ;;  %v5123_v6 = vadd.f32 %v5074_v48, %v4745_v42  ;;  %v5141_v46 = vadd.f32 %v12652_v3, %v5125_v2  ;;  %v5196_v34 = vsel %vm569_vm1, %v11414_v26, 0.0  ;;  %v12659_v51 = vld [vmem:[#allocation6_spill] sm:$0xff]  ;;  %v12661_v3 = vld [vmem:[#allocation5_spill] sm:$0xff] }
 0x845   : >> { %v7819_v14 = vpop.f32.mrf.mxu1 }
 0x846   : >> { %v5139_v23 = vadd.f32 %v12653_v15, %v5123_v6  ;;  %v5128_v56 = vadd.f32 %v7819_v14, %v4750_v7  ;;  %v5190_v9 = vsel %vm569_vm1, %v11411_v36, 0.0  ;;  %v11431_v13 = vadd.f32 %v11378_v41, %v5141_v46 }
 0x847   : >> { %5188 = vadd.xlane.f32.xlu1 %v5187_v60  ;;  %5191 = vadd.xlane.f32.xlu0 %v5190_v9  ;;  %v5087_v35 = vpop.f32.mrf.mxu1 }
 0x848   : >> { %v11427_v28 = vadd.f32 %v11378_v41, %v5139_v23  ;;  %v5126_v11 = vadd.f32 %v5087_v35, %v4748_v10  ;;  %v5144_v18 = vadd.f32 %v12654_v17, %v5128_v56  ;;  %v5199_v63 = vsel %vm569_vm1, %v11431_v13, 0.0 }
 0x849   : >> { %v7820_v8 = vpop.f32.mrf.mxu1 }
 0x84a   : >> { %v5142_v19 = vadd.f32 %v12655_v49, %v5126_v11  ;;  %v5129_v58 = vadd.f32 %v7820_v8, %v4751_v59  ;;  %v5193_v53 = vsel %vm569_vm1, %v11427_v28, 0.0  ;;  %v11445_v4 = vadd.f32 %v11378_v41, %v5144_v18 }
 0x84b   : >> { %5197 = vadd.xlane.f32.xlu0 %v5196_v34  ;;  %5194 = vadd.xlane.f32.xlu1 %v5193_v53  ;;  %v5090_v5 = vpop.f32.mrf.mxu1 }
 0x84c   : >> { %v11440_v22 = vadd.f32 %v11378_v41, %v5142_v19  ;;  %v5127_v20 = vadd.f32 %v5090_v5, %v4749_v39  ;;  %v5145_v57 = vadd.f32 %v12656_v44, %v5129_v58  ;;  %v5208_v62 = vsel %vm569_vm1, %v11445_v4, 0.0 }
 0x84e   : >> { %v5143_v30 = vadd.f32 %v12657_v55, %v5127_v20  ;;  %v5202_v27 = vsel %vm569_vm1, %v11440_v22, 0.0  ;;  %v11455_v43 = vadd.f32 %v11378_v41, %v5145_v57 }
 0x84f   : >> { %5200 = vadd.xlane.f32.xlu1 %v5199_v63  ;;  %5203 = vadd.xlane.f32.xlu0 %v5202_v27 }
 0x850   : >> { %v11452_v50 = vadd.f32 %v11378_v41, %v5143_v30  ;;  %v5211_v12 = vsel %vm569_vm1, %v11455_v43, 0.0 }
 0x852   : >> { %v5205_v32 = vsel %vm569_vm1, %v11452_v50, 0.0 }
 0x853   : >> { %5209 = vadd.xlane.f32.xlu0 %v5208_v62  ;;  %5206 = vadd.xlane.f32.xlu1 %v5205_v32 }
 0x857   : >> { %5212 = vadd.xlane.f32.xlu1 %v5211_v12 }
 0x8a7   : >> { %v7823_v61 = vpop.f32.mrf.mxu1 }
 0x8a8   : >> { %v5132_v42 = vadd.f32 %v7823_v61, %v11363_v31  ;;  %v12660_v31 = vld [vmem:[#allocation3_spill] sm:$0xff] }
 0x8a9   : >> { %v5103_v37 = vpop.f32.mrf.mxu1 }
 0x8aa   : >> { %v5130_v54 = vadd.f32 %v5103_v37, %v11365_v16  ;;  %v5148_v38 = vadd.f32 %v12658_v47, %v5132_v42 }
 0x8ab   : >> { %v7824_v33 = vpop.f32.mrf.mxu1 }
 0x8ac   : >> { %v5146_v2 = vadd.f32 %v12659_v51, %v5130_v54  ;;  %v5133_v0 = vadd.f32 %v7824_v33, %v11367_v21  ;;  %v11473_v6 = vadd.f32 %v11378_v41, %v5148_v38 }
 0x8ad   : >> { %v5106_v52 = vpop.f32.mrf.mxu1 }
 0x8ae   : >> { %v11469_v48 = vadd.f32 %v11378_v41, %v5146_v2  ;;  %v5131_v7 = vadd.f32 %v5106_v52, %v11370_v45  ;;  %v5149_v10 = vadd.f32 %v12660_v31, %v5133_v0  ;;  %v5220_v45 = vsel %vm569_vm1, %v11473_v6, 0.0 }
 0x8b0   : >> { %v5147_v16 = vadd.f32 %v12661_v3, %v5131_v7  ;;  %v5214_v46 = vsel %vm569_vm1, %v11469_v48, 0.0  ;;  %v11483_v21 = vadd.f32 %v11378_v41, %v5149_v10 }
 0x8b1   : >> { %5215 = vadd.xlane.f32.xlu0 %v5214_v46 }
 0x8b2   : >> { %v11480_v14 = vadd.f32 %v11378_v41, %v5147_v16  ;;  %v5223_v23 = vsel %vm569_vm1, %v11483_v21, 0.0 }
 0x8b4   : >> { %v5217_v15 = vsel %vm569_vm1, %v11480_v14, 0.0 }
 0x8b5   : >> { %5221 = vadd.xlane.f32.xlu0 %v5220_v45  ;;  %5218 = vadd.xlane.f32.xlu1 %v5217_v15 }
 0x8b9   : >> { %5224 = vadd.xlane.f32.xlu1 %v5223_v23 }
 0x8c8   : >> { %v5180_v56 = vpop.xlane.xlu0 %5179 }
 0x8c9   : >> { %v5226_v60 = vmul.f32 0.015625, %v5180_v56 }
 0x8cb   : >> { %v11492_v9 = vsub.f32 %v11383_v24, %v5226_v60 }
 0x8cc   : >> { %v5183_v29 = vpop.xlane.xlu1 %5182  ;;  %v5186_v41 = vpop.xlane.xlu0 %5185 }
 0x8cd   : >> { %v5227_v35 = vmul.f32 0.015625, %v5183_v29  ;;  %v5228_v59 = vmul.f32 0.015625, %v5186_v41  ;;  %v5258_v11 = vmul.f32 %v11492_v9, %v11492_v9 }
 0x8cf   : >> { %v11497_v39 = vsub.f32 %v11396_v25, %v5227_v35  ;;  %v11500_v8 = vsub.f32 %v11386_v40, %v5228_v59  ;;  %v5274_v34 = vsel %vm569_vm1, %v5258_v11, 0.0 }
 0x8d0   : >> { %v5189_v17 = vpop.xlane.xlu1 %5188  ;;  %5275 = vadd.xlane.f32.xlu0 %v5274_v34  ;;  %v5192_v18 = vpop.xlane.xlu0 %5191 }
 0x8d1   : >> { %v5229_v49 = vmul.f32 0.015625, %v5189_v17  ;;  %v5230_v19 = vmul.f32 0.015625, %v5192_v18  ;;  %v5259_v58 = vmul.f32 %v11497_v39, %v11497_v39  ;;  %v5260_v53 = vmul.f32 %v11500_v8, %v11500_v8 }
 0x8d3   : >> { %v11508_v5 = vsub.f32 %v11402_v1, %v5229_v49  ;;  %v11511_v20 = vsub.f32 %v11411_v36, %v5230_v19  ;;  %v5277_v63 = vsel %vm569_vm1, %v5259_v58, 0.0  ;;  %v5280_v44 = vsel %vm569_vm1, %v5260_v53, 0.0  ;;  %v8085_v58 = vld [vmem:[%s5440_s26 + $0x34] ss:$8 sps:$4 sm:$0xff]   ;;  %v8083_v53 = vld [vmem:[%s5440_s26 + $0x30] ss:$8 sps:$4 sm:$0xff]  }
 0x8d4   : >> { %v5195_v57 = vpop.xlane.xlu1 %5194  ;;  %5278 = vadd.xlane.f32.xlu1 %v5277_v63  ;;  %5281 = vadd.xlane.f32.xlu0 %v5280_v44  ;;  %v5198_v55 = vpop.xlane.xlu0 %5197  ;;  %v8088_v63 = vld [vmem:[%s5440_s26 + $0x24] ss:$8 sps:$4 sm:$0xff]   ;;  %v8086_v44 = vld [vmem:[%s5440_s26 + $0x20] ss:$8 sps:$4 sm:$0xff]  }
 0x8d5   : >> { %v5231_v30 = vmul.f32 0.015625, %v5195_v57  ;;  %v5232_v27 = vmul.f32 0.015625, %v5198_v55  ;;  %v5261_v62 = vmul.f32 %v11508_v5, %v11508_v5  ;;  %v5262_v32 = vmul.f32 %v11511_v20, %v11511_v20  ;;  %5535 = vmatprep.subr.bf16.mxu0 %v8085_v58  ;;  %v8091_v57 = vld [vmem:[%s5440_s26 + $0x14] ss:$8 sps:$4 sm:$0xff]   ;;  %v8089_v55 = vld [vmem:[%s5440_s26 + $0x10] ss:$8 sps:$4 sm:$0xff]  }
 0x8d6   : >> { %5536 = vmatpush1.bf16.msra.mxu0 %v8083_v53 }
 0x8d7   : >> { %v11520_v12 = vsub.f32 %v11427_v28, %v5231_v30  ;;  %v11523_v61 = vsub.f32 %v11414_v26, %v5232_v27  ;;  %v5283_v42 = vsel %vm569_vm1, %v5261_v62, 0.0  ;;  %v5286_v37 = vsel %vm569_vm1, %v5262_v32, 0.0  ;;  %5537 = vmatprep.subr.bf16.mxu0 %v8088_v63  ;;  %v8094_v30 = vld [vmem:[%s5440_s26 + $0x4] ss:$8 sps:$4 sm:$0xff]   ;;  %v8092_v27 = vld [vmem:[%s5440_s26] ss:$8 sps:$4 sm:$0xff]  }
 0x8d8   : >> { %v5201_v54 = vpop.xlane.xlu1 %5200  ;;  %5284 = vadd.xlane.f32.xlu1 %v5283_v42  ;;  %5287 = vadd.xlane.f32.xlu0 %v5286_v37  ;;  %v5204_v33 = vpop.xlane.xlu0 %5203  ;;  %v8740_v62 = vmov 0  }
 0x8d9   : >> { %v5233_v47 = vmul.f32 0.015625, %v5201_v54  ;;  %v5234_v38 = vmul.f32 0.015625, %v5204_v33  ;;  %v5263_v51 = vmul.f32 %v11520_v12, %v11520_v12  ;;  %v5264_v2 = vmul.f32 %v11523_v61, %v11523_v61  ;;  %5559 = vmatprep.mubr.bf16.mxu0 %v8740_v62 }
 0x8da   : >> { %5538 = vmatpush1.bf16.msra.mxu0 %v8086_v44 }
 0x8db   : >> { %v11532_v0 = vsub.f32 %v11431_v13, %v5233_v47  ;;  %v11535_v52 = vsub.f32 %v11440_v22, %v5234_v38  ;;  %v5289_v7 = vsel %vm569_vm1, %v5263_v51, 0.0  ;;  %v5292_v31 = vsel %vm569_vm1, %v5264_v2, 0.0  ;;  %5539 = vmatprep.subr.bf16.mxu0 %v8091_v57 }
 0x8dc   : >> { %v5207_v10 = vpop.xlane.xlu1 %5206  ;;  %5290 = vadd.xlane.f32.xlu1 %v5289_v7  ;;  %5293 = vadd.xlane.f32.xlu0 %v5292_v31  ;;  %v5210_v3 = vpop.xlane.xlu0 %5209 }
 0x8dd   : >> { %v5235_v16 = vmul.f32 0.015625, %v5207_v10  ;;  %v5236_v46 = vmul.f32 0.015625, %v5210_v3  ;;  %v5265_v45 = vmul.f32 %v11532_v0, %v11532_v0  ;;  %v5266_v15 = vmul.f32 %v11535_v52, %v11535_v52 }
 0x8de   : >> { %5540 = vmatpush1.bf16.msra.mxu0 %v8089_v55 }
 0x8df   : >> { %v11544_v23 = vsub.f32 %v11452_v50, %v5235_v16  ;;  %v11547_v56 = vsub.f32 %v11445_v4, %v5236_v46  ;;  %v5295_v60 = vsel %vm569_vm1, %v5265_v45, 0.0  ;;  %v5298_v29 = vsel %vm569_vm1, %v5266_v15, 0.0  ;;  %5541 = vmatprep.subr.bf16.mxu0 %v8094_v30 }
 0x8e0   : >> { %v5213_v41 = vpop.xlane.xlu1 %5212  ;;  %5296 = vadd.xlane.f32.xlu1 %v5295_v60  ;;  %5299 = vadd.xlane.f32.xlu0 %v5298_v29 }
 0x8e1   : >> { %v5237_v35 = vmul.f32 0.015625, %v5213_v41  ;;  %v5267_v59 = vmul.f32 %v11544_v23, %v11544_v23  ;;  %v5268_v11 = vmul.f32 %v11547_v56, %v11547_v56 }
 0x8e2   : >> { %5542 = vmatpush1.bf16.msra.mxu0 %v8092_v27 }
 0x8e3   : >> { %v11556_v34 = vsub.f32 %v11455_v43, %v5237_v35  ;;  %v5301_v17 = vsel %vm569_vm1, %v5267_v59, 0.0  ;;  %v5304_v18 = vsel %vm569_vm1, %v5268_v11, 0.0 }
 0x8e4   : >> { %5302 = vadd.xlane.f32.xlu1 %v5301_v17  ;;  %5305 = vadd.xlane.f32.xlu0 %v5304_v18 }
 0x8e5   : >> { %v5269_v49 = vmul.f32 %v11556_v34, %v11556_v34 }
 0x8e7   : >> { %v5307_v19 = vsel %vm569_vm1, %v5269_v49, 0.0 }
 0x8e8   : >> { %5308 = vadd.xlane.f32.xlu1 %v5307_v19 }
 0x93a   : >> { %v5216_v32 = vpop.xlane.xlu0 %5215 }
 0x93b   : >> { %v5238_v42 = vmul.f32 0.015625, %v5216_v32 }
 0x93d   : >> { %v11569_v37 = vsub.f32 %v11469_v48, %v5238_v42 }
 0x93e   : >> { %v5219_v54 = vpop.xlane.xlu1 %5218  ;;  %v5222_v33 = vpop.xlane.xlu0 %5221 }
 0x93f   : >> { %v5239_v47 = vmul.f32 0.015625, %v5219_v54  ;;  %v5240_v38 = vmul.f32 0.015625, %v5222_v33  ;;  %v5270_v51 = vmul.f32 %v11569_v37, %v11569_v37 }
 0x941   : >> { %v11574_v2 = vsub.f32 %v11480_v14, %v5239_v47  ;;  %v11577_v7 = vsub.f32 %v11473_v6, %v5240_v38  ;;  %v5310_v31 = vsel %vm569_vm1, %v5270_v51, 0.0 }
 0x942   : >> { %v5225_v10 = vpop.xlane.xlu1 %5224  ;;  %5311 = vadd.xlane.f32.xlu0 %v5310_v31 }
 0x943   : >> { %v5241_v3 = vmul.f32 0.015625, %v5225_v10  ;;  %v5271_v16 = vmul.f32 %v11574_v2, %v11574_v2  ;;  %v5272_v46 = vmul.f32 %v11577_v7, %v11577_v7  ;;  %v11596_v10 = vld [vmem:[%s5174_s29] ss:$0 sm:$0xff] }
 0x945   : >> { %v11585_v45 = vsub.f32 %v11483_v21, %v5241_v3  ;;  %v5313_v15 = vsel %vm569_vm1, %v5271_v16, 0.0  ;;  %v5316_v60 = vsel %vm569_vm1, %v5272_v46, 0.0 }
 0x946   : >> { %5314 = vadd.xlane.f32.xlu1 %v5313_v15  ;;  %5317 = vadd.xlane.f32.xlu0 %v5316_v60 }
 0x947   : >> { %v5273_v29 = vmul.f32 %v11585_v45, %v11585_v45 }
 0x949   : >> { %v5319_v41 = vsel %vm569_vm1, %v5273_v29, 0.0 }
 0x94a   : >> { %5320 = vadd.xlane.f32.xlu1 %v5319_v41 }
 0x959   : >> { %v5276_v35 = vpop.xlane.xlu0 %5275 }
 0x95a   : >> { %v5322_v59 = vmul.f32 0.015625, %v5276_v35 }
 0x95c   : >> { %v5338_v11 = vadd.f32 1e-05, %v5322_v59  ;;  %v11604_v59 = vld [vmem:[%s5176_s19] ss:$0 sm:$0xff] }
 0x95d   : >> { %v5279_v17 = vpop.xlane.xlu1 %5278  ;;  %v5282_v18 = vpop.xlane.xlu0 %5281 }
 0x95e   : >> { %8527 = vrsqrt.f32 %v5338_v11  ;;  %v5323_v49 = vmul.f32 0.015625, %v5279_v17  ;;  %v5324_v19 = vmul.f32 0.015625, %v5282_v18 }
 0x960   : >> { %v5339_v58 = vadd.f32 1e-05, %v5323_v49  ;;  %v5340_v53 = vadd.f32 1e-05, %v5324_v19 }
 0x961   : >> { %v5285_v63 = vpop.xlane.xlu1 %5284  ;;  %v5288_v44 = vpop.xlane.xlu0 %5287 }
 0x962   : >> { %8529 = vrsqrt.f32 %v5339_v58  ;;  %v5325_v57 = vmul.f32 0.015625, %v5285_v63  ;;  %v5326_v30 = vmul.f32 0.015625, %v5288_v44 }
 0x963   : >> { %8531 = vrsqrt.f32 %v5340_v53 }
 0x964   : >> { %v5341_v55 = vadd.f32 1e-05, %v5325_v57  ;;  %v5342_v54 = vadd.f32 1e-05, %v5326_v30 }
 0x965   : >> { %v5291_v27 = vpop.xlane.xlu1 %5290  ;;  %v5294_v42 = vpop.xlane.xlu0 %5293 }
 0x966   : >> { %8533 = vrsqrt.f32 %v5341_v55  ;;  %v5327_v32 = vmul.f32 0.015625, %v5291_v27  ;;  %v5328_v31 = vmul.f32 0.015625, %v5294_v42  ;;  %v8095_v55 = vld [vmem:[%s11613_s24 + $0x78] sm:$0xff]  }
 0x967   : >> { %7205 = vmatprep.subr.bf16.mxu1 %v8095_v55 }
 0x968   : >> { %v5343_v33 = vadd.f32 1e-05, %v5327_v32  ;;  %v5344_v41 = vadd.f32 1e-05, %v5328_v31  ;;  %v8096_v32 = vld [vmem:[%s11613_s24 + $0x38] sm:$0xff]  }
 0x969   : >> { %v5297_v47 = vpop.xlane.xlu1 %5296  ;;  %v5300_v16 = vpop.xlane.xlu0 %5299  ;;  %7206 = vmatpush3.bf16.msra.mxu1 %v8096_v32 }
 0x96a   : >> { %8535 = vrsqrt.f32 %v5343_v33  ;;  %v5329_v38 = vmul.f32 0.015625, %v5297_v47  ;;  %v5330_v35 = vmul.f32 0.015625, %v5300_v16  ;;  %v8097_v47 = vld [vmem:[%s11613_s24 + $0x70] sm:$0xff]  }
 0x96b   : >> { %v8528_v51 = vpop.eup %8527  ;;  %8537 = vrsqrt.f32 %v5342_v54  ;;  %7207 = vmatprep.subr.bf16.mxu1 %v8097_v47 }
 0x96c   : >> { %v5370_v3 = vmul.f32 %v8528_v51, %v11492_v9  ;;  %v5345_v15 = vadd.f32 1e-05, %v5329_v38  ;;  %v5346_v58 = vadd.f32 1e-05, %v5330_v35  ;;  %v8099_v51 = vld [vmem:[%s11613_s24 + $0x68] sm:$0xff]  }
 0x96d   : >> { %v5303_v46 = vpop.xlane.xlu1 %5302  ;;  %v5306_v57 = vpop.xlane.xlu0 %5305 }
 0x96e   : >> { %v5392_v29 = vmul.f32 %v11596_v10, %v5370_v3  ;;  %v5331_v17 = vmul.f32 0.015625, %v5303_v46  ;;  %8539 = vrsqrt.f32 %v5345_v15  ;;  %v5332_v54 = vmul.f32 0.015625, %v5306_v57 }
 0x96f   : >> { %v8530_v60 = vpop.eup %8529  ;;  %8541 = vrsqrt.f32 %v5344_v41  ;;  %v8101_v41 = vld [vmem:[%s11613_s24 + $0x60] sm:$0xff]  }
 0x970   : >> { %v5371_v11 = vmul.f32 %v8530_v60, %v11497_v39  ;;  %v8532_v9 = vpop.eup %8531  ;;  %v5414_v19 = vadd.f32 %v11604_v59, %v5392_v29  ;;  %v5347_v44 = vadd.f32 1e-05, %v5331_v17  ;;  %v5348_v46 = vadd.f32 1e-05, %v5332_v54  ;;  %v8100_v29 = vld [vmem:[%s11613_s24 + $0x28] sm:$0xff]  }
 0x971   : >> { %v5372_v53 = vmul.f32 %v8532_v9, %v11500_v8  ;;  %v5309_v33 = vpop.xlane.xlu1 %5308 }
 0x972   : >> { %v5393_v18 = vmul.f32 %v11596_v10, %v5371_v11  ;;  %8543 = vrsqrt.f32 %v5347_v44  ;;  %v5333_v3 = vmul.f32 0.015625, %v5309_v33 }
 0x973   : >> { %v8534_v49 = vpop.eup %8533  ;;  %v5394_v8 = vmul.f32 %v11596_v10, %v5372_v53  ;;  %8545 = vrsqrt.f32 %v5346_v58 }
 0x974   : >> { %v5415_v39 = vadd.f32 %v11604_v59, %v5393_v18  ;;  %v5373_v63 = vmul.f32 %v8534_v49, %v11508_v5  ;;  %v8098_v5 = vld [vmem:[%s11613_s24 + $0x30] sm:$0xff]   ;;  %v5349_v35 = vadd.f32 1e-05, %v5333_v3  ;;  %v8103_v18 = vld [vmem:[%s11613_s24 + $0x58] sm:$0xff]  }
 0x975   : >> { %v5416_v60 = vadd.f32 %v11604_v59, %v5394_v8  ;;  %7208 = vmatpush3.bf16.msra.mxu1 %v8098_v5 }
 0x976   : >> { %v5430_v30 = vpack.c.bf16 %v5415_v39, %v5414_v19  ;;  %v5395_v27 = vmul.f32 %v11596_v10, %v5373_v63  ;;  %7209 = vmatprep.subr.bf16.mxu1 %v8099_v51  ;;  %8547 = vrsqrt.f32 %v5349_v35  ;;  %v8104_v63 = vld [vmem:[%s11613_s24 + $0x18] sm:$0xff]   ;;  %v8109_v35 = vld [vmem:[%s11613_s24 + $0x40] sm:$0xff]  }
 0x977   : >> { %v8536_v42 = vpop.eup %8535  ;;  %8549 = vrsqrt.f32 %v5348_v46 }
 0x978   : >> { %6804 = vmatmul.mubr.msk.bf16.vlgmr.msra.gmra.mxu0 %vm569_vm1, %v5430_v30  ;;  %v8538_v38 = vpop.eup %8537  ;;  %v5375_v31 = vmul.f32 %v8536_v42, %v11520_v12  ;;  %v5417_v16 = vadd.f32 %v11604_v59, %v5395_v27  ;;  %v8102_v12 = vld [vmem:[%s11613_s24 + $0x20] sm:$0xff]  }
 0x979   : >> { %5569 = vmatprep.mubr.bf16.mxu0 %v8740_v62  ;;  %v5374_v15 = vmul.f32 %v8538_v38, %v11511_v20  ;;  %7210 = vmatpush3.bf16.msra.mxu1 %v8100_v29  ;;  %v8107_v29 = vld [vmem:[%s11613_s24 + $0x48] sm:$0xff]  }
 0x97a   : >> { %v5431_v11 = vpack.c.bf16 %v5417_v16, %v5416_v60  ;;  %v5397_v17 = vmul.f32 %v11596_v10, %v5375_v31  ;;  %7211 = vmatprep.subr.bf16.mxu1 %v8101_v41  ;;  %v8106_v60 = vld [vmem:[%s11613_s24 + $0x10] sm:$0xff]   ;;  %v8108_v41 = vld [vmem:[%s11613_s24 + $0x8] sm:$0xff]  }
 0x97b   : >> { %v8540_v9 = vpop.eup %8539  ;;  %v5396_v20 = vmul.f32 %v11596_v10, %v5374_v15  ;;  %v8105_v15 = vld [vmem:[%s11613_s24 + $0x50] sm:$0xff]  }
 0x97c   : >> { %v8542_v49 = vpop.eup %8541  ;;  %v5377_v19 = vmul.f32 %v8540_v9, %v11532_v0  ;;  %v5419_v58 = vadd.f32 %v11604_v59, %v5397_v17 }
 0x97d   : >> { %v5376_v39 = vmul.f32 %v8542_v49, %v11523_v61  ;;  %v5418_v53 = vadd.f32 %v11604_v59, %v5396_v20  ;;  %7212 = vmatpush3.bf16.msra.mxu1 %v8102_v12 }
 0x97e   : >> { %7213 = vmatprep.subr.bf16.mxu1 %v8103_v18  ;;  %v5399_v57 = vmul.f32 %v11596_v10, %v5377_v19 }
 0x97f   : >> { %v5432_v44 = vpack.c.bf16 %v5419_v58, %v5418_v53  ;;  %v8544_v55 = vpop.eup %8543  ;;  %v5398_v30 = vmul.f32 %v11596_v10, %v5376_v39 }
 0x980   : >> { %6805 = vmatmul.mubr.msk.bf16.gmra.mxu0 %vm569_vm1, %v5431_v11  ;;  %v8546_v0 = vpop.eup %8545  ;;  %v5379_v61 = vmul.f32 %v8544_v55, %v11544_v23  ;;  %v5421_v27 = vadd.f32 %v11604_v59, %v5399_v57  ;;  %v8110_v11 = vld [vmem:[%s11613_s24] sm:$0xff]  }
 0x981   : >> { %5579 = vmatprep.mubr.bf16.mxu0 %v8740_v62  ;;  %7214 = vmatpush3.bf16.msra.mxu1 %v8104_v63  ;;  %v5378_v32 = vmul.f32 %v8546_v0, %v11535_v52  ;;  %v5420_v42 = vadd.f32 %v11604_v59, %v5398_v30 }
 0x982   : >> { %v5401_v33 = vmul.f32 %v11596_v10, %v5379_v61  ;;  %7215 = vmatprep.subr.bf16.mxu1 %v8105_v15 }
 0x983   : >> { %v5433_v54 = vpack.c.bf16 %v5421_v27, %v5420_v42  ;;  %v8548_v47 = vpop.eup %8547  ;;  %v5400_v8 = vmul.f32 %v11596_v10, %v5378_v32 }
 0x984   : >> { %v8550_v5 = vpop.eup %8549  ;;  %v5381_v23 = vmul.f32 %v8548_v47, %v11556_v34  ;;  %v5423_v38 = vadd.f32 %v11604_v59, %v5401_v33 }
 0x985   : >> { %v5380_v52 = vmul.f32 %v8550_v5, %v11547_v56  ;;  %v5422_v51 = vadd.f32 %v11604_v59, %v5400_v8  ;;  %7216 = vmatpush3.bf16.msra.mxu1 %v8106_v60 }
 0x986   : >> { %v5403_v3 = vmul.f32 %v11596_v10, %v5381_v23  ;;  %7217 = vmatprep.subr.bf16.mxu1 %v8107_v29 }
 0x987   : >> { %v5434_v31 = vpack.c.bf16 %v5423_v38, %v5422_v51  ;;  %v5402_v16 = vmul.f32 %v11596_v10, %v5380_v52 }
 0x988   : >> { %6806 = vmatmul.mubr.msk.bf16.gmra.mxu0 %vm569_vm1, %v5432_v44  ;;  %v5425_v34 = vadd.f32 %v11604_v59, %v5403_v3  ;;  %v5451_v3 = vld [vmem:[%s5450_s28] sm:$0x3] }
 0x989   : >> { %5589 = vmatprep.mubr.bf16.mxu0 %v8740_v62  ;;  %v5424_v46 = vadd.f32 %v11604_v59, %v5402_v16  ;;  %7218 = vmatpush3.bf16.msra.mxu1 %v8108_v41 }
 0x98a   : >> { %7219 = vmatprep.subr.bf16.mxu1 %v8109_v35 }
 0x98b   : >> { %v5435_v56 = vpack.c.bf16 %v5425_v34, %v5424_v46 }
 0x98d   : >> { %7220 = vmatpush3.bf16.msra.mxu1 %v8110_v11 }
 0x990   : >> { %6807 = vmatmul.mubr.msk.bf16.gmra.mxu0 %vm569_vm1, %v5433_v54 }
 0x991   : >> { %5599 = vmatprep.mubr.bf16.mxu0 %v8740_v62 }
 0x998   : >> { %6808 = vmatmul.mubr.msk.bf16.gmra.mxu0 %vm569_vm1, %v5434_v31 }
 0x999   : >> { %5609 = vmatprep.mubr.bf16.mxu0 %v8740_v62 }
 0x9a0   : >> { %6809 = vmatmul.mubr.msk.bf16.gmra.mxu0 %vm569_vm1, %v5435_v56 }
 0x9a1   : >> { %5619 = vmatprep.mubr.bf16.mxu0 %v8740_v62 }
 0x9cb   : >> { %v5312_v17 = vpop.xlane.xlu0 %5311 }
 0x9cc   : >> { %v5334_v12 = vmul.f32 0.015625, %v5312_v17 }
 0x9ce   : >> { %v5350_v9 = vadd.f32 1e-05, %v5334_v12 }
 0x9cf   : >> { %v5315_v18 = vpop.xlane.xlu1 %5314  ;;  %v5318_v49 = vpop.xlane.xlu0 %5317 }
 0x9d0   : >> { %8551 = vrsqrt.f32 %v5350_v9  ;;  %v5335_v20 = vmul.f32 0.015625, %v5315_v18  ;;  %v5336_v19 = vmul.f32 0.015625, %v5318_v49 }
 0x9d2   : >> { %v5351_v58 = vadd.f32 1e-05, %v5335_v20  ;;  %v5352_v39 = vadd.f32 1e-05, %v5336_v19 }
 0x9d3   : >> { %v5321_v53 = vpop.xlane.xlu1 %5320 }
 0x9d4   : >> { %8553 = vrsqrt.f32 %v5351_v58  ;;  %v5337_v63 = vmul.f32 0.015625, %v5321_v53 }
 0x9d5   : >> { %8555 = vrsqrt.f32 %v5352_v39 }
 0x9d6   : >> { %v5353_v44 = vadd.f32 1e-05, %v5337_v63 }
 0x9d8   : >> { %8557 = vrsqrt.f32 %v5353_v44 }
 0x9dd   : >> { %v8552_v57 = vpop.eup %8551 }
 0x9de   : >> { %v5382_v55 = vmul.f32 %v8552_v57, %v11569_v37 }
 0x9e0   : >> { %v5404_v61 = vmul.f32 %v11596_v10, %v5382_v55 }
 0x9e1   : >> { %v8554_v30 = vpop.eup %8553 }
 0x9e2   : >> { %v5383_v0 = vmul.f32 %v8554_v30, %v11574_v2  ;;  %v8556_v27 = vpop.eup %8555  ;;  %v5426_v47 = vadd.f32 %v11604_v59, %v5404_v61 }
 0x9e3   : >> { %v5384_v54 = vmul.f32 %v8556_v27, %v11577_v7 }
 0x9e4   : >> { %v5405_v32 = vmul.f32 %v11596_v10, %v5383_v0 }
 0x9e5   : >> { %v8558_v42 = vpop.eup %8557  ;;  %v5406_v2 = vmul.f32 %v11596_v10, %v5384_v54 }
 0x9e6   : >> { %v5385_v33 = vmul.f32 %v8558_v42, %v11585_v45  ;;  %v5427_v8 = vadd.f32 %v11604_v59, %v5405_v32  ;;  %v12662_v45 = vlaneseq }
 0x9e7   : >> { %v5428_v38 = vadd.f32 %v11604_v59, %v5406_v2 }
 0x9e8   : >> { %v5436_v5 = vpack.c.bf16 %v5427_v8, %v5426_v47  ;;  %v5407_v37 = vmul.f32 %v11596_v10, %v5385_v33  ;;  %v5454_v52 = vshrl.u32 %v12662_v45, 7 }
 0x9ea   : >> { %6810 = vmatmul.mubr.msk.bf16.gmra.mxu0 %vm569_vm1, %v5436_v5  ;;  %v5429_v23 = vadd.f32 %v11604_v59, %v5407_v37  ;;  %v5459_v51 = vsub.s32 1, %v5454_v52  ;;  %v5455_v31 = vsub.s32 0, %v5454_v52 }
 0x9eb   : >> { %5629 = vmatprep.mubr.bf16.mxu0 %v8740_v62 }
 0x9ec   : >> { %v5437_v7 = vpack.c.bf16 %v5429_v23, %v5428_v38  ;;  %v11694_v16 = vrot.slane %v5451_v3, %v5459_v51  ;;  %v11696_v62 = vrot.slane %v5451_v3, %v5455_v31 }
 0x9f2   : >> { %6811 = vmatmul.mubr.msk.bf16.gmra.mxu0 %vm569_vm1, %v5437_v7 }
 0xa38   : >> { %v5561_v10 = vpop.f32.mrf.mxu0 }
 0xa39   : >> { %v5562_v15 = vadd.f32 %v5561_v10, %v11696_v62 }
 0xa3a   : >> { %v5563_v34 = vpop.f32.mrf.mxu0 }
 0xa3b   : >> { %v5564_v46 = vadd.f32 %v5563_v34, %v11694_v16  ;;  %v5640_v12 = vmax.f32 %v5562_v15, 0.0 }
 0xa3c   : >> { %v5565_v59 = vpop.f32.mrf.mxu0 }
 0xa3d   : >> { %v5566_v56 = vadd.f32 %v5565_v59, %v11696_v62  ;;  %v5641_v11 = vmax.f32 %v5564_v46, 0.0 }
 0xa3e   : >> { %v5567_v60 = vpop.f32.mrf.mxu0 }
 0xa3f   : >> { %v5568_v29 = vadd.f32 %v5567_v60, %v11694_v16  ;;  %v5642_v41 = vmax.f32 %v5566_v56, 0.0 }
 0xa40   : >> { %v5571_v35 = vpop.f32.mrf.mxu0 }
 0xa41   : >> { %v5643_v17 = vmax.f32 %v5568_v29, 0.0  ;;  %v5672_v49 = vpack.c.bf16 %v5642_v41, %v5640_v12  ;;  %v5572_v39 = vadd.f32 %v5571_v35, %v11696_v62 }
 0xa42   : >> { %v5573_v9 = vpop.f32.mrf.mxu0 }
 0xa43   : >> { %v5673_v18 = vpack.c.bf16 %v5643_v17, %v5641_v11  ;;  %v5574_v19 = vadd.f32 %v5573_v9, %v11694_v16  ;;  %v5644_v0 = vmax.f32 %v5572_v39, 0.0 }
 0xa44   : >> { %v5575_v20 = vpop.f32.mrf.mxu0 }
 0xa45   : >> { %v5576_v58 = vadd.f32 %v5575_v20, %v11696_v62  ;;  %5851 = vmatprep.mubr.bf16.mxu1 %v5673_v18  ;;  %v5645_v55 = vmax.f32 %v5574_v19, 0.0 }
 0xa46   : >> { %v5577_v53 = vpop.f32.mrf.mxu0  ;;  %5852 = vmatmul.mubr.bf16.vlgmr.msra.gmra.mxu1 %v5672_v49 }
 0xa47   : >> { %v5578_v63 = vadd.f32 %v5577_v53, %v11694_v16  ;;  %v5646_v44 = vmax.f32 %v5576_v58, 0.0 }
 0xa48   : >> { %v5581_v57 = vpop.f32.mrf.mxu0 }
 0xa49   : >> { %v5647_v30 = vmax.f32 %v5578_v63, 0.0  ;;  %v5674_v32 = vpack.c.bf16 %v5646_v44, %v5644_v0  ;;  %v5582_v47 = vadd.f32 %v5581_v57, %v11696_v62 }
 0xa4a   : >> { %v5583_v61 = vpop.f32.mrf.mxu0 }
 0xa4b   : >> { %v5675_v27 = vpack.c.bf16 %v5647_v30, %v5645_v55  ;;  %v5584_v54 = vadd.f32 %v5583_v61, %v11694_v16  ;;  %v5648_v7 = vmax.f32 %v5582_v47, 0.0 }
 0xa4c   : >> { %v5585_v42 = vpop.f32.mrf.mxu0 }
 0xa4d   : >> { %v5586_v33 = vadd.f32 %v5585_v42, %v11696_v62  ;;  %5859 = vmatprep.mubr.bf16.mxu1 %v5675_v27  ;;  %v5649_v23 = vmax.f32 %v5584_v54, 0.0 }
 0xa4e   : >> { %v5587_v8 = vpop.f32.mrf.mxu0  ;;  %5860 = vmatmul.mubr.bf16.gmra.mxu1 %v5674_v32 }
 0xa4f   : >> { %v5588_v5 = vadd.f32 %v5587_v8, %v11694_v16  ;;  %v5650_v37 = vmax.f32 %v5586_v33, 0.0 }
 0xa50   : >> { %v5591_v2 = vpop.f32.mrf.mxu0 }
 0xa51   : >> { %v5651_v38 = vmax.f32 %v5588_v5, 0.0  ;;  %v5676_v51 = vpack.c.bf16 %v5650_v37, %v5648_v7  ;;  %v5592_v34 = vadd.f32 %v5591_v2, %v11696_v62 }
 0xa52   : >> { %v5593_v45 = vpop.f32.mrf.mxu0 }
 0xa53   : >> { %v5677_v52 = vpack.c.bf16 %v5651_v38, %v5649_v23  ;;  %v5594_v3 = vadd.f32 %v5593_v45, %v11694_v16  ;;  %v5652_v41 = vmax.f32 %v5592_v34, 0.0 }
 0xa54   : >> { %v5595_v31 = vpop.f32.mrf.mxu0 }
 0xa55   : >> { %v5596_v10 = vadd.f32 %v5595_v31, %v11696_v62  ;;  %5867 = vmatprep.mubr.bf16.mxu1 %v5677_v52  ;;  %v5653_v60 = vmax.f32 %v5594_v3, 0.0 }
 0xa56   : >> { %v5597_v59 = vpop.f32.mrf.mxu0  ;;  %5868 = vmatmul.mubr.bf16.gmra.mxu1 %v5676_v51 }
 0xa57   : >> { %v5598_v46 = vadd.f32 %v5597_v59, %v11694_v16  ;;  %v5654_v56 = vmax.f32 %v5596_v10, 0.0 }
 0xa58   : >> { %v5601_v15 = vpop.f32.mrf.mxu0 }
 0xa59   : >> { %v5655_v29 = vmax.f32 %v5598_v46, 0.0  ;;  %v5678_v17 = vpack.c.bf16 %v5654_v56, %v5652_v41  ;;  %v5602_v49 = vadd.f32 %v5601_v15, %v11696_v62 }
 0xa5a   : >> { %v5603_v35 = vpop.f32.mrf.mxu0 }
 0xa5b   : >> { %v5679_v11 = vpack.c.bf16 %v5655_v29, %v5653_v60  ;;  %v5604_v9 = vadd.f32 %v5603_v35, %v11694_v16  ;;  %v5656_v44 = vmax.f32 %v5602_v49, 0.0 }
 0xa5c   : >> { %v5605_v12 = vpop.f32.mrf.mxu0 }
 0xa5d   : >> { %v5606_v18 = vadd.f32 %v5605_v12, %v11696_v62  ;;  %5875 = vmatprep.mubr.bf16.mxu1 %v5679_v11  ;;  %v5657_v53 = vmax.f32 %v5604_v9, 0.0 }
 0xa5e   : >> { %v5607_v20 = vpop.f32.mrf.mxu0  ;;  %5876 = vmatmul.mubr.bf16.gmra.mxu1 %v5678_v17 }
 0xa5f   : >> { %v5608_v19 = vadd.f32 %v5607_v20, %v11694_v16  ;;  %v5658_v58 = vmax.f32 %v5606_v18, 0.0 }
 0xa60   : >> { %v5611_v39 = vpop.f32.mrf.mxu0 }
 0xa61   : >> { %v5659_v63 = vmax.f32 %v5608_v19, 0.0  ;;  %v5680_v30 = vpack.c.bf16 %v5658_v58, %v5656_v44  ;;  %v5612_v32 = vadd.f32 %v5611_v39, %v11696_v62 }
 0xa62   : >> { %v5613_v57 = vpop.f32.mrf.mxu0 }
 0xa63   : >> { %v5681_v55 = vpack.c.bf16 %v5659_v63, %v5657_v53  ;;  %v5614_v61 = vadd.f32 %v5613_v57, %v11694_v16  ;;  %v5660_v5 = vmax.f32 %v5612_v32, 0.0 }
 0xa64   : >> { %v5615_v0 = vpop.f32.mrf.mxu0 }
 0xa65   : >> { %v5616_v27 = vadd.f32 %v5615_v0, %v11696_v62  ;;  %5883 = vmatprep.mubr.bf16.mxu1 %v5681_v55  ;;  %v5661_v47 = vmax.f32 %v5614_v61, 0.0 }
 0xa66   : >> { %v5617_v42 = vpop.f32.mrf.mxu0  ;;  %5884 = vmatmul.mubr.bf16.gmra.mxu1 %v5680_v30 }
 0xa67   : >> { %v5618_v54 = vadd.f32 %v5617_v42, %v11694_v16  ;;  %v5662_v33 = vmax.f32 %v5616_v27, 0.0 }
 0xa69   : >> { %v5663_v8 = vmax.f32 %v5618_v54, 0.0  ;;  %v5682_v2 = vpack.c.bf16 %v5662_v33, %v5660_v5 }
 0xa6b   : >> { %v5683_v37 = vpack.c.bf16 %v5663_v8, %v5661_v47 }
 0xa6d   : >> { %5891 = vmatprep.mubr.bf16.mxu1 %v5683_v37 }
 0xa6e   : >> { %5892 = vmatmul.mubr.bf16.gmra.mxu1 %v5682_v2 }
 0xaaa   : >> { %v5621_v23 = vpop.f32.mrf.mxu0 }
 0xaab   : >> { %v5622_v51 = vadd.f32 %v5621_v23, %v11696_v62 }
 0xaac   : >> { %v5623_v38 = vpop.f32.mrf.mxu0 }
 0xaad   : >> { %v5624_v45 = vadd.f32 %v5623_v38, %v11694_v16  ;;  %v5664_v56 = vmax.f32 %v5622_v51, 0.0 }
 0xaae   : >> { %v5625_v7 = vpop.f32.mrf.mxu0 }
 0xaaf   : >> { %v5626_v52 = vadd.f32 %v5625_v7, %v11696_v62  ;;  %v5665_v59 = vmax.f32 %v5624_v45, 0.0 }
 0xab0   : >> { %v5627_v31 = vpop.f32.mrf.mxu0 }
 0xab1   : >> { %v5628_v3 = vadd.f32 %v5627_v31, %v11694_v16  ;;  %v5666_v10 = vmax.f32 %v5626_v52, 0.0 }
 0xab2   : >> { %v5631_v34 = vpop.f32.mrf.mxu0 }
 0xab3   : >> { %v5667_v46 = vmax.f32 %v5628_v3, 0.0  ;;  %v5684_v29 = vpack.c.bf16 %v5666_v10, %v5664_v56  ;;  %v5632_v17 = vadd.f32 %v5631_v34, %v11696_v62 }
 0xab4   : >> { %v5633_v15 = vpop.f32.mrf.mxu0 }
 0xab5   : >> { %v5685_v60 = vpack.c.bf16 %v5667_v46, %v5665_v59  ;;  %v5634_v35 = vadd.f32 %v5633_v15, %v11694_v16  ;;  %v5668_v19 = vmax.f32 %v5632_v17, 0.0 }
 0xab6   : >> { %v5635_v41 = vpop.f32.mrf.mxu0 }
 0xab7   : >> { %v5636_v11 = vadd.f32 %v5635_v41, %v11696_v62  ;;  %5899 = vmatprep.mubr.bf16.mxu1 %v5685_v60  ;;  %v5669_v49 = vmax.f32 %v5634_v35, 0.0  ;;  %v11734_v62 = vld [vmem:[%s5932_s18] ss:$0 sm:$0xff] }
 0xab8   : >> { %v5637_v12 = vpop.f32.mrf.mxu0  ;;  %5900 = vmatmul.mubr.bf16.gmra.mxu1 %v5684_v29 }
 0xab9   : >> { %v5638_v9 = vadd.f32 %v5637_v12, %v11694_v16  ;;  %v5670_v18 = vmax.f32 %v5636_v11, 0.0 }
 0xabb   : >> { %v5671_v20 = vmax.f32 %v5638_v9, 0.0  ;;  %v5686_v39 = vpack.c.bf16 %v5670_v18, %v5668_v19 }
 0xabd   : >> { %v5687_v58 = vpack.c.bf16 %v5671_v20, %v5669_v49 }
 0xabf   : >> { %5907 = vmatprep.mubr.bf16.mxu1 %v5687_v58 }
 0xac0   : >> { %5908 = vmatmul.mubr.bf16.gmra.mxu1 %v5686_v39 }
 0xb06   : >> { %v7221_v53 = vpop.f32.mrf.mxu1 }
 0xb08   : >> { %v7222_v63 = vpop.f32.mrf.mxu1 }
 0xb09   : >> { %v7223_v44 = vadd.f32 %v7222_v63, %v7221_v53 }
 0xb0a   : >> { %v7224_v57 = vpop.f32.mrf.mxu1 }
 0xb0b   : >> { %v5916_v16 = vadd.f32 %v7223_v44, %v11383_v24 }
 0xb0c   : >> { %v7225_v55 = vpop.f32.mrf.mxu1 }
 0xb0d   : >> { %v11738_v30 = vadd.f32 %v11734_v62, %v5916_v16   ;;  %v7226_v0 = vadd.f32 %v7225_v55, %v7224_v57 }
 0xb0e   : >> { %v7227_v61 = vpop.f32.mrf.mxu1 }
 0xb0f   : >> { %v5917_v27 = vadd.f32 %v7226_v0, %v11396_v25 }
 0xb10   : >> { %v7228_v32 = vpop.f32.mrf.mxu1 }
 0xb11   : >> { %v11742_v5 = vadd.f32 %v11734_v62, %v5917_v27   ;;  %v7229_v54 = vadd.f32 %v7228_v32, %v7227_v61 }
 0xb12   : >> { %v7230_v33 = vpop.f32.mrf.mxu1 }
 0xb13   : >> { %v12663_v42 = vmov %v11742_v5  ;;  %v5918_v47 = vadd.f32 %v7229_v54, %v11386_v40 }
 0xb14   : >> { %v7231_v8 = vpop.f32.mrf.mxu1 }
 0xb15   : >> { %v11746_v37 = vadd.f32 %v11734_v62, %v5918_v47   ;;  %v7232_v24 = vadd.f32 %v7231_v8, %v7230_v33 }
 0xb16   : >> { %v7233_v2 = vpop.f32.mrf.mxu1 }
 0xb17   : >> { %v5919_v23 = vadd.f32 %v7232_v24, %v11402_v1 }
 0xb18   : >> { %v7234_v38 = vpop.f32.mrf.mxu1 }
 0xb19   : >> { %v11750_v7 = vadd.f32 %v11734_v62, %v5919_v23   ;;  %v7235_v45 = vadd.f32 %v7234_v38, %v7233_v2 }
 0xb1a   : >> { %v7236_v52 = vpop.f32.mrf.mxu1 }
 0xb1b   : >> { %v12664_v25 = vmov %v11750_v7  ;;  %v5920_v5 = vadd.f32 %v7235_v45, %v11411_v36 }
 0xb1c   : >> { %v7237_v51 = vpop.f32.mrf.mxu1 }
 0xb1d   : >> { %v11754_v8 = vadd.f32 %v11734_v62, %v5920_v5   ;;  %v7238_v31 = vadd.f32 %v7237_v51, %v7236_v52  ;;  %v12691_v5 = vmov %v12663_v42  ;;  %v5962_v51 = vsel (%p11801_p4), %vm569_vm1, %v12663_v42, 0.0 }
 0xb1e   : >> { %v7239_v3 = vpop.f32.mrf.mxu1 }
 0xb1f   : >> { %v12665_v40 = vmov %v11754_v8  ;;  %v5921_v10 = vadd.f32 %v7238_v31, %v11427_v28 }
 0xb20   : >> { %v7240_v34 = vpop.f32.mrf.mxu1 }
 0xb21   : >> { %v11758_v9 = vadd.f32 %v11734_v62, %v5921_v10   ;;  %v7241_v59 = vadd.f32 %v7240_v34, %v7239_v3  ;;  %v5965_v3 = vsel (%p11801_p4), %vm569_vm1, %v11746_v37, 0.0 }
 0xb22   : >> { %v7242_v46 = vpop.f32.mrf.mxu1 }
 0xb23   : >> { %v12666_v1 = vmov %v11758_v9  ;;  %v5922_v7 = vadd.f32 %v7241_v59, %v11414_v26 }
 0xb24   : >> { %v7243_v56 = vpop.f32.mrf.mxu1  ;;  %v5974_v34 = vsel (%p11801_p4), %vm569_vm1, %v12666_v1, 0.0 }
 0xb25   : >> { %v11762_v10 = vadd.f32 %v11734_v62, %v5922_v7   ;;  %v7244_v15 = vadd.f32 %v7243_v56, %v7242_v46  ;;  %v12689_v7 = vmov %v12664_v25 }
 0xb26   : >> { %v7245_v60 = vpop.f32.mrf.mxu1 }
 0xb27   : >> { %v12667_v36 = vmov %v11762_v10  ;;  %v5923_v29 = vadd.f32 %v7244_v15, %v11431_v13 }
 0xb28   : >> { %v7246_v41 = vpop.f32.mrf.mxu1  ;;  %v12686_v10 = vmov %v12667_v36  ;;  %v5977_v7 = vsel (%p11801_p4), %vm569_vm1, %v12667_v36, 0.0 }
 0xb29   : >> { %v11766_v11 = vadd.f32 %v11734_v62, %v5923_v29   ;;  %v7247_v35 = vadd.f32 %v7246_v41, %v7245_v60  ;;  %v5971_v10 = vsel (%p11801_p4), %vm569_vm1, %v12665_v40, 0.0 }
 0xb2a   : >> { %v7248_v17 = vpop.f32.mrf.mxu1 }
 0xb2b   : >> { %v12668_v28 = vmov %v11766_v11  ;;  %v5924_v12 = vadd.f32 %v7247_v35, %v11440_v22 }
 0xb2c   : >> { %v7249_v9 = vpop.f32.mrf.mxu1  ;;  %v5980_v56 = vsel (%p11801_p4), %vm569_vm1, %v12668_v28, 0.0 }
 0xb2d   : >> { %v11770_v12 = vadd.f32 %v11734_v62, %v5924_v12   ;;  %v7250_v18 = vadd.f32 %v7249_v9, %v7248_v17  ;;  %v12687_v9 = vmov %v12666_v1 }
 0xb2e   : >> { %v7251_v49 = vpop.f32.mrf.mxu1 }
 0xb2f   : >> { %v12669_v26 = vmov %v11770_v12  ;;  %v5925_v20 = vadd.f32 %v7250_v18, %v11452_v50 }
 0xb30   : >> { %v7252_v19 = vpop.f32.mrf.mxu1  ;;  %v12684_v12 = vmov %v12669_v26 }
 0xb31   : >> { %v11774_v13 = vadd.f32 %v11734_v62, %v5925_v20   ;;  %v7253_v39 = vadd.f32 %v7252_v19, %v7251_v49 }
 0xb32   : >> { %v7254_v53 = vpop.f32.mrf.mxu1 }
 0xb33   : >> { %v12670_v58 = vmov %v11774_v13  ;;  %v5926_v11 = vadd.f32 %v7253_v39, %v11445_v4 }
 0xb34   : >> { %v7255_v63 = vpop.f32.mrf.mxu1  ;;  %v5986_v31 = vsel (%p11801_p4), %vm569_vm1, %v12670_v58, 0.0 }
 0xb35   : >> { %v11778_v44 = vadd.f32 %v11734_v62, %v5926_v11   ;;  %v7256_v22 = vadd.f32 %v7255_v63, %v7254_v53  ;;  %v12685_v11 = vmov %v12668_v28 }
 0xb37   : >> { %v5927_v57 = vadd.f32 %v7256_v22, %v11455_v43 }
 0xb39   : >> { %v11782_v15 = vadd.f32 %v11734_v62, %v5927_v57  }
 0xb3b   : >> { %v12671_v55 = vmov %v11782_v15 }
 0xb3c   : >> { %v12681_v15 = vmov %v12671_v55  ;;  %v5992_v5 = vsel (%p11801_p4), %vm569_vm1, %v12671_v55, 0.0 }
 0xb78   : >> { %v7257_v16 = vpop.f32.mrf.mxu1 }
 0xb7a   : >> { %v7258_v50 = vpop.f32.mrf.mxu1 }
 0xb7b   : >> { %v7259_v0 = vadd.f32 %v7258_v50, %v7257_v16 }
 0xb7c   : >> { %v7260_v61 = vpop.f32.mrf.mxu1 }
 0xb7d   : >> { %v5928_v13 = vadd.f32 %v7259_v0, %v11469_v48 }
 0xb7e   : >> { %v7261_v27 = vpop.f32.mrf.mxu1 }
 0xb7f   : >> { %v11786_v16 = vadd.f32 %v11734_v62, %v5928_v13   ;;  %v7262_v4 = vadd.f32 %v7261_v27, %v7260_v61  ;;  %v12683_v13 = vmov %v12670_v58 }
 0xb80   : >> { %v7263_v54 = vpop.f32.mrf.mxu1 }
 0xb81   : >> { %v12672_v32 = vmov %v11786_v16  ;;  %v5929_v33 = vadd.f32 %v7262_v4, %v11480_v14  ;;  %v12682_v14 = vmov %v11778_v44  ;;  %v12692_v4 = vmov %v11738_v30 }
 0xb82   : >> { %v7264_v47 = vpop.f32.mrf.mxu1  ;;  %v12680_v16 = vmov %v12672_v32  ;;  %v5989_v14 = vsel (%p11801_p4), %vm569_vm1, %v11778_v44, 0.0  ;;  %v5995_v59 = vsel (%p11801_p4), %vm569_vm1, %v12672_v32, 0.0 }
 0xb83   : >> { %v11790_v17 = vadd.f32 %v11734_v62, %v5929_v33   ;;  %v7265_v8 = vadd.f32 %v7264_v47, %v7263_v54 }
 0xb84   : >> { %v7266_v24 = vpop.f32.mrf.mxu1 }
 0xb85   : >> { %v12673_v43 = vmov %v11790_v17  ;;  %v5930_v2 = vadd.f32 %v7265_v8, %v11473_v6  ;;  %v12688_v8 = vmov %v12665_v40  ;;  %v12690_v6 = vmov %v11746_v37 }
 0xb86   : >> { %v7267_v23 = vpop.f32.mrf.mxu1  ;;  %v12679_v17 = vmov %v12673_v43  ;;  %v5968_v6 = vsel (%p11801_p4), %vm569_vm1, %v12664_v25, 0.0  ;;  %v5998_v46 = vsel (%p11801_p4), %vm569_vm1, %v12673_v43, 0.0 }
 0xb87   : >> { %v11794_v18 = vadd.f32 %v11734_v62, %v5930_v2   ;;  %v7268_v38 = vadd.f32 %v7267_v23, %v7266_v24 }
 0xb89   : >> { %v12674_v48 = vmov %v11794_v18  ;;  %v5931_v45 = vadd.f32 %v7268_v38, %v11483_v21  ;;  %v5959_v21 = vsel (%p11801_p4), %vm569_vm1, %v11738_v30, 0.0 }
 0xb8a   : >> { %v12678_v18 = vmov %v12674_v48  ;;  %547 = sbr.rel (!%p11801_p4) target bundleno = 25 (0x19), region = 132  ;;  %5960 = vadd.xlane.f32.xlu0 (%p11801_p4), %v5959_v21  ;;  %v6001_v15 = vsel (%p11801_p4), %vm569_vm1, %v12674_v48, 0.0 }
 0xb8b   : >> { %v11798_v19 = vadd.f32 %v11734_v62, %v5931_v45   ;;  %v5983_v62 = vsel (%p11801_p4), %vm569_vm1, %v12669_v26, 0.0 }
 0xb8c   : > { %5984 = vadd.xlane.f32.xlu1 (%p11801_p4), %v5983_v62 }
 0xb8d   : >> { %v12675_v52 = vmov %v11798_v19 }
 0xb8e   : >> { %v12677_v19 = vmov %v12675_v52  ;;  %5963 = vadd.xlane.f32.xlu0 (%p11801_p4), %v5962_v51  ;;  %v6004_v60 = vsel (%p11801_p4), %vm569_vm1, %v12675_v52, 0.0 }
 0xb90   : > { %5987 = vadd.xlane.f32.xlu1 %v5986_v31 }
 0xb92   : > { %5966 = vadd.xlane.f32.xlu0 %v5965_v3 }
 0xb94   : > { %5969 = vadd.xlane.f32.xlu1 %v5968_v6 }
 0xb96   : > { %5990 = vadd.xlane.f32.xlu0 %v5989_v14 }
 0xb98   : > { %5993 = vadd.xlane.f32.xlu1 %v5992_v5 }
 0xb9a   : > { %5972 = vadd.xlane.f32.xlu0 %v5971_v10 }
 0xb9c   : > { %5975 = vadd.xlane.f32.xlu1 %v5974_v34 }
 0xb9e   : > { %5996 = vadd.xlane.f32.xlu0 %v5995_v59 }
 0xba0   : > { %5999 = vadd.xlane.f32.xlu1 %v5998_v46 }
 0xba2   : > { %5978 = vadd.xlane.f32.xlu0 %v5977_v7 }
 0xba4   : > { %5981 = vadd.xlane.f32.xlu1 %v5980_v56 }
 0xba6   : > { %6002 = vadd.xlane.f32.xlu0 %v6001_v15 }
 0xba8   : > { %6005 = vadd.xlane.f32.xlu1 %v6004_v60 }
 0xc13   : > { %v5961_v29 = vpop.xlane.xlu0 %5960 }
 0xc14   : > { %v6008_v35 = vmul.f32 0.015625, %v5961_v29 }
 0xc15   : > { %v5985_v41 = vpop.xlane.xlu1 %5984 }
 0xc16   : > { %v6016_v17 = vmul.f32 0.015625, %v5985_v41  ;;  %v11890_v12 = vsub.f32 %v11738_v30, %v6008_v35 }
 0xc17   : > { %v5964_v18 = vpop.xlane.xlu0 %5963 }
 0xc18   : > { %v11893_v9 = vsub.f32 %v12669_v26, %v6016_v17  ;;  %v6009_v20 = vmul.f32 0.015625, %v5964_v18  ;;  %v6040_v39 = vmul.f32 %v11890_v12, %v11890_v12 }
 0xc19   : > { %v5988_v49 = vpop.xlane.xlu1 %5987 }
 0xc1a   : > { %v6017_v19 = vmul.f32 0.015625, %v5988_v49  ;;  %v6048_v53 = vmul.f32 %v11893_v9, %v11893_v9  ;;  %v11900_v11 = vsub.f32 %v12663_v42, %v6009_v20  ;;  %v6056_v30 = vsel %vm569_vm1, %v6040_v39, 0.0 }
 0xc1b   : > { %6057 = vadd.xlane.f32.xlu0 %v6056_v30  ;;  %v5967_v26 = vpop.xlane.xlu0 %5966 }
 0xc1c   : > { %v11903_v63 = vsub.f32 %v12670_v58, %v6017_v19  ;;  %v6080_v57 = vsel %vm569_vm1, %v6048_v53, 0.0  ;;  %v6010_v16 = vmul.f32 0.015625, %v5967_v26  ;;  %v6041_v0 = vmul.f32 %v11900_v11, %v11900_v11 }
 0xc1d   : > { %v5970_v22 = vpop.xlane.xlu1 %5969 }
 0xc1e   : > { %v6011_v50 = vmul.f32 0.015625, %v5970_v22  ;;  %v6049_v61 = vmul.f32 %v11903_v63, %v11903_v63  ;;  %v11912_v42 = vsub.f32 %v11746_v37, %v6010_v16  ;;  %v6059_v13 = vsel %vm569_vm1, %v6041_v0, 0.0 }
 0xc1f   : > { %6081 = vadd.xlane.f32.xlu0 %v6080_v57  ;;  %6060 = vadd.xlane.f32.xlu1 %v6059_v13  ;;  %v5991_v27 = vpop.xlane.xlu0 %5990  ;;  %v8561_v13 = vld [vmem:[%s12091_s14 + $0x8] sm:$0xff]  }
 0xc20   : > { %v11915_v58 = vsub.f32 %v12664_v25, %v6011_v50  ;;  %v6083_v54 = vsel %vm569_vm1, %v6049_v61, 0.0  ;;  %v6018_v33 = vmul.f32 0.015625, %v5991_v27  ;;  %v6042_v8 = vmul.f32 %v11912_v42, %v11912_v42  ;;  %v8560_v61 = vld [vmem:[%s12091_s14 + $0x10] sm:$0xff]   ;;  %v8562_v27 = vld [vmem:[%s12091_s14] sm:$0xff]  }
 0xc21   : > { %v5994_v4 = vpop.xlane.xlu1 %5993 }
 0xc22   : > { %v6019_v47 = vmul.f32 0.015625, %v5994_v4  ;;  %v6043_v37 = vmul.f32 %v11915_v58, %v11915_v58  ;;  %v11924_v24 = vsub.f32 %v11778_v44, %v6018_v33  ;;  %v6062_v2 = vsel %vm569_vm1, %v6042_v8, 0.0 }
 0xc23   : > { %6084 = vadd.xlane.f32.xlu1 %v6083_v54  ;;  %6063 = vadd.xlane.f32.xlu0 %v6062_v2  ;;  %v5973_v23 = vpop.xlane.xlu0 %5972 }
 0xc24   : > { %v11927_v25 = vsub.f32 %v12671_v55, %v6019_v47  ;;  %v6065_v45 = vsel %vm569_vm1, %v6043_v37, 0.0  ;;  %v6012_v21 = vmul.f32 0.015625, %v5973_v23  ;;  %v6050_v51 = vmul.f32 %v11924_v24, %v11924_v24 }
 0xc25   : > { %v5976_v38 = vpop.xlane.xlu1 %5975 }
 0xc26   : > { %v6013_v62 = vmul.f32 0.015625, %v5976_v38  ;;  %v6051_v44 = vmul.f32 %v11927_v25, %v11927_v25  ;;  %v11936_v31 = vsub.f32 %v12665_v40, %v6012_v21  ;;  %v6086_v3 = vsel %vm569_vm1, %v6050_v51, 0.0 }
 0xc27   : > { %6066 = vadd.xlane.f32.xlu1 %v6065_v45  ;;  %6087 = vadd.xlane.f32.xlu0 %v6086_v3  ;;  %v5997_v6 = vpop.xlane.xlu0 %5996 }
 0xc28   : > { %v11939_v55 = vsub.f32 %v12666_v1, %v6013_v62  ;;  %v6089_v5 = vsel %vm569_vm1, %v6051_v44, 0.0  ;;  %v6020_v10 = vmul.f32 0.015625, %v5997_v6  ;;  %v6044_v59 = vmul.f32 %v11936_v31, %v11936_v31 }
 0xc29   : > { %v6000_v14 = vpop.xlane.xlu1 %5999 }
 0xc2a   : > { %v6021_v34 = vmul.f32 0.015625, %v6000_v14  ;;  %v6045_v40 = vmul.f32 %v11939_v55, %v11939_v55  ;;  %v11948_v46 = vsub.f32 %v12672_v32, %v6020_v10  ;;  %v6068_v7 = vsel %vm569_vm1, %v6044_v59, 0.0 }
 0xc2b   : > { %6090 = vadd.xlane.f32.xlu1 %v6089_v5  ;;  %6069 = vadd.xlane.f32.xlu0 %v6068_v7  ;;  %v5979_v56 = vpop.xlane.xlu0 %5978 }
 0xc2c   : > { %v11951_v1 = vsub.f32 %v12673_v43, %v6021_v34  ;;  %v6071_v60 = vsel %vm569_vm1, %v6045_v40, 0.0  ;;  %v6014_v29 = vmul.f32 0.015625, %v5979_v56  ;;  %v6052_v35 = vmul.f32 %v11948_v46, %v11948_v46 }
 0xc2d   : > { %v5982_v15 = vpop.xlane.xlu1 %5981 }
 0xc2e   : > { %v6015_v41 = vmul.f32 0.015625, %v5982_v15  ;;  %v6053_v32 = vmul.f32 %v11951_v1, %v11951_v1  ;;  %v11960_v17 = vsub.f32 %v12667_v36, %v6014_v29  ;;  %v6092_v18 = vsel %vm569_vm1, %v6052_v35, 0.0  ;;  %v12000_v35 = vld [vmem:[%s12089_s12] ss:$0 sm:$0xff] }
 0xc2f   : > { %6072 = vadd.xlane.f32.xlu1 %v6071_v60  ;;  %6093 = vadd.xlane.f32.xlu0 %v6092_v18  ;;  %v6003_v49 = vpop.xlane.xlu0 %6002 }
 0xc30   : > { %v11963_v43 = vsub.f32 %v12668_v28, %v6015_v41  ;;  %v6095_v19 = vsel %vm569_vm1, %v6053_v32, 0.0  ;;  %v6022_v39 = vmul.f32 0.015625, %v6003_v49  ;;  %v6046_v30 = vmul.f32 %v11960_v17, %v11960_v17 }
 0xc31   : > { %v6006_v20 = vpop.xlane.xlu1 %6005 }
 0xc32   : > { %v6023_v53 = vmul.f32 0.015625, %v6006_v20  ;;  %v6047_v36 = vmul.f32 %v11963_v43, %v11963_v43  ;;  %v11972_v26 = vsub.f32 %v12674_v48, %v6022_v39  ;;  %v6074_v22 = vsel %vm569_vm1, %v6046_v30, 0.0 }
 0xc33   : > { %6096 = vadd.xlane.f32.xlu1 %v6095_v19  ;;  %6075 = vadd.xlane.f32.xlu0 %v6074_v22 }
 0xc34   : > { %v11975_v28 = vsub.f32 %v12675_v52, %v6023_v53  ;;  %v6077_v57 = vsel %vm569_vm1, %v6047_v36, 0.0  ;;  %v6054_v16 = vmul.f32 %v11972_v26, %v11972_v26  ;;  %v8559_v52 = vld [vmem:[%s12091_s14 + $0x18] sm:$0xff]  }
 0xc35   : > { %7825 = vmatprep.subr.bf16.mxu0 %v8559_v52  ;;  %7849 = vmatprep.subr.bf16.mxu1 %v8559_v52 }
 0xc36   : > { %v6055_v50 = vmul.f32 %v11975_v28, %v11975_v28  ;;  %v6098_v0 = vsel %vm569_vm1, %v6054_v16, 0.0  ;;  %7826 = vmatpush3.bf16.msra.mxu0 %v8559_v52  ;;  %7853 = vmatpush3.bf16.msra.mxu1 %v8559_v52 }
 0xc37   : > { %6078 = vadd.xlane.f32.xlu1 %v6077_v57  ;;  %6099 = vadd.xlane.f32.xlu0 %v6098_v0  ;;  %v12007_v57 = vld [vmem:[%s12090_s13] ss:$0 sm:$0xff] }
 0xc38   : > { %v6101_v48 = vsel %vm569_vm1, %v6055_v50, 0.0  ;;  %7827 = vmatprep.subr.bf16.mxu0 %v8560_v61  ;;  %7850 = vmatprep.subr.bf16.mxu1 %v8560_v61 }
 0xc3a   : > { %7828 = vmatpush3.bf16.msra.mxu0 %v8560_v61  ;;  %7854 = vmatpush3.bf16.msra.mxu1 %v8560_v61 }
 0xc3b   : > { %6102 = vadd.xlane.f32.xlu1 %v6101_v48  ;;  %7829 = vmatprep.subr.bf16.mxu0 %v8561_v13 }
 0xc3c   : > { %7851 = vmatprep.subr.bf16.mxu1 %v8561_v13 }
 0xc3e   : > { %7830 = vmatpush3.bf16.msra.mxu0 %v8561_v13  ;;  %7855 = vmatpush3.bf16.msra.mxu1 %v8561_v13 }
 0xc3f   : > { %7831 = vmatprep.subr.bf16.mxu0 %v8562_v27  ;;  %7852 = vmatprep.subr.bf16.mxu1 %v8562_v27 }
 0xc42   : > { %7832 = vmatpush3.bf16.msra.mxu0 %v8562_v27  ;;  %7856 = vmatpush3.bf16.msra.mxu1 %v8562_v27 }
 0xca4   : > { %v6058_v4 = vpop.xlane.xlu0 %6057 }
 0xca5   : > { %v6104_v54 = vmul.f32 0.015625, %v6058_v4 }
 0xca7   : > { %v6120_v33 = vadd.f32 1e-05, %v6104_v54 }
 0xca8   : > { %v6061_v47 = vpop.xlane.xlu1 %6060  ;;  %v6082_v8 = vpop.xlane.xlu0 %6081 }
 0xca9   : > { %8563 = vrsqrt.f32 %v6120_v33  ;;  %v6105_v37 = vmul.f32 0.015625, %v6061_v47  ;;  %v6112_v2 = vmul.f32 0.015625, %v6082_v8 }
 0xcab   : > { %v6121_v23 = vadd.f32 1e-05, %v6105_v37  ;;  %v6128_v38 = vadd.f32 1e-05, %v6112_v2 }
 0xcac   : > { %v6085_v45 = vpop.xlane.xlu1 %6084  ;;  %v6064_v21 = vpop.xlane.xlu0 %6063 }
 0xcad   : > { %8565 = vrsqrt.f32 %v6121_v23  ;;  %v6113_v62 = vmul.f32 0.015625, %v6085_v45  ;;  %v6106_v51 = vmul.f32 0.015625, %v6064_v21 }
 0xcae   : > { %8567 = vrsqrt.f32 %v6128_v38 }
 0xcaf   : > { %v6129_v44 = vadd.f32 1e-05, %v6113_v62  ;;  %v6122_v3 = vadd.f32 1e-05, %v6106_v51 }
 0xcb0   : > { %v6067_v6 = vpop.xlane.xlu1 %6066  ;;  %v6088_v14 = vpop.xlane.xlu0 %6087 }
 0xcb1   : > { %8569 = vrsqrt.f32 %v6129_v44  ;;  %v6107_v5 = vmul.f32 0.015625, %v6067_v6  ;;  %v6114_v10 = vmul.f32 0.015625, %v6088_v14 }
 0xcb2   : > { %8571 = vrsqrt.f32 %v6122_v3 }
 0xcb3   : > { %v6123_v34 = vadd.f32 1e-05, %v6107_v5  ;;  %v6130_v59 = vadd.f32 1e-05, %v6114_v10 }
 0xcb4   : > { %v6091_v40 = vpop.xlane.xlu1 %6090  ;;  %v6070_v7 = vpop.xlane.xlu0 %6069 }
 0xcb5   : > { %8573 = vrsqrt.f32 %v6123_v34  ;;  %v6115_v56 = vmul.f32 0.015625, %v6091_v40  ;;  %v6108_v15 = vmul.f32 0.015625, %v6070_v7 }
 0xcb6   : > { %v8564_v60 = vpop.eup %8563  ;;  %8575 = vrsqrt.f32 %v6130_v59 }
 0xcb7   : > { %v6131_v29 = vadd.f32 1e-05, %v6115_v56  ;;  %v6124_v41 = vadd.f32 1e-05, %v6108_v15  ;;  %v6152_v32 = vmul.f32 %v8564_v60, %v11890_v12 }
 0xcb8   : > { %v6073_v18 = vpop.xlane.xlu1 %6072  ;;  %v6094_v49 = vpop.xlane.xlu0 %6093 }
 0xcb9   : > { %8577 = vrsqrt.f32 %v6131_v29  ;;  %v6109_v20 = vmul.f32 0.015625, %v6073_v18  ;;  %v6116_v19 = vmul.f32 0.015625, %v6094_v49  ;;  %v6174_v53 = vmul.f32 %v12000_v35, %v6152_v32 }
 0xcba   : > { %v8566_v39 = vpop.eup %8565  ;;  %8579 = vrsqrt.f32 %v6124_v41 }
 0xcbb   : > { %v8568_v30 = vpop.eup %8567  ;;  %v6125_v36 = vadd.f32 1e-05, %v6109_v20  ;;  %v6132_v22 = vadd.f32 1e-05, %v6116_v19  ;;  %v6153_v16 = vmul.f32 %v8566_v39, %v11900_v11  ;;  %v6196_v27 = vadd.f32 %v12007_v57, %v6174_v53 }
 0xcbc   : > { %v6097_v12 = vpop.xlane.xlu1 %6096  ;;  %v6076_v50 = vpop.xlane.xlu0 %6075  ;;  %v6160_v0 = vmul.f32 %v8568_v30, %v11893_v9 }
 0xcbd   : > { %8581 = vrsqrt.f32 %v6125_v36  ;;  %v6117_v48 = vmul.f32 0.015625, %v6097_v12  ;;  %v6110_v52 = vmul.f32 0.015625, %v6076_v50  ;;  %v6175_v61 = vmul.f32 %v12000_v35, %v6153_v16 }
 0xcbe   : > { %v8570_v13 = vpop.eup %8569  ;;  %8583 = vrsqrt.f32 %v6132_v22  ;;  %v6182_v9 = vmul.f32 %v12000_v35, %v6160_v0 }
 0xcbf   : > { %v8572_v4 = vpop.eup %8571  ;;  %v6133_v54 = vadd.f32 1e-05, %v6117_v48  ;;  %v6126_v33 = vadd.f32 1e-05, %v6110_v52  ;;  %v6197_v47 = vadd.f32 %v12007_v57, %v6175_v61  ;;  %v6161_v11 = vmul.f32 %v8570_v13, %v11903_v63 }
 0xcc0   : > { %v6079_v8 = vpop.xlane.xlu1 %6078  ;;  %v6100_v37 = vpop.xlane.xlu0 %6099  ;;  %v6154_v2 = vmul.f32 %v8572_v4, %v11912_v42  ;;  %v6204_v42 = vadd.f32 %v12007_v57, %v6182_v9 }
 0xcc1   : > { %8585 = vrsqrt.f32 %v6133_v54  ;;  %v6111_v23 = vmul.f32 0.015625, %v6079_v8  ;;  %v6118_v38 = vmul.f32 0.015625, %v6100_v37  ;;  %v6212_v45 = vpack.c.bf16 %v6197_v47, %v6196_v27 }
 0xcc2   : > { %v8574_v21 = vpop.eup %8573  ;;  %8587 = vrsqrt.f32 %v6126_v33  ;;  %v6183_v62 = vmul.f32 %v12000_v35, %v6161_v11  ;;  %v6176_v51 = vmul.f32 %v12000_v35, %v6154_v2 }
 0xcc3   : > { %v8576_v44 = vpop.eup %8575  ;;  %v6127_v3 = vadd.f32 1e-05, %v6111_v23  ;;  %v6134_v6 = vadd.f32 1e-05, %v6118_v38  ;;  %7833 = vmatprep.mubr.msk.bf16.mxu0 %vm569_vm1, %v6212_v45  ;;  %v6155_v63 = vmul.f32 %v8574_v21, %v11915_v58 }
 0xcc4   : > { %v6103_v14 = vpop.xlane.xlu1 %6102  ;;  %v6205_v5 = vadd.f32 %v12007_v57, %v6183_v62  ;;  %v6162_v10 = vmul.f32 %v8576_v44, %v11924_v24  ;;  %v6198_v56 = vadd.f32 %v12007_v57, %v6176_v51 }
 0xcc5   : > { %8589 = vrsqrt.f32 %v6127_v3  ;;  %v6119_v34 = vmul.f32 0.015625, %v6103_v14  ;;  %v6177_v59 = vmul.f32 %v12000_v35, %v6155_v63 }
 0xcc6   : > { %v8578_v40 = vpop.eup %8577  ;;  %8591 = vrsqrt.f32 %v6134_v6  ;;  %v6216_v7 = vpack.c.bf16 %v6205_v5, %v6204_v42  ;;  %v6184_v41 = vmul.f32 %v12000_v35, %v6162_v10 }
 0xcc7   : > { %v8580_v15 = vpop.eup %8579  ;;  %v6135_v60 = vadd.f32 1e-05, %v6119_v34  ;;  %v6199_v58 = vadd.f32 %v12007_v57, %v6177_v59  ;;  %v6163_v29 = vmul.f32 %v8578_v40, %v11927_v25 }
 0xcc8   : > { %7841 = vmatprep.mubr.msk.bf16.mxu1 %vm569_vm1, %v6216_v7  ;;  %v6156_v24 = vmul.f32 %v8580_v15, %v11936_v31  ;;  %v6206_v19 = vadd.f32 %v12007_v57, %v6184_v41 }
 0xcc9   : > { %8593 = vrsqrt.f32 %v6135_v60  ;;  %v6213_v32 = vpack.c.bf16 %v6199_v58, %v6198_v56  ;;  %v6185_v18 = vmul.f32 %v12000_v35, %v6163_v29 }
 0xcca   : > { %v8582_v49 = vpop.eup %8581  ;;  %v6178_v53 = vmul.f32 %v12000_v35, %v6156_v24 }
 0xccb   : > { %v8584_v20 = vpop.eup %8583  ;;  %7834 = vmatmul.mubr.msk.bf16.vlgmr.msra.gmra.mxu0 %vm569_vm1, %v6213_v32  ;;  %v6207_v39 = vadd.f32 %v12007_v57, %v6185_v18  ;;  %v6157_v25 = vmul.f32 %v8582_v49, %v11939_v55 }
 0xccc   : > { %v6164_v30 = vmul.f32 %v8584_v20, %v11948_v46  ;;  %v6200_v12 = vadd.f32 %v12007_v57, %v6178_v53 }
 0xccd   : > { %v6217_v36 = vpack.c.bf16 %v6207_v39, %v6206_v19  ;;  %v6179_v31 = vmul.f32 %v12000_v35, %v6157_v25 }
 0xcce   : > { %v8586_v22 = vpop.eup %8585  ;;  %v6186_v48 = vmul.f32 %v12000_v35, %v6164_v30 }
 0xccf   : > { %v8588_v16 = vpop.eup %8587  ;;  %7842 = vmatmul.mubr.msk.bf16.vlgmr.msra.gmra.mxu1 %vm569_vm1, %v6217_v36  ;;  %v6201_v50 = vadd.f32 %v12007_v57, %v6179_v31  ;;  %v6165_v0 = vmul.f32 %v8586_v22, %v11951_v1 }
 0xcd0   : > { %v6158_v55 = vmul.f32 %v8588_v16, %v11960_v17  ;;  %v6208_v27 = vadd.f32 %v12007_v57, %v6186_v48 }
 0xcd1   : > { %v6214_v52 = vpack.c.bf16 %v6201_v50, %v6200_v12  ;;  %v6187_v46 = vmul.f32 %v12000_v35, %v6165_v0 }
 0xcd2   : > { %v8590_v61 = vpop.eup %8589  ;;  %v6180_v33 = vmul.f32 %v12000_v35, %v6158_v55 }
 0xcd3   : > { %v8592_v13 = vpop.eup %8591  ;;  %7837 = vmatprep.mubr.msk.bf16.mxu0 %vm569_vm1, %v6214_v52  ;;  %v6209_v4 = vadd.f32 %v12007_v57, %v6187_v46  ;;  %v6159_v54 = vmul.f32 %v8590_v61, %v11963_v43 }
 0xcd4   : > { %v6166_v1 = vmul.f32 %v8592_v13, %v11972_v26  ;;  %v6202_v8 = vadd.f32 %v12007_v57, %v6180_v33 }
 0xcd5   : > { %v6218_v47 = vpack.c.bf16 %v6209_v4, %v6208_v27  ;;  %v6181_v17 = vmul.f32 %v12000_v35, %v6159_v54 }
 0xcd6   : > { %v8594_v11 = vpop.eup %8593  ;;  %v6188_v2 = vmul.f32 %v12000_v35, %v6166_v1 }
 0xcd7   : > { %7845 = vmatprep.mubr.msk.bf16.mxu1 %vm569_vm1, %v6218_v47  ;;  %v6203_v37 = vadd.f32 %v12007_v57, %v6181_v17  ;;  %v6167_v9 = vmul.f32 %v8594_v11, %v11975_v28  ;;  %v6833_v28 = vld [vmem:[%s12092_s15] ss:$0 sm:$0xff] }
 0xcd8   : > { %v6210_v26 = vadd.f32 %v12007_v57, %v6188_v2 }
 0xcd9   : > { %v6215_v23 = vpack.c.bf16 %v6203_v37, %v6202_v8  ;;  %v6189_v43 = vmul.f32 %v12000_v35, %v6167_v9 }
 0xcdb   : > { %7838 = vmatmul.mubr.msk.bf16.gmra.mxu0 %vm569_vm1, %v6215_v23  ;;  %v6211_v38 = vadd.f32 %v12007_v57, %v6189_v43 }
 0xcdd   : > { %v6219_v45 = vpack.c.bf16 %v6211_v38, %v6210_v26 }
 0xcdf   : > { %7846 = vmatmul.mubr.msk.bf16.gmra.mxu1 %vm569_vm1, %v6219_v45 }
 0xd8b   : > { %v7835_v21 = vpop.f32.mrf.mxu0 }
 0xd8c   : > { %v6326_v35 = vadd.f32 %v7835_v21, %v6833_v28 }
 0xd8d   : > { %v6317_v62 = vpop.f32.mrf.mxu0 }
 0xd8e   : > { %v6318_v57 = vadd.f32 %v6833_v28, %v6317_v62 }
 0xd8f   : > { %v7836_v51 = vpop.f32.mrf.mxu0  ;;  %v7843_v44 = vpop.f32.mrf.mxu1 }
 0xd90   : > { %v6329_v3 = vadd.f32 %v7836_v51, %v6833_v28  ;;  %v6358_v10 = vadd.f32 %v7843_v44, %v6833_v28 }
 0xd91   : > { %v6320_v6 = vpop.f32.mrf.mxu0  ;;  %v6349_v63 = vpop.f32.mrf.mxu1 }
 0xd92   : > { %v6894_v14 = vpack.c.bf16 %v6329_v3, %v6326_v35  ;;  %v6321_v42 = vadd.f32 %v6833_v28, %v6320_v6  ;;  %v6350_v7 = vadd.f32 %v6833_v28, %v6349_v63 }
 0xd93   : > { %v7844_v5 = vpop.f32.mrf.mxu1 }
 0xd94   : > { %6926 = vst [vmem:[%s8841_s0 + $0x8] sm:$0xff] %v6894_v14   ;;  %v6889_v34 = vpack.c.bf16 %v6321_v42, %v6318_v57  ;;  %v6361_v59 = vadd.f32 %v7844_v5, %v6833_v28 }
 0xd95   : > { %v6352_v40 = vpop.f32.mrf.mxu1 }
 0xd96   : > { %6890 = vst [vmem:[%s8841_s0] sm:$0xff] %v6889_v34   ;;  %v6914_v56 = vpack.c.bf16 %v6361_v59, %v6358_v10  ;;  %v6353_v15 = vadd.f32 %v6833_v28, %v6352_v40 }
 0xd98   : > { %6930 = vst [vmem:[%s8841_s0 + $0x28] sm:$0xff] %v6914_v56   ;;  %v6909_v60 = vpack.c.bf16 %v6353_v15, %v6350_v7 }
 0xd9a   : > { %6929 = vst [vmem:[%s8841_s0 + $0x20] sm:$0xff] %v6909_v60  }
 0xd9b   : > { %v7839_v58 = vpop.f32.mrf.mxu0 }
 0xd9c   : > { %v6342_v32 = vadd.f32 %v7839_v58, %v6833_v28 }
 0xd9d   : > { %v6333_v29 = vpop.f32.mrf.mxu0 }
 0xd9e   : > { %v6334_v19 = vadd.f32 %v6833_v28, %v6333_v29 }
 0xd9f   : > { %v7840_v41 = vpop.f32.mrf.mxu0  ;;  %v7847_v24 = vpop.f32.mrf.mxu1 }
 0xda0   : > { %v6345_v18 = vadd.f32 %v7840_v41, %v6833_v28  ;;  %v6374_v30 = vadd.f32 %v7847_v24, %v6833_v28 }
 0xda1   : > { %v6336_v49 = vpop.f32.mrf.mxu0  ;;  %v6365_v20 = vpop.f32.mrf.mxu1 }
 0xda2   : > { %v6904_v39 = vpack.c.bf16 %v6345_v18, %v6342_v32  ;;  %v6337_v25 = vadd.f32 %v6833_v28, %v6336_v49  ;;  %v6366_v16 = vadd.f32 %v6833_v28, %v6365_v20 }
 0xda3   : > { %v7848_v53 = vpop.f32.mrf.mxu1 }
 0xda4   : > { %6928 = vst [vmem:[%s8841_s0 + $0x18] sm:$0xff] %v6904_v39   ;;  %v6899_v36 = vpack.c.bf16 %v6337_v25, %v6334_v19  ;;  %v6377_v31 = vadd.f32 %v7848_v53, %v6833_v28 }
 0xda5   : > { %v6368_v22 = vpop.f32.mrf.mxu1 }
 0xda6   : > { %6927 = vst [vmem:[%s8841_s0 + $0x10] sm:$0xff] %v6899_v36   ;;  %v6924_v12 = vpack.c.bf16 %v6377_v31, %v6374_v30  ;;  %v6369_v50 = vadd.f32 %v6833_v28, %v6368_v22 }
 0xda8   : > { %6932 = vst [vmem:[%s8841_s0 + $0x38] sm:$0xff] %v6924_v12   ;;  %v6919_v0 = vpack.c.bf16 %v6369_v50, %v6366_v16 }
 0xdaa   : > { %6931 = vst [vmem:[%s8841_s0 + $0x30] sm:$0xff] %v6919_v0  }
 0xdab PF: > { %s26_s21 = sadd.s32 1, %s8669_s21  }
 0xdac   : > { %p23_p5 = scmp.ge.s32.totalorder %s26_s21, 4  }
 0xdae   :  { %25 = sbr.rel (!%p23_p5) target bundleno = 2 (0x2), region = 143 }

</bundles_post_ra>
